<compile_context>
chip_gen: v5e
topology: v5e:2x2
jax: 0.10.0
libtpu: 0.0.40
codegen_flags: <defaults>
</compile_context>

<pallas_src>
import jax
import jax.numpy as jnp
import numpy as np
from jax import lax
from jax.experimental import pallas as pl
from jax.experimental.pallas import tpu as pltpu

DIM_F = 16    # Hyper.dim_f    (mel bins)
DIM_C = 32    # Hyper.dim_c    (SSRN width)
DIM_FO = 64   # Hyper.audio_nfft // 2 + 1 (output spectrogram bins)

# Static layer description; params are stored flat in the same order.
#   ("c1", Cin, Cout, relu)   1x1 MaskedConv1d
#   ("hw", C, dilation)       HighwayConv1d, kernel 3, 'same' padding
#   ("dc", C)                 Deconv1d (ConvTranspose1d, kernel 2, stride 2)
LAYERS = (
    ("c1", DIM_F, DIM_C, False),       # conv_0
    ("hw", DIM_C, 1),                  # highway-conv_1
    ("hw", DIM_C, 3),                  # highway-conv_2
    ("dc", DIM_C),                     # deconv_3   (T -> 2T)
    ("hw", DIM_C, 1),                  # highway-conv_4
    ("hw", DIM_C, 3),                  # highway-conv_5
    ("dc", DIM_C),                     # deconv_6   (2T -> 4T)
    ("hw", DIM_C, 1),                  # highway-conv_7
    ("hw", DIM_C, 3),                  # highway-conv_8
    ("c1", DIM_C, 2 * DIM_C, False),   # conv_9
    ("hw", 2 * DIM_C, 1),              # highway-conv_10
    ("hw", 2 * DIM_C, 1),              # highway-conv_11
    ("c1", 2 * DIM_C, DIM_FO, False),  # conv_12
    ("c1", DIM_FO, DIM_FO, True),      # conv_13 + ReLU
    ("c1", DIM_FO, DIM_FO, True),      # conv_14 + ReLU
    ("c1", DIM_FO, DIM_FO, False),     # conv_15 -> logits
)


# ----------------------------------------------------------------------------
# In-kernel layer helpers (values are (C, time); weights are (Cout, Cin))
# ----------------------------------------------------------------------------
def _shift_mat(tc, off):
    # S[src, dst] = 1 iff src == dst + off ; (h @ S)[:, t] = h[:, t + off],
    # zero-filled outside [0, tc) -> exact 'same'-padding tap shift.
    src = lax.broadcasted_iota(jnp.int32, (tc, tc), 0)
    dst = lax.broadcasted_iota(jnp.int32, (tc, tc), 1)
    return jnp.where(src == dst + off, 1.0, 0.0)


def _conv1x1(h, w_ref, b_ref, relu):
    y = jnp.dot(w_ref[...], h, preferred_element_type=jnp.float32) + b_ref[...]
    if relu:
        y = jnp.maximum(y, 0.0)
    return y


def _highway(h, w1_ref, b1_ref, w2_ref, b2_ref, dil):
    # kernel-3 dilated conv with 'same' padding producing gates H1/H2, then
    # out = sigmoid(H1) * H2 + (1 - sigmoid(H1)) * h          (all f32)
    c, tc = h.shape
    taps = (
        jnp.dot(h, _shift_mat(tc, -dil), preferred_element_type=jnp.float32),
        h,                                                    # center tap
        jnp.dot(h, _shift_mat(tc, dil), preferred_element_type=jnp.float32),
    )
    h1 = jnp.zeros((c, tc), jnp.float32)
    h2 = jnp.zeros((c, tc), jnp.float32)
    for k in range(3):                                        # static unroll
        h1 = h1 + jnp.dot(w1_ref[k], taps[k], preferred_element_type=jnp.float32)
        h2 = h2 + jnp.dot(w2_ref[k], taps[k], preferred_element_type=jnp.float32)
    h1 = h1 + b1_ref[...]
    h2 = h2 + b2_ref[...]
    g = jax.nn.sigmoid(h1)
    return g * h2 + (1.0 - g) * h


def _deconv(h, w_ref, b_ref):
    # ConvTranspose1d(kernel=2, stride=2): out[:, 2t+k] = W_k^T x[:, t] + b.
    # Interleave the two phase outputs along time with exact 0/1 matrices.
    c, tc = h.shape
    y0 = jnp.dot(w_ref[0], h, preferred_element_type=jnp.float32) + b_ref[...]
    y1 = jnp.dot(w_ref[1], h, preferred_element_type=jnp.float32) + b_ref[...]
    src = lax.broadcasted_iota(jnp.int32, (tc, 2 * tc), 0)
    dst = lax.broadcasted_iota(jnp.int32, (tc, 2 * tc), 1)
    q_even = jnp.where(dst == 2 * src, 1.0, 0.0)
    q_odd = jnp.where(dst == 2 * src + 1, 1.0, 0.0)
    return (jnp.dot(y0, q_even, preferred_element_type=jnp.float32) +
            jnp.dot(y1, q_odd, preferred_element_type=jnp.float32))


# ----------------------------------------------------------------------------
# Fused kernel: one batch element per grid step, all layers in one body
# ----------------------------------------------------------------------------
def superres_kernel(*refs):
    x_ref = refs[0]                       # (dim_f, T)   NCW slice
    logits_ref = refs[-2]                 # (DIM_FO, 4T)
    mag_ref = refs[-1]                    # (DIM_FO, 4T)
    p = refs[1:-2]                        # flat weight/bias refs

    h = x_ref[...].astype(jnp.float32)
    idx = 0
    for spec in LAYERS:                   # static Python unroll
        kind = spec[0]
        if kind == "c1":
            h = _conv1x1(h, p[idx], p[idx + 1], relu=spec[3])
            idx += 2
        elif kind == "hw":
            h = _highway(h, p[idx], p[idx + 1], p[idx + 2], p[idx + 3],
                         dil=spec[2])
            idx += 4
        else:  # "dc"
            h = _deconv(h, p[idx], p[idx + 1])
            idx += 2

    logits_ref[...] = h.astype(logits_ref.dtype)
    mag_ref[...] = jax.nn.sigmoid(h).astype(mag_ref.dtype)


# ----------------------------------------------------------------------------
# Wrapper
# ----------------------------------------------------------------------------
def super_res(x_ncw, params):
    # x_ncw: (B, dim_f, T) NCW  ->  (logits, mag), each (B, DIM_FO, 4*T) NCW.
    B, c_in, T = x_ncw.shape
    assert c_in == DIM_F
    T_out = 4 * T

    def full_spec(a):
        return pl.BlockSpec(a.shape, lambda b, nd=a.ndim: (0,) * nd)

    in_specs = [pl.BlockSpec((None, DIM_F, T), lambda b: (b, 0, 0))]
    in_specs += [full_spec(a) for a in params]
    out_specs = (
        pl.BlockSpec((None, DIM_FO, T_out), lambda b: (b, 0, 0)),
        pl.BlockSpec((None, DIM_FO, T_out), lambda b: (b, 0, 0)),
    )
    out_shape = (
        jax.ShapeDtypeStruct((B, DIM_FO, T_out), x_ncw.dtype),
        jax.ShapeDtypeStruct((B, DIM_FO, T_out), x_ncw.dtype),
    )
    return pl.pallas_call(
        superres_kernel,
        grid=(B,),
        in_specs=in_specs,
        out_specs=out_specs,
        out_shape=out_shape,
        compiler_params=pltpu.CompilerParams(
            dimension_semantics=("parallel",)),
    )(x_ncw, *params)


def init_params(key):
    params = []
    n_tensors = sum({"c1": 2, "hw": 4, "dc": 2}[s[0]] for s in LAYERS)
    keys = iter(jax.random.split(key, n_tensors))

    def rnd(shape, scale=0.1):
        return jax.random.normal(next(keys), shape, jnp.float32) * scale

    for spec in LAYERS:
        kind = spec[0]
        if kind == "c1":
            _, cin, cout, _ = spec
            params.append(rnd((cout, cin)))     # weight (Cout, Cin)
            params.append(rnd((cout, 1)))       # bias   (Cout, 1)
        elif kind == "hw":
            _, c, _ = spec
            params.append(rnd((3, c, c)))       # H1 conv taps (K, Cout, Cin)
            params.append(rnd((c, 1)))
            params.append(rnd((3, c, c)))       # H2 conv taps
            params.append(rnd((c, 1)))
        else:  # "dc"
            _, c = spec
            params.append(rnd((2, c, c)))       # transpose-conv taps
            params.append(rnd((c, 1)))
    return params


# ----------------------------------------------------------------------------
# Pure-JAX reference (same math, independent formulation) for correctness
# ----------------------------------------------------------------------------
def super_res_ref(x_ncw, params):
    hi = jax.lax.Precision.HIGHEST
    h = x_ncw.astype(jnp.float32)
    idx = 0
    for spec in LAYERS:
        kind = spec[0]
        if kind == "c1":
            w, b = params[idx], params[idx + 1]; idx += 2
            h = jnp.einsum("oc,bct->bot", w, h, precision=hi) + b[None]
            if spec[3]:
                h = jnp.maximum(h, 0.0)
        elif kind == "hw":
            w1, b1, w2, b2 = params[idx:idx + 4]; idx += 4
            dil = spec[2]
            tc = h.shape[2]
            hp = jnp.pad(h, ((0, 0), (0, 0), (dil, dil)))
            taps = [hp[:, :, k * dil:k * dil + tc] for k in range(3)]
            h1 = sum(jnp.einsum("oc,bct->bot", w1[k], taps[k], precision=hi)
                     for k in range(3)) + b1[None]
            h2 = sum(jnp.einsum("oc,bct->bot", w2[k], taps[k], precision=hi)
                     for k in range(3)) + b2[None]
            g = jax.nn.sigmoid(h1)
            h = g * h2 + (1.0 - g) * h
        else:  # "dc"
            w, b = params[idx], params[idx + 1]; idx += 2
            y0 = jnp.einsum("oc,bct->bot", w[0], h, precision=hi) + b[None]
            y1 = jnp.einsum("oc,bct->bot", w[1], h, precision=hi) + b[None]
            bb, cc, tc = h.shape
            h = jnp.stack([y0, y1], axis=-1).reshape(bb, cc, 2 * tc)
    return h, jax.nn.sigmoid(h)


if __name__ == "__main__":
    key = jax.random.PRNGKey(0)
    k_par, k_x = jax.random.split(key)
    params = init_params(k_par)

    B, T = 2, 32                                  # output time = 4*T = 128
    x = jax.random.normal(k_x, (B, DIM_F, T), jnp.float32)   # NCW input

    run = jax.jit(super_res)
    logits, mag = jax.block_until_ready(run(x, params))

    logits_r, mag_r = super_res_ref(x, params)
    assert logits.shape == (B, DIM_FO, 4 * T), logits.shape
    assert mag.shape == (B, DIM_FO, 4 * T), mag.shape
    np.testing.assert_allclose(np.asarray(logits), np.asarray(logits_r),
                               rtol=1e-3, atol=1e-3)
    np.testing.assert_allclose(np.asarray(mag), np.asarray(mag_r),
                               rtol=1e-3, atol=1e-3)
    print("KERNEL_OK")
</pallas_src>

<mosaic_0001>
module attributes {stable_mosaic.version = 11 : i64} {
  func.func @superres_kernel(%arg0: i32, %arg1: memref<1x16x32xf32, #tpu.memory_space<vmem>>, %arg2: memref<32x16xf32, #tpu.memory_space<vmem>>, %arg3: memref<32x1xf32, #tpu.memory_space<vmem>>, %arg4: memref<3x32x32xf32, #tpu.memory_space<vmem>>, %arg5: memref<32x1xf32, #tpu.memory_space<vmem>>, %arg6: memref<3x32x32xf32, #tpu.memory_space<vmem>>, %arg7: memref<32x1xf32, #tpu.memory_space<vmem>>, %arg8: memref<3x32x32xf32, #tpu.memory_space<vmem>>, %arg9: memref<32x1xf32, #tpu.memory_space<vmem>>, %arg10: memref<3x32x32xf32, #tpu.memory_space<vmem>>, %arg11: memref<32x1xf32, #tpu.memory_space<vmem>>, %arg12: memref<2x32x32xf32, #tpu.memory_space<vmem>>, %arg13: memref<32x1xf32, #tpu.memory_space<vmem>>, %arg14: memref<3x32x32xf32, #tpu.memory_space<vmem>>, %arg15: memref<32x1xf32, #tpu.memory_space<vmem>>, %arg16: memref<3x32x32xf32, #tpu.memory_space<vmem>>, %arg17: memref<32x1xf32, #tpu.memory_space<vmem>>, %arg18: memref<3x32x32xf32, #tpu.memory_space<vmem>>, %arg19: memref<32x1xf32, #tpu.memory_space<vmem>>, %arg20: memref<3x32x32xf32, #tpu.memory_space<vmem>>, %arg21: memref<32x1xf32, #tpu.memory_space<vmem>>, %arg22: memref<2x32x32xf32, #tpu.memory_space<vmem>>, %arg23: memref<32x1xf32, #tpu.memory_space<vmem>>, %arg24: memref<3x32x32xf32, #tpu.memory_space<vmem>>, %arg25: memref<32x1xf32, #tpu.memory_space<vmem>>, %arg26: memref<3x32x32xf32, #tpu.memory_space<vmem>>, %arg27: memref<32x1xf32, #tpu.memory_space<vmem>>, %arg28: memref<3x32x32xf32, #tpu.memory_space<vmem>>, %arg29: memref<32x1xf32, #tpu.memory_space<vmem>>, %arg30: memref<3x32x32xf32, #tpu.memory_space<vmem>>, %arg31: memref<32x1xf32, #tpu.memory_space<vmem>>, %arg32: memref<64x32xf32, #tpu.memory_space<vmem>>, %arg33: memref<64x1xf32, #tpu.memory_space<vmem>>, %arg34: memref<3x64x64xf32, #tpu.memory_space<vmem>>, %arg35: memref<64x1xf32, #tpu.memory_space<vmem>>, %arg36: memref<3x64x64xf32, #tpu.memory_space<vmem>>, %arg37: memref<64x1xf32, #tpu.memory_space<vmem>>, %arg38: memref<3x64x64xf32, #tpu.memory_space<vmem>>, %arg39: memref<64x1xf32, #tpu.memory_space<vmem>>, %arg40: memref<3x64x64xf32, #tpu.memory_space<vmem>>, %arg41: memref<64x1xf32, #tpu.memory_space<vmem>>, %arg42: memref<64x64xf32, #tpu.memory_space<vmem>>, %arg43: memref<64x1xf32, #tpu.memory_space<vmem>>, %arg44: memref<64x64xf32, #tpu.memory_space<vmem>>, %arg45: memref<64x1xf32, #tpu.memory_space<vmem>>, %arg46: memref<64x64xf32, #tpu.memory_space<vmem>>, %arg47: memref<64x1xf32, #tpu.memory_space<vmem>>, %arg48: memref<64x64xf32, #tpu.memory_space<vmem>>, %arg49: memref<64x1xf32, #tpu.memory_space<vmem>>, %arg50: memref<1x64x128xf32, #tpu.memory_space<vmem>>, %arg51: memref<1x64x128xf32, #tpu.memory_space<vmem>>) attributes {dimension_semantics = [#tpu.dimension_semantics<parallel>], iteration_bounds = array<i64: 2>, scalar_prefetch = 0 : i64, scratch_operands = 0 : i64, tpu.core_type = #tpu.core_type<tc>, window_params = [{transform_indices = @transform_0, window_bounds = array<i64: 1, 16, 32>}, {pipeline_mode = #tpu.pipeline_mode<synchronous>, transform_indices = @transform_1, window_bounds = array<i64: 32, 16>}, {pipeline_mode = #tpu.pipeline_mode<synchronous>, transform_indices = @transform_2, window_bounds = array<i64: 32, 1>}, {pipeline_mode = #tpu.pipeline_mode<synchronous>, transform_indices = @transform_3, window_bounds = array<i64: 3, 32, 32>}, {pipeline_mode = #tpu.pipeline_mode<synchronous>, transform_indices = @transform_4, window_bounds = array<i64: 32, 1>}, {pipeline_mode = #tpu.pipeline_mode<synchronous>, transform_indices = @transform_5, window_bounds = array<i64: 3, 32, 32>}, {pipeline_mode = #tpu.pipeline_mode<synchronous>, transform_indices = @transform_6, window_bounds = array<i64: 32, 1>}, {pipeline_mode = #tpu.pipeline_mode<synchronous>, transform_indices = @transform_7, window_bounds = array<i64: 3, 32, 32>}, {pipeline_mode = #tpu.pipeline_mode<synchronous>, transform_indices = @transform_8, window_bounds = array<i64: 32, 1>}, {pipeline_mode = #tpu.pipeline_mode<synchronous>, transform_indices = @transform_9, window_bounds = array<i64: 3, 32, 32>}, {pipeline_mode = #tpu.pipeline_mode<synchronous>, transform_indices = @transform_10, window_bounds = array<i64: 32, 1>}, {pipeline_mode = #tpu.pipeline_mode<synchronous>, transform_indices = @transform_11, window_bounds = array<i64: 2, 32, 32>}, {pipeline_mode = #tpu.pipeline_mode<synchronous>, transform_indices = @transform_12, window_bounds = array<i64: 32, 1>}, {pipeline_mode = #tpu.pipeline_mode<synchronous>, transform_indices = @transform_13, window_bounds = array<i64: 3, 32, 32>}, {pipeline_mode = #tpu.pipeline_mode<synchronous>, transform_indices = @transform_14, window_bounds = array<i64: 32, 1>}, {pipeline_mode = #tpu.pipeline_mode<synchronous>, transform_indices = @transform_15, window_bounds = array<i64: 3, 32, 32>}, {pipeline_mode = #tpu.pipeline_mode<synchronous>, transform_indices = @transform_16, window_bounds = array<i64: 32, 1>}, {pipeline_mode = #tpu.pipeline_mode<synchronous>, transform_indices = @transform_17, window_bounds = array<i64: 3, 32, 32>}, {pipeline_mode = #tpu.pipeline_mode<synchronous>, transform_indices = @transform_18, window_bounds = array<i64: 32, 1>}, {pipeline_mode = #tpu.pipeline_mode<synchronous>, transform_indices = @transform_19, window_bounds = array<i64: 3, 32, 32>}, {pipeline_mode = #tpu.pipeline_mode<synchronous>, transform_indices = @transform_20, window_bounds = array<i64: 32, 1>}, {pipeline_mode = #tpu.pipeline_mode<synchronous>, transform_indices = @transform_21, window_bounds = array<i64: 2, 32, 32>}, {pipeline_mode = #tpu.pipeline_mode<synchronous>, transform_indices = @transform_22, window_bounds = array<i64: 32, 1>}, {pipeline_mode = #tpu.pipeline_mode<synchronous>, transform_indices = @transform_23, window_bounds = array<i64: 3, 32, 32>}, {pipeline_mode = #tpu.pipeline_mode<synchronous>, transform_indices = @transform_24, window_bounds = array<i64: 32, 1>}, {pipeline_mode = #tpu.pipeline_mode<synchronous>, transform_indices = @transform_25, window_bounds = array<i64: 3, 32, 32>}, {pipeline_mode = #tpu.pipeline_mode<synchronous>, transform_indices = @transform_26, window_bounds = array<i64: 32, 1>}, {pipeline_mode = #tpu.pipeline_mode<synchronous>, transform_indices = @transform_27, window_bounds = array<i64: 3, 32, 32>}, {pipeline_mode = #tpu.pipeline_mode<synchronous>, transform_indices = @transform_28, window_bounds = array<i64: 32, 1>}, {pipeline_mode = #tpu.pipeline_mode<synchronous>, transform_indices = @transform_29, window_bounds = array<i64: 3, 32, 32>}, {pipeline_mode = #tpu.pipeline_mode<synchronous>, transform_indices = @transform_30, window_bounds = array<i64: 32, 1>}, {pipeline_mode = #tpu.pipeline_mode<synchronous>, transform_indices = @transform_31, window_bounds = array<i64: 64, 32>}, {pipeline_mode = #tpu.pipeline_mode<synchronous>, transform_indices = @transform_32, window_bounds = array<i64: 64, 1>}, {pipeline_mode = #tpu.pipeline_mode<synchronous>, transform_indices = @transform_33, window_bounds = array<i64: 3, 64, 64>}, {pipeline_mode = #tpu.pipeline_mode<synchronous>, transform_indices = @transform_34, window_bounds = array<i64: 64, 1>}, {pipeline_mode = #tpu.pipeline_mode<synchronous>, transform_indices = @transform_35, window_bounds = array<i64: 3, 64, 64>}, {pipeline_mode = #tpu.pipeline_mode<synchronous>, transform_indices = @transform_36, window_bounds = array<i64: 64, 1>}, {pipeline_mode = #tpu.pipeline_mode<synchronous>, transform_indices = @transform_37, window_bounds = array<i64: 3, 64, 64>}, {pipeline_mode = #tpu.pipeline_mode<synchronous>, transform_indices = @transform_38, window_bounds = array<i64: 64, 1>}, {pipeline_mode = #tpu.pipeline_mode<synchronous>, transform_indices = @transform_39, window_bounds = array<i64: 3, 64, 64>}, {pipeline_mode = #tpu.pipeline_mode<synchronous>, transform_indices = @transform_40, window_bounds = array<i64: 64, 1>}, {pipeline_mode = #tpu.pipeline_mode<synchronous>, transform_indices = @transform_41, window_bounds = array<i64: 64, 64>}, {pipeline_mode = #tpu.pipeline_mode<synchronous>, transform_indices = @transform_42, window_bounds = array<i64: 64, 1>}, {pipeline_mode = #tpu.pipeline_mode<synchronous>, transform_indices = @transform_43, window_bounds = array<i64: 64, 64>}, {pipeline_mode = #tpu.pipeline_mode<synchronous>, transform_indices = @transform_44, window_bounds = array<i64: 64, 1>}, {pipeline_mode = #tpu.pipeline_mode<synchronous>, transform_indices = @transform_45, window_bounds = array<i64: 64, 64>}, {pipeline_mode = #tpu.pipeline_mode<synchronous>, transform_indices = @transform_46, window_bounds = array<i64: 64, 1>}, {pipeline_mode = #tpu.pipeline_mode<synchronous>, transform_indices = @transform_47, window_bounds = array<i64: 64, 64>}, {pipeline_mode = #tpu.pipeline_mode<synchronous>, transform_indices = @transform_48, window_bounds = array<i64: 64, 1>}, {transform_indices = @transform_49, window_bounds = array<i64: 1, 64, 128>}, {transform_indices = @transform_50, window_bounds = array<i64: 1, 64, 128>}]} {
    %c0 = arith.constant 0 : index
    %c0_0 = arith.constant 0 : index
    %c0_1 = arith.constant 0 : index
    %0 = vector.load %arg1[%c0, %c0_0, %c0_1] : memref<1x16x32xf32, #tpu.memory_space<vmem>>, vector<1x16x32xf32>
    %1 = vector.shape_cast %0 : vector<1x16x32xf32> to vector<16x32xf32>
    %c0_2 = arith.constant 0 : index
    %c0_3 = arith.constant 0 : index
    %2 = vector.load %arg2[%c0_2, %c0_3] : memref<32x16xf32, #tpu.memory_space<vmem>>, vector<32x16xf32>
    %cst = arith.constant dense<0.000000e+00> : vector<32x32xf32>
    %3 = tpu.matmul %2, %1, %cst {dimension_numbers = #tpu.dot_dimension_numbers<[1], [0], [0], [1], [0, 0, 1, 1], [], []>} : vector<32x16xf32>, vector<16x32xf32>, vector<32x32xf32> -> vector<32x32xf32>
    %c0_4 = arith.constant 0 : index
    %c0_5 = arith.constant 0 : index
    %4 = vector.load %arg3[%c0_4, %c0_5] : memref<32x1xf32, #tpu.memory_space<vmem>>, vector<32x1xf32>
    %5 = vector.broadcast %4 : vector<32x1xf32> to vector<32x32xf32>
    %6 = arith.addf %3, %5 : vector<32x32xf32>
    %7 = tpu.iota {dimensions = array<i32: 0>} : vector<32x32xi32>
    %8 = tpu.iota {dimensions = array<i32: 1>} : vector<32x32xi32>
    %c-1_i32 = arith.constant -1 : i32
    %9 = vector.broadcast %c-1_i32 : i32 to vector<32x32xi32>
    %10 = arith.addi %8, %9 : vector<32x32xi32>
    %11 = arith.cmpi eq, %7, %10 : vector<32x32xi32>
    %cst_6 = arith.constant 1.000000e+00 : f32
    %cst_7 = arith.constant 0.000000e+00 : f32
    %12 = vector.broadcast %cst_6 : f32 to vector<32x32xf32>
    %13 = vector.broadcast %cst_7 : f32 to vector<32x32xf32>
    %14 = arith.select %11, %12, %13 : vector<32x32xi1>, vector<32x32xf32>
    %cst_8 = arith.constant dense<0.000000e+00> : vector<32x32xf32>
    %15 = tpu.matmul %6, %14, %cst_8 {dimension_numbers = #tpu.dot_dimension_numbers<[1], [0], [0], [1], [0, 0, 1, 1], [], []>} : vector<32x32xf32>, vector<32x32xf32>, vector<32x32xf32> -> vector<32x32xf32>
    %16 = tpu.iota {dimensions = array<i32: 0>} : vector<32x32xi32>
    %17 = tpu.iota {dimensions = array<i32: 1>} : vector<32x32xi32>
    %c1_i32 = arith.constant 1 : i32
    %18 = vector.broadcast %c1_i32 : i32 to vector<32x32xi32>
    %19 = arith.addi %17, %18 : vector<32x32xi32>
    %20 = arith.cmpi eq, %16, %19 : vector<32x32xi32>
    %cst_9 = arith.constant 1.000000e+00 : f32
    %cst_10 = arith.constant 0.000000e+00 : f32
    %21 = vector.broadcast %cst_9 : f32 to vector<32x32xf32>
    %22 = vector.broadcast %cst_10 : f32 to vector<32x32xf32>
    %23 = arith.select %20, %21, %22 : vector<32x32xi1>, vector<32x32xf32>
    %cst_11 = arith.constant dense<0.000000e+00> : vector<32x32xf32>
    %24 = tpu.matmul %6, %23, %cst_11 {dimension_numbers = #tpu.dot_dimension_numbers<[1], [0], [0], [1], [0, 0, 1, 1], [], []>} : vector<32x32xf32>, vector<32x32xf32>, vector<32x32xf32> -> vector<32x32xf32>
    %cst_12 = arith.constant 0.000000e+00 : f32
    %25 = vector.broadcast %cst_12 : f32 to vector<32x32xf32>
    %cst_13 = arith.constant 0.000000e+00 : f32
    %26 = vector.broadcast %cst_13 : f32 to vector<32x32xf32>
    %c0_14 = arith.constant 0 : index
    %c0_15 = arith.constant 0 : index
    %c0_16 = arith.constant 0 : index
    %27 = vector.load %arg4[%c0_14, %c0_15, %c0_16] : memref<3x32x32xf32, #tpu.memory_space<vmem>>, vector<1x32x32xf32>
    %28 = vector.shape_cast %27 : vector<1x32x32xf32> to vector<32x32xf32>
    %cst_17 = arith.constant dense<0.000000e+00> : vector<32x32xf32>
    %29 = tpu.matmul %28, %15, %cst_17 {dimension_numbers = #tpu.dot_dimension_numbers<[1], [0], [0], [1], [0, 0, 1, 1], [], []>} : vector<32x32xf32>, vector<32x32xf32>, vector<32x32xf32> -> vector<32x32xf32>
    %30 = arith.addf %25, %29 : vector<32x32xf32>
    %c0_18 = arith.constant 0 : index
    %c0_19 = arith.constant 0 : index
    %c0_20 = arith.constant 0 : index
    %31 = vector.load %arg6[%c0_18, %c0_19, %c0_20] : memref<3x32x32xf32, #tpu.memory_space<vmem>>, vector<1x32x32xf32>
    %32 = vector.shape_cast %31 : vector<1x32x32xf32> to vector<32x32xf32>
    %cst_21 = arith.constant dense<0.000000e+00> : vector<32x32xf32>
    %33 = tpu.matmul %32, %15, %cst_21 {dimension_numbers = #tpu.dot_dimension_numbers<[1], [0], [0], [1], [0, 0, 1, 1], [], []>} : vector<32x32xf32>, vector<32x32xf32>, vector<32x32xf32> -> vector<32x32xf32>
    %34 = arith.addf %26, %33 : vector<32x32xf32>
    %c1 = arith.constant 1 : index
    %c0_22 = arith.constant 0 : index
    %c0_23 = arith.constant 0 : index
    %35 = vector.load %arg4[%c1, %c0_22, %c0_23] : memref<3x32x32xf32, #tpu.memory_space<vmem>>, vector<1x32x32xf32>
    %36 = vector.shape_cast %35 : vector<1x32x32xf32> to vector<32x32xf32>
    %cst_24 = arith.constant dense<0.000000e+00> : vector<32x32xf32>
    %37 = tpu.matmul %36, %6, %cst_24 {dimension_numbers = #tpu.dot_dimension_numbers<[1], [0], [0], [1], [0, 0, 1, 1], [], []>} : vector<32x32xf32>, vector<32x32xf32>, vector<32x32xf32> -> vector<32x32xf32>
    %38 = arith.addf %30, %37 : vector<32x32xf32>
    %c1_25 = arith.constant 1 : index
    %c0_26 = arith.constant 0 : index
    %c0_27 = arith.constant 0 : index
    %39 = vector.load %arg6[%c1_25, %c0_26, %c0_27] : memref<3x32x32xf32, #tpu.memory_space<vmem>>, vector<1x32x32xf32>
    %40 = vector.shape_cast %39 : vector<1x32x32xf32> to vector<32x32xf32>
    %cst_28 = arith.constant dense<0.000000e+00> : vector<32x32xf32>
    %41 = tpu.matmul %40, %6, %cst_28 {dimension_numbers = #tpu.dot_dimension_numbers<[1], [0], [0], [1], [0, 0, 1, 1], [], []>} : vector<32x32xf32>, vector<32x32xf32>, vector<32x32xf32> -> vector<32x32xf32>
    %42 = arith.addf %34, %41 : vector<32x32xf32>
    %c2 = arith.constant 2 : index
    %c0_29 = arith.constant 0 : index
    %c0_30 = arith.constant 0 : index
    %43 = vector.load %arg4[%c2, %c0_29, %c0_30] : memref<3x32x32xf32, #tpu.memory_space<vmem>>, vector<1x32x32xf32>
    %44 = vector.shape_cast %43 : vector<1x32x32xf32> to vector<32x32xf32>
    %cst_31 = arith.constant dense<0.000000e+00> : vector<32x32xf32>
    %45 = tpu.matmul %44, %24, %cst_31 {dimension_numbers = #tpu.dot_dimension_numbers<[1], [0], [0], [1], [0, 0, 1, 1], [], []>} : vector<32x32xf32>, vector<32x32xf32>, vector<32x32xf32> -> vector<32x32xf32>
    %46 = arith.addf %38, %45 : vector<32x32xf32>
    %c2_32 = arith.constant 2 : index
    %c0_33 = arith.constant 0 : index
    %c0_34 = arith.constant 0 : index
    %47 = vector.load %arg6[%c2_32, %c0_33, %c0_34] : memref<3x32x32xf32, #tpu.memory_space<vmem>>, vector<1x32x32xf32>
    %48 = vector.shape_cast %47 : vector<1x32x32xf32> to vector<32x32xf32>
    %cst_35 = arith.constant dense<0.000000e+00> : vector<32x32xf32>
    %49 = tpu.matmul %48, %24, %cst_35 {dimension_numbers = #tpu.dot_dimension_numbers<[1], [0], [0], [1], [0, 0, 1, 1], [], []>} : vector<32x32xf32>, vector<32x32xf32>, vector<32x32xf32> -> vector<32x32xf32>
    %50 = arith.addf %42, %49 : vector<32x32xf32>
    %c0_36 = arith.constant 0 : index
    %c0_37 = arith.constant 0 : index
    %51 = vector.load %arg5[%c0_36, %c0_37] : memref<32x1xf32, #tpu.memory_space<vmem>>, vector<32x1xf32>
    %52 = vector.broadcast %51 : vector<32x1xf32> to vector<32x32xf32>
    %53 = arith.addf %46, %52 : vector<32x32xf32>
    %c0_38 = arith.constant 0 : index
    %c0_39 = arith.constant 0 : index
    %54 = vector.load %arg7[%c0_38, %c0_39] : memref<32x1xf32, #tpu.memory_space<vmem>>, vector<32x1xf32>
    %55 = vector.broadcast %54 : vector<32x1xf32> to vector<32x32xf32>
    %56 = arith.addf %50, %55 : vector<32x32xf32>
    %57 = arith.negf %53 : vector<32x32xf32>
    %58 = math.exp %57 : vector<32x32xf32>
    %cst_40 = arith.constant 1.000000e+00 : f32
    %59 = vector.broadcast %cst_40 : f32 to vector<32x32xf32>
    %60 = arith.addf %59, %58 : vector<32x32xf32>
    %61 = arith.divf %59, %60 : vector<32x32xf32>
    %62 = arith.mulf %61, %56 : vector<32x32xf32>
    %cst_41 = arith.constant 1.000000e+00 : f32
    %63 = vector.broadcast %cst_41 : f32 to vector<32x32xf32>
    %64 = arith.subf %63, %61 : vector<32x32xf32>
    %65 = arith.mulf %64, %6 : vector<32x32xf32>
    %66 = arith.addf %62, %65 : vector<32x32xf32>
    %67 = tpu.iota {dimensions = array<i32: 0>} : vector<32x32xi32>
    %68 = tpu.iota {dimensions = array<i32: 1>} : vector<32x32xi32>
    %c-3_i32 = arith.constant -3 : i32
    %69 = vector.broadcast %c-3_i32 : i32 to vector<32x32xi32>
    %70 = arith.addi %68, %69 : vector<32x32xi32>
    %71 = arith.cmpi eq, %67, %70 : vector<32x32xi32>
    %cst_42 = arith.constant 1.000000e+00 : f32
    %cst_43 = arith.constant 0.000000e+00 : f32
    %72 = vector.broadcast %cst_42 : f32 to vector<32x32xf32>
    %73 = vector.broadcast %cst_43 : f32 to vector<32x32xf32>
    %74 = arith.select %71, %72, %73 : vector<32x32xi1>, vector<32x32xf32>
    %cst_44 = arith.constant dense<0.000000e+00> : vector<32x32xf32>
    %75 = tpu.matmul %66, %74, %cst_44 {dimension_numbers = #tpu.dot_dimension_numbers<[1], [0], [0], [1], [0, 0, 1, 1], [], []>} : vector<32x32xf32>, vector<32x32xf32>, vector<32x32xf32> -> vector<32x32xf32>
    %76 = tpu.iota {dimensions = array<i32: 0>} : vector<32x32xi32>
    %77 = tpu.iota {dimensions = array<i32: 1>} : vector<32x32xi32>
    %c3_i32 = arith.constant 3 : i32
    %78 = vector.broadcast %c3_i32 : i32 to vector<32x32xi32>
    %79 = arith.addi %77, %78 : vector<32x32xi32>
    %80 = arith.cmpi eq, %76, %79 : vector<32x32xi32>
    %cst_45 = arith.constant 1.000000e+00 : f32
    %cst_46 = arith.constant 0.000000e+00 : f32
    %81 = vector.broadcast %cst_45 : f32 to vector<32x32xf32>
    %82 = vector.broadcast %cst_46 : f32 to vector<32x32xf32>
    %83 = arith.select %80, %81, %82 : vector<32x32xi1>, vector<32x32xf32>
    %cst_47 = arith.constant dense<0.000000e+00> : vector<32x32xf32>
    %84 = tpu.matmul %66, %83, %cst_47 {dimension_numbers = #tpu.dot_dimension_numbers<[1], [0], [0], [1], [0, 0, 1, 1], [], []>} : vector<32x32xf32>, vector<32x32xf32>, vector<32x32xf32> -> vector<32x32xf32>
    %cst_48 = arith.constant 0.000000e+00 : f32
    %85 = vector.broadcast %cst_48 : f32 to vector<32x32xf32>
    %cst_49 = arith.constant 0.000000e+00 : f32
    %86 = vector.broadcast %cst_49 : f32 to vector<32x32xf32>
    %c0_50 = arith.constant 0 : index
    %c0_51 = arith.constant 0 : index
    %c0_52 = arith.constant 0 : index
    %87 = vector.load %arg8[%c0_50, %c0_51, %c0_52] : memref<3x32x32xf32, #tpu.memory_space<vmem>>, vector<1x32x32xf32>
    %88 = vector.shape_cast %87 : vector<1x32x32xf32> to vector<32x32xf32>
    %cst_53 = arith.constant dense<0.000000e+00> : vector<32x32xf32>
    %89 = tpu.matmul %88, %75, %cst_53 {dimension_numbers = #tpu.dot_dimension_numbers<[1], [0], [0], [1], [0, 0, 1, 1], [], []>} : vector<32x32xf32>, vector<32x32xf32>, vector<32x32xf32> -> vector<32x32xf32>
    %90 = arith.addf %85, %89 : vector<32x32xf32>
    %c0_54 = arith.constant 0 : index
    %c0_55 = arith.constant 0 : index
    %c0_56 = arith.constant 0 : index
    %91 = vector.load %arg10[%c0_54, %c0_55, %c0_56] : memref<3x32x32xf32, #tpu.memory_space<vmem>>, vector<1x32x32xf32>
    %92 = vector.shape_cast %91 : vector<1x32x32xf32> to vector<32x32xf32>
    %cst_57 = arith.constant dense<0.000000e+00> : vector<32x32xf32>
    %93 = tpu.matmul %92, %75, %cst_57 {dimension_numbers = #tpu.dot_dimension_numbers<[1], [0], [0], [1], [0, 0, 1, 1], [], []>} : vector<32x32xf32>, vector<32x32xf32>, vector<32x32xf32> -> vector<32x32xf32>
    %94 = arith.addf %86, %93 : vector<32x32xf32>
    %c1_58 = arith.constant 1 : index
    %c0_59 = arith.constant 0 : index
    %c0_60 = arith.constant 0 : index
    %95 = vector.load %arg8[%c1_58, %c0_59, %c0_60] : memref<3x32x32xf32, #tpu.memory_space<vmem>>, vector<1x32x32xf32>
    %96 = vector.shape_cast %95 : vector<1x32x32xf32> to vector<32x32xf32>
    %cst_61 = arith.constant dense<0.000000e+00> : vector<32x32xf32>
    %97 = tpu.matmul %96, %66, %cst_61 {dimension_numbers = #tpu.dot_dimension_numbers<[1], [0], [0], [1], [0, 0, 1, 1], [], []>} : vector<32x32xf32>, vector<32x32xf32>, vector<32x32xf32> -> vector<32x32xf32>
    %98 = arith.addf %90, %97 : vector<32x32xf32>
    %c1_62 = arith.constant 1 : index
    %c0_63 = arith.constant 0 : index
    %c0_64 = arith.constant 0 : index
    %99 = vector.load %arg10[%c1_62, %c0_63, %c0_64] : memref<3x32x32xf32, #tpu.memory_space<vmem>>, vector<1x32x32xf32>
    %100 = vector.shape_cast %99 : vector<1x32x32xf32> to vector<32x32xf32>
    %cst_65 = arith.constant dense<0.000000e+00> : vector<32x32xf32>
    %101 = tpu.matmul %100, %66, %cst_65 {dimension_numbers = #tpu.dot_dimension_numbers<[1], [0], [0], [1], [0, 0, 1, 1], [], []>} : vector<32x32xf32>, vector<32x32xf32>, vector<32x32xf32> -> vector<32x32xf32>
    %102 = arith.addf %94, %101 : vector<32x32xf32>
    %c2_66 = arith.constant 2 : index
    %c0_67 = arith.constant 0 : index
    %c0_68 = arith.constant 0 : index
    %103 = vector.load %arg8[%c2_66, %c0_67, %c0_68] : memref<3x32x32xf32, #tpu.memory_space<vmem>>, vector<1x32x32xf32>
    %104 = vector.shape_cast %103 : vector<1x32x32xf32> to vector<32x32xf32>
    %cst_69 = arith.constant dense<0.000000e+00> : vector<32x32xf32>
    %105 = tpu.matmul %104, %84, %cst_69 {dimension_numbers = #tpu.dot_dimension_numbers<[1], [0], [0], [1], [0, 0, 1, 1], [], []>} : vector<32x32xf32>, vector<32x32xf32>, vector<32x32xf32> -> vector<32x32xf32>
    %106 = arith.addf %98, %105 : vector<32x32xf32>
    %c2_70 = arith.constant 2 : index
    %c0_71 = arith.constant 0 : index
    %c0_72 = arith.constant 0 : index
    %107 = vector.load %arg10[%c2_70, %c0_71, %c0_72] : memref<3x32x32xf32, #tpu.memory_space<vmem>>, vector<1x32x32xf32>
    %108 = vector.shape_cast %107 : vector<1x32x32xf32> to vector<32x32xf32>
    %cst_73 = arith.constant dense<0.000000e+00> : vector<32x32xf32>
    %109 = tpu.matmul %108, %84, %cst_73 {dimension_numbers = #tpu.dot_dimension_numbers<[1], [0], [0], [1], [0, 0, 1, 1], [], []>} : vector<32x32xf32>, vector<32x32xf32>, vector<32x32xf32> -> vector<32x32xf32>
    %110 = arith.addf %102, %109 : vector<32x32xf32>
    %c0_74 = arith.constant 0 : index
    %c0_75 = arith.constant 0 : index
    %111 = vector.load %arg9[%c0_74, %c0_75] : memref<32x1xf32, #tpu.memory_space<vmem>>, vector<32x1xf32>
    %112 = vector.broadcast %111 : vector<32x1xf32> to vector<32x32xf32>
    %113 = arith.addf %106, %112 : vector<32x32xf32>
    %c0_76 = arith.constant 0 : index
    %c0_77 = arith.constant 0 : index
    %114 = vector.load %arg11[%c0_76, %c0_77] : memref<32x1xf32, #tpu.memory_space<vmem>>, vector<32x1xf32>
    %115 = vector.broadcast %114 : vector<32x1xf32> to vector<32x32xf32>
    %116 = arith.addf %110, %115 : vector<32x32xf32>
    %117 = arith.negf %113 : vector<32x32xf32>
    %118 = math.exp %117 : vector<32x32xf32>
    %cst_78 = arith.constant 1.000000e+00 : f32
    %119 = vector.broadcast %cst_78 : f32 to vector<32x32xf32>
    %120 = arith.addf %119, %118 : vector<32x32xf32>
    %121 = arith.divf %119, %120 : vector<32x32xf32>
    %122 = arith.mulf %121, %116 : vector<32x32xf32>
    %cst_79 = arith.constant 1.000000e+00 : f32
    %123 = vector.broadcast %cst_79 : f32 to vector<32x32xf32>
    %124 = arith.subf %123, %121 : vector<32x32xf32>
    %125 = arith.mulf %124, %66 : vector<32x32xf32>
    %126 = arith.addf %122, %125 : vector<32x32xf32>
    %c0_80 = arith.constant 0 : index
    %c0_81 = arith.constant 0 : index
    %c0_82 = arith.constant 0 : index
    %127 = vector.load %arg12[%c0_80, %c0_81, %c0_82] : memref<2x32x32xf32, #tpu.memory_space<vmem>>, vector<1x32x32xf32>
    %128 = vector.shape_cast %127 : vector<1x32x32xf32> to vector<32x32xf32>
    %cst_83 = arith.constant dense<0.000000e+00> : vector<32x32xf32>
    %129 = tpu.matmul %128, %126, %cst_83 {dimension_numbers = #tpu.dot_dimension_numbers<[1], [0], [0], [1], [0, 0, 1, 1], [], []>} : vector<32x32xf32>, vector<32x32xf32>, vector<32x32xf32> -> vector<32x32xf32>
    %c0_84 = arith.constant 0 : index
    %c0_85 = arith.constant 0 : index
    %130 = vector.load %arg13[%c0_84, %c0_85] : memref<32x1xf32, #tpu.memory_space<vmem>>, vector<32x1xf32>
    %131 = vector.broadcast %130 : vector<32x1xf32> to vector<32x32xf32>
    %132 = arith.addf %129, %131 : vector<32x32xf32>
    %c1_86 = arith.constant 1 : index
    %c0_87 = arith.constant 0 : index
    %c0_88 = arith.constant 0 : index
    %133 = vector.load %arg12[%c1_86, %c0_87, %c0_88] : memref<2x32x32xf32, #tpu.memory_space<vmem>>, vector<1x32x32xf32>
    %134 = vector.shape_cast %133 : vector<1x32x32xf32> to vector<32x32xf32>
    %cst_89 = arith.constant dense<0.000000e+00> : vector<32x32xf32>
    %135 = tpu.matmul %134, %126, %cst_89 {dimension_numbers = #tpu.dot_dimension_numbers<[1], [0], [0], [1], [0, 0, 1, 1], [], []>} : vector<32x32xf32>, vector<32x32xf32>, vector<32x32xf32> -> vector<32x32xf32>
    %c0_90 = arith.constant 0 : index
    %c0_91 = arith.constant 0 : index
    %136 = vector.load %arg13[%c0_90, %c0_91] : memref<32x1xf32, #tpu.memory_space<vmem>>, vector<32x1xf32>
    %137 = vector.broadcast %136 : vector<32x1xf32> to vector<32x32xf32>
    %138 = arith.addf %135, %137 : vector<32x32xf32>
    %139 = tpu.iota {dimensions = array<i32: 0>} : vector<32x64xi32>
    %140 = tpu.iota {dimensions = array<i32: 1>} : vector<32x64xi32>
    %c2_i32 = arith.constant 2 : i32
    %141 = vector.broadcast %c2_i32 : i32 to vector<32x64xi32>
    %142 = arith.muli %141, %139 : vector<32x64xi32>
    %143 = arith.cmpi eq, %140, %142 : vector<32x64xi32>
    %cst_92 = arith.constant 1.000000e+00 : f32
    %cst_93 = arith.constant 0.000000e+00 : f32
    %144 = vector.broadcast %cst_92 : f32 to vector<32x64xf32>
    %145 = vector.broadcast %cst_93 : f32 to vector<32x64xf32>
    %146 = arith.select %143, %144, %145 : vector<32x64xi1>, vector<32x64xf32>
    %c2_i32_94 = arith.constant 2 : i32
    %147 = vector.broadcast %c2_i32_94 : i32 to vector<32x64xi32>
    %148 = arith.muli %147, %139 : vector<32x64xi32>
    %c1_i32_95 = arith.constant 1 : i32
    %149 = vector.broadcast %c1_i32_95 : i32 to vector<32x64xi32>
    %150 = arith.addi %148, %149 : vector<32x64xi32>
    %151 = arith.cmpi eq, %140, %150 : vector<32x64xi32>
    %cst_96 = arith.constant 1.000000e+00 : f32
    %cst_97 = arith.constant 0.000000e+00 : f32
    %152 = vector.broadcast %cst_96 : f32 to vector<32x64xf32>
    %153 = vector.broadcast %cst_97 : f32 to vector<32x64xf32>
    %154 = arith.select %151, %152, %153 : vector<32x64xi1>, vector<32x64xf32>
    %cst_98 = arith.constant dense<0.000000e+00> : vector<32x64xf32>
    %155 = tpu.matmul %132, %146, %cst_98 {dimension_numbers = #tpu.dot_dimension_numbers<[1], [0], [0], [1], [0, 0, 1, 1], [], []>} : vector<32x32xf32>, vector<32x64xf32>, vector<32x64xf32> -> vector<32x64xf32>
    %cst_99 = arith.constant dense<0.000000e+00> : vector<32x64xf32>
    %156 = tpu.matmul %138, %154, %cst_99 {dimension_numbers = #tpu.dot_dimension_numbers<[1], [0], [0], [1], [0, 0, 1, 1], [], []>} : vector<32x32xf32>, vector<32x64xf32>, vector<32x64xf32> -> vector<32x64xf32>
    %157 = arith.addf %155, %156 : vector<32x64xf32>
    %158 = tpu.iota {dimensions = array<i32: 0>} : vector<64x64xi32>
    %159 = tpu.iota {dimensions = array<i32: 1>} : vector<64x64xi32>
    %c-1_i32_100 = arith.constant -1 : i32
    %160 = vector.broadcast %c-1_i32_100 : i32 to vector<64x64xi32>
    %161 = arith.addi %159, %160 : vector<64x64xi32>
    %162 = arith.cmpi eq, %158, %161 : vector<64x64xi32>
    %cst_101 = arith.constant 1.000000e+00 : f32
    %cst_102 = arith.constant 0.000000e+00 : f32
    %163 = vector.broadcast %cst_101 : f32 to vector<64x64xf32>
    %164 = vector.broadcast %cst_102 : f32 to vector<64x64xf32>
    %165 = arith.select %162, %163, %164 : vector<64x64xi1>, vector<64x64xf32>
    %cst_103 = arith.constant dense<0.000000e+00> : vector<32x64xf32>
    %166 = tpu.matmul %157, %165, %cst_103 {dimension_numbers = #tpu.dot_dimension_numbers<[1], [0], [0], [1], [0, 0, 1, 1], [], []>} : vector<32x64xf32>, vector<64x64xf32>, vector<32x64xf32> -> vector<32x64xf32>
    %167 = tpu.iota {dimensions = array<i32: 0>} : vector<64x64xi32>
    %168 = tpu.iota {dimensions = array<i32: 1>} : vector<64x64xi32>
    %c1_i32_104 = arith.constant 1 : i32
    %169 = vector.broadcast %c1_i32_104 : i32 to vector<64x64xi32>
    %170 = arith.addi %168, %169 : vector<64x64xi32>
    %171 = arith.cmpi eq, %167, %170 : vector<64x64xi32>
    %cst_105 = arith.constant 1.000000e+00 : f32
    %cst_106 = arith.constant 0.000000e+00 : f32
    %172 = vector.broadcast %cst_105 : f32 to vector<64x64xf32>
    %173 = vector.broadcast %cst_106 : f32 to vector<64x64xf32>
    %174 = arith.select %171, %172, %173 : vector<64x64xi1>, vector<64x64xf32>
    %cst_107 = arith.constant dense<0.000000e+00> : vector<32x64xf32>
    %175 = tpu.matmul %157, %174, %cst_107 {dimension_numbers = #tpu.dot_dimension_numbers<[1], [0], [0], [1], [0, 0, 1, 1], [], []>} : vector<32x64xf32>, vector<64x64xf32>, vector<32x64xf32> -> vector<32x64xf32>
    %cst_108 = arith.constant 0.000000e+00 : f32
    %176 = vector.broadcast %cst_108 : f32 to vector<32x64xf32>
    %cst_109 = arith.constant 0.000000e+00 : f32
    %177 = vector.broadcast %cst_109 : f32 to vector<32x64xf32>
    %c0_110 = arith.constant 0 : index
    %c0_111 = arith.constant 0 : index
    %c0_112 = arith.constant 0 : index
    %178 = vector.load %arg14[%c0_110, %c0_111, %c0_112] : memref<3x32x32xf32, #tpu.memory_space<vmem>>, vector<1x32x32xf32>
    %179 = vector.shape_cast %178 : vector<1x32x32xf32> to vector<32x32xf32>
    %cst_113 = arith.constant dense<0.000000e+00> : vector<32x64xf32>
    %180 = tpu.matmul %179, %166, %cst_113 {dimension_numbers = #tpu.dot_dimension_numbers<[1], [0], [0], [1], [0, 0, 1, 1], [], []>} : vector<32x32xf32>, vector<32x64xf32>, vector<32x64xf32> -> vector<32x64xf32>
    %181 = arith.addf %176, %180 : vector<32x64xf32>
    %c0_114 = arith.constant 0 : index
    %c0_115 = arith.constant 0 : index
    %c0_116 = arith.constant 0 : index
    %182 = vector.load %arg16[%c0_114, %c0_115, %c0_116] : memref<3x32x32xf32, #tpu.memory_space<vmem>>, vector<1x32x32xf32>
    %183 = vector.shape_cast %182 : vector<1x32x32xf32> to vector<32x32xf32>
    %cst_117 = arith.constant dense<0.000000e+00> : vector<32x64xf32>
    %184 = tpu.matmul %183, %166, %cst_117 {dimension_numbers = #tpu.dot_dimension_numbers<[1], [0], [0], [1], [0, 0, 1, 1], [], []>} : vector<32x32xf32>, vector<32x64xf32>, vector<32x64xf32> -> vector<32x64xf32>
    %185 = arith.addf %177, %184 : vector<32x64xf32>
    %c1_118 = arith.constant 1 : index
    %c0_119 = arith.constant 0 : index
    %c0_120 = arith.constant 0 : index
    %186 = vector.load %arg14[%c1_118, %c0_119, %c0_120] : memref<3x32x32xf32, #tpu.memory_space<vmem>>, vector<1x32x32xf32>
    %187 = vector.shape_cast %186 : vector<1x32x32xf32> to vector<32x32xf32>
    %cst_121 = arith.constant dense<0.000000e+00> : vector<32x64xf32>
    %188 = tpu.matmul %187, %157, %cst_121 {dimension_numbers = #tpu.dot_dimension_numbers<[1], [0], [0], [1], [0, 0, 1, 1], [], []>} : vector<32x32xf32>, vector<32x64xf32>, vector<32x64xf32> -> vector<32x64xf32>
    %189 = arith.addf %181, %188 : vector<32x64xf32>
    %c1_122 = arith.constant 1 : index
    %c0_123 = arith.constant 0 : index
    %c0_124 = arith.constant 0 : index
    %190 = vector.load %arg16[%c1_122, %c0_123, %c0_124] : memref<3x32x32xf32, #tpu.memory_space<vmem>>, vector<1x32x32xf32>
    %191 = vector.shape_cast %190 : vector<1x32x32xf32> to vector<32x32xf32>
    %cst_125 = arith.constant dense<0.000000e+00> : vector<32x64xf32>
    %192 = tpu.matmul %191, %157, %cst_125 {dimension_numbers = #tpu.dot_dimension_numbers<[1], [0], [0], [1], [0, 0, 1, 1], [], []>} : vector<32x32xf32>, vector<32x64xf32>, vector<32x64xf32> -> vector<32x64xf32>
    %193 = arith.addf %185, %192 : vector<32x64xf32>
    %c2_126 = arith.constant 2 : index
    %c0_127 = arith.constant 0 : index
    %c0_128 = arith.constant 0 : index
    %194 = vector.load %arg14[%c2_126, %c0_127, %c0_128] : memref<3x32x32xf32, #tpu.memory_space<vmem>>, vector<1x32x32xf32>
    %195 = vector.shape_cast %194 : vector<1x32x32xf32> to vector<32x32xf32>
    %cst_129 = arith.constant dense<0.000000e+00> : vector<32x64xf32>
    %196 = tpu.matmul %195, %175, %cst_129 {dimension_numbers = #tpu.dot_dimension_numbers<[1], [0], [0], [1], [0, 0, 1, 1], [], []>} : vector<32x32xf32>, vector<32x64xf32>, vector<32x64xf32> -> vector<32x64xf32>
    %197 = arith.addf %189, %196 : vector<32x64xf32>
    %c2_130 = arith.constant 2 : index
    %c0_131 = arith.constant 0 : index
    %c0_132 = arith.constant 0 : index
    %198 = vector.load %arg16[%c2_130, %c0_131, %c0_132] : memref<3x32x32xf32, #tpu.memory_space<vmem>>, vector<1x32x32xf32>
    %199 = vector.shape_cast %198 : vector<1x32x32xf32> to vector<32x32xf32>
    %cst_133 = arith.constant dense<0.000000e+00> : vector<32x64xf32>
    %200 = tpu.matmul %199, %175, %cst_133 {dimension_numbers = #tpu.dot_dimension_numbers<[1], [0], [0], [1], [0, 0, 1, 1], [], []>} : vector<32x32xf32>, vector<32x64xf32>, vector<32x64xf32> -> vector<32x64xf32>
    %201 = arith.addf %193, %200 : vector<32x64xf32>
    %c0_134 = arith.constant 0 : index
    %c0_135 = arith.constant 0 : index
    %202 = vector.load %arg15[%c0_134, %c0_135] : memref<32x1xf32, #tpu.memory_space<vmem>>, vector<32x1xf32>
    %203 = vector.broadcast %202 : vector<32x1xf32> to vector<32x64xf32>
    %204 = arith.addf %197, %203 : vector<32x64xf32>
    %c0_136 = arith.constant 0 : index
    %c0_137 = arith.constant 0 : index
    %205 = vector.load %arg17[%c0_136, %c0_137] : memref<32x1xf32, #tpu.memory_space<vmem>>, vector<32x1xf32>
    %206 = vector.broadcast %205 : vector<32x1xf32> to vector<32x64xf32>
    %207 = arith.addf %201, %206 : vector<32x64xf32>
    %208 = arith.negf %204 : vector<32x64xf32>
    %209 = math.exp %208 : vector<32x64xf32>
    %cst_138 = arith.constant 1.000000e+00 : f32
    %210 = vector.broadcast %cst_138 : f32 to vector<32x64xf32>
    %211 = arith.addf %210, %209 : vector<32x64xf32>
    %212 = arith.divf %210, %211 : vector<32x64xf32>
    %213 = arith.mulf %212, %207 : vector<32x64xf32>
    %cst_139 = arith.constant 1.000000e+00 : f32
    %214 = vector.broadcast %cst_139 : f32 to vector<32x64xf32>
    %215 = arith.subf %214, %212 : vector<32x64xf32>
    %216 = arith.mulf %215, %157 : vector<32x64xf32>
    %217 = arith.addf %213, %216 : vector<32x64xf32>
    %218 = tpu.iota {dimensions = array<i32: 0>} : vector<64x64xi32>
    %219 = tpu.iota {dimensions = array<i32: 1>} : vector<64x64xi32>
    %c-3_i32_140 = arith.constant -3 : i32
    %220 = vector.broadcast %c-3_i32_140 : i32 to vector<64x64xi32>
    %221 = arith.addi %219, %220 : vector<64x64xi32>
    %222 = arith.cmpi eq, %218, %221 : vector<64x64xi32>
    %cst_141 = arith.constant 1.000000e+00 : f32
    %cst_142 = arith.constant 0.000000e+00 : f32
    %223 = vector.broadcast %cst_141 : f32 to vector<64x64xf32>
    %224 = vector.broadcast %cst_142 : f32 to vector<64x64xf32>
    %225 = arith.select %222, %223, %224 : vector<64x64xi1>, vector<64x64xf32>
    %cst_143 = arith.constant dense<0.000000e+00> : vector<32x64xf32>
    %226 = tpu.matmul %217, %225, %cst_143 {dimension_numbers = #tpu.dot_dimension_numbers<[1], [0], [0], [1], [0, 0, 1, 1], [], []>} : vector<32x64xf32>, vector<64x64xf32>, vector<32x64xf32> -> vector<32x64xf32>
    %227 = tpu.iota {dimensions = array<i32: 0>} : vector<64x64xi32>
    %228 = tpu.iota {dimensions = array<i32: 1>} : vector<64x64xi32>
    %c3_i32_144 = arith.constant 3 : i32
    %229 = vector.broadcast %c3_i32_144 : i32 to vector<64x64xi32>
    %230 = arith.addi %228, %229 : vector<64x64xi32>
    %231 = arith.cmpi eq, %227, %230 : vector<64x64xi32>
    %cst_145 = arith.constant 1.000000e+00 : f32
    %cst_146 = arith.constant 0.000000e+00 : f32
    %232 = vector.broadcast %cst_145 : f32 to vector<64x64xf32>
    %233 = vector.broadcast %cst_146 : f32 to vector<64x64xf32>
    %234 = arith.select %231, %232, %233 : vector<64x64xi1>, vector<64x64xf32>
    %cst_147 = arith.constant dense<0.000000e+00> : vector<32x64xf32>
    %235 = tpu.matmul %217, %234, %cst_147 {dimension_numbers = #tpu.dot_dimension_numbers<[1], [0], [0], [1], [0, 0, 1, 1], [], []>} : vector<32x64xf32>, vector<64x64xf32>, vector<32x64xf32> -> vector<32x64xf32>
    %cst_148 = arith.constant 0.000000e+00 : f32
    %236 = vector.broadcast %cst_148 : f32 to vector<32x64xf32>
    %cst_149 = arith.constant 0.000000e+00 : f32
    %237 = vector.broadcast %cst_149 : f32 to vector<32x64xf32>
    %c0_150 = arith.constant 0 : index
    %c0_151 = arith.constant 0 : index
    %c0_152 = arith.constant 0 : index
    %238 = vector.load %arg18[%c0_150, %c0_151, %c0_152] : memref<3x32x32xf32, #tpu.memory_space<vmem>>, vector<1x32x32xf32>
    %239 = vector.shape_cast %238 : vector<1x32x32xf32> to vector<32x32xf32>
    %cst_153 = arith.constant dense<0.000000e+00> : vector<32x64xf32>
    %240 = tpu.matmul %239, %226, %cst_153 {dimension_numbers = #tpu.dot_dimension_numbers<[1], [0], [0], [1], [0, 0, 1, 1], [], []>} : vector<32x32xf32>, vector<32x64xf32>, vector<32x64xf32> -> vector<32x64xf32>
    %241 = arith.addf %236, %240 : vector<32x64xf32>
    %c0_154 = arith.constant 0 : index
    %c0_155 = arith.constant 0 : index
    %c0_156 = arith.constant 0 : index
    %242 = vector.load %arg20[%c0_154, %c0_155, %c0_156] : memref<3x32x32xf32, #tpu.memory_space<vmem>>, vector<1x32x32xf32>
    %243 = vector.shape_cast %242 : vector<1x32x32xf32> to vector<32x32xf32>
    %cst_157 = arith.constant dense<0.000000e+00> : vector<32x64xf32>
    %244 = tpu.matmul %243, %226, %cst_157 {dimension_numbers = #tpu.dot_dimension_numbers<[1], [0], [0], [1], [0, 0, 1, 1], [], []>} : vector<32x32xf32>, vector<32x64xf32>, vector<32x64xf32> -> vector<32x64xf32>
    %245 = arith.addf %237, %244 : vector<32x64xf32>
    %c1_158 = arith.constant 1 : index
    %c0_159 = arith.constant 0 : index
    %c0_160 = arith.constant 0 : index
    %246 = vector.load %arg18[%c1_158, %c0_159, %c0_160] : memref<3x32x32xf32, #tpu.memory_space<vmem>>, vector<1x32x32xf32>
    %247 = vector.shape_cast %246 : vector<1x32x32xf32> to vector<32x32xf32>
    %cst_161 = arith.constant dense<0.000000e+00> : vector<32x64xf32>
    %248 = tpu.matmul %247, %217, %cst_161 {dimension_numbers = #tpu.dot_dimension_numbers<[1], [0], [0], [1], [0, 0, 1, 1], [], []>} : vector<32x32xf32>, vector<32x64xf32>, vector<32x64xf32> -> vector<32x64xf32>
    %249 = arith.addf %241, %248 : vector<32x64xf32>
    %c1_162 = arith.constant 1 : index
    %c0_163 = arith.constant 0 : index
    %c0_164 = arith.constant 0 : index
    %250 = vector.load %arg20[%c1_162, %c0_163, %c0_164] : memref<3x32x32xf32, #tpu.memory_space<vmem>>, vector<1x32x32xf32>
    %251 = vector.shape_cast %250 : vector<1x32x32xf32> to vector<32x32xf32>
    %cst_165 = arith.constant dense<0.000000e+00> : vector<32x64xf32>
    %252 = tpu.matmul %251, %217, %cst_165 {dimension_numbers = #tpu.dot_dimension_numbers<[1], [0], [0], [1], [0, 0, 1, 1], [], []>} : vector<32x32xf32>, vector<32x64xf32>, vector<32x64xf32> -> vector<32x64xf32>
    %253 = arith.addf %245, %252 : vector<32x64xf32>
    %c2_166 = arith.constant 2 : index
    %c0_167 = arith.constant 0 : index
    %c0_168 = arith.constant 0 : index
    %254 = vector.load %arg18[%c2_166, %c0_167, %c0_168] : memref<3x32x32xf32, #tpu.memory_space<vmem>>, vector<1x32x32xf32>
    %255 = vector.shape_cast %254 : vector<1x32x32xf32> to vector<32x32xf32>
    %cst_169 = arith.constant dense<0.000000e+00> : vector<32x64xf32>
    %256 = tpu.matmul %255, %235, %cst_169 {dimension_numbers = #tpu.dot_dimension_numbers<[1], [0], [0], [1], [0, 0, 1, 1], [], []>} : vector<32x32xf32>, vector<32x64xf32>, vector<32x64xf32> -> vector<32x64xf32>
    %257 = arith.addf %249, %256 : vector<32x64xf32>
    %c2_170 = arith.constant 2 : index
    %c0_171 = arith.constant 0 : index
    %c0_172 = arith.constant 0 : index
    %258 = vector.load %arg20[%c2_170, %c0_171, %c0_172] : memref<3x32x32xf32, #tpu.memory_space<vmem>>, vector<1x32x32xf32>
    %259 = vector.shape_cast %258 : vector<1x32x32xf32> to vector<32x32xf32>
    %cst_173 = arith.constant dense<0.000000e+00> : vector<32x64xf32>
    %260 = tpu.matmul %259, %235, %cst_173 {dimension_numbers = #tpu.dot_dimension_numbers<[1], [0], [0], [1], [0, 0, 1, 1], [], []>} : vector<32x32xf32>, vector<32x64xf32>, vector<32x64xf32> -> vector<32x64xf32>
    %261 = arith.addf %253, %260 : vector<32x64xf32>
    %c0_174 = arith.constant 0 : index
    %c0_175 = arith.constant 0 : index
    %262 = vector.load %arg19[%c0_174, %c0_175] : memref<32x1xf32, #tpu.memory_space<vmem>>, vector<32x1xf32>
    %263 = vector.broadcast %262 : vector<32x1xf32> to vector<32x64xf32>
    %264 = arith.addf %257, %263 : vector<32x64xf32>
    %c0_176 = arith.constant 0 : index
    %c0_177 = arith.constant 0 : index
    %265 = vector.load %arg21[%c0_176, %c0_177] : memref<32x1xf32, #tpu.memory_space<vmem>>, vector<32x1xf32>
    %266 = vector.broadcast %265 : vector<32x1xf32> to vector<32x64xf32>
    %267 = arith.addf %261, %266 : vector<32x64xf32>
    %268 = arith.negf %264 : vector<32x64xf32>
    %269 = math.exp %268 : vector<32x64xf32>
    %cst_178 = arith.constant 1.000000e+00 : f32
    %270 = vector.broadcast %cst_178 : f32 to vector<32x64xf32>
    %271 = arith.addf %270, %269 : vector<32x64xf32>
    %272 = arith.divf %270, %271 : vector<32x64xf32>
    %273 = arith.mulf %272, %267 : vector<32x64xf32>
    %cst_179 = arith.constant 1.000000e+00 : f32
    %274 = vector.broadcast %cst_179 : f32 to vector<32x64xf32>
    %275 = arith.subf %274, %272 : vector<32x64xf32>
    %276 = arith.mulf %275, %217 : vector<32x64xf32>
    %277 = arith.addf %273, %276 : vector<32x64xf32>
    %c0_180 = arith.constant 0 : index
    %c0_181 = arith.constant 0 : index
    %c0_182 = arith.constant 0 : index
    %278 = vector.load %arg22[%c0_180, %c0_181, %c0_182] : memref<2x32x32xf32, #tpu.memory_space<vmem>>, vector<1x32x32xf32>
    %279 = vector.shape_cast %278 : vector<1x32x32xf32> to vector<32x32xf32>
    %cst_183 = arith.constant dense<0.000000e+00> : vector<32x64xf32>
    %280 = tpu.matmul %279, %277, %cst_183 {dimension_numbers = #tpu.dot_dimension_numbers<[1], [0], [0], [1], [0, 0, 1, 1], [], []>} : vector<32x32xf32>, vector<32x64xf32>, vector<32x64xf32> -> vector<32x64xf32>
    %c0_184 = arith.constant 0 : index
    %c0_185 = arith.constant 0 : index
    %281 = vector.load %arg23[%c0_184, %c0_185] : memref<32x1xf32, #tpu.memory_space<vmem>>, vector<32x1xf32>
    %282 = vector.broadcast %281 : vector<32x1xf32> to vector<32x64xf32>
    %283 = arith.addf %280, %282 : vector<32x64xf32>
    %c1_186 = arith.constant 1 : index
    %c0_187 = arith.constant 0 : index
    %c0_188 = arith.constant 0 : index
    %284 = vector.load %arg22[%c1_186, %c0_187, %c0_188] : memref<2x32x32xf32, #tpu.memory_space<vmem>>, vector<1x32x32xf32>
    %285 = vector.shape_cast %284 : vector<1x32x32xf32> to vector<32x32xf32>
    %cst_189 = arith.constant dense<0.000000e+00> : vector<32x64xf32>
    %286 = tpu.matmul %285, %277, %cst_189 {dimension_numbers = #tpu.dot_dimension_numbers<[1], [0], [0], [1], [0, 0, 1, 1], [], []>} : vector<32x32xf32>, vector<32x64xf32>, vector<32x64xf32> -> vector<32x64xf32>
    %c0_190 = arith.constant 0 : index
    %c0_191 = arith.constant 0 : index
    %287 = vector.load %arg23[%c0_190, %c0_191] : memref<32x1xf32, #tpu.memory_space<vmem>>, vector<32x1xf32>
    %288 = vector.broadcast %287 : vector<32x1xf32> to vector<32x64xf32>
    %289 = arith.addf %286, %288 : vector<32x64xf32>
    %290 = tpu.iota {dimensions = array<i32: 0>} : vector<64x128xi32>
    %291 = tpu.iota {dimensions = array<i32: 1>} : vector<64x128xi32>
    %c2_i32_192 = arith.constant 2 : i32
    %292 = vector.broadcast %c2_i32_192 : i32 to vector<64x128xi32>
    %293 = arith.muli %292, %290 : vector<64x128xi32>
    %294 = arith.cmpi eq, %291, %293 : vector<64x128xi32>
    %cst_193 = arith.constant 1.000000e+00 : f32
    %cst_194 = arith.constant 0.000000e+00 : f32
    %295 = vector.broadcast %cst_193 : f32 to vector<64x128xf32>
    %296 = vector.broadcast %cst_194 : f32 to vector<64x128xf32>
    %297 = arith.select %294, %295, %296 : vector<64x128xi1>, vector<64x128xf32>
    %c2_i32_195 = arith.constant 2 : i32
    %298 = vector.broadcast %c2_i32_195 : i32 to vector<64x128xi32>
    %299 = arith.muli %298, %290 : vector<64x128xi32>
    %c1_i32_196 = arith.constant 1 : i32
    %300 = vector.broadcast %c1_i32_196 : i32 to vector<64x128xi32>
    %301 = arith.addi %299, %300 : vector<64x128xi32>
    %302 = arith.cmpi eq, %291, %301 : vector<64x128xi32>
    %cst_197 = arith.constant 1.000000e+00 : f32
    %cst_198 = arith.constant 0.000000e+00 : f32
    %303 = vector.broadcast %cst_197 : f32 to vector<64x128xf32>
    %304 = vector.broadcast %cst_198 : f32 to vector<64x128xf32>
    %305 = arith.select %302, %303, %304 : vector<64x128xi1>, vector<64x128xf32>
    %cst_199 = arith.constant dense<0.000000e+00> : vector<32x128xf32>
    %306 = tpu.matmul %283, %297, %cst_199 {dimension_numbers = #tpu.dot_dimension_numbers<[1], [0], [0], [1], [0, 0, 1, 1], [], []>} : vector<32x64xf32>, vector<64x128xf32>, vector<32x128xf32> -> vector<32x128xf32>
    %cst_200 = arith.constant dense<0.000000e+00> : vector<32x128xf32>
    %307 = tpu.matmul %289, %305, %cst_200 {dimension_numbers = #tpu.dot_dimension_numbers<[1], [0], [0], [1], [0, 0, 1, 1], [], []>} : vector<32x64xf32>, vector<64x128xf32>, vector<32x128xf32> -> vector<32x128xf32>
    %308 = arith.addf %306, %307 : vector<32x128xf32>
    %309 = tpu.iota {dimensions = array<i32: 0>} : vector<128x128xi32>
    %310 = tpu.iota {dimensions = array<i32: 1>} : vector<128x128xi32>
    %c-1_i32_201 = arith.constant -1 : i32
    %311 = vector.broadcast %c-1_i32_201 : i32 to vector<128x128xi32>
    %312 = arith.addi %310, %311 : vector<128x128xi32>
    %313 = arith.cmpi eq, %309, %312 : vector<128x128xi32>
    %cst_202 = arith.constant 1.000000e+00 : f32
    %cst_203 = arith.constant 0.000000e+00 : f32
    %314 = vector.broadcast %cst_202 : f32 to vector<128x128xf32>
    %315 = vector.broadcast %cst_203 : f32 to vector<128x128xf32>
    %316 = arith.select %313, %314, %315 : vector<128x128xi1>, vector<128x128xf32>
    %cst_204 = arith.constant dense<0.000000e+00> : vector<32x128xf32>
    %317 = tpu.matmul %308, %316, %cst_204 {dimension_numbers = #tpu.dot_dimension_numbers<[1], [0], [0], [1], [0, 0, 1, 1], [], []>} : vector<32x128xf32>, vector<128x128xf32>, vector<32x128xf32> -> vector<32x128xf32>
    %318 = tpu.iota {dimensions = array<i32: 0>} : vector<128x128xi32>
    %319 = tpu.iota {dimensions = array<i32: 1>} : vector<128x128xi32>
    %c1_i32_205 = arith.constant 1 : i32
    %320 = vector.broadcast %c1_i32_205 : i32 to vector<128x128xi32>
    %321 = arith.addi %319, %320 : vector<128x128xi32>
    %322 = arith.cmpi eq, %318, %321 : vector<128x128xi32>
    %cst_206 = arith.constant 1.000000e+00 : f32
    %cst_207 = arith.constant 0.000000e+00 : f32
    %323 = vector.broadcast %cst_206 : f32 to vector<128x128xf32>
    %324 = vector.broadcast %cst_207 : f32 to vector<128x128xf32>
    %325 = arith.select %322, %323, %324 : vector<128x128xi1>, vector<128x128xf32>
    %cst_208 = arith.constant dense<0.000000e+00> : vector<32x128xf32>
    %326 = tpu.matmul %308, %325, %cst_208 {dimension_numbers = #tpu.dot_dimension_numbers<[1], [0], [0], [1], [0, 0, 1, 1], [], []>} : vector<32x128xf32>, vector<128x128xf32>, vector<32x128xf32> -> vector<32x128xf32>
    %cst_209 = arith.constant 0.000000e+00 : f32
    %327 = vector.broadcast %cst_209 : f32 to vector<32x128xf32>
    %cst_210 = arith.constant 0.000000e+00 : f32
    %328 = vector.broadcast %cst_210 : f32 to vector<32x128xf32>
    %c0_211 = arith.constant 0 : index
    %c0_212 = arith.constant 0 : index
    %c0_213 = arith.constant 0 : index
    %329 = vector.load %arg24[%c0_211, %c0_212, %c0_213] : memref<3x32x32xf32, #tpu.memory_space<vmem>>, vector<1x32x32xf32>
    %330 = vector.shape_cast %329 : vector<1x32x32xf32> to vector<32x32xf32>
    %cst_214 = arith.constant dense<0.000000e+00> : vector<32x128xf32>
    %331 = tpu.matmul %330, %317, %cst_214 {dimension_numbers = #tpu.dot_dimension_numbers<[1], [0], [0], [1], [0, 0, 1, 1], [], []>} : vector<32x32xf32>, vector<32x128xf32>, vector<32x128xf32> -> vector<32x128xf32>
    %332 = arith.addf %327, %331 : vector<32x128xf32>
    %c0_215 = arith.constant 0 : index
    %c0_216 = arith.constant 0 : index
    %c0_217 = arith.constant 0 : index
    %333 = vector.load %arg26[%c0_215, %c0_216, %c0_217] : memref<3x32x32xf32, #tpu.memory_space<vmem>>, vector<1x32x32xf32>
    %334 = vector.shape_cast %333 : vector<1x32x32xf32> to vector<32x32xf32>
    %cst_218 = arith.constant dense<0.000000e+00> : vector<32x128xf32>
    %335 = tpu.matmul %334, %317, %cst_218 {dimension_numbers = #tpu.dot_dimension_numbers<[1], [0], [0], [1], [0, 0, 1, 1], [], []>} : vector<32x32xf32>, vector<32x128xf32>, vector<32x128xf32> -> vector<32x128xf32>
    %336 = arith.addf %328, %335 : vector<32x128xf32>
    %c1_219 = arith.constant 1 : index
    %c0_220 = arith.constant 0 : index
    %c0_221 = arith.constant 0 : index
    %337 = vector.load %arg24[%c1_219, %c0_220, %c0_221] : memref<3x32x32xf32, #tpu.memory_space<vmem>>, vector<1x32x32xf32>
    %338 = vector.shape_cast %337 : vector<1x32x32xf32> to vector<32x32xf32>
    %cst_222 = arith.constant dense<0.000000e+00> : vector<32x128xf32>
    %339 = tpu.matmul %338, %308, %cst_222 {dimension_numbers = #tpu.dot_dimension_numbers<[1], [0], [0], [1], [0, 0, 1, 1], [], []>} : vector<32x32xf32>, vector<32x128xf32>, vector<32x128xf32> -> vector<32x128xf32>
    %340 = arith.addf %332, %339 : vector<32x128xf32>
    %c1_223 = arith.constant 1 : index
    %c0_224 = arith.constant 0 : index
    %c0_225 = arith.constant 0 : index
    %341 = vector.load %arg26[%c1_223, %c0_224, %c0_225] : memref<3x32x32xf32, #tpu.memory_space<vmem>>, vector<1x32x32xf32>
    %342 = vector.shape_cast %341 : vector<1x32x32xf32> to vector<32x32xf32>
    %cst_226 = arith.constant dense<0.000000e+00> : vector<32x128xf32>
    %343 = tpu.matmul %342, %308, %cst_226 {dimension_numbers = #tpu.dot_dimension_numbers<[1], [0], [0], [1], [0, 0, 1, 1], [], []>} : vector<32x32xf32>, vector<32x128xf32>, vector<32x128xf32> -> vector<32x128xf32>
    %344 = arith.addf %336, %343 : vector<32x128xf32>
    %c2_227 = arith.constant 2 : index
    %c0_228 = arith.constant 0 : index
    %c0_229 = arith.constant 0 : index
    %345 = vector.load %arg24[%c2_227, %c0_228, %c0_229] : memref<3x32x32xf32, #tpu.memory_space<vmem>>, vector<1x32x32xf32>
    %346 = vector.shape_cast %345 : vector<1x32x32xf32> to vector<32x32xf32>
    %cst_230 = arith.constant dense<0.000000e+00> : vector<32x128xf32>
    %347 = tpu.matmul %346, %326, %cst_230 {dimension_numbers = #tpu.dot_dimension_numbers<[1], [0], [0], [1], [0, 0, 1, 1], [], []>} : vector<32x32xf32>, vector<32x128xf32>, vector<32x128xf32> -> vector<32x128xf32>
    %348 = arith.addf %340, %347 : vector<32x128xf32>
    %c2_231 = arith.constant 2 : index
    %c0_232 = arith.constant 0 : index
    %c0_233 = arith.constant 0 : index
    %349 = vector.load %arg26[%c2_231, %c0_232, %c0_233] : memref<3x32x32xf32, #tpu.memory_space<vmem>>, vector<1x32x32xf32>
    %350 = vector.shape_cast %349 : vector<1x32x32xf32> to vector<32x32xf32>
    %cst_234 = arith.constant dense<0.000000e+00> : vector<32x128xf32>
    %351 = tpu.matmul %350, %326, %cst_234 {dimension_numbers = #tpu.dot_dimension_numbers<[1], [0], [0], [1], [0, 0, 1, 1], [], []>} : vector<32x32xf32>, vector<32x128xf32>, vector<32x128xf32> -> vector<32x128xf32>
    %352 = arith.addf %344, %351 : vector<32x128xf32>
    %c0_235 = arith.constant 0 : index
    %c0_236 = arith.constant 0 : index
    %353 = vector.load %arg25[%c0_235, %c0_236] : memref<32x1xf32, #tpu.memory_space<vmem>>, vector<32x1xf32>
    %354 = vector.broadcast %353 : vector<32x1xf32> to vector<32x128xf32>
    %355 = arith.addf %348, %354 : vector<32x128xf32>
    %c0_237 = arith.constant 0 : index
    %c0_238 = arith.constant 0 : index
    %356 = vector.load %arg27[%c0_237, %c0_238] : memref<32x1xf32, #tpu.memory_space<vmem>>, vector<32x1xf32>
    %357 = vector.broadcast %356 : vector<32x1xf32> to vector<32x128xf32>
    %358 = arith.addf %352, %357 : vector<32x128xf32>
    %359 = arith.negf %355 : vector<32x128xf32>
    %360 = math.exp %359 : vector<32x128xf32>
    %cst_239 = arith.constant 1.000000e+00 : f32
    %361 = vector.broadcast %cst_239 : f32 to vector<32x128xf32>
    %362 = arith.addf %361, %360 : vector<32x128xf32>
    %363 = arith.divf %361, %362 : vector<32x128xf32>
    %364 = arith.mulf %363, %358 : vector<32x128xf32>
    %cst_240 = arith.constant 1.000000e+00 : f32
    %365 = vector.broadcast %cst_240 : f32 to vector<32x128xf32>
    %366 = arith.subf %365, %363 : vector<32x128xf32>
    %367 = arith.mulf %366, %308 : vector<32x128xf32>
    %368 = arith.addf %364, %367 : vector<32x128xf32>
    %369 = tpu.iota {dimensions = array<i32: 0>} : vector<128x128xi32>
    %370 = tpu.iota {dimensions = array<i32: 1>} : vector<128x128xi32>
    %c-3_i32_241 = arith.constant -3 : i32
    %371 = vector.broadcast %c-3_i32_241 : i32 to vector<128x128xi32>
    %372 = arith.addi %370, %371 : vector<128x128xi32>
    %373 = arith.cmpi eq, %369, %372 : vector<128x128xi32>
    %cst_242 = arith.constant 1.000000e+00 : f32
    %cst_243 = arith.constant 0.000000e+00 : f32
    %374 = vector.broadcast %cst_242 : f32 to vector<128x128xf32>
    %375 = vector.broadcast %cst_243 : f32 to vector<128x128xf32>
    %376 = arith.select %373, %374, %375 : vector<128x128xi1>, vector<128x128xf32>
    %cst_244 = arith.constant dense<0.000000e+00> : vector<32x128xf32>
    %377 = tpu.matmul %368, %376, %cst_244 {dimension_numbers = #tpu.dot_dimension_numbers<[1], [0], [0], [1], [0, 0, 1, 1], [], []>} : vector<32x128xf32>, vector<128x128xf32>, vector<32x128xf32> -> vector<32x128xf32>
    %378 = tpu.iota {dimensions = array<i32: 0>} : vector<128x128xi32>
    %379 = tpu.iota {dimensions = array<i32: 1>} : vector<128x128xi32>
    %c3_i32_245 = arith.constant 3 : i32
    %380 = vector.broadcast %c3_i32_245 : i32 to vector<128x128xi32>
    %381 = arith.addi %379, %380 : vector<128x128xi32>
    %382 = arith.cmpi eq, %378, %381 : vector<128x128xi32>
    %cst_246 = arith.constant 1.000000e+00 : f32
    %cst_247 = arith.constant 0.000000e+00 : f32
    %383 = vector.broadcast %cst_246 : f32 to vector<128x128xf32>
    %384 = vector.broadcast %cst_247 : f32 to vector<128x128xf32>
    %385 = arith.select %382, %383, %384 : vector<128x128xi1>, vector<128x128xf32>
    %cst_248 = arith.constant dense<0.000000e+00> : vector<32x128xf32>
    %386 = tpu.matmul %368, %385, %cst_248 {dimension_numbers = #tpu.dot_dimension_numbers<[1], [0], [0], [1], [0, 0, 1, 1], [], []>} : vector<32x128xf32>, vector<128x128xf32>, vector<32x128xf32> -> vector<32x128xf32>
    %cst_249 = arith.constant 0.000000e+00 : f32
    %387 = vector.broadcast %cst_249 : f32 to vector<32x128xf32>
    %cst_250 = arith.constant 0.000000e+00 : f32
    %388 = vector.broadcast %cst_250 : f32 to vector<32x128xf32>
    %c0_251 = arith.constant 0 : index
    %c0_252 = arith.constant 0 : index
    %c0_253 = arith.constant 0 : index
    %389 = vector.load %arg28[%c0_251, %c0_252, %c0_253] : memref<3x32x32xf32, #tpu.memory_space<vmem>>, vector<1x32x32xf32>
    %390 = vector.shape_cast %389 : vector<1x32x32xf32> to vector<32x32xf32>
    %cst_254 = arith.constant dense<0.000000e+00> : vector<32x128xf32>
    %391 = tpu.matmul %390, %377, %cst_254 {dimension_numbers = #tpu.dot_dimension_numbers<[1], [0], [0], [1], [0, 0, 1, 1], [], []>} : vector<32x32xf32>, vector<32x128xf32>, vector<32x128xf32> -> vector<32x128xf32>
    %392 = arith.addf %387, %391 : vector<32x128xf32>
    %c0_255 = arith.constant 0 : index
    %c0_256 = arith.constant 0 : index
    %c0_257 = arith.constant 0 : index
    %393 = vector.load %arg30[%c0_255, %c0_256, %c0_257] : memref<3x32x32xf32, #tpu.memory_space<vmem>>, vector<1x32x32xf32>
    %394 = vector.shape_cast %393 : vector<1x32x32xf32> to vector<32x32xf32>
    %cst_258 = arith.constant dense<0.000000e+00> : vector<32x128xf32>
    %395 = tpu.matmul %394, %377, %cst_258 {dimension_numbers = #tpu.dot_dimension_numbers<[1], [0], [0], [1], [0, 0, 1, 1], [], []>} : vector<32x32xf32>, vector<32x128xf32>, vector<32x128xf32> -> vector<32x128xf32>
    %396 = arith.addf %388, %395 : vector<32x128xf32>
    %c1_259 = arith.constant 1 : index
    %c0_260 = arith.constant 0 : index
    %c0_261 = arith.constant 0 : index
    %397 = vector.load %arg28[%c1_259, %c0_260, %c0_261] : memref<3x32x32xf32, #tpu.memory_space<vmem>>, vector<1x32x32xf32>
    %398 = vector.shape_cast %397 : vector<1x32x32xf32> to vector<32x32xf32>
    %cst_262 = arith.constant dense<0.000000e+00> : vector<32x128xf32>
    %399 = tpu.matmul %398, %368, %cst_262 {dimension_numbers = #tpu.dot_dimension_numbers<[1], [0], [0], [1], [0, 0, 1, 1], [], []>} : vector<32x32xf32>, vector<32x128xf32>, vector<32x128xf32> -> vector<32x128xf32>
    %400 = arith.addf %392, %399 : vector<32x128xf32>
    %c1_263 = arith.constant 1 : index
    %c0_264 = arith.constant 0 : index
    %c0_265 = arith.constant 0 : index
    %401 = vector.load %arg30[%c1_263, %c0_264, %c0_265] : memref<3x32x32xf32, #tpu.memory_space<vmem>>, vector<1x32x32xf32>
    %402 = vector.shape_cast %401 : vector<1x32x32xf32> to vector<32x32xf32>
    %cst_266 = arith.constant dense<0.000000e+00> : vector<32x128xf32>
    %403 = tpu.matmul %402, %368, %cst_266 {dimension_numbers = #tpu.dot_dimension_numbers<[1], [0], [0], [1], [0, 0, 1, 1], [], []>} : vector<32x32xf32>, vector<32x128xf32>, vector<32x128xf32> -> vector<32x128xf32>
    %404 = arith.addf %396, %403 : vector<32x128xf32>
    %c2_267 = arith.constant 2 : index
    %c0_268 = arith.constant 0 : index
    %c0_269 = arith.constant 0 : index
    %405 = vector.load %arg28[%c2_267, %c0_268, %c0_269] : memref<3x32x32xf32, #tpu.memory_space<vmem>>, vector<1x32x32xf32>
    %406 = vector.shape_cast %405 : vector<1x32x32xf32> to vector<32x32xf32>
    %cst_270 = arith.constant dense<0.000000e+00> : vector<32x128xf32>
    %407 = tpu.matmul %406, %386, %cst_270 {dimension_numbers = #tpu.dot_dimension_numbers<[1], [0], [0], [1], [0, 0, 1, 1], [], []>} : vector<32x32xf32>, vector<32x128xf32>, vector<32x128xf32> -> vector<32x128xf32>
    %408 = arith.addf %400, %407 : vector<32x128xf32>
    %c2_271 = arith.constant 2 : index
    %c0_272 = arith.constant 0 : index
    %c0_273 = arith.constant 0 : index
    %409 = vector.load %arg30[%c2_271, %c0_272, %c0_273] : memref<3x32x32xf32, #tpu.memory_space<vmem>>, vector<1x32x32xf32>
    %410 = vector.shape_cast %409 : vector<1x32x32xf32> to vector<32x32xf32>
    %cst_274 = arith.constant dense<0.000000e+00> : vector<32x128xf32>
    %411 = tpu.matmul %410, %386, %cst_274 {dimension_numbers = #tpu.dot_dimension_numbers<[1], [0], [0], [1], [0, 0, 1, 1], [], []>} : vector<32x32xf32>, vector<32x128xf32>, vector<32x128xf32> -> vector<32x128xf32>
    %412 = arith.addf %404, %411 : vector<32x128xf32>
    %c0_275 = arith.constant 0 : index
    %c0_276 = arith.constant 0 : index
    %413 = vector.load %arg29[%c0_275, %c0_276] : memref<32x1xf32, #tpu.memory_space<vmem>>, vector<32x1xf32>
    %414 = vector.broadcast %413 : vector<32x1xf32> to vector<32x128xf32>
    %415 = arith.addf %408, %414 : vector<32x128xf32>
    %c0_277 = arith.constant 0 : index
    %c0_278 = arith.constant 0 : index
    %416 = vector.load %arg31[%c0_277, %c0_278] : memref<32x1xf32, #tpu.memory_space<vmem>>, vector<32x1xf32>
    %417 = vector.broadcast %416 : vector<32x1xf32> to vector<32x128xf32>
    %418 = arith.addf %412, %417 : vector<32x128xf32>
    %419 = arith.negf %415 : vector<32x128xf32>
    %420 = math.exp %419 : vector<32x128xf32>
    %cst_279 = arith.constant 1.000000e+00 : f32
    %421 = vector.broadcast %cst_279 : f32 to vector<32x128xf32>
    %422 = arith.addf %421, %420 : vector<32x128xf32>
    %423 = arith.divf %421, %422 : vector<32x128xf32>
    %424 = arith.mulf %423, %418 : vector<32x128xf32>
    %cst_280 = arith.constant 1.000000e+00 : f32
    %425 = vector.broadcast %cst_280 : f32 to vector<32x128xf32>
    %426 = arith.subf %425, %423 : vector<32x128xf32>
    %427 = arith.mulf %426, %368 : vector<32x128xf32>
    %428 = arith.addf %424, %427 : vector<32x128xf32>
    %c0_281 = arith.constant 0 : index
    %c0_282 = arith.constant 0 : index
    %429 = vector.load %arg32[%c0_281, %c0_282] : memref<64x32xf32, #tpu.memory_space<vmem>>, vector<64x32xf32>
    %cst_283 = arith.constant dense<0.000000e+00> : vector<64x128xf32>
    %430 = tpu.matmul %429, %428, %cst_283 {dimension_numbers = #tpu.dot_dimension_numbers<[1], [0], [0], [1], [0, 0, 1, 1], [], []>} : vector<64x32xf32>, vector<32x128xf32>, vector<64x128xf32> -> vector<64x128xf32>
    %c0_284 = arith.constant 0 : index
    %c0_285 = arith.constant 0 : index
    %431 = vector.load %arg33[%c0_284, %c0_285] : memref<64x1xf32, #tpu.memory_space<vmem>>, vector<64x1xf32>
    %432 = vector.broadcast %431 : vector<64x1xf32> to vector<64x128xf32>
    %433 = arith.addf %430, %432 : vector<64x128xf32>
    %434 = tpu.iota {dimensions = array<i32: 0>} : vector<128x128xi32>
    %435 = tpu.iota {dimensions = array<i32: 1>} : vector<128x128xi32>
    %c-1_i32_286 = arith.constant -1 : i32
    %436 = vector.broadcast %c-1_i32_286 : i32 to vector<128x128xi32>
    %437 = arith.addi %435, %436 : vector<128x128xi32>
    %438 = arith.cmpi eq, %434, %437 : vector<128x128xi32>
    %cst_287 = arith.constant 1.000000e+00 : f32
    %cst_288 = arith.constant 0.000000e+00 : f32
    %439 = vector.broadcast %cst_287 : f32 to vector<128x128xf32>
    %440 = vector.broadcast %cst_288 : f32 to vector<128x128xf32>
    %441 = arith.select %438, %439, %440 : vector<128x128xi1>, vector<128x128xf32>
    %cst_289 = arith.constant dense<0.000000e+00> : vector<64x128xf32>
    %442 = tpu.matmul %433, %441, %cst_289 {dimension_numbers = #tpu.dot_dimension_numbers<[1], [0], [0], [1], [0, 0, 1, 1], [], []>} : vector<64x128xf32>, vector<128x128xf32>, vector<64x128xf32> -> vector<64x128xf32>
    %443 = tpu.iota {dimensions = array<i32: 0>} : vector<128x128xi32>
    %444 = tpu.iota {dimensions = array<i32: 1>} : vector<128x128xi32>
    %c1_i32_290 = arith.constant 1 : i32
    %445 = vector.broadcast %c1_i32_290 : i32 to vector<128x128xi32>
    %446 = arith.addi %444, %445 : vector<128x128xi32>
    %447 = arith.cmpi eq, %443, %446 : vector<128x128xi32>
    %cst_291 = arith.constant 1.000000e+00 : f32
    %cst_292 = arith.constant 0.000000e+00 : f32
    %448 = vector.broadcast %cst_291 : f32 to vector<128x128xf32>
    %449 = vector.broadcast %cst_292 : f32 to vector<128x128xf32>
    %450 = arith.select %447, %448, %449 : vector<128x128xi1>, vector<128x128xf32>
    %cst_293 = arith.constant dense<0.000000e+00> : vector<64x128xf32>
    %451 = tpu.matmul %433, %450, %cst_293 {dimension_numbers = #tpu.dot_dimension_numbers<[1], [0], [0], [1], [0, 0, 1, 1], [], []>} : vector<64x128xf32>, vector<128x128xf32>, vector<64x128xf32> -> vector<64x128xf32>
    %cst_294 = arith.constant 0.000000e+00 : f32
    %452 = vector.broadcast %cst_294 : f32 to vector<64x128xf32>
    %cst_295 = arith.constant 0.000000e+00 : f32
    %453 = vector.broadcast %cst_295 : f32 to vector<64x128xf32>
    %c0_296 = arith.constant 0 : index
    %c0_297 = arith.constant 0 : index
    %c0_298 = arith.constant 0 : index
    %454 = vector.load %arg34[%c0_296, %c0_297, %c0_298] : memref<3x64x64xf32, #tpu.memory_space<vmem>>, vector<1x64x64xf32>
    %455 = vector.shape_cast %454 : vector<1x64x64xf32> to vector<64x64xf32>
    %cst_299 = arith.constant dense<0.000000e+00> : vector<64x128xf32>
    %456 = tpu.matmul %455, %442, %cst_299 {dimension_numbers = #tpu.dot_dimension_numbers<[1], [0], [0], [1], [0, 0, 1, 1], [], []>} : vector<64x64xf32>, vector<64x128xf32>, vector<64x128xf32> -> vector<64x128xf32>
    %457 = arith.addf %452, %456 : vector<64x128xf32>
    %c0_300 = arith.constant 0 : index
    %c0_301 = arith.constant 0 : index
    %c0_302 = arith.constant 0 : index
    %458 = vector.load %arg36[%c0_300, %c0_301, %c0_302] : memref<3x64x64xf32, #tpu.memory_space<vmem>>, vector<1x64x64xf32>
    %459 = vector.shape_cast %458 : vector<1x64x64xf32> to vector<64x64xf32>
    %cst_303 = arith.constant dense<0.000000e+00> : vector<64x128xf32>
    %460 = tpu.matmul %459, %442, %cst_303 {dimension_numbers = #tpu.dot_dimension_numbers<[1], [0], [0], [1], [0, 0, 1, 1], [], []>} : vector<64x64xf32>, vector<64x128xf32>, vector<64x128xf32> -> vector<64x128xf32>
    %461 = arith.addf %453, %460 : vector<64x128xf32>
    %c1_304 = arith.constant 1 : index
    %c0_305 = arith.constant 0 : index
    %c0_306 = arith.constant 0 : index
    %462 = vector.load %arg34[%c1_304, %c0_305, %c0_306] : memref<3x64x64xf32, #tpu.memory_space<vmem>>, vector<1x64x64xf32>
    %463 = vector.shape_cast %462 : vector<1x64x64xf32> to vector<64x64xf32>
    %cst_307 = arith.constant dense<0.000000e+00> : vector<64x128xf32>
    %464 = tpu.matmul %463, %433, %cst_307 {dimension_numbers = #tpu.dot_dimension_numbers<[1], [0], [0], [1], [0, 0, 1, 1], [], []>} : vector<64x64xf32>, vector<64x128xf32>, vector<64x128xf32> -> vector<64x128xf32>
    %465 = arith.addf %457, %464 : vector<64x128xf32>
    %c1_308 = arith.constant 1 : index
    %c0_309 = arith.constant 0 : index
    %c0_310 = arith.constant 0 : index
    %466 = vector.load %arg36[%c1_308, %c0_309, %c0_310] : memref<3x64x64xf32, #tpu.memory_space<vmem>>, vector<1x64x64xf32>
    %467 = vector.shape_cast %466 : vector<1x64x64xf32> to vector<64x64xf32>
    %cst_311 = arith.constant dense<0.000000e+00> : vector<64x128xf32>
    %468 = tpu.matmul %467, %433, %cst_311 {dimension_numbers = #tpu.dot_dimension_numbers<[1], [0], [0], [1], [0, 0, 1, 1], [], []>} : vector<64x64xf32>, vector<64x128xf32>, vector<64x128xf32> -> vector<64x128xf32>
    %469 = arith.addf %461, %468 : vector<64x128xf32>
    %c2_312 = arith.constant 2 : index
    %c0_313 = arith.constant 0 : index
    %c0_314 = arith.constant 0 : index
    %470 = vector.load %arg34[%c2_312, %c0_313, %c0_314] : memref<3x64x64xf32, #tpu.memory_space<vmem>>, vector<1x64x64xf32>
    %471 = vector.shape_cast %470 : vector<1x64x64xf32> to vector<64x64xf32>
    %cst_315 = arith.constant dense<0.000000e+00> : vector<64x128xf32>
    %472 = tpu.matmul %471, %451, %cst_315 {dimension_numbers = #tpu.dot_dimension_numbers<[1], [0], [0], [1], [0, 0, 1, 1], [], []>} : vector<64x64xf32>, vector<64x128xf32>, vector<64x128xf32> -> vector<64x128xf32>
    %473 = arith.addf %465, %472 : vector<64x128xf32>
    %c2_316 = arith.constant 2 : index
    %c0_317 = arith.constant 0 : index
    %c0_318 = arith.constant 0 : index
    %474 = vector.load %arg36[%c2_316, %c0_317, %c0_318] : memref<3x64x64xf32, #tpu.memory_space<vmem>>, vector<1x64x64xf32>
    %475 = vector.shape_cast %474 : vector<1x64x64xf32> to vector<64x64xf32>
    %cst_319 = arith.constant dense<0.000000e+00> : vector<64x128xf32>
    %476 = tpu.matmul %475, %451, %cst_319 {dimension_numbers = #tpu.dot_dimension_numbers<[1], [0], [0], [1], [0, 0, 1, 1], [], []>} : vector<64x64xf32>, vector<64x128xf32>, vector<64x128xf32> -> vector<64x128xf32>
    %477 = arith.addf %469, %476 : vector<64x128xf32>
    %c0_320 = arith.constant 0 : index
    %c0_321 = arith.constant 0 : index
    %478 = vector.load %arg35[%c0_320, %c0_321] : memref<64x1xf32, #tpu.memory_space<vmem>>, vector<64x1xf32>
    %479 = vector.broadcast %478 : vector<64x1xf32> to vector<64x128xf32>
    %480 = arith.addf %473, %479 : vector<64x128xf32>
    %c0_322 = arith.constant 0 : index
    %c0_323 = arith.constant 0 : index
    %481 = vector.load %arg37[%c0_322, %c0_323] : memref<64x1xf32, #tpu.memory_space<vmem>>, vector<64x1xf32>
    %482 = vector.broadcast %481 : vector<64x1xf32> to vector<64x128xf32>
    %483 = arith.addf %477, %482 : vector<64x128xf32>
    %484 = arith.negf %480 : vector<64x128xf32>
    %485 = math.exp %484 : vector<64x128xf32>
    %cst_324 = arith.constant 1.000000e+00 : f32
    %486 = vector.broadcast %cst_324 : f32 to vector<64x128xf32>
    %487 = arith.addf %486, %485 : vector<64x128xf32>
    %488 = arith.divf %486, %487 : vector<64x128xf32>
    %489 = arith.mulf %488, %483 : vector<64x128xf32>
    %cst_325 = arith.constant 1.000000e+00 : f32
    %490 = vector.broadcast %cst_325 : f32 to vector<64x128xf32>
    %491 = arith.subf %490, %488 : vector<64x128xf32>
    %492 = arith.mulf %491, %433 : vector<64x128xf32>
    %493 = arith.addf %489, %492 : vector<64x128xf32>
    %494 = tpu.iota {dimensions = array<i32: 0>} : vector<128x128xi32>
    %495 = tpu.iota {dimensions = array<i32: 1>} : vector<128x128xi32>
    %c-1_i32_326 = arith.constant -1 : i32
    %496 = vector.broadcast %c-1_i32_326 : i32 to vector<128x128xi32>
    %497 = arith.addi %495, %496 : vector<128x128xi32>
    %498 = arith.cmpi eq, %494, %497 : vector<128x128xi32>
    %cst_327 = arith.constant 1.000000e+00 : f32
    %cst_328 = arith.constant 0.000000e+00 : f32
    %499 = vector.broadcast %cst_327 : f32 to vector<128x128xf32>
    %500 = vector.broadcast %cst_328 : f32 to vector<128x128xf32>
    %501 = arith.select %498, %499, %500 : vector<128x128xi1>, vector<128x128xf32>
    %cst_329 = arith.constant dense<0.000000e+00> : vector<64x128xf32>
    %502 = tpu.matmul %493, %501, %cst_329 {dimension_numbers = #tpu.dot_dimension_numbers<[1], [0], [0], [1], [0, 0, 1, 1], [], []>} : vector<64x128xf32>, vector<128x128xf32>, vector<64x128xf32> -> vector<64x128xf32>
    %503 = tpu.iota {dimensions = array<i32: 0>} : vector<128x128xi32>
    %504 = tpu.iota {dimensions = array<i32: 1>} : vector<128x128xi32>
    %c1_i32_330 = arith.constant 1 : i32
    %505 = vector.broadcast %c1_i32_330 : i32 to vector<128x128xi32>
    %506 = arith.addi %504, %505 : vector<128x128xi32>
    %507 = arith.cmpi eq, %503, %506 : vector<128x128xi32>
    %cst_331 = arith.constant 1.000000e+00 : f32
    %cst_332 = arith.constant 0.000000e+00 : f32
    %508 = vector.broadcast %cst_331 : f32 to vector<128x128xf32>
    %509 = vector.broadcast %cst_332 : f32 to vector<128x128xf32>
    %510 = arith.select %507, %508, %509 : vector<128x128xi1>, vector<128x128xf32>
    %cst_333 = arith.constant dense<0.000000e+00> : vector<64x128xf32>
    %511 = tpu.matmul %493, %510, %cst_333 {dimension_numbers = #tpu.dot_dimension_numbers<[1], [0], [0], [1], [0, 0, 1, 1], [], []>} : vector<64x128xf32>, vector<128x128xf32>, vector<64x128xf32> -> vector<64x128xf32>
    %cst_334 = arith.constant 0.000000e+00 : f32
    %512 = vector.broadcast %cst_334 : f32 to vector<64x128xf32>
    %cst_335 = arith.constant 0.000000e+00 : f32
    %513 = vector.broadcast %cst_335 : f32 to vector<64x128xf32>
    %c0_336 = arith.constant 0 : index
    %c0_337 = arith.constant 0 : index
    %c0_338 = arith.constant 0 : index
    %514 = vector.load %arg38[%c0_336, %c0_337, %c0_338] : memref<3x64x64xf32, #tpu.memory_space<vmem>>, vector<1x64x64xf32>
    %515 = vector.shape_cast %514 : vector<1x64x64xf32> to vector<64x64xf32>
    %cst_339 = arith.constant dense<0.000000e+00> : vector<64x128xf32>
    %516 = tpu.matmul %515, %502, %cst_339 {dimension_numbers = #tpu.dot_dimension_numbers<[1], [0], [0], [1], [0, 0, 1, 1], [], []>} : vector<64x64xf32>, vector<64x128xf32>, vector<64x128xf32> -> vector<64x128xf32>
    %517 = arith.addf %512, %516 : vector<64x128xf32>
    %c0_340 = arith.constant 0 : index
    %c0_341 = arith.constant 0 : index
    %c0_342 = arith.constant 0 : index
    %518 = vector.load %arg40[%c0_340, %c0_341, %c0_342] : memref<3x64x64xf32, #tpu.memory_space<vmem>>, vector<1x64x64xf32>
    %519 = vector.shape_cast %518 : vector<1x64x64xf32> to vector<64x64xf32>
    %cst_343 = arith.constant dense<0.000000e+00> : vector<64x128xf32>
    %520 = tpu.matmul %519, %502, %cst_343 {dimension_numbers = #tpu.dot_dimension_numbers<[1], [0], [0], [1], [0, 0, 1, 1], [], []>} : vector<64x64xf32>, vector<64x128xf32>, vector<64x128xf32> -> vector<64x128xf32>
    %521 = arith.addf %513, %520 : vector<64x128xf32>
    %c1_344 = arith.constant 1 : index
    %c0_345 = arith.constant 0 : index
    %c0_346 = arith.constant 0 : index
    %522 = vector.load %arg38[%c1_344, %c0_345, %c0_346] : memref<3x64x64xf32, #tpu.memory_space<vmem>>, vector<1x64x64xf32>
    %523 = vector.shape_cast %522 : vector<1x64x64xf32> to vector<64x64xf32>
    %cst_347 = arith.constant dense<0.000000e+00> : vector<64x128xf32>
    %524 = tpu.matmul %523, %493, %cst_347 {dimension_numbers = #tpu.dot_dimension_numbers<[1], [0], [0], [1], [0, 0, 1, 1], [], []>} : vector<64x64xf32>, vector<64x128xf32>, vector<64x128xf32> -> vector<64x128xf32>
    %525 = arith.addf %517, %524 : vector<64x128xf32>
    %c1_348 = arith.constant 1 : index
    %c0_349 = arith.constant 0 : index
    %c0_350 = arith.constant 0 : index
    %526 = vector.load %arg40[%c1_348, %c0_349, %c0_350] : memref<3x64x64xf32, #tpu.memory_space<vmem>>, vector<1x64x64xf32>
    %527 = vector.shape_cast %526 : vector<1x64x64xf32> to vector<64x64xf32>
    %cst_351 = arith.constant dense<0.000000e+00> : vector<64x128xf32>
    %528 = tpu.matmul %527, %493, %cst_351 {dimension_numbers = #tpu.dot_dimension_numbers<[1], [0], [0], [1], [0, 0, 1, 1], [], []>} : vector<64x64xf32>, vector<64x128xf32>, vector<64x128xf32> -> vector<64x128xf32>
    %529 = arith.addf %521, %528 : vector<64x128xf32>
    %c2_352 = arith.constant 2 : index
    %c0_353 = arith.constant 0 : index
    %c0_354 = arith.constant 0 : index
    %530 = vector.load %arg38[%c2_352, %c0_353, %c0_354] : memref<3x64x64xf32, #tpu.memory_space<vmem>>, vector<1x64x64xf32>
    %531 = vector.shape_cast %530 : vector<1x64x64xf32> to vector<64x64xf32>
    %cst_355 = arith.constant dense<0.000000e+00> : vector<64x128xf32>
    %532 = tpu.matmul %531, %511, %cst_355 {dimension_numbers = #tpu.dot_dimension_numbers<[1], [0], [0], [1], [0, 0, 1, 1], [], []>} : vector<64x64xf32>, vector<64x128xf32>, vector<64x128xf32> -> vector<64x128xf32>
    %533 = arith.addf %525, %532 : vector<64x128xf32>
    %c2_356 = arith.constant 2 : index
    %c0_357 = arith.constant 0 : index
    %c0_358 = arith.constant 0 : index
    %534 = vector.load %arg40[%c2_356, %c0_357, %c0_358] : memref<3x64x64xf32, #tpu.memory_space<vmem>>, vector<1x64x64xf32>
    %535 = vector.shape_cast %534 : vector<1x64x64xf32> to vector<64x64xf32>
    %cst_359 = arith.constant dense<0.000000e+00> : vector<64x128xf32>
    %536 = tpu.matmul %535, %511, %cst_359 {dimension_numbers = #tpu.dot_dimension_numbers<[1], [0], [0], [1], [0, 0, 1, 1], [], []>} : vector<64x64xf32>, vector<64x128xf32>, vector<64x128xf32> -> vector<64x128xf32>
    %537 = arith.addf %529, %536 : vector<64x128xf32>
    %c0_360 = arith.constant 0 : index
    %c0_361 = arith.constant 0 : index
    %538 = vector.load %arg39[%c0_360, %c0_361] : memref<64x1xf32, #tpu.memory_space<vmem>>, vector<64x1xf32>
    %539 = vector.broadcast %538 : vector<64x1xf32> to vector<64x128xf32>
    %540 = arith.addf %533, %539 : vector<64x128xf32>
    %c0_362 = arith.constant 0 : index
    %c0_363 = arith.constant 0 : index
    %541 = vector.load %arg41[%c0_362, %c0_363] : memref<64x1xf32, #tpu.memory_space<vmem>>, vector<64x1xf32>
    %542 = vector.broadcast %541 : vector<64x1xf32> to vector<64x128xf32>
    %543 = arith.addf %537, %542 : vector<64x128xf32>
    %544 = arith.negf %540 : vector<64x128xf32>
    %545 = math.exp %544 : vector<64x128xf32>
    %cst_364 = arith.constant 1.000000e+00 : f32
    %546 = vector.broadcast %cst_364 : f32 to vector<64x128xf32>
    %547 = arith.addf %546, %545 : vector<64x128xf32>
    %548 = arith.divf %546, %547 : vector<64x128xf32>
    %549 = arith.mulf %548, %543 : vector<64x128xf32>
    %cst_365 = arith.constant 1.000000e+00 : f32
    %550 = vector.broadcast %cst_365 : f32 to vector<64x128xf32>
    %551 = arith.subf %550, %548 : vector<64x128xf32>
    %552 = arith.mulf %551, %493 : vector<64x128xf32>
    %553 = arith.addf %549, %552 : vector<64x128xf32>
    %c0_366 = arith.constant 0 : index
    %c0_367 = arith.constant 0 : index
    %554 = vector.load %arg42[%c0_366, %c0_367] : memref<64x64xf32, #tpu.memory_space<vmem>>, vector<64x64xf32>
    %cst_368 = arith.constant dense<0.000000e+00> : vector<64x128xf32>
    %555 = tpu.matmul %554, %553, %cst_368 {dimension_numbers = #tpu.dot_dimension_numbers<[1], [0], [0], [1], [0, 0, 1, 1], [], []>} : vector<64x64xf32>, vector<64x128xf32>, vector<64x128xf32> -> vector<64x128xf32>
    %c0_369 = arith.constant 0 : index
    %c0_370 = arith.constant 0 : index
    %556 = vector.load %arg43[%c0_369, %c0_370] : memref<64x1xf32, #tpu.memory_space<vmem>>, vector<64x1xf32>
    %557 = vector.broadcast %556 : vector<64x1xf32> to vector<64x128xf32>
    %558 = arith.addf %555, %557 : vector<64x128xf32>
    %c0_371 = arith.constant 0 : index
    %c0_372 = arith.constant 0 : index
    %559 = vector.load %arg44[%c0_371, %c0_372] : memref<64x64xf32, #tpu.memory_space<vmem>>, vector<64x64xf32>
    %cst_373 = arith.constant dense<0.000000e+00> : vector<64x128xf32>
    %560 = tpu.matmul %559, %558, %cst_373 {dimension_numbers = #tpu.dot_dimension_numbers<[1], [0], [0], [1], [0, 0, 1, 1], [], []>} : vector<64x64xf32>, vector<64x128xf32>, vector<64x128xf32> -> vector<64x128xf32>
    %c0_374 = arith.constant 0 : index
    %c0_375 = arith.constant 0 : index
    %561 = vector.load %arg45[%c0_374, %c0_375] : memref<64x1xf32, #tpu.memory_space<vmem>>, vector<64x1xf32>
    %562 = vector.broadcast %561 : vector<64x1xf32> to vector<64x128xf32>
    %563 = arith.addf %560, %562 : vector<64x128xf32>
    %cst_376 = arith.constant 0.000000e+00 : f32
    %564 = vector.broadcast %cst_376 : f32 to vector<64x128xf32>
    %565 = arith.maximumf %563, %564 : vector<64x128xf32>
    %c0_377 = arith.constant 0 : index
    %c0_378 = arith.constant 0 : index
    %566 = vector.load %arg46[%c0_377, %c0_378] : memref<64x64xf32, #tpu.memory_space<vmem>>, vector<64x64xf32>
    %cst_379 = arith.constant dense<0.000000e+00> : vector<64x128xf32>
    %567 = tpu.matmul %566, %565, %cst_379 {dimension_numbers = #tpu.dot_dimension_numbers<[1], [0], [0], [1], [0, 0, 1, 1], [], []>} : vector<64x64xf32>, vector<64x128xf32>, vector<64x128xf32> -> vector<64x128xf32>
    %c0_380 = arith.constant 0 : index
    %c0_381 = arith.constant 0 : index
    %568 = vector.load %arg47[%c0_380, %c0_381] : memref<64x1xf32, #tpu.memory_space<vmem>>, vector<64x1xf32>
    %569 = vector.broadcast %568 : vector<64x1xf32> to vector<64x128xf32>
    %570 = arith.addf %567, %569 : vector<64x128xf32>
    %cst_382 = arith.constant 0.000000e+00 : f32
    %571 = vector.broadcast %cst_382 : f32 to vector<64x128xf32>
    %572 = arith.maximumf %570, %571 : vector<64x128xf32>
    %c0_383 = arith.constant 0 : index
    %c0_384 = arith.constant 0 : index
    %573 = vector.load %arg48[%c0_383, %c0_384] : memref<64x64xf32, #tpu.memory_space<vmem>>, vector<64x64xf32>
    %cst_385 = arith.constant dense<0.000000e+00> : vector<64x128xf32>
    %574 = tpu.matmul %573, %572, %cst_385 {dimension_numbers = #tpu.dot_dimension_numbers<[1], [0], [0], [1], [0, 0, 1, 1], [], []>} : vector<64x64xf32>, vector<64x128xf32>, vector<64x128xf32> -> vector<64x128xf32>
    %c0_386 = arith.constant 0 : index
    %c0_387 = arith.constant 0 : index
    %575 = vector.load %arg49[%c0_386, %c0_387] : memref<64x1xf32, #tpu.memory_space<vmem>>, vector<64x1xf32>
    %576 = vector.broadcast %575 : vector<64x1xf32> to vector<64x128xf32>
    %577 = arith.addf %574, %576 : vector<64x128xf32>
    %c0_388 = arith.constant 0 : index
    %c0_389 = arith.constant 0 : index
    %c0_390 = arith.constant 0 : index
    %578 = vector.load %arg50[%c0_388, %c0_389, %c0_390] : memref<1x64x128xf32, #tpu.memory_space<vmem>>, vector<1x64x128xf32>
    %579 = vector.shape_cast %578 : vector<1x64x128xf32> to vector<64x128xf32>
    %580 = vector.shape_cast %577 : vector<64x128xf32> to vector<1x64x128xf32>
    tpu.vector_store %arg50[%c0_388, %c0_389, %c0_390], %580 {strides = array<i32>} : memref<1x64x128xf32, #tpu.memory_space<vmem>>, vector<1x64x128xf32>,
    %581 = arith.negf %577 : vector<64x128xf32>
    %582 = math.exp %581 : vector<64x128xf32>
    %cst_391 = arith.constant 1.000000e+00 : f32
    %583 = vector.broadcast %cst_391 : f32 to vector<64x128xf32>
    %584 = arith.addf %583, %582 : vector<64x128xf32>
    %585 = arith.divf %583, %584 : vector<64x128xf32>
    %c0_392 = arith.constant 0 : index
    %c0_393 = arith.constant 0 : index
    %c0_394 = arith.constant 0 : index
    %586 = vector.load %arg51[%c0_392, %c0_393, %c0_394] : memref<1x64x128xf32, #tpu.memory_space<vmem>>, vector<1x64x128xf32>
    %587 = vector.shape_cast %586 : vector<1x64x128xf32> to vector<64x128xf32>
    %588 = vector.shape_cast %585 : vector<64x128xf32> to vector<1x64x128xf32>
    tpu.vector_store %arg51[%c0_392, %c0_393, %c0_394], %588 {strides = array<i32>} : memref<1x64x128xf32, #tpu.memory_space<vmem>>, vector<1x64x128xf32>,
    return
  }
  func.func @transform_0(%arg0: i32) -> (i32, i32, i32) {
    %c0_i32 = arith.constant 0 : i32
    %c0_i32_0 = arith.constant 0 : i32
    %c0_i32_1 = arith.constant 0 : i32
    return %arg0, %c0_i32, %c0_i32_0 : i32, i32, i32
  }
  func.func @transform_1(%arg0: i32) -> (i32, i32) {
    %c0_i32 = arith.constant 0 : i32
    %c0_i32_0 = arith.constant 0 : i32
    %c0_i32_1 = arith.constant 0 : i32
    return %c0_i32, %c0_i32_0 : i32, i32
  }
  func.func @transform_2(%arg0: i32) -> (i32, i32) {
    %c0_i32 = arith.constant 0 : i32
    %c0_i32_0 = arith.constant 0 : i32
    %c0_i32_1 = arith.constant 0 : i32
    return %c0_i32, %c0_i32_0 : i32, i32
  }
  func.func @transform_3(%arg0: i32) -> (i32, i32, i32) {
    %c0_i32 = arith.constant 0 : i32
    %c0_i32_0 = arith.constant 0 : i32
    %c0_i32_1 = arith.constant 0 : i32
    %c0_i32_2 = arith.constant 0 : i32
    return %c0_i32, %c0_i32_0, %c0_i32_1 : i32, i32, i32
  }
  func.func @transform_4(%arg0: i32) -> (i32, i32) {
    %c0_i32 = arith.constant 0 : i32
    %c0_i32_0 = arith.constant 0 : i32
    %c0_i32_1 = arith.constant 0 : i32
    return %c0_i32, %c0_i32_0 : i32, i32
  }
  func.func @transform_5(%arg0: i32) -> (i32, i32, i32) {
    %c0_i32 = arith.constant 0 : i32
    %c0_i32_0 = arith.constant 0 : i32
    %c0_i32_1 = arith.constant 0 : i32
    %c0_i32_2 = arith.constant 0 : i32
    return %c0_i32, %c0_i32_0, %c0_i32_1 : i32, i32, i32
  }
  func.func @transform_6(%arg0: i32) -> (i32, i32) {
    %c0_i32 = arith.constant 0 : i32
    %c0_i32_0 = arith.constant 0 : i32
    %c0_i32_1 = arith.constant 0 : i32
    return %c0_i32, %c0_i32_0 : i32, i32
  }
  func.func @transform_7(%arg0: i32) -> (i32, i32, i32) {
    %c0_i32 = arith.constant 0 : i32
    %c0_i32_0 = arith.constant 0 : i32
    %c0_i32_1 = arith.constant 0 : i32
    %c0_i32_2 = arith.constant 0 : i32
    return %c0_i32, %c0_i32_0, %c0_i32_1 : i32, i32, i32
  }
  func.func @transform_8(%arg0: i32) -> (i32, i32) {
    %c0_i32 = arith.constant 0 : i32
    %c0_i32_0 = arith.constant 0 : i32
    %c0_i32_1 = arith.constant 0 : i32
    return %c0_i32, %c0_i32_0 : i32, i32
  }
  func.func @transform_9(%arg0: i32) -> (i32, i32, i32) {
    %c0_i32 = arith.constant 0 : i32
    %c0_i32_0 = arith.constant 0 : i32
    %c0_i32_1 = arith.constant 0 : i32
    %c0_i32_2 = arith.constant 0 : i32
    return %c0_i32, %c0_i32_0, %c0_i32_1 : i32, i32, i32
  }
  func.func @transform_10(%arg0: i32) -> (i32, i32) {
    %c0_i32 = arith.constant 0 : i32
    %c0_i32_0 = arith.constant 0 : i32
    %c0_i32_1 = arith.constant 0 : i32
    return %c0_i32, %c0_i32_0 : i32, i32
  }
  func.func @transform_11(%arg0: i32) -> (i32, i32, i32) {
    %c0_i32 = arith.constant 0 : i32
    %c0_i32_0 = arith.constant 0 : i32
    %c0_i32_1 = arith.constant 0 : i32
    %c0_i32_2 = arith.constant 0 : i32
    return %c0_i32, %c0_i32_0, %c0_i32_1 : i32, i32, i32
  }
  func.func @transform_12(%arg0: i32) -> (i32, i32) {
    %c0_i32 = arith.constant 0 : i32
    %c0_i32_0 = arith.constant 0 : i32
    %c0_i32_1 = arith.constant 0 : i32
    return %c0_i32, %c0_i32_0 : i32, i32
  }
  func.func @transform_13(%arg0: i32) -> (i32, i32, i32) {
    %c0_i32 = arith.constant 0 : i32
    %c0_i32_0 = arith.constant 0 : i32
    %c0_i32_1 = arith.constant 0 : i32
    %c0_i32_2 = arith.constant 0 : i32
    return %c0_i32, %c0_i32_0, %c0_i32_1 : i32, i32, i32
  }
  func.func @transform_14(%arg0: i32) -> (i32, i32) {
    %c0_i32 = arith.constant 0 : i32
    %c0_i32_0 = arith.constant 0 : i32
    %c0_i32_1 = arith.constant 0 : i32
    return %c0_i32, %c0_i32_0 : i32, i32
  }
  func.func @transform_15(%arg0: i32) -> (i32, i32, i32) {
    %c0_i32 = arith.constant 0 : i32
    %c0_i32_0 = arith.constant 0 : i32
    %c0_i32_1 = arith.constant 0 : i32
    %c0_i32_2 = arith.constant 0 : i32
    return %c0_i32, %c0_i32_0, %c0_i32_1 : i32, i32, i32
  }
  func.func @transform_16(%arg0: i32) -> (i32, i32) {
    %c0_i32 = arith.constant 0 : i32
    %c0_i32_0 = arith.constant 0 : i32
    %c0_i32_1 = arith.constant 0 : i32
    return %c0_i32, %c0_i32_0 : i32, i32
  }
  func.func @transform_17(%arg0: i32) -> (i32, i32, i32) {
    %c0_i32 = arith.constant 0 : i32
    %c0_i32_0 = arith.constant 0 : i32
    %c0_i32_1 = arith.constant 0 : i32
    %c0_i32_2 = arith.constant 0 : i32
    return %c0_i32, %c0_i32_0, %c0_i32_1 : i32, i32, i32
  }
  func.func @transform_18(%arg0: i32) -> (i32, i32) {
    %c0_i32 = arith.constant 0 : i32
    %c0_i32_0 = arith.constant 0 : i32
    %c0_i32_1 = arith.constant 0 : i32
    return %c0_i32, %c0_i32_0 : i32, i32
  }
  func.func @transform_19(%arg0: i32) -> (i32, i32, i32) {
    %c0_i32 = arith.constant 0 : i32
    %c0_i32_0 = arith.constant 0 : i32
    %c0_i32_1 = arith.constant 0 : i32
    %c0_i32_2 = arith.constant 0 : i32
    return %c0_i32, %c0_i32_0, %c0_i32_1 : i32, i32, i32
  }
  func.func @transform_20(%arg0: i32) -> (i32, i32) {
    %c0_i32 = arith.constant 0 : i32
    %c0_i32_0 = arith.constant 0 : i32
    %c0_i32_1 = arith.constant 0 : i32
    return %c0_i32, %c0_i32_0 : i32, i32
  }
  func.func @transform_21(%arg0: i32) -> (i32, i32, i32) {
    %c0_i32 = arith.constant 0 : i32
    %c0_i32_0 = arith.constant 0 : i32
    %c0_i32_1 = arith.constant 0 : i32
    %c0_i32_2 = arith.constant 0 : i32
    return %c0_i32, %c0_i32_0, %c0_i32_1 : i32, i32, i32
  }
  func.func @transform_22(%arg0: i32) -> (i32, i32) {
    %c0_i32 = arith.constant 0 : i32
    %c0_i32_0 = arith.constant 0 : i32
    %c0_i32_1 = arith.constant 0 : i32
    return %c0_i32, %c0_i32_0 : i32, i32
  }
  func.func @transform_23(%arg0: i32) -> (i32, i32, i32) {
    %c0_i32 = arith.constant 0 : i32
    %c0_i32_0 = arith.constant 0 : i32
    %c0_i32_1 = arith.constant 0 : i32
    %c0_i32_2 = arith.constant 0 : i32
    return %c0_i32, %c0_i32_0, %c0_i32_1 : i32, i32, i32
  }
  func.func @transform_24(%arg0: i32) -> (i32, i32) {
    %c0_i32 = arith.constant 0 : i32
    %c0_i32_0 = arith.constant 0 : i32
    %c0_i32_1 = arith.constant 0 : i32
    return %c0_i32, %c0_i32_0 : i32, i32
  }
  func.func @transform_25(%arg0: i32) -> (i32, i32, i32) {
    %c0_i32 = arith.constant 0 : i32
    %c0_i32_0 = arith.constant 0 : i32
    %c0_i32_1 = arith.constant 0 : i32
    %c0_i32_2 = arith.constant 0 : i32
    return %c0_i32, %c0_i32_0, %c0_i32_1 : i32, i32, i32
  }
  func.func @transform_26(%arg0: i32) -> (i32, i32) {
    %c0_i32 = arith.constant 0 : i32
    %c0_i32_0 = arith.constant 0 : i32
    %c0_i32_1 = arith.constant 0 : i32
    return %c0_i32, %c0_i32_0 : i32, i32
  }
  func.func @transform_27(%arg0: i32) -> (i32, i32, i32) {
    %c0_i32 = arith.constant 0 : i32
    %c0_i32_0 = arith.constant 0 : i32
    %c0_i32_1 = arith.constant 0 : i32
    %c0_i32_2 = arith.constant 0 : i32
    return %c0_i32, %c0_i32_0, %c0_i32_1 : i32, i32, i32
  }
  func.func @transform_28(%arg0: i32) -> (i32, i32) {
    %c0_i32 = arith.constant 0 : i32
    %c0_i32_0 = arith.constant 0 : i32
    %c0_i32_1 = arith.constant 0 : i32
    return %c0_i32, %c0_i32_0 : i32, i32
  }
  func.func @transform_29(%arg0: i32) -> (i32, i32, i32) {
    %c0_i32 = arith.constant 0 : i32
    %c0_i32_0 = arith.constant 0 : i32
    %c0_i32_1 = arith.constant 0 : i32
    %c0_i32_2 = arith.constant 0 : i32
    return %c0_i32, %c0_i32_0, %c0_i32_1 : i32, i32, i32
  }
  func.func @transform_30(%arg0: i32) -> (i32, i32) {
    %c0_i32 = arith.constant 0 : i32
    %c0_i32_0 = arith.constant 0 : i32
    %c0_i32_1 = arith.constant 0 : i32
    return %c0_i32, %c0_i32_0 : i32, i32
  }
  func.func @transform_31(%arg0: i32) -> (i32, i32) {
    %c0_i32 = arith.constant 0 : i32
    %c0_i32_0 = arith.constant 0 : i32
    %c0_i32_1 = arith.constant 0 : i32
    return %c0_i32, %c0_i32_0 : i32, i32
  }
  func.func @transform_32(%arg0: i32) -> (i32, i32) {
    %c0_i32 = arith.constant 0 : i32
    %c0_i32_0 = arith.constant 0 : i32
    %c0_i32_1 = arith.constant 0 : i32
    return %c0_i32, %c0_i32_0 : i32, i32
  }
  func.func @transform_33(%arg0: i32) -> (i32, i32, i32) {
    %c0_i32 = arith.constant 0 : i32
    %c0_i32_0 = arith.constant 0 : i32
    %c0_i32_1 = arith.constant 0 : i32
    %c0_i32_2 = arith.constant 0 : i32
    return %c0_i32, %c0_i32_0, %c0_i32_1 : i32, i32, i32
  }
  func.func @transform_34(%arg0: i32) -> (i32, i32) {
    %c0_i32 = arith.constant 0 : i32
    %c0_i32_0 = arith.constant 0 : i32
    %c0_i32_1 = arith.constant 0 : i32
    return %c0_i32, %c0_i32_0 : i32, i32
  }
  func.func @transform_35(%arg0: i32) -> (i32, i32, i32) {
    %c0_i32 = arith.constant 0 : i32
    %c0_i32_0 = arith.constant 0 : i32
    %c0_i32_1 = arith.constant 0 : i32
    %c0_i32_2 = arith.constant 0 : i32
    return %c0_i32, %c0_i32_0, %c0_i32_1 : i32, i32, i32
  }
  func.func @transform_36(%arg0: i32) -> (i32, i32) {
    %c0_i32 = arith.constant 0 : i32
    %c0_i32_0 = arith.constant 0 : i32
    %c0_i32_1 = arith.constant 0 : i32
    return %c0_i32, %c0_i32_0 : i32, i32
  }
  func.func @transform_37(%arg0: i32) -> (i32, i32, i32) {
    %c0_i32 = arith.constant 0 : i32
    %c0_i32_0 = arith.constant 0 : i32
    %c0_i32_1 = arith.constant 0 : i32
    %c0_i32_2 = arith.constant 0 : i32
    return %c0_i32, %c0_i32_0, %c0_i32_1 : i32, i32, i32
  }
  func.func @transform_38(%arg0: i32) -> (i32, i32) {
    %c0_i32 = arith.constant 0 : i32
    %c0_i32_0 = arith.constant 0 : i32
    %c0_i32_1 = arith.constant 0 : i32
    return %c0_i32, %c0_i32_0 : i32, i32
  }
  func.func @transform_39(%arg0: i32) -> (i32, i32, i32) {
    %c0_i32 = arith.constant 0 : i32
    %c0_i32_0 = arith.constant 0 : i32
    %c0_i32_1 = arith.constant 0 : i32
    %c0_i32_2 = arith.constant 0 : i32
    return %c0_i32, %c0_i32_0, %c0_i32_1 : i32, i32, i32
  }
  func.func @transform_40(%arg0: i32) -> (i32, i32) {
    %c0_i32 = arith.constant 0 : i32
    %c0_i32_0 = arith.constant 0 : i32
    %c0_i32_1 = arith.constant 0 : i32
    return %c0_i32, %c0_i32_0 : i32, i32
  }
  func.func @transform_41(%arg0: i32) -> (i32, i32) {
    %c0_i32 = arith.constant 0 : i32
    %c0_i32_0 = arith.constant 0 : i32
    %c0_i32_1 = arith.constant 0 : i32
    return %c0_i32, %c0_i32_0 : i32, i32
  }
  func.func @transform_42(%arg0: i32) -> (i32, i32) {
    %c0_i32 = arith.constant 0 : i32
    %c0_i32_0 = arith.constant 0 : i32
    %c0_i32_1 = arith.constant 0 : i32
    return %c0_i32, %c0_i32_0 : i32, i32
  }
  func.func @transform_43(%arg0: i32) -> (i32, i32) {
    %c0_i32 = arith.constant 0 : i32
    %c0_i32_0 = arith.constant 0 : i32
    %c0_i32_1 = arith.constant 0 : i32
    return %c0_i32, %c0_i32_0 : i32, i32
  }
  func.func @transform_44(%arg0: i32) -> (i32, i32) {
    %c0_i32 = arith.constant 0 : i32
    %c0_i32_0 = arith.constant 0 : i32
    %c0_i32_1 = arith.constant 0 : i32
    return %c0_i32, %c0_i32_0 : i32, i32
  }
  func.func @transform_45(%arg0: i32) -> (i32, i32) {
    %c0_i32 = arith.constant 0 : i32
    %c0_i32_0 = arith.constant 0 : i32
    %c0_i32_1 = arith.constant 0 : i32
    return %c0_i32, %c0_i32_0 : i32, i32
  }
  func.func @transform_46(%arg0: i32) -> (i32, i32) {
    %c0_i32 = arith.constant 0 : i32
    %c0_i32_0 = arith.constant 0 : i32
    %c0_i32_1 = arith.constant 0 : i32
    return %c0_i32, %c0_i32_0 : i32, i32
  }
  func.func @transform_47(%arg0: i32) -> (i32, i32) {
    %c0_i32 = arith.constant 0 : i32
    %c0_i32_0 = arith.constant 0 : i32
    %c0_i32_1 = arith.constant 0 : i32
    return %c0_i32, %c0_i32_0 : i32, i32
  }
  func.func @transform_48(%arg0: i32) -> (i32, i32) {
    %c0_i32 = arith.constant 0 : i32
    %c0_i32_0 = arith.constant 0 : i32
    %c0_i32_1 = arith.constant 0 : i32
    return %c0_i32, %c0_i32_0 : i32, i32
  }
  func.func @transform_49(%arg0: i32) -> (i32, i32, i32) {
    %c0_i32 = arith.constant 0 : i32
    %c0_i32_0 = arith.constant 0 : i32
    %c0_i32_1 = arith.constant 0 : i32
    return %arg0, %c0_i32, %c0_i32_0 : i32, i32, i32
  }
  func.func @transform_50(%arg0: i32) -> (i32, i32, i32) {
    %c0_i32 = arith.constant 0 : i32
    %c0_i32_0 = arith.constant 0 : i32
    %c0_i32_1 = arith.constant 0 : i32
    return %arg0, %c0_i32, %c0_i32_0 : i32, i32, i32
  }
}

</mosaic_0001>

<bundles_post_ra>
// kernel: super_res.1
= control target key start
LH: loop header
LB: loop body
LE: loop exit
PB: predicated region body
PF: predicated region fallthrough
CT: control target
= control target key end

     0   :  { %s9501_s6 = smov 1   ;;  %s9502_s10 = smov 2   ;;  %s12640_s0 = inlined_call_operand.smem [shape: u32[51], index: -1, kind: input, shape index: {}] }
   0x1   :  { %s9574_s5 = sld [smem:[%s12640_s0]]   ;;  %s9503_s14 = smov 3  }
   0x2   :  { %s9579_s9 = sld [smem:[%s12640_s0 + %s9501_s6]]   ;;  %s9504_s18 = smov 4  }
   0x3   :  { %s9584_s13 = sld [smem:[%s12640_s0 + %s9502_s10]]   ;;  %s9505_s22 = smov 5  }
   0x4   :  { %s9589_s17 = sld [smem:[%s12640_s0 + %s9503_s14]]   ;;  %s9506_s26 = smov 6  }
   0x5   :  { %s9594_s21 = sld [smem:[%s12640_s0 + %s9504_s18]]   ;;  %s9507_s30 = smov 7  }
   0x6   :  { %s9599_s25 = sld [smem:[%s12640_s0 + %s9505_s22]]   ;;  %s9508_s4 = smov 8  }
   0x7   :  { %12780 = sst [smem:[#allocation27_spill]] %s9574_s5  ;;  %s9509_s10 = smov 9  }
   0x8   :  { %12781 = sst [smem:[#allocation28_spill]] %s9579_s9  ;;  %s9510_s15 = smov 10  }
   0x9   :  { %s9604_s29 = sld [smem:[%s12640_s0 + %s9506_s26]]   ;;  %s9511_s20 = smov 11  }
   0xa   :  { %12782 = sst [smem:[#allocation29_spill]] %s9589_s17  ;;  %s9512_s26 = smov 12  }
   0xb   :  { %s9609_s3 = sld [smem:[%s12640_s0 + %s9507_s30]]   ;;  %s9513_s1 = smov 13  }
   0xc   :  { %12783 = sst [smem:[#allocation30_spill]] %s9599_s25  ;;  %s9514_s7 = smov 14  }
   0xd   :  { %s9614_s8 = sld [smem:[%s12640_s0 + %s9508_s4]]   ;;  %s9516_s22 = smov 16  }
   0xe   :  { %s9619_s14 = sld [smem:[%s12640_s0 + %s9509_s10]]   ;;  %s9517_s28 = smov 17  }
   0xf   :  { %s9624_s19 = sld [smem:[%s12640_s0 + %s9510_s15]]   ;;  %s9515_s15 = smov 15  }
  0x10   :  { %s9629_s24 = sld [smem:[%s12640_s0 + %s9511_s20]]  }
  0x11   :  { %12784 = sst [smem:[#allocation31_spill]] %s9609_s3 }
  0x12   :  { %s9634_s30 = sld [smem:[%s12640_s0 + %s9512_s26]]  }
  0x13   :  { %12785 = sst [smem:[#allocation32_spill]] %s9614_s8 }
  0x14   :  { %12786 = sst [smem:[#allocation33_spill]] %s9619_s14 }
  0x15   :  { %12787 = sst [smem:[#allocation34_spill]] %s9624_s19 }
  0x16   :  { %12788 = sst [smem:[#allocation35_spill]] %s9629_s24 }
  0x17   :  { %s9639_s6 = sld [smem:[%s12640_s0 + %s9513_s1]]  }
  0x18   :  { %12789 = sst [smem:[#allocation36_spill]] %s9634_s30 }
  0x19   :  { %s9644_s12 = sld [smem:[%s12640_s0 + %s9514_s7]]   ;;  %s9518_s7 = smov 18  }
  0x1a   :  { %s9649_s20 = sld [smem:[%s12640_s0 + %s9515_s15]]   ;;  %s9519_s15 = smov 19  }
  0x1b   :  { %s9654_s27 = sld [smem:[%s12640_s0 + %s9516_s22]]   ;;  %s9520_s22 = smov 20  }
  0x1c   :  { %s9659_s4 = sld [smem:[%s12640_s0 + %s9517_s28]]   ;;  %s9521_s28 = smov 21  }
  0x1d   :  { %12790 = sst [smem:[#allocation37_spill]] %s9639_s6 }
  0x1e   :  { %s9664_s6 = sld [smem:[%s12640_s0 + %s9518_s7]]   ;;  %s9522_s7 = smov 22  }
  0x1f   :  { %12791 = sst [smem:[#allocation38_spill]] %s9644_s12 }
  0x20   :  { %12792 = sst [smem:[#allocation39_spill]] %s9649_s20 }
  0x21   :  { %12793 = sst [smem:[#allocation40_spill]] %s9654_s27 }
  0x22   :  { %12794 = sst [smem:[#allocation41_spill]] %s9659_s4 }
  0x23   :  { %s9669_s20 = sld [smem:[%s12640_s0 + %s9519_s15]]   ;;  %s9523_s15 = smov 23  }
  0x24   :  { %12795 = sst [smem:[#allocation42_spill]] %s9664_s6 }
  0x25   :  { %s9674_s24 = sld [smem:[%s12640_s0 + %s9520_s22]]   ;;  %s9524_s22 = smov 24  }
  0x26   :  { %s9679_s4 = sld [smem:[%s12640_s0 + %s9521_s28]]   ;;  %s9525_s28 = smov 25  }
  0x27   :  { %s9684_s14 = sld [smem:[%s12640_s0 + %s9522_s7]]   ;;  %s9526_s7 = smov 26  }
  0x28   :  { %s9689_s3 = sld [smem:[%s12640_s0 + %s9523_s15]]   ;;  %s9527_s15 = smov 27  }
  0x29   :  { %s9694_s25 = sld [smem:[%s12640_s0 + %s9524_s22]]   ;;  %s9528_s22 = smov 28  }
  0x2a   :  { %s9704_s17 = sld [smem:[%s12640_s0 + %s9526_s7]]   ;;  %s9530_s7 = smov 30  }
  0x2b   :  { %12796 = sst [smem:[#allocation43_spill]] %s9674_s24 }
  0x2c   :  { %12797 = sst [smem:[#allocation44_spill]] %s9679_s4 }
  0x2d   :  { %12798 = sst [smem:[#allocation45_spill]] %s9684_s14 }
  0x2e   :  { %12799 = sst [smem:[#allocation46_spill]] %s9689_s3 }
  0x2f   :  { %12800 = sst [smem:[#allocation47_spill]] %s9694_s25 }
  0x30   :  { %s9699_s4 = sld [smem:[%s12640_s0 + %s9525_s28]]   ;;  %s9529_s28 = smov 29  }
  0x31   :  { %12802 = sst [smem:[#allocation49_spill]] %s9704_s17 }
  0x32   :  { %s9709_s14 = sld [smem:[%s12640_s0 + %s9527_s15]]   ;;  %s9531_s15 = smov 31  }
  0x33   :  { %s9714_s25 = sld [smem:[%s12640_s0 + %s9528_s22]]   ;;  %s9532_s22 = smov 32  }
  0x34   :  { %s9719_s24 = sld [smem:[%s12640_s0 + %s9529_s28]]   ;;  %s9533_s28 = smov 33  }
  0x35   :  { %s9724_s17 = sld [smem:[%s12640_s0 + %s9530_s7]]   ;;  %s9534_s7 = smov 34  }
  0x36   :  { %12801 = sst [smem:[#allocation48_spill]] %s9699_s4 }
  0x37   :  { %s9729_s6 = sld [smem:[%s12640_s0 + %s9531_s15]]   ;;  %s9535_s15 = smov 35  }
  0x38   :  { %s9739_s27 = sld [smem:[%s12640_s0 + %s9533_s28]]   ;;  %s9537_s28 = smov 37  }
  0x39   :  { %12803 = sst [smem:[#allocation50_spill]] %s9714_s25 }
  0x3a   :  { %s9734_s25 = sld [smem:[%s12640_s0 + %s9532_s22]]   ;;  %s9536_s22 = smov 36  }
  0x3b   :  { %12804 = sst [smem:[#allocation51_spill]] %s9724_s17 }
  0x3c   :  { %s9744_s17 = sld [smem:[%s12640_s0 + %s9534_s7]]   ;;  %s9538_s7 = smov 38  }
  0x3d   :  { %12805 = sst [smem:[#allocation52_spill]] %s9729_s6 }
  0x3e   :  { %s9749_s6 = sld [smem:[%s12640_s0 + %s9535_s15]]   ;;  %s9539_s15 = smov 39  }
  0x3f   :  { %s9759_s12 = sld [smem:[%s12640_s0 + %s9537_s28]]   ;;  %s9541_s28 = smov 41  }
  0x40   :  { %12806 = sst [smem:[#allocation53_spill]] %s9734_s25 }
  0x41   :  { %s9754_s25 = sld [smem:[%s12640_s0 + %s9536_s22]]   ;;  %s9540_s22 = smov 40  }
  0x42   :  { %12807 = sst [smem:[#allocation54_spill]] %s9744_s17 }
  0x43   :  { %s9764_s17 = sld [smem:[%s12640_s0 + %s9538_s7]]   ;;  %s9542_s7 = smov 42  }
  0x44   :  { %12808 = sst [smem:[#allocation55_spill]] %s9749_s6 }
  0x45   :  { %s9769_s30 = sld [smem:[%s12640_s0 + %s9539_s15]]   ;;  %s9543_s15 = smov 43  }
  0x46   :  { %s9779_s19 = sld [smem:[%s12640_s0 + %s9541_s28]]   ;;  %s9545_s28 = smov 45  }
  0x47   :  { %12809 = sst [smem:[#allocation56_spill]] %s9754_s25 }
  0x48   :  { %s9774_s25 = sld [smem:[%s12640_s0 + %s9540_s22]]   ;;  %s9544_s22 = smov 44  }
  0x49   :  { %12810 = sst [smem:[#allocation57_spill]] %s9764_s17 }
  0x4a   :  { %s9784_s17 = sld [smem:[%s12640_s0 + %s9542_s7]]   ;;  %s9546_s7 = smov 46  }
  0x4b   :  { %s9789_s8 = sld [smem:[%s12640_s0 + %s9543_s15]]   ;;  %s9547_s15 = smov 47  }
  0x4c   :  { %12812 = sst [smem:[#allocation59_spill]] %s9779_s19 }
  0x4d   :  { %s9799_s19 = sld [smem:[%s12640_s0 + %s9545_s28]]   ;;  %s9549_s28 = smov 49  }
  0x4e   :  { %12811 = sst [smem:[#allocation58_spill]] %s9774_s25 }
  0x4f   :  { %s9794_s25 = sld [smem:[%s12640_s0 + %s9544_s22]]   ;;  %s9548_s22 = smov 48  }
  0x50   :  { %12813 = sst [smem:[#allocation60_spill]] %s9784_s17 }
  0x51   :  { %12814 = sst [smem:[#allocation61_spill]] %s9789_s8 }
  0x52   :  { %s9804_s17 = sld [smem:[%s12640_s0 + %s9546_s7]]   ;;  %s9550_s7 = smov 50  }
  0x53   :  { %12816 = sst [smem:[#allocation63_spill]] %s9799_s19 }
  0x54   :  { %s9809_s8 = sld [smem:[%s12640_s0 + %s9547_s15]]  }
  0x55   :  { %12815 = sst [smem:[#allocation62_spill]] %s9794_s25 }
  0x56   :  { %s9814_s25 = sld [smem:[%s12640_s0 + %s9548_s22]]  }
  0x57   :  { %s9819_s19 = sld [smem:[%s12640_s0 + %s9549_s28]]  }
  0x58   :  { %12817 = sst [smem:[#allocation64_spill]] %s9804_s17 }
  0x59   :  { %s9824_s17 = sld [smem:[%s12640_s0 + %s9550_s7]]  }
  0x5a   :  { %12818 = sst [smem:[#allocation65_spill]] %s9809_s8 }
  0x5d   :  { %12819 = sst [smem:[#allocation66_spill]] %s9819_s19 }
  0x5f   :  { %12820 = sst [smem:[#allocation67_spill]] %s9824_s17 }
  0x60   :  { %107 = vsyncpa [#allocation3], 0 }
  0x61   :  { %108 = vsyncpa [#allocation6], 0 }
  0x62   :  { %109 = vsyncpa [#allocation9], 0 }
  0x63   :  { %110 = vsyncpa [#allocation12], 0 }
  0x64   :  { %111 = vsyncpa [#allocation15], 0 }
  0x65   :  { %112 = vsyncpa [#allocation4], 0 }
  0x66   :  { %114 = vsyncpa [#allocation4 + $0x1], 0 }
  0x67   :  { %115 = vsyncpa [#allocation19], 0 }
  0x68   :  { %117 = vsyncpa [#allocation19 + $0x1], 0  ;;  %s9826_s15 = smov 0   ;;  %s9828_s16 = smov 0  }
  0x69   :  { %s9830_s18 = smov 0   ;;  %s9832_s22 = smov 0  }
  0x6a LB: > { %s12821_s9 = sld [smem:[#allocation28_spill]]  ;;  %s9847_s0 = sadd.s32 4294967295, %s9499_s22   ;;  %s9487_s15 = sphi %s9826_s15, %s13323_s15   ;;  %s9499_s22 = sphi %s9832_s22, %s13320_s22   ;;  %s9495_s18 = sphi %s9830_s18, %s13322_s18   ;;  %s9491_s16 = sphi %s9828_s16, %s13324_s16  }
  0x6b   : > { %s12822_s8 = sld [smem:[#allocation65_spill]]  ;;  %s8024_s23 = sadd.s32 4294967294, %s9499_s22  }
  0x6c   : > { %s12823_s6 = sld [smem:[#allocation55_spill]]  ;;  %s9851_s26 = sadd.s32 1, %s9499_s22  }
  0x6d   : > { %s12824_s4 = sld [smem:[#allocation48_spill]]  ;;  %s1164_s28 = sadd.s32 1, %s9495_s18 }
  0x6e   : > { %s12825_s3 = sld [smem:[#allocation46_spill]]  ;;  %s1161_s1 = ssub.s32 %s9499_s22, %s9851_s26 }
  0x6f   : > { %12826 = sst [smem:[#allocation68_spill]] %s9487_s15  ;;  %p1174_p0 = scmp.ne.s32.totalorder %s9495_s18, %s9491_s16 }
  0x70   : > { %12827 = sst [smem:[#allocation69_spill]] %s9495_s18  ;;  %p1162_p1 = scmp.eq.s32.totalorder %s1161_s1, 0 }
  0x71   : > { %12828 = sst [smem:[#allocation70_spill]] %s9499_s22  ;;  %p1175_p2 = scmp.eq.s32.totalorder %s9847_s0, 1 }
  0x72   : > { %12829 = sst [smem:[#allocation71_spill]] %s9851_s26  ;;  %p1180_p3 = scmp.ne.s32.totalorder %s9491_s16, %s9487_s15 }
  0x73   : > { %p1181_p4 = scmp.eq.s32.totalorder %s8024_s23, 1  ;;  %p9864_p5 = por %p1175_p2, %p1174_p0 }
  0x74   : > { %s9862_s2 = scalar_select %p1162_p1, %s9495_s18, %s1164_s28  }
  0x75   : > { %s12831_s7 = scalar_select %p9864_p5, 1, 0 }
  0x76   : > { %12830 = sst [smem:[#allocation72_spill]] %s9862_s2  ;;  %p9868_p6 = por %p1181_p4, %p1180_p3 }
  0x77   : > { %12832 = sst [smem:[#allocation73_spill]] %s12831_s7  ;;  %p8025_p7 = scmp.ge.s32.totalorder %s9499_s22, 1 }
  0x78   : > { %s12833_s10 = scalar_select %p9868_p6, 1, 0 }
  0x79   : > { %p1214_p8 = scmp.lt.s32.totalorder %s9499_s22, 3  ;;  %p8804_p9 = scmp.eq.s32.totalorder %s9847_s0, 0 }
  0x7a   : > { %12834 = sst [smem:[#allocation74_spill]] %s12833_s10  ;;  %s1302_s1 = sshll.u32 %s12825_s3, 4  ;;  %s1303_s1 = int_to_ptr.hbm [resolvable:$true] %s1302_s1 }
  0x7b   : > { %p9875_p10 = pnand %p8025_p7, %p1214_p8  ;;  %s1336_s23 = sshll.u32 %s9709_s14, 4  ;;  %s9889_s23 = int_to_ptr.hbm [resolvable:$true] %s1336_s23 }
  0x7c   : > { %s9551_s2 = smov [#allocation5]   ;;  %s9115_s26 = sshra.s32 %s1303_s1, 4  ;;  %s9116_s26 = int_to_ptr.hbm [resolvable:$true] %s9115_s26 }
  0x7d   : > { %p8769_p11 = pneg %p9875_p10  ;;  %s1304_s18 = sshll.u32 %s9551_s2, 4  ;;  %s1305_s18 = int_to_ptr.vmem [resolvable:$true] %s1304_s18 }
  0x7e   : > { %s9117_s10 = scalar_lea.hbm %s9116_s26, 96  ;;  %s9122_s22 = scalar_lea.hbm %s12825_s3, 96 }
  0x7f   : > { %p9885_p12 = pnand %p8804_p9, %p8769_p11  ;;  %p9118_p13 = scmp.ne.s32.totalorder %s9116_s26, %s9117_s10 }
  0x80   : > { %p9123_p3 = scmp.lt.s32.totalorder %s9116_s26, %s12825_s3  ;;  %p9124_p4 = scmp.lt.s32.totalorder %s9122_s22, %s9117_s10 }
  0x81   : > { %p9893_p0 = pneg %p9885_p12 }
  0x82   : > { %p9125_p7 = por %p9124_p4, %p9123_p3 }
  0x83   : > { %p9120_p1 = pnand %p9893_p0, %p9118_p13 }
  0x85   : > { %p9121_p2 = pneg %p9120_p1 }
  0x87   : > { %p9126_p8 = pnand %p9125_p7, %p9121_p2 }
  0x89   : > { %9129 = shalt.err (!%p9126_p8)
}
  0x8a   : > { %s9552_s2 = smov 128   ;;  %s9553_s17 = smov 8  }
  0x8b   : > { %8775 = dma.hbm_to_vmem [thread:$0]  (!%p9885_p12), %s1303_s1, 1536, %s1305_s18, [#allocation6], %s9552_s2, %s9552_s2, %s9553_s17  }
  0x8c   : > { %s9554_s7 = smov [#allocation8]   ;;  %s1376_s26 = sshll.u32 %s9739_s27, 4  ;;  %s9907_s26 = int_to_ptr.hbm [resolvable:$true] %s1376_s26 }
  0x8d   : > { %s1338_s19 = sshll.u32 %s9554_s7, 4  ;;  %s9145_s22 = sshra.s32 %s9889_s23, 4  ;;  %s1339_s19 = int_to_ptr.vmem [resolvable:$true] %s1338_s19  ;;  %s9146_s22 = int_to_ptr.hbm [resolvable:$true] %s9145_s22 }
  0x8e   : > { %s9147_s10 = scalar_lea.hbm %s9146_s22, 96  ;;  %s9152_s3 = scalar_lea.hbm %s9709_s14, 96 }
  0x8f   : > { %p9148_p11 = scmp.ne.s32.totalorder %s9146_s22, %s9147_s10  ;;  %p9153_p2 = scmp.lt.s32.totalorder %s9146_s22, %s9709_s14 }
  0x90   : > { %p9154_p3 = scmp.lt.s32.totalorder %s9152_s3, %s9147_s10 }
  0x91   : > { %p9150_p13 = pnand %p9148_p11, %p9893_p0 }
  0x92   : > { %p9155_p4 = por %p9154_p3, %p9153_p2 }
  0x93   : > { %p9151_p1 = pneg %p9150_p13 }
  0x95   : > { %p9156_p7 = pnand %p9155_p4, %p9151_p1 }
  0x97   : > { %9159 = shalt.err (!%p9156_p7)
}
  0x98   : > { %8781 = dma.hbm_to_vmem [thread:$0]  (!%p9885_p12), %s9889_s23, 1536, %s1339_s19, [#allocation9], %s9552_s2, %s9552_s2, %s9553_s17  }
  0x99   : > { %s1410_s18 = sshll.u32 %s9759_s12, 4  ;;  %s9555_s7 = smov [#allocation11]   ;;  %s9921_s18 = int_to_ptr.hbm [resolvable:$true] %s1410_s18 }
  0x9a   : > { %s1378_s1 = sshll.u32 %s9555_s7, 4  ;;  %s9175_s3 = sshra.s32 %s9907_s26, 4  ;;  %s1379_s1 = int_to_ptr.vmem [resolvable:$true] %s1378_s1  ;;  %s9176_s3 = int_to_ptr.hbm [resolvable:$true] %s9175_s3 }
  0x9b   : > { %s9177_s22 = scalar_lea.hbm %s9176_s3, 192  ;;  %s9182_s10 = scalar_lea.hbm %s9739_s27, 192 }
  0x9c   : > { %p9178_p8 = scmp.ne.s32.totalorder %s9176_s3, %s9177_s22  ;;  %p9183_p1 = scmp.lt.s32.totalorder %s9176_s3, %s9739_s27 }
  0x9d   : > { %p9184_p2 = scmp.lt.s32.totalorder %s9182_s10, %s9177_s22 }
  0x9e   : > { %p9180_p11 = pnand %p9178_p8, %p9893_p0 }
  0x9f   : > { %p9185_p3 = por %p9184_p2, %p9183_p1 }
  0xa0   : > { %p9181_p13 = pneg %p9180_p11 }
  0xa2   : > { %p9186_p4 = pnand %p9185_p3, %p9181_p13 }
  0xa4   : > { %9189 = shalt.err (!%p9186_p4)
}
  0xa5   : > { %8787 = dma.hbm_to_vmem [thread:$0]  (!%p9885_p12), %s9907_s26, 3072, %s1379_s1, [#allocation12], %s9552_s2, %s9552_s2, %s9553_s17  }
  0xa6   : > { %s9556_s19 = smov [#allocation14]   ;;  %s1279_s7 = sshll.u32 %s9669_s20, 4  ;;  %s9935_s7 = int_to_ptr.hbm [resolvable:$true] %s1279_s7 }
  0xa7   : > { %s1412_s23 = sshll.u32 %s9556_s19, 4  ;;  %s9205_s3 = sshra.s32 %s9921_s18, 4  ;;  %s1413_s23 = int_to_ptr.vmem [resolvable:$true] %s1412_s23  ;;  %s9206_s3 = int_to_ptr.hbm [resolvable:$true] %s9205_s3 }
  0xa8   : > { %s9207_s22 = scalar_lea.hbm %s9206_s3, 192  ;;  %s9212_s10 = scalar_lea.hbm %s9759_s12, 192 }
  0xa9   : > { %p9208_p7 = scmp.ne.s32.totalorder %s9206_s3, %s9207_s22  ;;  %p9213_p13 = scmp.lt.s32.totalorder %s9206_s3, %s9759_s12 }
  0xaa   : > { %p9214_p1 = scmp.lt.s32.totalorder %s9212_s10, %s9207_s22 }
  0xab   : > { %p9210_p8 = pnand %p9208_p7, %p9893_p0 }
  0xac   : > { %p9215_p2 = por %p9214_p1, %p9213_p13 }
  0xad   : > { %p9211_p11 = pneg %p9210_p8 }
  0xaf   : > { %p9216_p3 = pnand %p9215_p2, %p9211_p11 }
  0xb1   : > { %9219 = shalt.err (!%p9216_p3)
}
  0xb2   : > { %8793 = dma.hbm_to_vmem [thread:$0]  (!%p9885_p12), %s9921_s18, 3072, %s1413_s23, [#allocation15], %s9552_s2, %s9552_s2, %s9553_s17  }
  0xb3   : > { %s1319_s26 = sshll.u32 %s12824_s4, 4  ;;  %s9557_s1 = smov [#allocation2]   ;;  %s9949_s26 = int_to_ptr.hbm [resolvable:$true] %s1319_s26 }
  0xb4   : > { %s1281_s19 = sshll.u32 %s9557_s1, 4  ;;  %s9235_s3 = sshra.s32 %s9935_s7, 4  ;;  %s1282_s19 = int_to_ptr.vmem [resolvable:$true] %s1281_s19  ;;  %s9236_s3 = int_to_ptr.hbm [resolvable:$true] %s9235_s3 }
  0xb5   : > { %s9237_s22 = scalar_lea.hbm %s9236_s3, 96  ;;  %s9242_s10 = scalar_lea.hbm %s9669_s20, 96 }
  0xb6   : > { %p9238_p4 = scmp.ne.s32.totalorder %s9236_s3, %s9237_s22  ;;  %p9243_p11 = scmp.lt.s32.totalorder %s9236_s3, %s9669_s20 }
  0xb7   : > { %p9244_p13 = scmp.lt.s32.totalorder %s9242_s10, %s9237_s22 }
  0xb8   : > { %p9240_p7 = pnand %p9238_p4, %p9893_p0 }
  0xb9   : > { %p9245_p1 = por %p9244_p13, %p9243_p11 }
  0xba   : > { %p9241_p8 = pneg %p9240_p7 }
  0xbc   : > { %p9246_p2 = pnand %p9245_p1, %p9241_p8 }
  0xbe   : > { %9249 = shalt.err (!%p9246_p2)
}
  0xbf   : > { %8772 = dma.hbm_to_vmem [thread:$0]  (!%p9885_p12), %s9935_s7, 1536, %s1282_s19, [#allocation3], %s9552_s2, %s9552_s2, %s9553_s17  }
  0xc0   : > { %s9558_s18 = smov [#allocation7]   ;;  %s1353_s1 = sshll.u32 %s9719_s24, 4  ;;  %s9963_s1 = int_to_ptr.hbm [resolvable:$true] %s1353_s1 }
  0xc1   : > { %s1321_s23 = sshll.u32 %s9558_s18, 4  ;;  %s9265_s3 = sshra.s32 %s9949_s26, 4  ;;  %s1322_s23 = int_to_ptr.vmem [resolvable:$true] %s1321_s23  ;;  %s9266_s3 = int_to_ptr.hbm [resolvable:$true] %s9265_s3 }
  0xc2   : > { %s9267_s22 = scalar_lea.hbm %s9266_s3, 96  ;;  %s9272_s10 = scalar_lea.hbm %s12824_s4, 96 }
  0xc3   : > { %p9268_p3 = scmp.ne.s32.totalorder %s9266_s3, %s9267_s22  ;;  %p9273_p8 = scmp.lt.s32.totalorder %s9266_s3, %s12824_s4 }
  0xc4   : > { %p9274_p11 = scmp.lt.s32.totalorder %s9272_s10, %s9267_s22 }
  0xc5   : > { %p9270_p4 = pnand %p9268_p3, %p9893_p0 }
  0xc6   : > { %p9275_p13 = por %p9274_p11, %p9273_p8 }
  0xc7   : > { %p9271_p7 = pneg %p9270_p4 }
  0xc9   : > { %p9276_p1 = pnand %p9275_p13, %p9271_p7 }
  0xcb   : > { %9279 = shalt.err (!%p9276_p1)
}
  0xcc   : > { %8778 = dma.hbm_to_vmem [thread:$0]  (!%p9885_p12), %s9949_s26, 1536, %s1322_s23, [#allocation6], %s9552_s2, %s9552_s2, %s9553_s17  }
  0xcd   : > { %s1393_s7 = sshll.u32 %s12823_s6, 4  ;;  %s9559_s19 = smov [#allocation10]   ;;  %s9977_s7 = int_to_ptr.hbm [resolvable:$true] %s1393_s7 }
  0xce   : > { %s1355_s18 = sshll.u32 %s9559_s19, 4  ;;  %s9295_s3 = sshra.s32 %s9963_s1, 4  ;;  %s1356_s18 = int_to_ptr.vmem [resolvable:$true] %s1355_s18  ;;  %s9296_s3 = int_to_ptr.hbm [resolvable:$true] %s9295_s3 }
  0xcf   : > { %s9297_s22 = scalar_lea.hbm %s9296_s3, 96  ;;  %s9302_s10 = scalar_lea.hbm %s9719_s24, 96 }
  0xd0   : > { %p9298_p2 = scmp.ne.s32.totalorder %s9296_s3, %s9297_s22  ;;  %p9303_p7 = scmp.lt.s32.totalorder %s9296_s3, %s9719_s24 }
  0xd1   : > { %p9304_p8 = scmp.lt.s32.totalorder %s9302_s10, %s9297_s22 }
  0xd2   : > { %p9300_p3 = pnand %p9298_p2, %p9893_p0 }
  0xd3   : > { %p9305_p11 = por %p9304_p8, %p9303_p7 }
  0xd4   : > { %p9301_p4 = pneg %p9300_p3 }
  0xd6   : > { %p9306_p13 = pnand %p9305_p11, %p9301_p4 }
  0xd8   : > { %9309 = shalt.err (!%p9306_p13)
}
  0xd9   : > { %8784 = dma.hbm_to_vmem [thread:$0]  (!%p9885_p12), %s9963_s1, 1536, %s1356_s18, [#allocation9], %s9552_s2, %s9552_s2, %s9553_s17  }
  0xda   : > { %s9560_s26 = smov [#allocation13]   ;;  %s1427_s19 = sshll.u32 %s9769_s30, 4  ;;  %s1428_s19 = int_to_ptr.hbm [resolvable:$true] %s1427_s19 }
  0xdb   : > { %s1395_s23 = sshll.u32 %s9560_s26, 4  ;;  %s9325_s3 = sshra.s32 %s9977_s7, 4  ;;  %s1396_s23 = int_to_ptr.vmem [resolvable:$true] %s1395_s23  ;;  %s9326_s3 = int_to_ptr.hbm [resolvable:$true] %s9325_s3 }
  0xdc   : > { %s9327_s22 = scalar_lea.hbm %s9326_s3, 192  ;;  %s9332_s10 = scalar_lea.hbm %s12823_s6, 192 }
  0xdd   : > { %p9328_p1 = scmp.ne.s32.totalorder %s9326_s3, %s9327_s22  ;;  %p9333_p4 = scmp.lt.s32.totalorder %s9326_s3, %s12823_s6 }
  0xde   : > { %p9334_p7 = scmp.lt.s32.totalorder %s9332_s10, %s9327_s22 }
  0xdf   : > { %p9330_p2 = pnand %p9328_p1, %p9893_p0 }
  0xe0   : > { %p9335_p8 = por %p9334_p7, %p9333_p4 }
  0xe1   : > { %p9331_p3 = pneg %p9330_p2 }
  0xe3   : > { %p9336_p11 = pnand %p9335_p8, %p9331_p3 }
  0xe5   : > { %9339 = shalt.err (!%p9336_p11)
}
  0xe6   : > { %8790 = dma.hbm_to_vmem [thread:$0]  (!%p9885_p12), %s9977_s7, 3072, %s1396_s23, [#allocation12], %s9552_s2, %s9552_s2, %s9553_s17  }
  0xe7   : > { %s9561_s1 = smov [#allocation16]   ;;  %s9355_s26 = sshra.s32 %s1428_s19, 4  ;;  %s9356_s26 = int_to_ptr.hbm [resolvable:$true] %s9355_s26 }
  0xe8   : > { %s1429_s18 = sshll.u32 %s9561_s1, 4  ;;  %s9357_s3 = scalar_lea.hbm %s9356_s26, 192  ;;  %s1430_s18 = int_to_ptr.vmem [resolvable:$true] %s1429_s18 }
  0xe9   : > { %p9358_p13 = scmp.ne.s32.totalorder %s9356_s26, %s9357_s3  ;;  %s9362_s22 = scalar_lea.hbm %s9769_s30, 192 }
  0xea   : > { %p9363_p3 = scmp.lt.s32.totalorder %s9356_s26, %s9769_s30  ;;  %p9364_p4 = scmp.lt.s32.totalorder %s9362_s22, %s9357_s3 }
  0xeb   : > { %p9360_p1 = pnand %p9358_p13, %p9893_p0 }
  0xec   : > { %p9365_p7 = por %p9364_p4, %p9363_p3 }
  0xed   : > { %p9361_p2 = pneg %p9360_p1 }
  0xef   : > { %p9366_p8 = pnand %p9365_p7, %p9361_p2 }
  0xf1   : > { %9369 = shalt.err (!%p9366_p8)
}
  0xf2   : > { %8796 = dma.hbm_to_vmem [thread:$0]  (!%p9885_p12), %s1428_s19, 3072, %s1430_s18, [#allocation15], %s9552_s2, %s9552_s2, %s9553_s17  }
  0xf3   : > { %1480 = sbr.rel (%p9875_p10) target bundleno = 4891 (0x131b), region = 216 }
  0xf8   : > { %9458 = dma.done.wait (%p8804_p9), [#allocation3], 1536  }
  0xf9   : > { %9460 = vsyncadd (%p8804_p9), [#allocation3], 4294965760 }
  0xfa   : > { %9462 = dma.done.wait (%p8804_p9), [#allocation6], 3072  }
  0xfb   : > { %9464 = vsyncadd (%p8804_p9), [#allocation6], 4294964224 }
  0xfc   : > { %9466 = dma.done.wait (%p8804_p9), [#allocation9], 3072  }
  0xfd   : > { %9468 = vsyncadd (%p8804_p9), [#allocation9], 4294964224 }
  0xfe   : > { %9470 = dma.done.wait (%p8804_p9), [#allocation12], 6144  }
  0xff   : > { %9472 = vsyncadd (%p8804_p9), [#allocation12], 4294961152 }
 0x100   : > { %9474 = dma.done.wait (%p8804_p9), [#allocation15], 6144  }
 0x101   : > { %9476 = vsyncadd (%p8804_p9), [#allocation15], 4294961152  ;;  %s12838_s5 = sld [smem:[#allocation27_spill]]  ;;  %p1644_p10 = scmp.lt.s32.totalorder %s9847_s0, 1  ;;  %v9562_v0 = vmov 0   ;;  %v1658_v1 = vld [vmem:[%s9584_s13 + $0x18] sm:$0xff]  ;;  %v1721_v42 = vlaneseq }
 0x102   : > { %8921 = vset.pattern.permute.xlu1 %v9562_v0  ;;  %8920 = vset.pattern.permute.xlu0 %v9562_v0  ;;  %v1656_v2 = vld [vmem:[%s9584_s13 + $0x8] sm:$0xff]  ;;  %v1651_v5 = vld [vmem:[%s12821_s9] sm:$0xff]  ;;  %vm1679_vm0 = vcmask 130048   ;;  %v1657_v7 = vld [vmem:[%s9584_s13 + $0x10] sm:$0xff]  ;;  %s12839_s28 = sld [smem:[#allocation32_spill]]  ;;  %v12738_v54 = vmov 1.0  }
 0x103   : > { %s1645_s17 = scalar_select %p1644_p10, %s9847_s0, 1  ;;  %8922 = vset.pattern.permute.xlu2 %v9562_v0  ;;  %1676 = vperm.xlu1 %8921, %v1658_v1   ;;  %v2099_v6 = vld [vmem:[%s9594_s21] sm:$0xff]  ;;  %v1652_v9 = vld [vmem:[%s12821_s9 + $0x8] sm:$0xff]  ;;  %v2101_v11 = vld [vmem:[%s9594_s21 + $0x10] sm:$0xff]  ;;  %v10079_v43 = vshrl.u32 %v1721_v42, 7  ;;  %v10081_v44 = vand.u32 127, %v1721_v42 }
 0x104   : > { %1666 = vperm.xlu0 %8920, %v1656_v2   ;;  %2105 = vperm.xlu2 %8922, %v2099_v6   ;;  %v1655_v8 = vld [vmem:[%s9584_s13] sm:$0xff]  ;;  %v2100_v10 = vld [vmem:[%s9594_s21 + $0x8] sm:$0xff]  ;;  %v2102_v12 = vld [vmem:[%s9594_s21 + $0x18] sm:$0xff]  ;;  %s12840_s2 = sld [smem:[#allocation34_spill]]  ;;  %v12858_v57 = vmov 0  ;;  %vm12706_vm7 = vcmask 261120  }
 0x105   : > { %s8718_s15 = sshll.u32 %s1645_s17, 4  ;;  %v1653_v13 = vld [vmem:[%s12821_s9 + $0x10] sm:$0xff]  ;;  %v2127_v14 = vld [vmem:[%s9604_s29] sm:$0xff]  ;;  %v2128_v15 = vld [vmem:[%s9604_s29 + $0x8] sm:$0xff]  ;;  %s12841_s7 = sld [smem:[#allocation36_spill]]  ;;  %v10085_v46 = vadd.s32 24, %v10079_v43 }
 0x106   : > { %v2129_v16 = vld [vmem:[%s9604_s29 + $0x10] sm:$0xff]  ;;  %v1654_v17 = vld [vmem:[%s12821_s9 + $0x18] sm:$0xff]  ;;  %s12842_s23 = sld [smem:[#allocation38_spill]]  ;;  %v10088_v47 = vadd.s32 4294967295, %v10081_v44  ;;  %v10091_v48 = vadd.s32 16, %v10079_v43  ;;  %v10094_v49 = vadd.s32 8, %v10079_v43 }
 0x107   : > { %s1648_s11 = scalar_lea.vmem %s12838_s5, %s8718_s15  ;;  %v2130_v18 = vld [vmem:[%s9604_s29 + $0x18] sm:$0xff]  ;;  %s12843_s19 = sld [smem:[#allocation40_spill]]  ;;  %12846 = vst [vmem:[#allocation75_spill] sm:$0xff] %v10085_v46  ;;  %v5514_v50 = vld [vmem:[#allocation11 + $0x50] sm:$0xff] }
 0x108   : > { %v1650_v3 = vld [vmem:[%s1648_s11 + $0x8] sm:$0xff]  ;;  %v1649_v4 = vld [vmem:[%s1648_s11] sm:$0xff]  ;;  %v2620_v19 = vld [vmem:[%s12839_s28 + $0x18] sm:$0xff]  ;;  %s12844_s10 = sld [smem:[#allocation42_spill]]  ;;  %12847 = vst [vmem:[#allocation76_spill] sm:$0xff] %v10091_v48  ;;  %vm10098_vm1 = vcmp.eq.s32.totalorder %v10085_v46, %v10088_v47  ;;  %vm10104_vm2 = vcmp.eq.s32.totalorder %v10091_v48, %v10088_v47  ;;  %vm10118_vm3 = vcmp.eq.s32.totalorder %v10094_v49, %v10088_v47  ;;  %vm10137_vm4 = vcmp.eq.s32.totalorder %v10079_v43, %v10088_v47 }
 0x109   : > { %1706 = vmatpush.msra.mxu0 %v1650_v3  ;;  %v2619_v20 = vld [vmem:[%s12839_s28 + $0x10] sm:$0xff]  ;;  %v2618_v21 = vld [vmem:[%s12839_s28 + $0x8] sm:$0xff]  ;;  %v2617_v22 = vld [vmem:[%s12839_s28] sm:$0xff]  ;;  %s12845_s1 = sld [smem:[#allocation43_spill]]  ;;  %12848 = vst [vmem:[#allocation77_spill] sm:$0xff] %v10094_v49  ;;  %8054 = vmatpush.msk.msra.mxu1 %vm10098_vm1, %v12738_v54  ;;  %v12859_v57 = vsel %vm10137_vm4, 4294967295, %v12858_v57 }
 0x10a   : > { %v2648_v23 = vld [vmem:[%s12840_s2 + $0x18] sm:$0xff]  ;;  %v2647_v24 = vld [vmem:[%s12840_s2 + $0x10] sm:$0xff]  ;;  %v2646_v25 = vld [vmem:[%s12840_s2 + $0x8] sm:$0xff]  ;;  %s12853_s18 = sld [smem:[#allocation45_spill]]  ;;  %8721 = vmatpush.msk.msra.mxu2 %vm10098_vm1, %v12738_v54 }
 0x10b   : > { %1707 = vmatpush.msra.mxu0 %v1649_v4  ;;  %1661 = vperm.xlu1 %8921, %v1655_v8   ;;  %v2645_v26 = vld [vmem:[%s12840_s2] sm:$0xff]  ;;  %v2770_v28 = vld [vmem:[%s12841_s7 + $0x8] sm:$0xff]  ;;  %v2771_v29 = vld [vmem:[%s12841_s7 + $0x10] sm:$0xff]  ;;  %s12857_s3 = sld [smem:[#allocation47_spill]]  ;;  %v10157_v4 = vadd.s32 1, %v10081_v44 }
 0x10c   : > { %8050 = vmatmul.msk.f32.vlgmr.msra.gmra.mxu0 %vm1679_vm0, %v1651_v5  ;;  %1671 = vperm.xlu0 %8920, %v1657_v7   ;;  %v2769_v27 = vld [vmem:[%s12841_s7] sm:$0xff]  ;;  %v2772_v30 = vld [vmem:[%s12841_s7 + $0x18] sm:$0xff]  ;;  %v3360_v32 = vld [vmem:[%s12842_s23 + $0x8] sm:$0xff]  ;;  %s12860_s22 = sld [smem:[#allocation49_spill]] }
 0x10d   : > { %2110 = vperm.xlu2 %8922, %v2100_v10   ;;  %v3359_v31 = vld [vmem:[%s12842_s23] sm:$0xff]  ;;  %v3361_v33 = vld [vmem:[%s12842_s23 + $0x10] sm:$0xff]  ;;  %v3362_v34 = vld [vmem:[%s12842_s23 + $0x18] sm:$0xff]  ;;  %8055 = vmatpush.msk.msra.mxu1 %vm10104_vm2, %v12738_v54  ;;  %vm10163_vm5 = vcmp.eq.s32.totalorder %v10085_v46, %v10157_v4  ;;  %s12864_s15 = sld [smem:[#allocation50_spill]]  ;;  %vm10172_vm6 = vcmp.eq.s32.totalorder %v10091_v48, %v10157_v4  ;;  %vm10182_vm8 = vcmp.eq.s32.totalorder %v10094_v49, %v10157_v4 }
 0x10e   : > { %v3387_v35 = vld [vmem:[%s12843_s19] sm:$0xff]  ;;  %v3388_v36 = vld [vmem:[%s12843_s19 + $0x8] sm:$0xff]  ;;  %v3389_v37 = vld [vmem:[%s12843_s19 + $0x10] sm:$0xff]  ;;  %8722 = vmatpush.msk.msra.mxu2 %vm10104_vm2, %v12738_v54  ;;  %vm10193_vm9 = vcmp.eq.s32.totalorder %v10079_v43, %v10157_v4 }
 0x10f   : > { %v3390_v38 = vld [vmem:[%s12843_s19 + $0x18] sm:$0xff]  ;;  %v3877_v40 = vld [vmem:[%s12844_s10 + $0x10] sm:$0xff]  ;;  %v3876_v41 = vld [vmem:[%s12844_s10 + $0x8] sm:$0xff]  ;;  %8056 = vmatpush.msk.msra.mxu1 %vm10118_vm3, %v12738_v54 }
 0x110   : > { %v3878_v39 = vld [vmem:[%s12844_s10 + $0x18] sm:$0xff]  ;;  %v3875_v45 = vld [vmem:[%s12844_s10] sm:$0xff]  ;;  %v3905_v53 = vld [vmem:[%s12845_s1 + $0x10] sm:$0xff]  ;;  %s12854_s26 = smov %s12853_s18  ;;  %8723 = vmatpush.msk.msra.mxu2 %vm10118_vm3, %v12738_v54 }
 0x111   : > { %v3906_v52 = vld [vmem:[%s12845_s1 + $0x18] sm:$0xff]  ;;  %v3904_v56 = vld [vmem:[%s12845_s1 + $0x8] sm:$0xff]  ;;  %8057 = vmatpush.msk.msra.mxu1 %vm10137_vm4, %v12738_v54  ;;  %v3903_v58 = vld [vmem:[%s12845_s1] sm:$0xff] }
 0x112   : > { %8724 = vmatpush.msk.msra.mxu2 %vm10137_vm4, %v12738_v54  ;;  %v4027_v59 = vld [vmem:[%s12853_s18] sm:$0xff]  ;;  %v4028_v60 = vld [vmem:[%s12854_s26 + $0x8] sm:$0xff]  ;;  %s12861_s17 = smov %s12860_s22  ;;  %v4029_v61 = vld [vmem:[%s12854_s26 + $0x10] sm:$0xff]  ;;  %s12872_s18 = sld [smem:[#allocation51_spill]] }
 0x113   : > { %2120 = vperm.xlu1 %8921, %v2102_v12   ;;  %v4030_v62 = vld [vmem:[%s12854_s26 + $0x18] sm:$0xff]  ;;  %v4624_v63 = vld [vmem:[%s12857_s3] sm:$0xff]  ;;  %v4625_v0 = vld [vmem:[%s12857_s3 + $0x8] sm:$0xff]  ;;  %s12865_s11 = smov %s12864_s15 }
 0x114   : > { %8051 = vmatmul.msk.f32.gmra.mxu0 %vm1679_vm0, %v1652_v9  ;;  %2115 = vperm.xlu0 %8920, %v2101_v11   ;;  %v4626_v1 = vld [vmem:[%s12857_s3 + $0x10] sm:$0xff]  ;;  %v4627_v3 = vld [vmem:[%s12857_s3 + $0x18] sm:$0xff]  ;;  %v4652_v5 = vld [vmem:[%s12860_s22] sm:$0xff]  ;;  %s12874_s22 = sld [smem:[#allocation53_spill]] }
 0x115   : > { %2133 = vperm.xlu2 %8922, %v2127_v14   ;;  %v4653_v6 = vld [vmem:[%s12861_s17 + $0x8] sm:$0xff]  ;;  %8062 = vmatpush.msk.msrb.mxu2 %vm10163_vm5, %v12738_v54  ;;  %v4654_v11 = vld [vmem:[%s12861_s17 + $0x10] sm:$0xff]  ;;  %v12870_v14 = vmov 0 }
 0x116   : > { %v12871_v14 = vsel %vm10193_vm9, 4294967295, %v12870_v14  ;;  %v5795_v7 = vld [vmem:[#allocation11 + $0xa8] sm:$0xff]  ;;  %v5653_v8 = vld [vmem:[#allocation13 + $0x50] sm:$0xff] }
 0x117   : > { %8063 = vmatpush.msk.msrb.mxu2 %vm10172_vm6, %v12738_v54  ;;  %v5501_v12 = vld [vmem:[#allocation11 + $0x30] sm:$0xff] }
 0x118   : > { %s12873_s1 = smov %s12872_s18 }
 0x119   : > { %8064 = vmatpush.msk.msrb.mxu2 %vm10182_vm8, %v12738_v54 }
 0x11a   : > { %s12875_s2 = smov %s12874_s22 }
 0x11b   : > { %2143 = vperm.xlu1 %8921, %v2129_v16   ;;  %v5147_v16 = vld [vmem:[%s12864_s15 + $0x18] sm:$0xff]  ;;  %8065 = vmatpush.msk.msrb.mxu2 %vm10193_vm9, %v12738_v54  ;;  %s12876_s15 = sld [smem:[#allocation54_spill]] }
 0x11c   : > { %8052 = vmatmul.msk.f32.gmra.mxu0 %vm1679_vm0, %v1653_v13  ;;  %2138 = vperm.xlu0 %8920, %v2128_v15   ;;  %v4655_v15 = vld [vmem:[%s12861_s17 + $0x18] sm:$0xff] }
 0x11d   : > { %2148 = vperm.xlu2 %8922, %v2130_v18  }
 0x123   : > { %2633 = vperm.xlu1 %8921, %v2619_v20  }
 0x124   : > { %8053 = vmatmul.msk.f32.gmra.mxu0 %vm1679_vm0, %v1654_v17  ;;  %2638 = vperm.xlu0 %8920, %v2620_v19   ;;  %v5146_v19 = vld [vmem:[%s12865_s11 + $0x10] sm:$0xff] }
 0x125   : > { %2628 = vperm.xlu2 %8922, %v2618_v21   ;;  %v5145_v21 = vld [vmem:[%s12865_s11 + $0x8] sm:$0xff] }
 0x12b   : > { %2666 = vperm.xlu1 %8921, %v2648_v23  }
 0x12c   : > { %2623 = vperm.xlu0 %8920, %v2617_v22   ;;  %v5144_v22 = vld [vmem:[%s12865_s11] sm:$0xff] }
 0x12d   : > { %2661 = vperm.xlu2 %8922, %v2647_v24  }
 0x133   : > { %2651 = vperm.xlu1 %8921, %v2645_v26  }
 0x134   : > { %2656 = vperm.xlu0 %8920, %v2646_v25   ;;  %v5175_v25 = vld [vmem:[%s12872_s18 + $0x18] sm:$0xff]  ;;  %s12878_s18 = sld [smem:[#allocation56_spill]] }
 0x135   : > { %2775 = vperm.xlu2 %8922, %v2769_v27   ;;  %v5174_v27 = vld [vmem:[%s12873_s1 + $0x10] sm:$0xff] }
 0x13a   : > { %s12879_s3 = smov %s12878_s18 }
 0x13b   : > { %2785 = vperm.xlu1 %8921, %v2771_v29  }
 0x13c   : > { %2780 = vperm.xlu0 %8920, %v2770_v28   ;;  %v5173_v28 = vld [vmem:[%s12873_s1 + $0x8] sm:$0xff] }
 0x13d   : > { %2790 = vperm.xlu2 %8922, %v2772_v30  }
 0x143   : > { %3370 = vperm.xlu1 %8921, %v3360_v32   ;;  %v5300_v32 = vld [vmem:[%s12874_s22] sm:$0xff]  ;;  %s12880_s22 = sld [smem:[#allocation57_spill]] }
 0x144   : > { %3365 = vperm.xlu0 %8920, %v3359_v31   ;;  %v5172_v31 = vld [vmem:[%s12873_s1] sm:$0xff]  ;;  %s12877_s1 = smov %s12876_s15 }
 0x145   : > { %3375 = vperm.xlu2 %8922, %v3361_v33   ;;  %v5301_v33 = vld [vmem:[%s12875_s2 + $0x8] sm:$0xff]  ;;  %v5955_v42 = vld [vmem:[%s12877_s1 + $0x10] sm:$0xff] }
 0x14b   : > { %3393 = vperm.xlu1 %8921, %v3387_v35   ;;  %v5303_v35 = vld [vmem:[%s12875_s2 + $0x18] sm:$0xff] }
 0x14c   : > { %3380 = vperm.xlu0 %8920, %v3362_v34   ;;  %v5302_v34 = vld [vmem:[%s12875_s2 + $0x10] sm:$0xff] }
 0x14d   : > { %3398 = vperm.xlu2 %8922, %v3388_v36   ;;  %v5304_v36 = vld [vmem:[%s12875_s2 + $0x20] sm:$0xff] }
 0x153   : > { %3408 = vperm.xlu1 %8921, %v3390_v38   ;;  %v5306_v38 = vld [vmem:[%s12875_s2 + $0x30] sm:$0xff] }
 0x154   : > { %3403 = vperm.xlu0 %8920, %v3389_v37   ;;  %v5305_v37 = vld [vmem:[%s12875_s2 + $0x28] sm:$0xff] }
 0x155   : > { %3896 = vperm.xlu2 %8922, %v3878_v39   ;;  %v5307_v39 = vld [vmem:[%s12875_s2 + $0x38] sm:$0xff]  ;;  %s12881_s2 = smov %s12880_s22 }
 0x15b   : > { %3886 = vperm.xlu1 %8921, %v3876_v41   ;;  %v5954_v41 = vld [vmem:[%s12877_s1 + $0x8] sm:$0xff] }
 0x15c   : > { %3891 = vperm.xlu0 %8920, %v3877_v40   ;;  %v5953_v40 = vld [vmem:[%s12876_s15] sm:$0xff]  ;;  %s12882_s15 = sld [smem:[#allocation58_spill]] }
 0x15d   : > { %3881 = vperm.xlu2 %8922, %v3875_v45   ;;  %v5956_v45 = vld [vmem:[%s12877_s1 + $0x18] sm:$0xff] }
 0x162   : > { %s12883_s4 = smov %s12882_s15 }
 0x163   : > { %3919 = vperm.xlu1 %8921, %v3905_v53   ;;  %v5957_v53 = vld [vmem:[%s12877_s1 + $0x20] sm:$0xff] }
 0x164   : > { %3924 = vperm.xlu0 %8920, %v3906_v52   ;;  %v6009_v52 = vld [vmem:[%s12878_s18] sm:$0xff]  ;;  %s12884_s18 = sld [smem:[#allocation60_spill]] }
 0x165   : > { %3914 = vperm.xlu2 %8922, %v3904_v56   ;;  %v6010_v56 = vld [vmem:[%s12879_s3 + $0x8] sm:$0xff] }
 0x16b   : > { %4033 = vperm.xlu1 %8921, %v4027_v59   ;;  %v6011_v59 = vld [vmem:[%s12879_s3 + $0x10] sm:$0xff] }
 0x16c   : > { %3909 = vperm.xlu0 %8920, %v3903_v58   ;;  %v5958_v58 = vld [vmem:[%s12877_s1 + $0x28] sm:$0xff] }
 0x16d   : > { %4038 = vperm.xlu2 %8922, %v4028_v60   ;;  %v5959_v60 = vld [vmem:[%s12877_s1 + $0x30] sm:$0xff] }
 0x173   : > { %4048 = vperm.xlu1 %8921, %v4030_v62   ;;  %v5960_v62 = vld [vmem:[%s12877_s1 + $0x38] sm:$0xff]  ;;  %s12885_s1 = smov %s12884_s18 }
 0x174   : > { %4043 = vperm.xlu0 %8920, %v4029_v61   ;;  %v6012_v61 = vld [vmem:[%s12879_s3 + $0x18] sm:$0xff] }
 0x175   : > { %4630 = vperm.xlu2 %8922, %v4624_v63   ;;  %v1677_v2 = vpop.permute.xlu1 %1676  ;;  %v6013_v63 = vld [vmem:[%s12879_s3 + $0x20] sm:$0xff] }
 0x176   : > { %v1667_v17 = vpop.permute.xlu0 %1666 }
 0x17b   : > { %4640 = vperm.xlu1 %8921, %v4626_v1   ;;  %v6015_v1 = vld [vmem:[%s12879_s3 + $0x30] sm:$0xff] }
 0x17c   : > { %4635 = vperm.xlu0 %8920, %v4625_v0   ;;  %v6014_v0 = vld [vmem:[%s12879_s3 + $0x28] sm:$0xff] }
 0x17d   : > { %4645 = vperm.xlu2 %8922, %v4627_v3   ;;  %v1662_v9 = vpop.permute.xlu1 %1661  ;;  %v6796_v3 = vld [vmem:[%s12880_s22 + $0x38] sm:$0xff]  ;;  %s12886_s22 = sld [smem:[#allocation29_spill]] }
 0x17e   : > { %v1672_v23 = vpop.permute.xlu0 %1671 }
 0x183   : > { %4663 = vperm.xlu1 %8921, %v4653_v6   ;;  %v6794_v6 = vld [vmem:[%s12881_s2 + $0x28] sm:$0xff] }
 0x184   : > { %4658 = vperm.xlu0 %8920, %v4652_v5   ;;  %v6795_v5 = vld [vmem:[%s12881_s2 + $0x30] sm:$0xff] }
 0x185   : > { %4668 = vperm.xlu2 %8922, %v4654_v11   ;;  %v6791_v11 = vld [vmem:[%s12881_s2 + $0x10] sm:$0xff] }
 0x189   : > { %v1709_v10 = vpop.f32.mrf.mxu0 }
 0x18a   : > { %v10186_v13 = vadd.f32 %v1709_v10, %v1662_v9  ;;  %v6793_v9 = vld [vmem:[%s12881_s2 + $0x20] sm:$0xff]  ;;  %v6792_v10 = vld [vmem:[%s12881_s2 + $0x18] sm:$0xff] }
 0x18b   : > { %5165 = vperm.xlu1 %8921, %v5147_v16   ;;  %v6789_v16 = vld [vmem:[%s12881_s2] sm:$0xff] }
 0x18c   : > { %8058 = vmatmul.msk.f32.vlgmr.msra.gmra.mxu1 %vm12706_vm7, %v10186_v13  ;;  %4673 = vperm.xlu0 %8920, %v4655_v15   ;;  %v6790_v15 = vld [vmem:[%s12881_s2 + $0x8] sm:$0xff] }
 0x18d   : > { %5160 = vperm.xlu2 %8922, %v5146_v19   ;;  %v6850_v19 = vld [vmem:[%s12883_s4 + $0x28] sm:$0xff] }
 0x191   : > { %v1712_v18 = vpop.f32.mrf.mxu0 }
 0x192   : > { %v10205_v20 = vadd.f32 %v1712_v18, %v1667_v17  ;;  %v6852_v17 = vld [vmem:[%s12882_s15 + $0x38] sm:$0xff]  ;;  %v6851_v18 = vld [vmem:[%s12883_s4 + $0x30] sm:$0xff]  ;;  %s12888_s15 = sld [smem:[#allocation62_spill]] }
 0x193   : > { %5150 = vperm.xlu1 %8921, %v5144_v22   ;;  %v6848_v22 = vld [vmem:[%s12883_s4 + $0x18] sm:$0xff] }
 0x194   : > { %8059 = vmatmul.msk.f32.vlgmr.msra.gmra.mxu2 %vm12706_vm7, %v10205_v20  ;;  %5155 = vperm.xlu0 %8920, %v5145_v21   ;;  %v6849_v21 = vld [vmem:[%s12883_s4 + $0x20] sm:$0xff] }
 0x195   : > { %5193 = vperm.xlu2 %8922, %v5175_v25   ;;  %v6845_v25 = vld [vmem:[%s12883_s4] sm:$0xff] }
 0x198   : > { %s12889_s2 = smov %s12888_s15 }
 0x199   : > { %v1715_v24 = vpop.f32.mrf.mxu0 }
 0x19a   : > { %v10212_v26 = vadd.f32 %v1715_v24, %v1672_v23  ;;  %v6847_v23 = vld [vmem:[%s12883_s4 + $0x10] sm:$0xff]  ;;  %v6846_v24 = vld [vmem:[%s12883_s4 + $0x8] sm:$0xff] }
 0x19b   : > { %5183 = vperm.xlu1 %8921, %v5173_v28   ;;  %v8070_v28 = vld [vmem:[%s12886_s22 + $0x20] sm:$0xff] }
 0x19c   : > { %8060 = vmatmul.msk.f32.gmra.mxu2 %vm12706_vm7, %v10212_v26  ;;  %5188 = vperm.xlu0 %8920, %v5174_v27   ;;  %v7100_v27 = vld [vmem:[%s12884_s18 + $0x38] sm:$0xff]  ;;  %s12890_s18 = sld [smem:[#allocation30_spill]] }
 0x19d   : > { %5178 = vperm.xlu2 %8922, %v5172_v31   ;;  %v7098_v31 = vld [vmem:[%s12885_s1 + $0x28] sm:$0xff] }
 0x1a1   : > { %v1718_v29 = vpop.f32.mrf.mxu0 }
 0x1a2   : > { %v10218_v30 = vadd.f32 %v1718_v29, %v1677_v2  ;;  %v6016_v2 = vld [vmem:[%s12879_s3 + $0x38] sm:$0xff]  ;;  %s12887_s3 = smov %s12886_s22  ;;  %v7099_v29 = vld [vmem:[%s12885_s1 + $0x30] sm:$0xff]  ;;  %s12891_s4 = smov %s12890_s18 }
 0x1a3   : > { %5315 = vperm.xlu1 %8921, %v5301_v33   ;;  %s12892_s22 = sld [smem:[#allocation64_spill]] }
 0x1a4   : > { %8061 = vmatmul.msk.f32.gmra.mxu2 %vm12706_vm7, %v10218_v30  ;;  %1854 = vmatpush.msra.mxu3 %v10218_v30 }
 0x1a5   : > { %1941 = vmatpush.msrb.mxu1 %v10218_v30  ;;  %5310 = vperm.xlu0 %8920, %v5300_v32   ;;  %v7097_v32 = vld [vmem:[%s12885_s1 + $0x20] sm:$0xff] }
 0x1a6   : > { %1855 = vmatpush.msra.mxu3 %v10212_v26  ;;  %5320 = vperm.xlu2 %8922, %v5302_v34   ;;  %v8071_v34 = vld [vmem:[%s12887_s3 + $0x28] sm:$0xff] }
 0x1a7   : > { %1942 = vmatpush.msrb.mxu1 %v10212_v26 }
 0x1a8   : > { %1856 = vmatpush.msra.mxu3 %v10205_v20 }
 0x1a9   : > { %1943 = vmatpush.msrb.mxu1 %v10205_v20 }
 0x1aa   : > { %1857 = vmatpush.msra.mxu3 %v10186_v13 }
 0x1ab   : > { %1944 = vmatpush.msrb.mxu1 %v10186_v13  ;;  %5330 = vperm.xlu1 %8921, %v5304_v36   ;;  %v7095_v36 = vld [vmem:[%s12885_s1 + $0x10] sm:$0xff] }
 0x1ac   : > { %8066 = vmatmul.msk.f32.vlgmr.msrb.gmra.mxu2 %vm12706_vm7, %v10186_v13  ;;  %8074 = vmatmul.msk.f32.vlgmr.msra.gmra.mxu3 %vm12706_vm7, %v8070_v28 }
 0x1ad   : > { %5325 = vperm.xlu0 %8920, %v5303_v35   ;;  %v7096_v35 = vld [vmem:[%s12885_s1 + $0x18] sm:$0xff] }
 0x1ae   : > { %5335 = vperm.xlu2 %8922, %v5305_v37   ;;  %v7094_v37 = vld [vmem:[%s12885_s1 + $0x8] sm:$0xff] }
 0x1b3   : > { %5345 = vperm.xlu1 %8921, %v5307_v39   ;;  %v8072_v39 = vld [vmem:[%s12887_s3 + $0x30] sm:$0xff] }
 0x1b4   : > { %8067 = vmatmul.msk.f32.gmra.mxu2 %vm12706_vm7, %v10205_v20  ;;  %8075 = vmatmul.msk.f32.gmra.mxu3 %vm12706_vm7, %v8071_v34  ;;  %v7472_v34 = vld [vmem:[%s9814_s25] sm:$0xff] }
 0x1b5   : > { %5340 = vperm.xlu0 %8920, %v5306_v38  }
 0x1b6   : > { %5963 = vperm.xlu2 %8922, %v5953_v40   ;;  %v7093_v40 = vld [vmem:[%s12885_s1] sm:$0xff]  ;;  %s12893_s1 = smov %s12892_s22 }
 0x1bb   : > { %5973 = vperm.xlu1 %8921, %v5955_v42   ;;  %v7220_v42 = vld [vmem:[%s12889_s2 + $0x30] sm:$0xff] }
 0x1bc   : > { %8068 = vmatmul.msk.f32.gmra.mxu2 %vm12706_vm7, %v10212_v26  ;;  %8076 = vmatmul.msk.f32.gmra.mxu3 %vm12706_vm7, %v8072_v39  ;;  %v7475_v39 = vld [vmem:[%s9814_s25 + $0x18] sm:$0xff] }
 0x1bd   : > { %5968 = vperm.xlu0 %8920, %v5954_v41   ;;  %v7221_v41 = vld [vmem:[%s12888_s15 + $0x38] sm:$0xff]  ;;  %s12895_s15 = sld [smem:[#allocation31_spill]] }
 0x1be   : > { %5978 = vperm.xlu2 %8922, %v5956_v45  }
 0x1c3   : > { %5983 = vperm.xlu1 %8921, %v5957_v53   ;;  %v7219_v53 = vld [vmem:[%s12889_s2 + $0x28] sm:$0xff] }
 0x1c4   : > { %8069 = vmatmul.msk.f32.gmra.mxu2 %vm12706_vm7, %v10218_v30 }
 0x1c5   : > { %6019 = vperm.xlu0 %8920, %v6009_v52   ;;  %v8073_v52 = vld [vmem:[%s12887_s3 + $0x38] sm:$0xff] }
 0x1c6   : > { %6024 = vperm.xlu2 %8922, %v6010_v56   ;;  %8077 = vmatmul.msk.f32.gmra.mxu3 %vm12706_vm7, %v8073_v52  ;;  %v1817_v56 = vld [vmem:[%s12887_s3] sm:$0xff]  ;;  %v7478_v52 = vld [vmem:[%s9814_s25 + $0x30] sm:$0xff] }
 0x1cb   : > { %6029 = vperm.xlu1 %8921, %v6011_v59   ;;  %v8082_v59 = vld [vmem:[%s12891_s4 + $0x20] sm:$0xff] }
 0x1cc   : > { %8086 = vmatmul.msk.f32.vlgmr.msrb.gmra.mxu1 %vm12706_vm7, %v8082_v59 }
 0x1cd   : > { %5988 = vperm.xlu0 %8920, %v5958_v58   ;;  %v1821_v58 = vld [vmem:[%s12890_s18] sm:$0xff]  ;;  %s12897_s18 = sld [smem:[#allocation33_spill]] }
 0x1ce   : > { %5993 = vperm.xlu2 %8922, %v5959_v60  }
 0x1d3   : > { %5998 = vperm.xlu1 %8921, %v5960_v62   ;;  %v7217_v62 = vld [vmem:[%s12889_s2 + $0x18] sm:$0xff] }
 0x1d5   : > { %6034 = vperm.xlu0 %8920, %v6012_v61   ;;  %v7218_v61 = vld [vmem:[%s12889_s2 + $0x20] sm:$0xff] }
 0x1d6   : > { %6039 = vperm.xlu2 %8922, %v6013_v63  }
 0x1db   : > { %6049 = vperm.xlu1 %8921, %v6015_v1   ;;  %v8083_v1 = vld [vmem:[%s12891_s4 + $0x28] sm:$0xff] }
 0x1dc   : > { %8087 = vmatmul.msk.f32.gmra.mxu1 %vm12706_vm7, %v8083_v1  ;;  %v10360_v1 = vadd.s32 4294967293, %v10081_v44 }
 0x1dd   : > { %6044 = vperm.xlu0 %8920, %v6014_v0   ;;  %v7216_v0 = vld [vmem:[%s12889_s2 + $0x10] sm:$0xff] }
 0x1de   : > { %6054 = vperm.xlu2 %8922, %v6016_v2   ;;  %v1818_v2 = vld [vmem:[%s12887_s3 + $0x8] sm:$0xff]  ;;  %vm12705_vm10 = vcmp.eq.s32.totalorder %v10085_v46, %v10360_v1  ;;  %vm12703_vm12 = vcmp.eq.s32.totalorder %v10091_v48, %v10360_v1  ;;  %vm12700_vm14 = vcmp.eq.s32.totalorder %v10094_v49, %v10360_v1  ;;  %vm12698_vm0 = vcmp.eq.s32.totalorder %v10079_v43, %v10360_v1 }
 0x1df   : > { %8114 = vmatpush.msk.msra.mxu1 %vm12705_vm10, %v12738_v54 }
 0x1e1   : > { %8115 = vmatpush.msk.msra.mxu1 %vm12703_vm12, %v12738_v54 }
 0x1e3   : > { %6829 = vperm.xlu1 %8921, %v6795_v5   ;;  %v7215_v5 = vld [vmem:[%s12889_s2 + $0x8] sm:$0xff]  ;;  %8116 = vmatpush.msk.msra.mxu1 %vm12700_vm14, %v12738_v54 }
 0x1e5   : > { %6834 = vperm.xlu0 %8920, %v6796_v3   ;;  %v1822_v3 = vld [vmem:[%s12891_s4 + $0x8] sm:$0xff]  ;;  %8117 = vmatpush.msk.msra.mxu1 %vm12698_vm0, %v12738_v54 }
 0x1e6   : > { %6824 = vperm.xlu2 %8922, %v6794_v6   ;;  %v7214_v6 = vld [vmem:[%s12889_s2] sm:$0xff]  ;;  %s12898_s2 = smov %s12897_s18 }
 0x1eb   : > { %6814 = vperm.xlu1 %8921, %v6792_v10   ;;  %v7350_v10 = vld [vmem:[%s12892_s22 + $0x38] sm:$0xff]  ;;  %s12905_s22 = sld [smem:[#allocation35_spill]] }
 0x1ed   : > { %6819 = vperm.xlu0 %8920, %v6793_v9  }
 0x1ee   : > { %6809 = vperm.xlu2 %8922, %v6791_v11   ;;  %v8084_v11 = vld [vmem:[%s12891_s4 + $0x30] sm:$0xff] }
 0x1ef   : > { %8088 = vmatmul.msk.f32.gmra.mxu1 %vm12706_vm7, %v8084_v11 }
 0x1f3   : > { %6799 = vperm.xlu1 %8921, %v6789_v16   ;;  %v1823_v16 = vld [vmem:[%s12891_s4 + $0x10] sm:$0xff] }
 0x1f5   : > { %6804 = vperm.xlu0 %8920, %v6790_v15   ;;  %v1819_v15 = vld [vmem:[%s12887_s3 + $0x10] sm:$0xff] }
 0x1f6   : > { %6890 = vperm.xlu2 %8922, %v6852_v17   ;;  %v7349_v17 = vld [vmem:[%s12893_s1 + $0x30] sm:$0xff] }
 0x1fb   : > { %6880 = vperm.xlu1 %8921, %v6850_v19  }
 0x1fd   : > { %6885 = vperm.xlu0 %8920, %v6851_v18   ;;  %v7348_v18 = vld [vmem:[%s12893_s1 + $0x28] sm:$0xff] }
 0x1fe   : > { %6875 = vperm.xlu2 %8922, %v6849_v21   ;;  %v7347_v21 = vld [vmem:[%s12893_s1 + $0x20] sm:$0xff] }
 0x203   : > { %6865 = vperm.xlu1 %8921, %v6847_v23   ;;  %v1820_v23 = vld [vmem:[%s12887_s3 + $0x18] sm:$0xff] }
 0x205   : > { %6870 = vperm.xlu0 %8920, %v6848_v22   ;;  %v8085_v22 = vld [vmem:[%s12891_s4 + $0x38] sm:$0xff] }
 0x206   : > { %6860 = vperm.xlu2 %8922, %v6846_v24   ;;  %v1824_v24 = vld [vmem:[%s12891_s4 + $0x18] sm:$0xff]  ;;  %8089 = vmatmul.msk.f32.gmra.mxu1 %vm12706_vm7, %v8085_v22 }
 0x209   : > { %v1767_v60 = vpop.f32.mrf.mxu1 }
 0x20b   : > { %7138 = vperm.xlu1 %8921, %v7100_v27   ;;  %v7345_v27 = vld [vmem:[%s12893_s1 + $0x10] sm:$0xff] }
 0x20d   : > { %6855 = vperm.xlu0 %8920, %v6845_v25   ;;  %v7346_v25 = vld [vmem:[%s12893_s1 + $0x18] sm:$0xff] }
 0x20e   : > { %7133 = vperm.xlu2 %8922, %v7099_v29   ;;  %v7344_v29 = vld [vmem:[%s12893_s1 + $0x8] sm:$0xff] }
 0x213   : > { %7123 = vperm.xlu1 %8921, %v7097_v32   ;;  %v8102_v32 = vld [vmem:[%s12891_s4 + $0x40] sm:$0xff] }
 0x215   : > { %7128 = vperm.xlu0 %8920, %v7098_v31   ;;  %v8094_v31 = vld [vmem:[%s12887_s3 + $0x40] sm:$0xff] }
 0x216   : > { %7118 = vperm.xlu2 %8922, %v7096_v35   ;;  %v7473_v35 = vld [vmem:[%s9814_s25 + $0x8] sm:$0xff] }
 0x217   : > { %v1770_v33 = vpop.f32.mrf.mxu2 }
 0x21b   : > { %7108 = vperm.xlu1 %8921, %v7094_v37   ;;  %v8103_v37 = vld [vmem:[%s12891_s4 + $0x48] sm:$0xff] }
 0x21d   : > { %7113 = vperm.xlu0 %8920, %v7095_v36   ;;  %v8095_v36 = vld [vmem:[%s12887_s3 + $0x48] sm:$0xff] }
 0x21e   : > { %7103 = vperm.xlu2 %8922, %v7093_v40   ;;  %v7476_v40 = vld [vmem:[%s9814_s25 + $0x20] sm:$0xff] }
 0x21f   : > { %v1773_v38 = vpop.f32.mrf.mxu2 }
 0x223   : > { %7254 = vperm.xlu1 %8921, %v7220_v42   ;;  %v8104_v42 = vld [vmem:[%s12891_s4 + $0x50] sm:$0xff] }
 0x225   : > { %7259 = vperm.xlu0 %8920, %v7221_v41   ;;  %v8096_v41 = vld [vmem:[%s12887_s3 + $0x50] sm:$0xff] }
 0x226   : > { %7249 = vperm.xlu2 %8922, %v7219_v53   ;;  %v7479_v53 = vld [vmem:[%s9814_s25 + $0x38] sm:$0xff] }
 0x227   : > { %v1776_v45 = vpop.f32.mrf.mxu2 }
 0x228   : > { %1895 = vmatpush.msrb.mxu0 %v1776_v45  ;;  %1982 = vmatpush.msra.mxu2 %v1776_v45  ;;  %v7477_v45 = vld [vmem:[%s9814_s25 + $0x28] sm:$0xff] }
 0x22a   : > { %1896 = vmatpush.msrb.mxu0 %v1773_v38  ;;  %1983 = vmatpush.msra.mxu2 %v1773_v38  ;;  %v7474_v38 = vld [vmem:[%s9814_s25 + $0x10] sm:$0xff] }
 0x22b   : > { %7239 = vperm.xlu1 %8921, %v7217_v62  }
 0x22c   : > { %1897 = vmatpush.msrb.mxu0 %v1770_v33  ;;  %1984 = vmatpush.msra.mxu2 %v1770_v33  ;;  %v7343_v33 = vld [vmem:[%s12893_s1] sm:$0xff]  ;;  %s12896_s1 = smov %s12895_s15 }
 0x22d   : > { %7244 = vperm.xlu0 %8920, %v7218_v61  }
 0x22e   : > { %1898 = vmatpush.msrb.mxu0 %v1767_v60  ;;  %1985 = vmatpush.msra.mxu2 %v1767_v60 }
 0x22f   : > { %v1805_v63 = vpop.f32.mrf.mxu2  ;;  %8078 = vmatmul.msk.f32.vlgmr.msrb.gmra.mxu0 %vm12706_vm7, %v1817_v56  ;;  %8090 = vmatmul.msk.f32.vlgmr.msra.gmra.mxu2 %vm12706_vm7, %v1821_v58  ;;  %v8097_v56 = vld [vmem:[%s12887_s3 + $0x58] sm:$0xff]  ;;  %v1859_v59 = vpop.f32.mrf.mxu3  ;;  %s12774_s3 = sshll.u32 %s9847_s0, 6 }
 0x230   : > { %7234 = vperm.xlu2 %8922, %v7216_v0   ;;  %v8105_v58 = vld [vmem:[%s12891_s4 + $0x58] sm:$0xff] }
 0x233   : > { %7224 = vperm.xlu1 %8921, %v7214_v6  }
 0x235   : > { %7229 = vperm.xlu0 %8920, %v7215_v5  }
 0x237   : > { %v1808_v9 = vpop.f32.mrf.mxu2  ;;  %8079 = vmatmul.msk.f32.gmra.mxu0 %vm12706_vm7, %v1818_v2  ;;  %8091 = vmatmul.msk.f32.gmra.mxu2 %vm12706_vm7, %v1822_v3  ;;  %v1862_v60 = vpop.f32.mrf.mxu3  ;;  %v10363_v2 = vadd.s32 3, %v10081_v44 }
 0x238   : > { %7388 = vperm.xlu2 %8922, %v7350_v10   ;;  %v2106_v3 = vpop.permute.xlu2 %2105 }
 0x239   : > { %12894 = vst [vmem:[#allocation78_spill] sm:$0xff] %v10363_v2  ;;  %vm12704_vm11 = vcmp.eq.s32.totalorder %v10085_v46, %v10363_v2  ;;  %vm12696_vm13 = vcmp.eq.s32.totalorder %v10091_v48, %v10363_v2  ;;  %vm12699_vm15 = vcmp.eq.s32.totalorder %v10094_v49, %v10363_v2 }
 0x23a   : > { %8122 = vmatpush.msk.msrb.mxu2 %vm12704_vm11, %v12738_v54 }
 0x23b   : > { %7378 = vperm.xlu1 %8921, %v7348_v18  }
 0x23c   : > { %8123 = vmatpush.msk.msrb.mxu2 %vm12696_vm13, %v12738_v54  ;;  %vm12697_vm13 = vcmp.eq.s32.totalorder %v10079_v43, %v10363_v2 }
 0x23d   : > { %7383 = vperm.xlu0 %8920, %v7349_v17  }
 0x23e   : > { %8124 = vmatpush.msk.msrb.mxu2 %vm12699_vm15, %v12738_v54 }
 0x23f   : > { %v1811_v19 = vpop.f32.mrf.mxu2  ;;  %8080 = vmatmul.msk.f32.gmra.mxu0 %vm12706_vm7, %v1819_v15  ;;  %8092 = vmatmul.msk.f32.gmra.mxu2 %vm12706_vm7, %v1823_v16  ;;  %v1865_v62 = vpop.f32.mrf.mxu3 }
 0x240   : > { %7373 = vperm.xlu2 %8922, %v7347_v21   ;;  %8125 = vmatpush.msk.msrb.mxu2 %vm12697_vm13, %v12738_v54 }
 0x243   : > { %7363 = vperm.xlu1 %8921, %v7345_v27  }
 0x245   : > { %7368 = vperm.xlu0 %8920, %v7346_v25  }
 0x247   : > { %v1814_v28 = vpop.f32.mrf.mxu2  ;;  %8081 = vmatmul.msk.f32.gmra.mxu0 %vm12706_vm7, %v1820_v23  ;;  %8093 = vmatmul.msk.f32.gmra.mxu2 %vm12706_vm7, %v1824_v24 }
 0x248   : > { %2028 = vmatpush.msrb.mxu3 %v1814_v28  ;;  %2078 = vmatpush.msra.mxu0 %v1814_v28 }
 0x249   : > { %7358 = vperm.xlu2 %8922, %v7344_v29   ;;  %v1868_v0 = vpop.f32.mrf.mxu3  ;;  %v1946_v28 = vpop.f32.mrf.mxu1 }
 0x24a   : > { %2029 = vmatpush.msrb.mxu3 %v1811_v19  ;;  %2079 = vmatpush.msra.mxu0 %v1811_v19  ;;  %v2111_v19 = vpop.permute.xlu2 %2110 }
 0x24b   : > { %7482 = vperm.xlu1 %8921, %v7472_v34  }
 0x24c   : > { %2030 = vmatpush.msrb.mxu3 %v1808_v9  ;;  %2080 = vmatpush.msra.mxu0 %v1808_v9 }
 0x24d   : > { %7353 = vperm.xlu0 %8920, %v7343_v33   ;;  %v2116_v33 = vpop.permute.xlu0 %2115 }
 0x24e   : > { %2031 = vmatpush.msrb.mxu3 %v1805_v63  ;;  %2081 = vmatpush.msra.mxu0 %v1805_v63 }
 0x24f   : > { %8098 = vmatmul.msk.f32.vlgmr.msrb.gmra.mxu3 %vm12706_vm7, %v8094_v31  ;;  %8106 = vmatmul.msk.f32.vlgmr.msra.gmra.mxu0 %vm12706_vm7, %v8102_v32 }
 0x251   : > { %7487 = vperm.xlu2 %8922, %v7473_v35  }
 0x253   : > { %7497 = vperm.xlu1 %8921, %v7475_v39  }
 0x255   : > { %7492 = vperm.xlu0 %8920, %v7474_v38  }
 0x257   : > { %8099 = vmatmul.msk.f32.gmra.mxu3 %vm12706_vm7, %v8095_v36  ;;  %8107 = vmatmul.msk.f32.gmra.mxu0 %vm12706_vm7, %v8103_v37 }
 0x259   : > { %7502 = vperm.xlu2 %8922, %v7476_v40  }
 0x25b   : > { %7512 = vperm.xlu1 %8921, %v7478_v52  }
 0x25d   : > { %7507 = vperm.xlu0 %8920, %v7477_v45   ;;  %v2121_v45 = vpop.permute.xlu1 %2120 }
 0x25f   : > { %8100 = vmatmul.msk.f32.gmra.mxu3 %vm12706_vm7, %v8096_v41  ;;  %8108 = vmatmul.msk.f32.gmra.mxu0 %vm12706_vm7, %v8104_v42 }
 0x261   : > { %7517 = vperm.xlu2 %8922, %v7479_v53  }
 0x267   : > { %8101 = vmatmul.msk.f32.gmra.mxu3 %vm12706_vm7, %v8097_v56  ;;  %8109 = vmatmul.msk.f32.gmra.mxu0 %vm12706_vm7, %v8105_v58  ;;  %v1949_v58 = vpop.f32.mrf.mxu1 }
 0x2ac   : > { %v1900_v61 = vpop.f32.mrf.mxu0 }
 0x2ad   : > { %v1901_v5 = vadd.f32 %v1900_v61, %v1859_v59 }
 0x2b2   : > { %v1987_v29 = vpop.f32.mrf.mxu2 }
 0x2b3   : > { %v1988_v52 = vadd.f32 %v1987_v29, %v1946_v28 }
 0x2b4   : > { %v1903_v63 = vpop.f32.mrf.mxu0 }
 0x2b5   : > { %v1904_v16 = vadd.f32 %v1903_v63, %v1862_v60 }
 0x2ba   : > { %v1990_v59 = vpop.f32.mrf.mxu2 }
 0x2bc   : > { %v1906_v6 = vpop.f32.mrf.mxu0 }
 0x2bd   : > { %v1907_v27 = vadd.f32 %v1906_v6, %v1865_v62 }
 0x2c4   : > { %v1909_v21 = vpop.f32.mrf.mxu0 }
 0x2c5   : > { %v1910_v40 = vadd.f32 %v1909_v21, %v1868_v0 }
 0x2cc   : > { %v2083_v35 = vpop.f32.mrf.mxu0 }
 0x2d2   : > { %v2033_v9 = vpop.f32.mrf.mxu3 }
 0x2d3   : > { %v2045_v10 = vadd.f32 %v2033_v9, %v1901_v5  ;;  %v2095_v5 = vadd.f32 %v2083_v35, %v1988_v52 }
 0x2d5   : > { %v2123_v11 = vadd.f32 %v2106_v3, %v2045_v10  ;;  %v2086_v10 = vpop.f32.mrf.mxu0 }
 0x2d7   : > { %v8110_v15 = vmul.f32 -1.442695, %v2123_v11 }
 0x2d9   : > { %8923 = vpow2.f32 %v8110_v15 }
 0x2da   : > { %v2036_v17 = vpop.f32.mrf.mxu3 }
 0x2db   : > { %v2046_v18 = vadd.f32 %v2036_v17, %v1904_v16 }
 0x2dd   : > { %v2124_v22 = vadd.f32 %v2111_v19, %v2046_v18  ;;  %v2134_v18 = vpop.permute.xlu2 %2133  ;;  %v2089_v52 = vpop.f32.mrf.mxu0 }
 0x2de   : > { %v2151_v21 = vadd.f32 %v2134_v18, %v2095_v5  ;;  %v2144_v18 = vpop.permute.xlu1 %2143 }
 0x2df   : > { %v8924_v23 = vpop.eup %8923  ;;  %v8111_v24 = vmul.f32 -1.442695, %v2124_v22  ;;  %v1991_v22 = vadd.f32 %v1990_v59, %v1949_v58 }
 0x2e0   : > { %v2167_v25 = vadd.f32 1.0, %v8924_v23 }
 0x2e1   : > { %8925 = vpow2.f32 %v8111_v24  ;;  %v2096_v35 = vadd.f32 %v2086_v10, %v1991_v22 }
 0x2e2   : > { %8927 = vrcp.f32 %v2167_v25  ;;  %v2039_v31 = vpop.f32.mrf.mxu3  ;;  %v2182_v60 = vand.u32 2147483648, %v2167_v25  ;;  %v2180_v63 = vand.u32 2147483647, %v2167_v25  ;;  %vm2176_vm0 = vweird.f32 %v2167_v25 }
 0x2e3   : > { %v2047_v32 = vadd.f32 %v2039_v31, %v1907_v27 }
 0x2e4   : > { %v2183_v15 = vor.u32 1.1754944e-38, %v2182_v60  ;;  %vm2181_vm14 = vcmp.eq.f32.partialorder %v2180_v63, 8.507059e+37 }
 0x2e5   : > { %v2125_v34 = vadd.f32 %v2116_v33, %v2047_v32  ;;  %v1952_v32 = vpop.f32.mrf.mxu1  ;;  %v1993_v33 = vpop.f32.mrf.mxu2 }
 0x2e7   : > { %v8926_v36 = vpop.eup %8925  ;;  %v8112_v37 = vmul.f32 -1.442695, %v2125_v34 }
 0x2e8   : > { %v8928_v38 = vpop.eup %8927  ;;  %v2168_v39 = vadd.f32 1.0, %v8926_v36 }
 0x2e9   : > { %v2172_v41 = vmul.f32 %v8928_v38, %v2167_v25  ;;  %8929 = vpow2.f32 %v8112_v37  ;;  %vm2177_vm13 = vweird.f32 %v8928_v38 }
 0x2ea   : > { %8931 = vrcp.f32 %v2168_v39  ;;  %v2042_v42 = vpop.f32.mrf.mxu3  ;;  %vm2178_vm15 = vmor %vm2176_vm0, %vm2177_vm13  ;;  %v2197_v25 = vand.u32 2147483648, %v2168_v39  ;;  %v2195_v27 = vand.u32 2147483647, %v2168_v39 }
 0x2eb   : > { %v2173_v53 = vsub.f32 1.0, %v2172_v41  ;;  %v2048_v56 = vadd.f32 %v2042_v42, %v1910_v40 }
 0x2ec   : > { %v2198_v41 = vor.u32 1.1754944e-38, %v2197_v25  ;;  %vm2196_vm0 = vcmp.eq.f32.partialorder %v2195_v27, 8.507059e+37 }
 0x2ed   : > { %v2174_v61 = vmul.f32 %v8928_v38, %v2173_v53  ;;  %v2126_v62 = vadd.f32 %v2121_v45, %v2048_v56  ;;  %v2139_v45 = vpop.permute.xlu0 %2138  ;;  %v1994_v56 = vadd.f32 %v1993_v33, %v1952_v32  ;;  %v1955_v10 = vpop.f32.mrf.mxu1 }
 0x2ee   : > { %v2152_v53 = vadd.f32 %v2139_v45, %v2096_v35 }
 0x2ef   : > { %v8930_v3 = vpop.eup %8929  ;;  %v8113_v6 = vmul.f32 -1.442695, %v2126_v62  ;;  %v2175_v0 = vadd.f32 %v8928_v38, %v2174_v61  ;;  %v2097_v5 = vadd.f32 %v2089_v52, %v1994_v56  ;;  %v8131_v52 = vld [vmem:[%s12896_s1 + $0x28] sm:$0xff] }
 0x2f0   : > { %v8932_v9 = vpop.eup %8931  ;;  %v10413_v11 = vadd.f32 1.0, %v8930_v3 }
 0x2f1   : > { %v2187_v16 = vmul.f32 %v8932_v9, %v2168_v39  ;;  %8933 = vpow2.f32 %v8113_v6  ;;  %v2179_v17 = vsel %vm2178_vm15, %v8928_v38, %v2175_v0  ;;  %vm2192_vm13 = vweird.f32 %v8932_v9 }
 0x2f2   : > { %8935 = vrcp.f32 %v10413_v11  ;;  %v2184_v19 = vsel %vm2181_vm14, %v2183_v15, %v2179_v17  ;;  %vm2191_vm15 = vweird.f32 %v2168_v39  ;;  %v2212_v60 = vand.u32 2147483648, %v10413_v11  ;;  %v1996_v15 = vpop.f32.mrf.mxu2 }
 0x2f3   : > { %v2188_v23 = vsub.f32 1.0, %v2187_v16  ;;  %v2235_v24 = vsub.f32 1.0, %v2184_v19  ;;  %v2231_v29 = vmul.f32 %v2184_v19, %v2151_v21  ;;  %vm2193_vm14 = vmor %vm2191_vm15, %vm2192_vm13  ;;  %v2210_v61 = vand.u32 2147483647, %v10413_v11 }
 0x2f4   : > { %vm2206_vm15 = vweird.f32 %v10413_v11  ;;  %v2213_v16 = vor.u32 1.1754944e-38, %v2212_v60  ;;  %v1997_v21 = vadd.f32 %v1996_v15, %v1955_v10  ;;  %v8143_v10 = vld [vmem:[%s12898_s2 + $0x28] sm:$0xff]  ;;  %v8154_v15 = vld [vmem:[%s12896_s1 + $0x40] sm:$0xff] }
 0x2f5   : > { %v2189_v28 = vmul.f32 %v8932_v9, %v2188_v23  ;;  %v2239_v31 = vmul.f32 %v2235_v24, %v10186_v13  ;;  %v2092_v24 = vpop.f32.mrf.mxu0 }
 0x2f6   : > { %v2098_v32 = vadd.f32 %v2092_v24, %v1997_v21  ;;  %v8145_v21 = vld [vmem:[%s12898_s2 + $0x38] sm:$0xff] }
 0x2f7   : > { %v8934_v34 = vpop.eup %8933  ;;  %v10417_v36 = vadd.f32 %v2239_v31, %v2231_v29  ;;  %v2190_v37 = vadd.f32 %v8932_v9, %v2189_v28  ;;  %v2342_v24 = vld [vmem:[%s12898_s2 + $0x18] sm:$0xff] }
 0x2f8   : > { %v8936_v38 = vpop.eup %8935  ;;  %v2170_v40 = vadd.f32 1.0, %v8934_v34 }
 0x2f9   : > { %v2202_v42 = vmul.f32 %v8936_v38, %v10413_v11  ;;  %8118 = vmatmul.msk.f32.vlgmr.msra.gmra.mxu1 %vm12706_vm7, %v10417_v36  ;;  %8126 = vmatmul.msk.f32.vlgmr.msrb.gmra.mxu2 %vm12706_vm7, %v10417_v36  ;;  %v2194_v13 = vsel %vm2193_vm14, %v8932_v9, %v2190_v37  ;;  %vm2207_vm13 = vweird.f32 %v8936_v38  ;;  %v2153_v11 = vadd.f32 %v2144_v18, %v2097_v5  ;;  %v2335_v5 = vld [vmem:[%s12896_s1] sm:$0xff]  ;;  %v8155_v18 = vld [vmem:[%s12896_s1 + $0x48] sm:$0xff] }
 0x2fa   : > { %8937 = vrcp.f32 %v2170_v40  ;;  %v2199_v39 = vsel %vm2196_vm0, %v2198_v41, %v2194_v13  ;;  %vm2208_vm14 = vmor %vm2206_vm15, %vm2207_vm13  ;;  %vm2211_vm0 = vcmp.eq.f32.partialorder %v2210_v61, 8.507059e+37  ;;  %v2227_v25 = vand.u32 2147483648, %v2170_v40 }
 0x2fb   : > { %v2203_v58 = vsub.f32 1.0, %v2202_v42  ;;  %v2236_v59 = vsub.f32 1.0, %v2199_v39  ;;  %v2232_v63 = vmul.f32 %v2199_v39, %v2152_v53  ;;  %v2225_v27 = vand.u32 2147483647, %v2170_v40  ;;  %v8132_v39 = vld [vmem:[%s12896_s1 + $0x30] sm:$0xff]  ;;  %v8133_v53 = vld [vmem:[%s12896_s1 + $0x38] sm:$0xff] }
 0x2fc   : > { %vm2221_vm15 = vweird.f32 %v2170_v40  ;;  %v2228_v35 = vor.u32 1.1754944e-38, %v2227_v25  ;;  %v8157_v25 = vld [vmem:[%s12896_s1 + $0x58] sm:$0xff] }
 0x2fd   : > { %v2204_v62 = vmul.f32 %v8936_v38, %v2203_v58  ;;  %v2240_v3 = vmul.f32 %v2236_v59, %v10205_v20 }
 0x2ff   : > { %v10428_v6 = vadd.f32 %v2240_v3, %v2232_v63  ;;  %v2205_v0 = vadd.f32 %v8936_v38, %v2204_v62  ;;  %v8142_v3 = vld [vmem:[%s12897_s18 + $0x20] sm:$0xff]  ;;  %s12932_s18 = sld [smem:[#allocation39_spill]] }
 0x300   : > { %v8938_v9 = vpop.eup %8937 }
 0x301   : > { %v2217_v17 = vmul.f32 %v8938_v9, %v2170_v40  ;;  %8119 = vmatmul.msk.f32.gmra.mxu1 %vm12706_vm7, %v10428_v6  ;;  %8127 = vmatmul.msk.f32.gmra.mxu2 %vm12706_vm7, %v10428_v6  ;;  %v2209_v20 = vsel %vm2208_vm14, %v8936_v38, %v2205_v0  ;;  %vm2222_vm13 = vweird.f32 %v8938_v9  ;;  %v2149_v38 = vpop.permute.xlu2 %2148 }
 0x302   : > { %v2214_v19 = vsel %vm2211_vm0, %v2213_v16, %v2209_v20  ;;  %vm2223_vm14 = vmor %vm2221_vm15, %vm2222_vm13  ;;  %vm2226_vm0 = vcmp.eq.f32.partialorder %v2225_v27, 8.507059e+37  ;;  %v2336_v16 = vld [vmem:[%s12896_s1 + $0x8] sm:$0xff]  ;;  %v8144_v20 = vld [vmem:[%s12898_s2 + $0x30] sm:$0xff] }
 0x303   : > { %v2218_v22 = vsub.f32 1.0, %v2217_v17  ;;  %v2237_v23 = vsub.f32 1.0, %v2214_v19  ;;  %v2233_v29 = vmul.f32 %v2214_v19, %v2153_v11  ;;  %v2340_v17 = vld [vmem:[%s12898_s2 + $0x8] sm:$0xff]  ;;  %v2337_v19 = vld [vmem:[%s12896_s1 + $0x10] sm:$0xff]  ;;  %v8162_v27 = vld [vmem:[%s12898_s2 + $0x40] sm:$0xff] }
 0x304   : > { %v2341_v11 = vld [vmem:[%s12898_s2 + $0x10] sm:$0xff] }
 0x305   : > { %v2219_v28 = vmul.f32 %v8938_v9, %v2218_v22  ;;  %v2241_v31 = vmul.f32 %v2237_v23, %v10212_v26  ;;  %v2154_v26 = vadd.f32 %v2149_v38, %v2098_v32  ;;  %v8156_v22 = vld [vmem:[%s12896_s1 + $0x50] sm:$0xff]  ;;  %v2338_v23 = vld [vmem:[%s12896_s1 + $0x18] sm:$0xff]  ;;  %s12906_s1 = smov %s12905_s22 }
 0x307   : > { %v10435_v33 = vadd.f32 %v2241_v31, %v2233_v29  ;;  %v2220_v34 = vadd.f32 %v8938_v9, %v2219_v28  ;;  %v8163_v28 = vld [vmem:[%s12898_s2 + $0x48] sm:$0xff]  ;;  %v8164_v29 = vld [vmem:[%s12898_s2 + $0x50] sm:$0xff]  ;;  %v8165_v31 = vld [vmem:[%s12898_s2 + $0x58] sm:$0xff] }
 0x309   : > { %8120 = vmatmul.msk.f32.gmra.mxu1 %vm12706_vm7, %v10435_v33  ;;  %8128 = vmatmul.msk.f32.gmra.mxu2 %vm12706_vm7, %v10435_v33  ;;  %v2224_v37 = vsel %vm2223_vm14, %v8938_v9, %v2220_v34  ;;  %v2339_v9 = vld [vmem:[%s12898_s2] sm:$0xff]  ;;  %s12933_s2 = smov %s12932_s18 }
 0x30a   : > { %v2229_v41 = vsel %vm2226_vm0, %v2228_v35, %v2224_v37 }
 0x30b   : > { %v2238_v42 = vsub.f32 1.0, %v2229_v41  ;;  %v2234_v40 = vmul.f32 %v2229_v41, %v2154_v26  ;;  %v2639_v41 = vpop.permute.xlu0 %2638 }
 0x30d   : > { %v2242_v13 = vmul.f32 %v2238_v42, %v10218_v30  ;;  %v8130_v30 = vld [vmem:[%s12895_s15 + $0x20] sm:$0xff]  ;;  %s12930_s15 = sld [smem:[#allocation37_spill]] }
 0x30f   : > { %v10442_v45 = vadd.f32 %v2242_v13, %v2234_v40 }
 0x311   : > { %8121 = vmatmul.msk.f32.gmra.mxu1 %vm12706_vm7, %v10442_v45  ;;  %8129 = vmatmul.msk.f32.gmra.mxu2 %vm12706_vm7, %v10442_v45 }
 0x312   : > { %2372 = vmatpush.msra.mxu3 %v10442_v45  ;;  %2459 = vmatpush.msrb.mxu1 %v10442_v45 }
 0x314   : > { %2373 = vmatpush.msra.mxu3 %v10435_v33  ;;  %2460 = vmatpush.msrb.mxu1 %v10435_v33 }
 0x316   : > { %2374 = vmatpush.msra.mxu3 %v10428_v6  ;;  %2461 = vmatpush.msrb.mxu1 %v10428_v6 }
 0x318   : > { %2375 = vmatpush.msra.mxu3 %v10417_v36  ;;  %2462 = vmatpush.msrb.mxu1 %v10417_v36 }
 0x319   : > { %8134 = vmatmul.msk.f32.vlgmr.msra.gmra.mxu3 %vm12706_vm7, %v8130_v30  ;;  %8146 = vmatmul.msk.f32.vlgmr.msrb.gmra.mxu1 %vm12706_vm7, %v8142_v3  ;;  %v2624_v30 = vpop.permute.xlu0 %2623 }
 0x321   : > { %8135 = vmatmul.msk.f32.gmra.mxu3 %vm12706_vm7, %v8131_v52  ;;  %8147 = vmatmul.msk.f32.gmra.mxu1 %vm12706_vm7, %v8143_v10 }
 0x329   : > { %8136 = vmatmul.msk.f32.gmra.mxu3 %vm12706_vm7, %v8132_v39  ;;  %8148 = vmatmul.msk.f32.gmra.mxu1 %vm12706_vm7, %v8144_v20 }
 0x331   : > { %8137 = vmatmul.msk.f32.gmra.mxu3 %vm12706_vm7, %v8133_v53  ;;  %8149 = vmatmul.msk.f32.gmra.mxu1 %vm12706_vm7, %v8145_v21 }
 0x376   : > { %v2285_v56 = vpop.f32.mrf.mxu1 }
 0x37c   : > { %v2323_v58 = vpop.f32.mrf.mxu2 }
 0x37e   : > { %v2288_v59 = vpop.f32.mrf.mxu1 }
 0x384   : > { %v2326_v60 = vpop.f32.mrf.mxu2 }
 0x386   : > { %v2291_v61 = vpop.f32.mrf.mxu1 }
 0x38c   : > { %v2329_v62 = vpop.f32.mrf.mxu2 }
 0x38e   : > { %v2294_v63 = vpop.f32.mrf.mxu1 }
 0x38f   : > { %2413 = vmatpush.msrb.mxu0 %v2294_v63  ;;  %2500 = vmatpush.msra.mxu2 %v2294_v63 }
 0x391   : > { %2414 = vmatpush.msrb.mxu0 %v2291_v61  ;;  %2501 = vmatpush.msra.mxu2 %v2291_v61 }
 0x393   : > { %2415 = vmatpush.msrb.mxu0 %v2288_v59  ;;  %2502 = vmatpush.msra.mxu2 %v2288_v59 }
 0x394   : > { %v2332_v0 = vpop.f32.mrf.mxu2 }
 0x395   : > { %2416 = vmatpush.msrb.mxu0 %v2285_v56  ;;  %2503 = vmatpush.msra.mxu2 %v2285_v56 }
 0x396   : > { %2546 = vmatpush.msrb.mxu3 %v2332_v0  ;;  %8138 = vmatmul.msk.f32.vlgmr.msrb.gmra.mxu0 %vm12706_vm7, %v2335_v5  ;;  %v10504_v5 = vpop.f32.mrf.mxu1 }
 0x397   : > { %2596 = vmatpush.msra.mxu0 %v2332_v0  ;;  %8150 = vmatmul.msk.f32.vlgmr.msra.gmra.mxu2 %vm12706_vm7, %v2339_v9 }
 0x398   : > { %2547 = vmatpush.msrb.mxu3 %v2329_v62 }
 0x399   : > { %2597 = vmatpush.msra.mxu0 %v2329_v62 }
 0x39a   : > { %2548 = vmatpush.msrb.mxu3 %v2326_v60 }
 0x39b   : > { %2598 = vmatpush.msra.mxu0 %v2326_v60  ;;  %v2629_v60 = vpop.permute.xlu2 %2628 }
 0x39c   : > { %2549 = vmatpush.msrb.mxu3 %v2323_v58  ;;  %v2377_v32 = vpop.f32.mrf.mxu3 }
 0x39d   : > { %8158 = vmatmul.msk.f32.vlgmr.msrb.gmra.mxu3 %vm12706_vm7, %v8154_v15  ;;  %2599 = vmatpush.msra.mxu0 %v2323_v58 }
 0x39e   : > { %8139 = vmatmul.msk.f32.gmra.mxu0 %vm12706_vm7, %v2336_v16  ;;  %v2634_v16 = vpop.permute.xlu1 %2633 }
 0x39f   : > { %8151 = vmatmul.msk.f32.gmra.mxu2 %vm12706_vm7, %v2340_v17 }
 0x3a4   : > { %v2380_v34 = vpop.f32.mrf.mxu3 }
 0x3a5   : > { %8159 = vmatmul.msk.f32.gmra.mxu3 %vm12706_vm7, %v8155_v18 }
 0x3a6   : > { %8140 = vmatmul.msk.f32.gmra.mxu0 %vm12706_vm7, %v2337_v19 }
 0x3a7   : > { %8152 = vmatmul.msk.f32.gmra.mxu2 %vm12706_vm7, %v2341_v11 }
 0x3ac   : > { %v2383_v35 = vpop.f32.mrf.mxu3 }
 0x3ad   : > { %8160 = vmatmul.msk.f32.gmra.mxu3 %vm12706_vm7, %v8156_v22 }
 0x3ae   : > { %8141 = vmatmul.msk.f32.gmra.mxu0 %vm12706_vm7, %v2338_v23 }
 0x3af   : > { %8153 = vmatmul.msk.f32.gmra.mxu2 %vm12706_vm7, %v2342_v24 }
 0x3b4   : > { %v2386_v38 = vpop.f32.mrf.mxu3 }
 0x3b5   : > { %8161 = vmatmul.msk.f32.gmra.mxu3 %vm12706_vm7, %v8157_v25  ;;  %v2467_v25 = vpop.f32.mrf.mxu1 }
 0x3b6   : > { %8166 = vmatmul.msk.f32.vlgmr.msra.gmra.mxu0 %vm12706_vm7, %v8162_v27 }
 0x3be   : > { %8167 = vmatmul.msk.f32.gmra.mxu0 %vm12706_vm7, %v8163_v28 }
 0x3c6   : > { %8168 = vmatmul.msk.f32.gmra.mxu0 %vm12706_vm7, %v8164_v29 }
 0x3ce   : > { %8169 = vmatmul.msk.f32.gmra.mxu0 %vm12706_vm7, %v8165_v31 }
 0x413   : > { %v2418_v37 = vpop.f32.mrf.mxu0 }
 0x414   : > { %v2419_v42 = vadd.f32 %v2418_v37, %v2377_v32 }
 0x41a   : > { %v10506_v0 = vpop.f32.mrf.mxu2 }
 0x41b   : > { %v2421_v26 = vpop.f32.mrf.mxu0 }
 0x41c   : > { %v2422_v53 = vadd.f32 %v2421_v26, %v2380_v34 }
 0x420   : > { %v2551_v40 = vpop.f32.mrf.mxu3 }
 0x421   : > { %v2563_v13 = vadd.f32 %v2551_v40, %v2419_v42  ;;  %v2470_v42 = vpop.f32.mrf.mxu1 }
 0x422   : > { %v2508_v27 = vpop.f32.mrf.mxu2 }
 0x423   : > { %v2424_v52 = vpop.f32.mrf.mxu0  ;;  %v2641_v39 = vadd.f32 %v2624_v30, %v2563_v13 }
 0x424   : > { %v2425_v3 = vadd.f32 %v2424_v52, %v2383_v35 }
 0x425   : > { %v8170_v56 = vmul.f32 -1.442695, %v2641_v39 }
 0x427   : > { %8939 = vpow2.f32 %v8170_v56 }
 0x428   : > { %v2554_v58 = vpop.f32.mrf.mxu3 }
 0x429   : > { %v2564_v59 = vadd.f32 %v2554_v58, %v2422_v53 }
 0x42a   : > { %v2511_v40 = vpop.f32.mrf.mxu2 }
 0x42b   : > { %v2642_v61 = vadd.f32 %v2629_v60, %v2564_v59  ;;  %v2427_v62 = vpop.f32.mrf.mxu0 }
 0x42c   : > { %v2428_v22 = vadd.f32 %v2427_v62, %v2386_v38  ;;  %v2509_v62 = vadd.f32 %v2508_v27, %v2467_v25 }
 0x42d   : > { %v8171_v63 = vmul.f32 -1.442695, %v2642_v61  ;;  %v8940_v15 = vpop.eup %8939 }
 0x42e   : > { %v10510_v19 = vadd.f32 1.0, %v8940_v15 }
 0x42f   : > { %8941 = vpow2.f32 %v8171_v63  ;;  %v2512_v63 = vadd.f32 %v2511_v40, %v2470_v42  ;;  %v2883_v42 = vmul.u32 2, %v10085_v46 }
 0x430   : > { %v2557_v9 = vpop.f32.mrf.mxu3  ;;  %vm2694_vm13 = vweird.f32 %v10510_v19 }
 0x431   : > { %v2565_v10 = vadd.f32 %v2557_v9, %v2425_v3  ;;  %v2473_v9 = vpop.f32.mrf.mxu1 }
 0x433   : > { %v2643_v17 = vadd.f32 %v2634_v16, %v2565_v10  ;;  %v10508_v20 = vpop.f32.mrf.mxu0  ;;  %v2514_v10 = vpop.f32.mrf.mxu2 }
 0x435   : > { %v8942_v18 = vpop.eup %8941  ;;  %v8172_v11 = vmul.f32 -1.442695, %v2643_v17 }
 0x436   : > { %v10512_v21 = vadd.f32 1.0, %v8942_v18 }
 0x437   : > { %8943 = vpow2.f32 %v8172_v11 }
 0x438   : > { %v2560_v23 = vpop.f32.mrf.mxu3  ;;  %8945 = vrcp.f32 %v10510_v19  ;;  %v2715_v25 = vand.u32 2147483648, %v10512_v21  ;;  %vm2709_vm7 = vweird.f32 %v10512_v21 }
 0x439   : > { %v2566_v24 = vadd.f32 %v2560_v23, %v2428_v22  ;;  %8947 = vrcp.f32 %v10512_v21  ;;  %v2698_v23 = vand.u32 2147483647, %v10510_v19 }
 0x43b   : > { %v2644_v28 = vadd.f32 %v2639_v41, %v2566_v24  ;;  %v10516_v34 = vpop.f32.mrf.mxu0  ;;  %v2700_v24 = vand.u32 2147483648, %v10510_v19 }
 0x43d   : > { %v8944_v29 = vpop.eup %8943  ;;  %v8173_v31 = vmul.f32 -1.442695, %v2644_v28  ;;  %v2515_v28 = vadd.f32 %v2514_v10, %v2473_v9 }
 0x43e   : > { %v2687_v32 = vadd.f32 1.0, %v8944_v29  ;;  %v10518_v35 = vpop.eup %8945 }
 0x43f   : > { %8949 = vpow2.f32 %v8173_v31  ;;  %v10520_v37 = vpop.eup %8947  ;;  %v2690_v38 = vmul.f32 %v10518_v35, %v10510_v19  ;;  %vm2695_vm14 = vweird.f32 %v10518_v35  ;;  %v2713_v31 = vand.u32 2147483647, %v10512_v21 }
 0x440   : > { %8951 = vrcp.f32 %v2687_v32  ;;  %v2705_v26 = vmul.f32 %v10520_v37, %v10512_v21  ;;  %v2728_v17 = vand.u32 2147483647, %v2687_v32  ;;  %v2730_v18 = vand.u32 2147483648, %v2687_v32  ;;  %vm10547_vm10 = vmor %vm2694_vm13, %vm2695_vm14 }
 0x441   : > { %v2691_v30 = vsub.f32 1.0, %v2690_v38  ;;  %vm2710_vm0 = vweird.f32 %v10520_v37  ;;  %vm2724_vm12 = vweird.f32 %v2687_v32 }
 0x442   : > { %v2706_v39 = vsub.f32 1.0, %v2705_v26  ;;  %vm2729_vm13 = vcmp.eq.f32.partialorder %v2728_v17, 8.507059e+37  ;;  %v2731_v19 = vor.u32 1.1754944e-38, %v2730_v18 }
 0x443   : > { %v2607_v56 = vpop.f32.mrf.mxu0  ;;  %v2692_v59 = vmul.f32 %v10518_v35, %v2691_v30  ;;  %v2667_v30 = vpop.permute.xlu1 %2666 }
 0x444   : > { %v2707_v60 = vmul.f32 %v10520_v37, %v2706_v39  ;;  %v2615_v10 = vadd.f32 %v2607_v56, %v2512_v63  ;;  %v2657_v56 = vpop.permute.xlu0 %2656 }
 0x445   : > { %v8950_v41 = vpop.eup %8949  ;;  %v2693_v16 = vadd.f32 %v10518_v35, %v2692_v59 }
 0x446   : > { %v8952_v13 = vpop.eup %8951  ;;  %v10526_v52 = vadd.f32 1.0, %v8950_v41  ;;  %v2708_v11 = vadd.f32 %v10520_v37, %v2707_v60 }
 0x447   : > { %v2720_v53 = vmul.f32 %v8952_v13, %v2687_v32  ;;  %vm2725_vm15 = vweird.f32 %v8952_v13  ;;  %v2697_v26 = vsel %vm10547_vm10, %v10518_v35, %v2693_v16  ;;  %v2701_v35 = vor.u32 1.1754944e-38, %v2700_v24 }
 0x448   : > { %8953 = vrcp.f32 %v10526_v52  ;;  %vm10541_vm11 = vmor %vm2724_vm12, %vm2725_vm15  ;;  %v2745_v41 = vand.u32 2147483648, %v10526_v52  ;;  %v2743_v39 = vand.u32 2147483647, %v10526_v52  ;;  %vm2699_vm15 = vcmp.eq.f32.partialorder %v2698_v23, 8.507059e+37 }
 0x449   : > { %v2721_v58 = vsub.f32 1.0, %v2720_v53  ;;  %vm10558_vm12 = vmor %vm2709_vm7, %vm2710_vm0  ;;  %v2716_v53 = vor.u32 1.1754944e-38, %v2715_v25  ;;  %vm2714_vm7 = vcmp.eq.f32.partialorder %v2713_v31, 8.507059e+37  ;;  %vm2739_vm10 = vweird.f32 %v10526_v52  ;;  %v2662_v25 = vpop.permute.xlu2 %2661 }
 0x44a   : > { %v2712_v21 = vsel %vm10558_vm12, %v10520_v37, %v2708_v11  ;;  %v2746_v37 = vor.u32 1.1754944e-38, %v2745_v41  ;;  %vm2744_vm0 = vcmp.eq.f32.partialorder %v2743_v39, 8.507059e+37  ;;  %v2614_v11 = vadd.f32 %v10516_v34, %v2509_v62  ;;  %v2765_v41 = vld [vmem:[%s12905_s22] sm:$0xff]  ;;  %v2768_v39 = vld [vmem:[%s12906_s1 + $0x18] sm:$0xff]  ;;  %s12967_s22 = sld [smem:[#allocation41_spill]] }
 0x44b   : > { %v2722_v61 = vmul.f32 %v8952_v13, %v2721_v58  ;;  %v2610_v40 = vpop.f32.mrf.mxu0  ;;  %v2717_v9 = vsel %vm2714_vm7, %v2716_v53, %v2712_v21  ;;  %v2652_v63 = vpop.permute.xlu1 %2651  ;;  %vm10579_vm12 = vcmp.eq.s32.totalorder %v10081_v44, %v2883_v42  ;;  %v8178_v21 = vld [vmem:[%s12906_s1 + $0x20] sm:$0xff]  ;;  %v8180_v53 = vld [vmem:[%s12906_s1 + $0x30] sm:$0xff] }
 0x44c   : > { %v2616_v59 = vadd.f32 %v2610_v40, %v2515_v28  ;;  %v2671_v28 = vadd.f32 %v2662_v25, %v2615_v10  ;;  %8194 = vmatpush.msk.msrb.mxu0 %vm10579_vm12, %v12738_v54 }
 0x44d   : > { %v2723_v3 = vadd.f32 %v8952_v13, %v2722_v61  ;;  %v2506_v61 = vadd.f32 %v10506_v0, %v10504_v5 }
 0x44e   : > { %v8954_v15 = vpop.eup %8953  ;;  %v2672_v23 = vadd.f32 %v2667_v30, %v2616_v59  ;;  %v2767_v30 = vld [vmem:[%s12906_s1 + $0x10] sm:$0xff]  ;;  %v2881_v59 = vmul.u32 2, %v10094_v49 }
 0x44f   : > { %v2735_v22 = vmul.f32 %v8954_v15, %v10526_v52  ;;  %v2727_v32 = vsel %vm10541_vm11, %v8952_v13, %v2723_v3  ;;  %vm2740_vm11 = vweird.f32 %v8954_v15  ;;  %v2702_v3 = vsel %vm2699_vm15, %v2701_v35, %v2697_v26  ;;  %v8179_v35 = vld [vmem:[%s12906_s1 + $0x28] sm:$0xff] }
 0x450   : > { %v2732_v58 = vsel %vm2729_vm13, %v2731_v19, %v2727_v32  ;;  %vm2741_vm14 = vmor %vm2739_vm10, %vm2740_vm11  ;;  %v2613_v52 = vadd.f32 %v10508_v20, %v2506_v61  ;;  %v2753_v27 = vsub.f32 1.0, %v2702_v3  ;;  %vm12911_vm11 = vcmask 261120  }
 0x451   : > { %v2736_v38 = vsub.f32 1.0, %v2735_v22  ;;  %v2755_v16 = vsub.f32 1.0, %v2732_v58  ;;  %v2754_v22 = vsub.f32 1.0, %v2717_v9  ;;  %v2751_v31 = vmul.f32 %v2732_v58, %v2671_v28  ;;  %vm12912_vm15 = vmmov %vm12911_vm11  ;;  %v8181_v58 = vld [vmem:[%s12906_s1 + $0x38] sm:$0xff] }
 0x452   : > { %v2669_v62 = vadd.f32 %v2652_v63, %v2613_v52  ;;  %vm12913_vm7 = vmmov %vm12911_vm11  ;;  %v10616_v61 = vadd.s32 1, %v2883_v42  ;;  %v10640_v10 = vadd.s32 1, %v2881_v59  ;;  %v10690_v42 = vadd.s32 32, %v10079_v43 }
 0x453   : > { %v2737_v13 = vmul.f32 %v8954_v15, %v2736_v38  ;;  %v2759_v29 = vmul.f32 %v2755_v16, %v10435_v33  ;;  %v2758_v34 = vmul.f32 %v2754_v22, %v10428_v6  ;;  %v2757_v38 = vmul.f32 %v2753_v27, %v10417_v36  ;;  %vm12914_vm10 = vmmov %vm12913_vm7 }
 0x454   : > { %v2882_v33 = vmul.u32 2, %v10091_v48  ;;  %v12907_v6 = vmov 0  ;;  %v12909_v36 = vmov 0 }
 0x455   : > { %v2738_v60 = vadd.f32 %v8954_v15, %v2737_v13  ;;  %v2763_v20 = vadd.f32 %v2759_v29, %v2751_v31  ;;  %v12908_v6 = vsel %vm10579_vm12, 4294967295, %v12907_v6  ;;  %v2766_v13 = vld [vmem:[%s12906_s1 + $0x8] sm:$0xff]  ;;  %s12931_s1 = smov %s12930_s15 }
 0x456   : > { %vm10584_vm13 = vcmp.eq.s32.totalorder %v10081_v44, %v2882_v33 }
 0x457   : > { %v2742_v17 = vsel %vm2741_vm14, %v8954_v15, %v2738_v60  ;;  %v2670_v15 = vadd.f32 %v2657_v56, %v2614_v11  ;;  %v12910_v36 = vsel %vm10584_vm13, 4294967295, %v12909_v36  ;;  %8195 = vmatpush.msk.msrb.mxu0 %vm10584_vm13, %v12738_v54  ;;  %vm12915_vm14 = vmmov %vm12913_vm7 }
 0x458   : > { %v2747_v18 = vsel %vm2744_vm0, %v2746_v37, %v2742_v17  ;;  %vm12916_vm0 = vmmov %vm12913_vm7  ;;  %v10629_v37 = vadd.s32 1, %v2882_v33  ;;  %v2776_v17 = vpop.permute.xlu2 %2775 }
 0x459   : > { %v2756_v24 = vsub.f32 1.0, %v2747_v18  ;;  %v2752_v5 = vmul.f32 %v2747_v18, %v2672_v23  ;;  %v2750_v26 = vmul.f32 %v2717_v9, %v2670_v15  ;;  %vm12917_vm13 = vmmov %vm12916_vm0  ;;  %v2781_v23 = vpop.permute.xlu0 %2780 }
 0x45a   : > { %vm12918_vm12 = vmmov %vm12916_vm0 }
 0x45b   : > { %v2760_v0 = vmul.f32 %v2756_v24, %v10442_v45  ;;  %v2749_v45 = vmul.f32 %v2702_v3, %v2669_v62  ;;  %v2762_v19 = vadd.f32 %v2758_v34, %v2750_v26  ;;  %v2880_v3 = vmul.u32 2, %v10079_v43 }
 0x45c   : > { %v10676_v26 = vadd.s32 48, %v10079_v43 }
 0x45d   : > { %v2764_v32 = vadd.f32 %v2760_v0, %v2752_v5  ;;  %v2761_v40 = vadd.f32 %v2757_v38, %v2749_v45  ;;  %v10648_v16 = vadd.s32 1, %v2880_v3  ;;  %v2786_v5 = vpop.permute.xlu1 %2785  ;;  %v10669_v38 = vadd.s32 56, %v10079_v43 }
 0x45f   : > { %2817 = vmatpush.msra.mxu1 %v2764_v32  ;;  %8725 = vmatpush.msra.mxu3 %v2764_v32 }
 0x460   : > { %2863 = vmatpush.msrb.mxu2 %v2764_v32  ;;  %v2791_v15 = vpop.permute.xlu2 %2790 }
 0x461   : > { %2818 = vmatpush.msra.mxu1 %v2763_v20  ;;  %8726 = vmatpush.msra.mxu3 %v2763_v20 }
 0x462   : > { %2864 = vmatpush.msrb.mxu2 %v2763_v20  ;;  %v10679_v20 = vadd.s32 40, %v10079_v43 }
 0x463   : > { %2819 = vmatpush.msra.mxu1 %v2762_v19  ;;  %8727 = vmatpush.msra.mxu3 %v2762_v19 }
 0x464   : > { %2865 = vmatpush.msrb.mxu2 %v2762_v19 }
 0x465   : > { %2820 = vmatpush.msra.mxu1 %v2761_v40  ;;  %8728 = vmatpush.msra.mxu3 %v2761_v40 }
 0x466   : > { %2866 = vmatpush.msrb.mxu2 %v2761_v40  ;;  %8174 = vmatmul.msk.f32.vlgmr.msra.gmra.mxu1 %vm12911_vm11, %v2765_v41  ;;  %vm10612_vm11 = vcmp.eq.s32.totalorder %v10081_v44, %v2881_v59  ;;  %v8226_v59 = vld [vmem:[%s12930_s15 + $0x20] sm:$0xff]  ;;  %s12999_s15 = sld [smem:[#allocation44_spill]] }
 0x467   : > { %8176 = vmatmul.msk.f32.vlgmr.msra.gmra.mxu3 %vm12912_vm15, %v2767_v30  ;;  %8182 = vmatmul.msk.f32.vlgmr.msrb.gmra.mxu2 %vm12913_vm7, %v8178_v21  ;;  %vm12712_vm15 = vcmp.eq.s32.totalorder %v10081_v44, %v10629_v37  ;;  %vm12710_vm7 = vcmp.eq.s32.totalorder %v10081_v44, %v10640_v10 }
 0x468   : > { %8196 = vmatpush.msk.msrb.mxu0 %vm10612_vm11, %v12738_v54 }
 0x46e   : > { %8175 = vmatmul.msk.f32.gmra.mxu1 %vm12914_vm10, %v2766_v13  ;;  %vm12711_vm10 = vcmp.eq.s32.totalorder %v10081_v44, %v10648_v16 }
 0x46f   : > { %8177 = vmatmul.msk.f32.gmra.mxu3 %vm12915_vm14, %v2768_v39  ;;  %8183 = vmatmul.msk.f32.gmra.mxu2 %vm12916_vm0, %v8179_v35  ;;  %vm12923_vm14 = vmmov %vm12916_vm0 }
 0x477   : > { %8184 = vmatmul.msk.f32.gmra.mxu2 %vm12917_vm13, %v8180_v53  ;;  %vm12713_vm13 = vcmp.eq.s32.totalorder %v10081_v44, %v10616_v61 }
 0x478   : > { %8186 = vmatpush.msk.msrb.mxu3 %vm12713_vm13, %v12738_v54  ;;  %vm12928_vm13 = vmmov %vm12916_vm0 }
 0x47a   : > { %8187 = vmatpush.msk.msrb.mxu3 %vm12712_vm15, %v12738_v54  ;;  %vm12926_vm15 = vmmov %vm12916_vm0 }
 0x47c   : > { %8188 = vmatpush.msk.msrb.mxu3 %vm12710_vm7, %v12738_v54  ;;  %vm12924_vm7 = vmmov %vm12916_vm0 }
 0x47e   : > { %8189 = vmatpush.msk.msrb.mxu3 %vm12711_vm10, %v12738_v54  ;;  %vm12925_vm10 = vmmov %vm12916_vm0 }
 0x47f   : > { %8185 = vmatmul.msk.f32.gmra.mxu2 %vm12918_vm12, %v8181_v58  ;;  %vm10625_vm12 = vcmp.eq.s32.totalorder %v10081_v44, %v2880_v3  ;;  %v8227_v3 = vld [vmem:[%s12931_s1 + $0x28] sm:$0xff] }
 0x480   : > { %8197 = vmatpush.msk.msrb.mxu0 %vm10625_vm12, %v12738_v54 }
 0x4e3   : > { %v2822_v18 = vpop.f32.mrf.mxu1 }
 0x4e4   : > { %v2823_v11 = vadd.f32 %v2822_v18, %v2776_v17  ;;  %v8229_v18 = vld [vmem:[%s12931_s1 + $0x38] sm:$0xff] }
 0x4e6   : > { %8198 = vmatmul.msk.f32.vlgmr.msrb.gmra.mxu0 %vm12923_vm14, %v2823_v11  ;;  %vm12927_vm14 = vmmov %vm12916_vm0 }
 0x4ea   : > { %v2868_v22 = vpop.f32.mrf.mxu2  ;;  %v2828_v27 = vpop.f32.mrf.mxu3 }
 0x4eb   : > { %v2869_v24 = vadd.f32 %v2868_v22, %v2776_v17  ;;  %v2825_v25 = vpop.f32.mrf.mxu1  ;;  %v2829_v29 = vadd.f32 %v2828_v27, %v2786_v5  ;;  %v8228_v17 = vld [vmem:[%s12931_s1 + $0x30] sm:$0xff] }
 0x4ec   : > { %v2826_v52 = vadd.f32 %v2825_v25, %v2781_v23 }
 0x4ed   : > { %8190 = vmatmul.msk.f32.vlgmr.msrb.gmra.mxu3 %vm12916_vm0, %v2869_v24 }
 0x4ee   : > { %8199 = vmatmul.msk.f32.gmra.mxu0 %vm12924_vm7, %v2826_v52  ;;  %vm12929_vm7 = vmmov %vm12916_vm0  ;;  %vm12722_vm0 = vcmp.eq.s32.totalorder %v10676_v26, %v10157_v4 }
 0x4f2   : > { %v2871_v28 = vpop.f32.mrf.mxu2  ;;  %v2831_v56 = vpop.f32.mrf.mxu3 }
 0x4f3   : > { %v2872_v0 = vadd.f32 %v2871_v28, %v2781_v23  ;;  %v2832_v32 = vadd.f32 %v2831_v56, %v2791_v15  ;;  %v8238_v28 = vld [vmem:[%s12932_s18 + $0x20] sm:$0xff]  ;;  %v8239_v56 = vld [vmem:[%s12933_s2 + $0x28] sm:$0xff]  ;;  %s13125_s18 = sld [smem:[#allocation52_spill]] }
 0x4f5   : > { %8191 = vmatmul.msk.f32.gmra.mxu3 %vm12925_vm10, %v2872_v0  ;;  %vm12715_vm10 = vcmp.eq.s32.totalorder %v10669_v38, %v10088_v47 }
 0x4f6   : > { %8200 = vmatmul.msk.f32.gmra.mxu0 %vm12926_vm15, %v2829_v29  ;;  %vm12714_vm15 = vcmp.eq.s32.totalorder %v10669_v38, %v10157_v4  ;;  %8202 = vmatpush.msk.msrb.mxu1 %vm12715_vm10, %v12738_v54  ;;  %vm12716_vm10 = vcmp.eq.s32.totalorder %v10690_v42, %v10157_v4  ;;  %v3081_v29 = vld [vmem:[%s12933_s2] sm:$0xff] }
 0x4f7   : > { %8214 = vmatpush.msk.msra.mxu2 %vm12714_vm15, %v12738_v54  ;;  %vm12719_vm15 = vcmp.eq.s32.totalorder %v10690_v42, %v10088_v47 }
 0x4f9   : > { %8215 = vmatpush.msk.msra.mxu2 %vm12722_vm0, %v12738_v54 }
 0x4fa   : > { %v2874_v63 = vpop.f32.mrf.mxu2 }
 0x4fb   : > { %v2875_v31 = vadd.f32 %v2874_v63, %v2786_v5  ;;  %v3077_v5 = vld [vmem:[%s12931_s1] sm:$0xff] }
 0x4fc   : > { %v8250_v63 = vld [vmem:[%s12931_s1 + $0x40] sm:$0xff] }
 0x4fd   : > { %8192 = vmatmul.msk.f32.gmra.mxu3 %vm12927_vm14, %v2875_v31  ;;  %vm12721_vm14 = vcmp.eq.s32.totalorder %v10679_v20, %v10088_v47  ;;  %v3082_v31 = vld [vmem:[%s12933_s2 + $0x8] sm:$0xff] }
 0x4fe   : > { %8201 = vmatmul.msk.f32.gmra.mxu0 %vm12928_vm13, %v2832_v32  ;;  %vm12723_vm13 = vcmp.eq.s32.totalorder %v10676_v26, %v10088_v47  ;;  %v8240_v32 = vld [vmem:[%s12933_s2 + $0x30] sm:$0xff] }
 0x4ff   : > { %8203 = vmatpush.msk.msrb.mxu1 %vm12723_vm13, %v12738_v54 }
 0x501   : > { %8204 = vmatpush.msk.msrb.mxu1 %vm12721_vm14, %v12738_v54 }
 0x502   : > { %v2877_v34 = vpop.f32.mrf.mxu2 }
 0x503   : > { %v2878_v62 = vadd.f32 %v2877_v34, %v2791_v15  ;;  %8205 = vmatpush.msk.msrb.mxu1 %vm12719_vm15, %v12738_v54  ;;  %vm12934_vm15 = vcmask 261120   ;;  %v3078_v15 = vld [vmem:[%s12931_s1 + $0x8] sm:$0xff] }
 0x504   : > { %v8251_v34 = vld [vmem:[%s12931_s1 + $0x48] sm:$0xff] }
 0x505   : > { %8193 = vmatmul.msk.f32.gmra.mxu3 %vm12929_vm7, %v2878_v62  ;;  %vm12720_vm7 = vcmp.eq.s32.totalorder %v10679_v20, %v10157_v4  ;;  %8206 = vmatpush.msk.msrb.mxu1 %vm10098_vm1, %v12738_v54  ;;  %v3079_v62 = vld [vmem:[%s12931_s1 + $0x10] sm:$0xff] }
 0x506   : > { %8216 = vmatpush.msk.msra.mxu2 %vm12720_vm7, %v12738_v54  ;;  %vm12935_vm7 = vmmov %vm12934_vm15 }
 0x507   : > { %8207 = vmatpush.msk.msrb.mxu1 %vm10104_vm2, %v12738_v54  ;;  %vm12936_vm14 = vmmov %vm12935_vm7 }
 0x508   : > { %8217 = vmatpush.msk.msra.mxu2 %vm12716_vm10, %v12738_v54  ;;  %vm12724_vm10 = vcmask 523264   ;;  %vm12937_vm0 = vmmov %vm12935_vm7 }
 0x509   : > { %8208 = vmatpush.msk.msrb.mxu1 %vm10118_vm3, %v12738_v54  ;;  %vm12944_vm13 = vmmov %vm12937_vm0 }
 0x50a   : > { %8218 = vmatpush.msk.msra.mxu2 %vm10163_vm5, %v12738_v54 }
 0x50b   : > { %8209 = vmatpush.msk.msrb.mxu1 %vm10137_vm4, %v12738_v54  ;;  %vm12953_vm4 = vmmov %vm12937_vm0 }
 0x50c   : > { %8219 = vmatpush.msk.msra.mxu2 %vm10172_vm6, %v12738_v54 }
 0x50e   : > { %8220 = vmatpush.msk.msra.mxu2 %vm10182_vm8, %v12738_v54 }
 0x510   : > { %8221 = vmatpush.msk.msra.mxu2 %vm10193_vm9, %v12738_v54  ;;  %vm12949_vm9 = vmmov %vm12937_vm0 }
 0x563   : > { %v2974_v33 = vpop.f32.mrf.mxu0 }
 0x56b   : > { %v2977_v40 = vpop.f32.mrf.mxu0 }
 0x570   : > { %v2933_v45 = vpop.f32.mrf.mxu3 }
 0x571   : > { %v10752_v19 = vadd.f32 %v2974_v33, %v2933_v45  ;;  %v3083_v33 = vld [vmem:[%s12933_s2 + $0x10] sm:$0xff]  ;;  %v8241_v45 = vld [vmem:[%s12933_s2 + $0x38] sm:$0xff] }
 0x573   : > { %8210 = vmatmul.msk.f32.vlgmr.msrb.gmra.mxu1 %vm12724_vm10, %v10752_v19  ;;  %8222 = vmatmul.msk.f32.vlgmr.msra.gmra.mxu2 %vm12724_vm10, %v10752_v19  ;;  %v2980_v21 = vpop.f32.mrf.mxu0 }
 0x578   : > { %v2936_v41 = vpop.f32.mrf.mxu3 }
 0x579   : > { %v10758_v30 = vadd.f32 %v2977_v40, %v2936_v41  ;;  %v8252_v40 = vld [vmem:[%s12931_s1 + $0x50] sm:$0xff]  ;;  %v3080_v41 = vld [vmem:[%s12931_s1 + $0x18] sm:$0xff] }
 0x57b   : > { %8211 = vmatmul.msk.f32.gmra.mxu1 %vm12724_vm10, %v10758_v30  ;;  %8223 = vmatmul.msk.f32.gmra.mxu2 %vm12724_vm10, %v10758_v30  ;;  %v2983_v35 = vpop.f32.mrf.mxu0 }
 0x580   : > { %v2939_v13 = vpop.f32.mrf.mxu3 }
 0x581   : > { %v10764_v39 = vadd.f32 %v2980_v21, %v2939_v13  ;;  %v3084_v21 = vld [vmem:[%s12933_s2 + $0x18] sm:$0xff] }
 0x582   : > { %v8253_v13 = vld [vmem:[%s12931_s1 + $0x58] sm:$0xff]  ;;  %s12968_s1 = smov %s12967_s22 }
 0x583   : > { %8212 = vmatmul.msk.f32.gmra.mxu1 %vm12724_vm10, %v10764_v39  ;;  %8224 = vmatmul.msk.f32.gmra.mxu2 %vm12724_vm10, %v10764_v39 }
 0x588   : > { %v2942_v53 = vpop.f32.mrf.mxu3 }
 0x589   : > { %v10770_v58 = vadd.f32 %v2983_v35, %v2942_v53  ;;  %v8258_v35 = vld [vmem:[%s12933_s2 + $0x40] sm:$0xff]  ;;  %v8259_v53 = vld [vmem:[%s12933_s2 + $0x48] sm:$0xff] }
 0x58b   : > { %8213 = vmatmul.msk.f32.gmra.mxu1 %vm12724_vm10, %v10770_v58  ;;  %8225 = vmatmul.msk.f32.gmra.mxu2 %vm12724_vm10, %v10770_v58  ;;  %vm12945_vm10 = vmmov %vm12937_vm0 }
 0x58c   : > { %3114 = vmatpush.msra.mxu3 %v10770_v58  ;;  %3201 = vmatpush.msra.mxu1 %v10770_v58 }
 0x58e   : > { %3115 = vmatpush.msra.mxu3 %v10764_v39  ;;  %3202 = vmatpush.msra.mxu1 %v10764_v39 }
 0x590   : > { %3116 = vmatpush.msra.mxu3 %v10758_v30  ;;  %3203 = vmatpush.msra.mxu1 %v10758_v30 }
 0x592   : > { %3117 = vmatpush.msra.mxu3 %v10752_v19  ;;  %3204 = vmatpush.msra.mxu1 %v10752_v19 }
 0x593   : > { %8230 = vmatmul.msk.f32.vlgmr.msra.gmra.mxu3 %vm12934_vm15, %v8226_v59  ;;  %vm12938_vm15 = vmmov %vm12937_vm0  ;;  %v8260_v59 = vld [vmem:[%s12933_s2 + $0x50] sm:$0xff] }
 0x594   : > { %8242 = vmatmul.msk.f32.vlgmr.msra.gmra.mxu1 %vm12938_vm15, %v8238_v28  ;;  %vm12941_vm15 = vmmov %vm12937_vm0  ;;  %v3366_v28 = vpop.permute.xlu0 %3365 }
 0x59b   : > { %8231 = vmatmul.msk.f32.gmra.mxu3 %vm12935_vm7, %v8227_v3  ;;  %vm12940_vm7 = vmmov %vm12937_vm0  ;;  %v8261_v3 = vld [vmem:[%s12933_s2 + $0x58] sm:$0xff] }
 0x59c   : > { %8243 = vmatmul.msk.f32.gmra.mxu1 %vm12940_vm7, %v8239_v56  ;;  %vm12943_vm7 = vmmov %vm12937_vm0 }
 0x5a3   : > { %8232 = vmatmul.msk.f32.gmra.mxu3 %vm12936_vm14, %v8228_v17  ;;  %vm12939_vm14 = vmmov %vm12937_vm0 }
 0x5a4   : > { %8244 = vmatmul.msk.f32.gmra.mxu1 %vm12943_vm7, %v8240_v32  ;;  %vm12948_vm7 = vmmov %vm12937_vm0 }
 0x5ab   : > { %8233 = vmatmul.msk.f32.gmra.mxu3 %vm12937_vm0, %v8229_v18 }
 0x5ac   : > { %8245 = vmatmul.msk.f32.gmra.mxu1 %vm12937_vm0, %v8241_v45 }
 0x5f0   : > { %v3028_v11 = vpop.f32.mrf.mxu1 }
 0x5f6   : > { %v3065_v22 = vpop.f32.mrf.mxu2 }
 0x5f8   : > { %v3031_v23 = vpop.f32.mrf.mxu1 }
 0x5fe   : > { %v3068_v24 = vpop.f32.mrf.mxu2 }
 0x600   : > { %v3034_v25 = vpop.f32.mrf.mxu1 }
 0x606   : > { %v3071_v52 = vpop.f32.mrf.mxu2 }
 0x608   : > { %v3037_v27 = vpop.f32.mrf.mxu1 }
 0x609   : > { %3155 = vmatpush.msra.mxu0 %v3037_v27  ;;  %3242 = vmatpush.msrb.mxu2 %v3037_v27 }
 0x60b   : > { %3156 = vmatpush.msra.mxu0 %v3034_v25  ;;  %3243 = vmatpush.msrb.mxu2 %v3034_v25 }
 0x60d   : > { %3157 = vmatpush.msra.mxu0 %v3031_v23  ;;  %3244 = vmatpush.msrb.mxu2 %v3031_v23 }
 0x60e   : > { %v3074_v0 = vpop.f32.mrf.mxu2 }
 0x60f   : > { %3158 = vmatpush.msra.mxu0 %v3028_v11  ;;  %3245 = vmatpush.msrb.mxu2 %v3028_v11 }
 0x610   : > { %3288 = vmatpush.msrb.mxu3 %v3074_v0  ;;  %8234 = vmatmul.msk.f32.vlgmr.msra.gmra.mxu0 %vm12937_vm0, %v3077_v5 }
 0x611   : > { %3338 = vmatpush.msrb.mxu0 %v3074_v0  ;;  %8246 = vmatmul.msk.f32.vlgmr.msrb.gmra.mxu2 %vm12939_vm14, %v3081_v29  ;;  %vm12942_vm14 = vmmov %vm12937_vm0 }
 0x612   : > { %3289 = vmatpush.msrb.mxu3 %v3071_v52 }
 0x613   : > { %3339 = vmatpush.msrb.mxu0 %v3071_v52 }
 0x614   : > { %3290 = vmatpush.msrb.mxu3 %v3068_v24 }
 0x615   : > { %3340 = vmatpush.msrb.mxu0 %v3068_v24 }
 0x616   : > { %3291 = vmatpush.msrb.mxu3 %v3065_v22  ;;  %v3119_v17 = vpop.f32.mrf.mxu3 }
 0x617   : > { %8254 = vmatmul.msk.f32.vlgmr.msrb.gmra.mxu3 %vm12941_vm15, %v8250_v63  ;;  %3341 = vmatpush.msrb.mxu0 %v3065_v22  ;;  %vm12946_vm15 = vmmov %vm12937_vm0 }
 0x618   : > { %8235 = vmatmul.msk.f32.gmra.mxu0 %vm12937_vm0, %v3078_v15 }
 0x619   : > { %8247 = vmatmul.msk.f32.gmra.mxu2 %vm12942_vm14, %v3082_v31  ;;  %vm12947_vm14 = vmmov %vm12937_vm0  ;;  %v3371_v31 = vpop.permute.xlu1 %3370 }
 0x61e   : > { %v3122_v18 = vpop.f32.mrf.mxu3 }
 0x61f   : > { %8255 = vmatmul.msk.f32.gmra.mxu3 %vm12944_vm13, %v8251_v34  ;;  %vm12950_vm13 = vmmov %vm12937_vm0 }
 0x620   : > { %8236 = vmatmul.msk.f32.gmra.mxu0 %vm12945_vm10, %v3079_v62  ;;  %vm12951_vm10 = vmmov %vm12937_vm0 }
 0x621   : > { %8248 = vmatmul.msk.f32.gmra.mxu2 %vm12946_vm15, %v3083_v33  ;;  %vm12952_vm15 = vmmov %vm12937_vm0 }
 0x626   : > { %v3125_v11 = vpop.f32.mrf.mxu3 }
 0x627   : > { %8256 = vmatmul.msk.f32.gmra.mxu3 %vm12947_vm14, %v8252_v40  ;;  %vm12736_vm14 = vcmp.eq.s32.totalorder %v10669_v38, %v10363_v2 }
 0x628   : > { %8237 = vmatmul.msk.f32.gmra.mxu0 %vm12948_vm7, %v3080_v41  ;;  %8282 = vmatpush.msk.msra.mxu2 %vm12736_vm14, %v12738_v54  ;;  %vm12733_vm7 = vcmp.eq.s32.totalorder %v10676_v26, %v10363_v2  ;;  %v3206_v41 = vpop.f32.mrf.mxu1 }
 0x629   : > { %8249 = vmatmul.msk.f32.gmra.mxu2 %vm12949_vm9, %v3084_v21  ;;  %vm12737_vm9 = vcmp.eq.s32.totalorder %v10669_v38, %v10360_v1 }
 0x62a   : > { %8270 = vmatpush.msk.msrb.mxu1 %vm12737_vm9, %v12738_v54  ;;  %8283 = vmatpush.msk.msra.mxu2 %vm12733_vm7, %v12738_v54  ;;  %vm12962_vm7 = vcmask 523264  }
 0x62e   : > { %v3128_v23 = vpop.f32.mrf.mxu3 }
 0x62f   : > { %8257 = vmatmul.msk.f32.gmra.mxu3 %vm12950_vm13, %v8253_v13  ;;  %vm12730_vm13 = vcmp.eq.s32.totalorder %v10679_v20, %v10360_v1 }
 0x630   : > { %8262 = vmatmul.msk.f32.vlgmr.msrb.gmra.mxu0 %vm12951_vm10, %v8258_v35  ;;  %vm12729_vm10 = vcmp.eq.s32.totalorder %v10679_v20, %v10363_v2 }
 0x631   : > { %8284 = vmatpush.msk.msra.mxu2 %vm12729_vm10, %v12738_v54  ;;  %vm12954_vm10 = vcmp.eq.s32.totalorder %v10085_v46, %v10360_v1 }
 0x638   : > { %8263 = vmatmul.msk.f32.gmra.mxu0 %vm12952_vm15, %v8259_v53  ;;  %vm12731_vm15 = vcmp.eq.s32.totalorder %v10690_v42, %v10360_v1  ;;  %v3376_v53 = vpop.permute.xlu2 %3375 }
 0x640   : > { %8264 = vmatmul.msk.f32.gmra.mxu0 %vm12937_vm0, %v8260_v59  ;;  %vm12732_vm0 = vcmp.eq.s32.totalorder %v10690_v42, %v10363_v2 }
 0x641   : > { %8285 = vmatpush.msk.msra.mxu2 %vm12732_vm0, %v12738_v54  ;;  %vm12957_vm0 = vcmp.eq.s32.totalorder %v10091_v48, %v10363_v2 }
 0x648   : > { %8265 = vmatmul.msk.f32.gmra.mxu0 %vm12953_vm4, %v8261_v3  ;;  %vm12734_vm4 = vcmp.eq.s32.totalorder %v10676_v26, %v10360_v1 }
 0x649   : > { %8271 = vmatpush.msk.msrb.mxu1 %vm12734_vm4, %v12738_v54  ;;  %vm12963_vm4 = vmmov %vm12962_vm7 }
 0x64b   : > { %8272 = vmatpush.msk.msrb.mxu1 %vm12730_vm13, %v12738_v54  ;;  %vm12955_vm13 = vcmp.eq.s32.totalorder %v10085_v46, %v10363_v2 }
 0x64c   : > { %8286 = vmatpush.msk.msra.mxu2 %vm12955_vm13, %v12738_v54  ;;  %vm12959_vm13 = vcmp.eq.s32.totalorder %v10094_v49, %v10363_v2 }
 0x64d   : > { %8273 = vmatpush.msk.msrb.mxu1 %vm12731_vm15, %v12738_v54  ;;  %vm12956_vm15 = vcmp.eq.s32.totalorder %v10091_v48, %v10360_v1 }
 0x64e   : > { %8287 = vmatpush.msk.msra.mxu2 %vm12957_vm0, %v12738_v54  ;;  %vm12961_vm0 = vcmp.eq.s32.totalorder %v10079_v43, %v10363_v2 }
 0x64f   : > { %8274 = vmatpush.msk.msrb.mxu1 %vm12954_vm10, %v12738_v54  ;;  %vm12958_vm10 = vcmp.eq.s32.totalorder %v10094_v49, %v10360_v1 }
 0x650   : > { %8288 = vmatpush.msk.msra.mxu2 %vm12959_vm13, %v12738_v54 }
 0x651   : > { %8275 = vmatpush.msk.msrb.mxu1 %vm12956_vm15, %v12738_v54  ;;  %vm12960_vm15 = vcmp.eq.s32.totalorder %v10079_v43, %v10360_v1 }
 0x652   : > { %8289 = vmatpush.msk.msra.mxu2 %vm12961_vm0, %v12738_v54 }
 0x653   : > { %8276 = vmatpush.msk.msrb.mxu1 %vm12958_vm10, %v12738_v54 }
 0x655   : > { %8277 = vmatpush.msk.msrb.mxu1 %vm12960_vm15, %v12738_v54 }
 0x68d   : > { %v3160_v22 = vpop.f32.mrf.mxu0 }
 0x68e   : > { %v3161_v25 = vadd.f32 %v3160_v22, %v3119_v17 }
 0x694   : > { %v3247_v13 = vpop.f32.mrf.mxu2 }
 0x695   : > { %v3163_v24 = vpop.f32.mrf.mxu0 }
 0x696   : > { %v3164_v56 = vadd.f32 %v3163_v24, %v3122_v18 }
 0x69a   : > { %v3293_v52 = vpop.f32.mrf.mxu3 }
 0x69b   : > { %v3305_v27 = vadd.f32 %v3293_v52, %v3161_v25 }
 0x69d   : > { %v3383_v5 = vadd.f32 %v3366_v28, %v3305_v27  ;;  %v3166_v0 = vpop.f32.mrf.mxu0  ;;  %v3381_v28 = vpop.permute.xlu0 %3380 }
 0x69e   : > { %v3167_v40 = vadd.f32 %v3166_v0, %v3125_v11  ;;  %v3248_v11 = vadd.f32 %v3247_v13, %v3206_v41 }
 0x69f   : > { %v8266_v29 = vmul.f32 -1.442695, %v3383_v5 }
 0x6a1   : > { %8955 = vpow2.f32 %v8266_v29 }
 0x6a2   : > { %v3296_v63 = vpop.f32.mrf.mxu3 }
 0x6a3   : > { %v3306_v15 = vadd.f32 %v3296_v63, %v3164_v56  ;;  %v3209_v56 = vpop.f32.mrf.mxu1  ;;  %v3250_v63 = vpop.f32.mrf.mxu2 }
 0x6a5   : > { %v3384_v32 = vadd.f32 %v3371_v31, %v3306_v15  ;;  %v3169_v34 = vpop.f32.mrf.mxu0 }
 0x6a6   : > { %v3170_v25 = vadd.f32 %v3169_v34, %v3128_v23 }
 0x6a7   : > { %v8956_v62 = vpop.eup %8955  ;;  %v8267_v33 = vmul.f32 -1.442695, %v3384_v32 }
 0x6a8   : > { %v3427_v45 = vadd.f32 1.0, %v8956_v62 }
 0x6a9   : > { %8957 = vpow2.f32 %v8267_v33 }
 0x6aa   : > { %8959 = vrcp.f32 %v3427_v45  ;;  %v3299_v21 = vpop.f32.mrf.mxu3  ;;  %v3442_v29 = vand.u32 2147483648, %v3427_v45  ;;  %v3440_v31 = vand.u32 2147483647, %v3427_v45  ;;  %vm3436_vm13 = vweird.f32 %v3427_v45 }
 0x6ab   : > { %v3307_v35 = vadd.f32 %v3299_v21, %v3167_v40 }
 0x6ac   : > { %vm3441_vm0 = vcmp.eq.f32.partialorder %v3440_v31, 8.507059e+37 }
 0x6ad   : > { %v3385_v59 = vadd.f32 %v3376_v53, %v3307_v35  ;;  %v3343_v3 = vpop.f32.mrf.mxu0  ;;  %v3443_v35 = vor.u32 1.1754944e-38, %v3442_v29  ;;  %v3253_v29 = vpop.f32.mrf.mxu2 }
 0x6ae   : > { %v3355_v33 = vadd.f32 %v3343_v3, %v3248_v11 }
 0x6af   : > { %v8958_v17 = vpop.eup %8957  ;;  %v8268_v18 = vmul.f32 -1.442695, %v3385_v59  ;;  %v3394_v59 = vpop.permute.xlu1 %3393 }
 0x6b0   : > { %v8960_v22 = vpop.eup %8959  ;;  %v3428_v24 = vadd.f32 1.0, %v8958_v17 }
 0x6b1   : > { %8961 = vpow2.f32 %v8268_v18  ;;  %v3432_v52 = vmul.f32 %v8960_v22, %v3427_v45  ;;  %vm3437_vm10 = vweird.f32 %v8960_v22  ;;  %v3411_v18 = vadd.f32 %v3394_v59, %v3355_v33 }
 0x6b2   : > { %8963 = vrcp.f32 %v3428_v24  ;;  %v3302_v27 = vpop.f32.mrf.mxu3  ;;  %vm3438_vm15 = vmor %vm3436_vm13, %vm3437_vm10  ;;  %v3455_v3 = vand.u32 2147483647, %v3428_v24  ;;  %vm3451_vm13 = vweird.f32 %v3428_v24 }
 0x6b3   : > { %v3433_v5 = vsub.f32 1.0, %v3432_v52  ;;  %v3308_v0 = vadd.f32 %v3302_v27, %v3170_v25  ;;  %v3251_v52 = vadd.f32 %v3250_v63, %v3209_v56 }
 0x6b5   : > { %v3434_v15 = vmul.f32 %v8960_v22, %v3433_v5  ;;  %v3386_v32 = vadd.f32 %v3381_v28, %v3308_v0  ;;  %v3346_v53 = vpop.f32.mrf.mxu0  ;;  %v3457_v28 = vand.u32 2147483648, %v3428_v24  ;;  %v3212_v0 = vpop.f32.mrf.mxu1 }
 0x6b6   : > { %v3356_v31 = vadd.f32 %v3346_v53, %v3251_v52 }
 0x6b7   : > { %v8962_v62 = vpop.eup %8961  ;;  %v3435_v40 = vadd.f32 %v8960_v22, %v3434_v15  ;;  %v8269_v23 = vmul.f32 -1.442695, %v3386_v32  ;;  %v3458_v56 = vor.u32 1.1754944e-38, %v3457_v28 }
 0x6b8   : > { %v8964_v34 = vpop.eup %8963  ;;  %v3429_v21 = vadd.f32 1.0, %v8962_v62 }
 0x6b9   : > { %v3439_v41 = vsel %vm3438_vm15, %v8960_v22, %v3435_v40  ;;  %8965 = vpow2.f32 %v8269_v23  ;;  %v3447_v13 = vmul.f32 %v8964_v34, %v3428_v24  ;;  %vm3452_vm10 = vweird.f32 %v8964_v34 }
 0x6ba   : > { %8967 = vrcp.f32 %v3429_v21  ;;  %v3444_v17 = vsel %vm3441_vm0, %v3443_v35, %v3439_v41  ;;  %vm3453_vm15 = vmor %vm3451_vm13, %vm3452_vm10  ;;  %vm3456_vm0 = vcmp.eq.f32.partialorder %v3455_v3, 8.507059e+37  ;;  %v3254_v24 = vadd.f32 %v3253_v29, %v3212_v0 }
 0x6bb   : > { %v3495_v25 = vsub.f32 1.0, %v3444_v17  ;;  %v3448_v27 = vsub.f32 1.0, %v3447_v13  ;;  %v3491_v45 = vmul.f32 %v3444_v17, %v3411_v18  ;;  %v3470_v59 = vand.u32 2147483647, %v3429_v21 }
 0x6bc   : > { %v3472_v17 = vand.u32 2147483648, %v3429_v21 }
 0x6bd   : > { %v3499_v11 = vmul.f32 %v3495_v25, %v10752_v19  ;;  %v3449_v5 = vmul.f32 %v8964_v34, %v3448_v27  ;;  %v3399_v19 = vpop.permute.xlu2 %3398  ;;  %v3349_v35 = vpop.f32.mrf.mxu0  ;;  %vm3471_vm13 = vcmp.eq.f32.partialorder %v3470_v59, 8.507059e+37 }
 0x6be   : > { %v3412_v53 = vadd.f32 %v3399_v19, %v3356_v31  ;;  %v3357_v27 = vadd.f32 %v3349_v35, %v3254_v24 }
 0x6bf   : > { %v8966_v22 = vpop.eup %8965  ;;  %v10913_v15 = vadd.f32 %v3499_v11, %v3491_v45  ;;  %v3450_v32 = vadd.f32 %v8964_v34, %v3449_v5  ;;  %v3473_v45 = vor.u32 1.1754944e-38, %v3472_v17  ;;  %v3215_v11 = vpop.f32.mrf.mxu1 }
 0x6c0   : > { %v8968_v62 = vpop.eup %8967  ;;  %v3430_v33 = vadd.f32 1.0, %v8966_v22  ;;  %v3256_v5 = vpop.f32.mrf.mxu2 }
 0x6c1   : > { %v3454_v63 = vsel %vm3453_vm15, %v8964_v34, %v3450_v32  ;;  %v3462_v40 = vmul.f32 %v8968_v62, %v3429_v21  ;;  %8278 = vmatmul.msk.f32.vlgmr.msrb.gmra.mxu1 %vm12962_vm7, %v10913_v15  ;;  %8290 = vmatmul.msk.f32.vlgmr.msra.gmra.mxu2 %vm12963_vm4, %v10913_v15  ;;  %vm3467_vm10 = vweird.f32 %v8968_v62  ;;  %vm3466_vm4 = vweird.f32 %v3429_v21  ;;  %v3409_v17 = vpop.permute.xlu1 %3408 }
 0x6c2   : > { %8969 = vrcp.f32 %v3430_v33  ;;  %v3459_v23 = vsel %vm3456_vm0, %v3458_v56, %v3454_v63  ;;  %vm3468_vm7 = vmor %vm3466_vm4, %vm3467_vm10  ;;  %vm12964_vm15 = vcmask 523264   ;;  %v3257_v56 = vadd.f32 %v3256_v5, %v3215_v11 }
 0x6c3   : > { %v3496_v41 = vsub.f32 1.0, %v3459_v23  ;;  %v3463_v13 = vsub.f32 1.0, %v3462_v40  ;;  %v3492_v18 = vmul.f32 %v3459_v23, %v3412_v53  ;;  %vm12965_vm0 = vmmov %vm12964_vm15  ;;  %v3485_v40 = vand.u32 2147483647, %v3430_v33 }
 0x6c4   : > { %v3487_v19 = vand.u32 2147483648, %v3430_v33  ;;  %vm3481_vm4 = vweird.f32 %v3430_v33 }
 0x6c5   : > { %v3500_v34 = vmul.f32 %v3496_v41, %v10758_v30  ;;  %v3464_v25 = vmul.f32 %v8968_v62, %v3463_v13  ;;  %v3404_v30 = vpop.permute.xlu0 %3403  ;;  %v3352_v63 = vpop.f32.mrf.mxu0 }
 0x6c6   : > { %v3413_v31 = vadd.f32 %v3404_v30, %v3357_v27  ;;  %v3358_v41 = vadd.f32 %v3352_v63, %v3257_v56  ;;  %v3488_v13 = vor.u32 1.1754944e-38, %v3487_v19  ;;  %v3593_v56 = vld [vmem:[%s12968_s1] sm:$0xff] }
 0x6c7   : > { %v10920_v52 = vadd.f32 %v3500_v34, %v3492_v18  ;;  %v3465_v3 = vadd.f32 %v8968_v62, %v3464_v25  ;;  %v3597_v63 = vld [vmem:[#allocation2] sm:$0xff] }
 0x6c8   : > { %v8970_v28 = vpop.eup %8969  ;;  %v8314_v19 = vld [vmem:[%s12968_s1 + $0x40] sm:$0xff] }
 0x6c9   : > { %v3469_v22 = vsel %vm3468_vm7, %v8968_v62, %v3465_v3  ;;  %v3477_v0 = vmul.f32 %v8970_v28, %v3430_v33  ;;  %8279 = vmatmul.msk.f32.gmra.mxu1 %vm12964_vm15, %v10920_v52  ;;  %8291 = vmatmul.msk.f32.gmra.mxu2 %vm12965_vm0, %v10920_v52  ;;  %vm3482_vm10 = vweird.f32 %v8970_v28  ;;  %vm12966_vm15 = vmmov %vm12965_vm0  ;;  %v8295_v3 = vld [vmem:[%s12968_s1 + $0x28] sm:$0xff] }
 0x6ca   : > { %v3474_v29 = vsel %vm3471_vm13, %v3473_v45, %v3469_v22  ;;  %vm3483_vm7 = vmor %vm3481_vm4, %vm3482_vm10  ;;  %vm3486_vm13 = vcmp.eq.f32.partialorder %v3485_v40, 8.507059e+37  ;;  %v8297_v45 = vld [vmem:[%s12968_s1 + $0x38] sm:$0xff]  ;;  %v3690_v40 = vld [vmem:[#allocation2 + $0x28] sm:$0xff] }
 0x6cb   : > { %v3497_v32 = vsub.f32 1.0, %v3474_v29  ;;  %v3478_v21 = vsub.f32 1.0, %v3477_v0  ;;  %v3493_v23 = vmul.f32 %v3474_v29, %v3413_v31  ;;  %vm12969_vm10 = vmmov %vm12965_vm0 }
 0x6cc   : > { %vm12970_vm4 = vmmov %vm12965_vm0 }
 0x6cd   : > { %v3501_v62 = vmul.f32 %v3497_v32, %v10764_v39  ;;  %v3479_v35 = vmul.f32 %v8970_v28, %v3478_v21  ;;  %v3414_v39 = vadd.f32 %v3409_v17, %v3358_v41  ;;  %v3689_v32 = vld [vmem:[#allocation2 + $0x20] sm:$0xff]  ;;  %v8315_v41 = vld [vmem:[%s12968_s1 + $0x48] sm:$0xff]  ;;  %v8316_v17 = vld [vmem:[%s12968_s1 + $0x50] sm:$0xff] }
 0x6cf   : > { %v10927_v53 = vadd.f32 %v3501_v62, %v3493_v23  ;;  %v3480_v24 = vadd.f32 %v8970_v28, %v3479_v35  ;;  %v3594_v23 = vld [vmem:[%s12968_s1 + $0x8] sm:$0xff]  ;;  %v3691_v35 = vld [vmem:[#allocation2 + $0x30] sm:$0xff] }
 0x6d0   : > { %v3598_v62 = vld [vmem:[#allocation2 + $0x8] sm:$0xff] }
 0x6d1   : > { %v3484_v59 = vsel %vm3483_vm7, %v8970_v28, %v3480_v24  ;;  %8280 = vmatmul.msk.f32.gmra.mxu1 %vm12966_vm15, %v10927_v53  ;;  %8292 = vmatmul.msk.f32.gmra.mxu2 %vm12965_vm0, %v10927_v53  ;;  %vm12971_vm7 = vcmask 261120   ;;  %v8296_v28 = vld [vmem:[%s12968_s1 + $0x30] sm:$0xff] }
 0x6d2   : > { %v3489_v18 = vsel %vm3486_vm13, %v3488_v13, %v3484_v59  ;;  %vm12972_vm13 = vmmov %vm12971_vm7  ;;  %v3595_v24 = vld [vmem:[%s12968_s1 + $0x10] sm:$0xff]  ;;  %v3692_v59 = vld [vmem:[#allocation2 + $0x38] sm:$0xff] }
 0x6d3   : > { %v3498_v34 = vsub.f32 1.0, %v3489_v18  ;;  %v3494_v25 = vmul.f32 %v3489_v18, %v3414_v39  ;;  %vm12973_vm15 = vmmov %vm12971_vm7  ;;  %v3599_v13 = vld [vmem:[#allocation2 + $0x10] sm:$0xff]  ;;  %v3596_v18 = vld [vmem:[%s12968_s1 + $0x18] sm:$0xff] }
 0x6d4   : > { %vm12974_vm0 = vmmov %vm12971_vm7  ;;  %v3600_v39 = vld [vmem:[#allocation2 + $0x18] sm:$0xff] }
 0x6d5   : > { %v3502_v27 = vmul.f32 %v3498_v34, %v10770_v58  ;;  %v8294_v58 = vld [vmem:[%s12967_s22 + $0x20] sm:$0xff]  ;;  %vm12984_vm14 = vmmov %vm12974_vm0  ;;  %v8317_v34 = vld [vmem:[%s12968_s1 + $0x58] sm:$0xff]  ;;  %s13000_s1 = smov %s12999_s15  ;;  %s13273_s22 = sld [smem:[#allocation59_spill]] }
 0x6d6   : > { %vm12988_vm9 = vmmov %vm12974_vm0 }
 0x6d7   : > { %v10934_v33 = vadd.f32 %v3502_v27, %v3494_v25  ;;  %v3826_v25 = vld [vmem:[#allocation2 + $0x40] sm:$0xff]  ;;  %v3827_v27 = vld [vmem:[#allocation2 + $0x48] sm:$0xff] }
 0x6d9   : > { %8281 = vmatmul.msk.f32.gmra.mxu1 %vm12969_vm10, %v10934_v33  ;;  %8293 = vmatmul.msk.f32.gmra.mxu2 %vm12970_vm4, %v10934_v33  ;;  %vm12975_vm10 = vmmov %vm12974_vm0 }
 0x6da   : > { %3630 = vmatpush.msra.mxu3 %v10934_v33  ;;  %3717 = vmatpush.msra.mxu1 %v10934_v33  ;;  %vm12976_vm4 = vmmov %vm12974_vm0 }
 0x6dc   : > { %3631 = vmatpush.msra.mxu3 %v10927_v53  ;;  %3718 = vmatpush.msra.mxu1 %v10927_v53 }
 0x6de   : > { %3632 = vmatpush.msra.mxu3 %v10920_v52  ;;  %3719 = vmatpush.msra.mxu1 %v10920_v52 }
 0x6e0   : > { %3633 = vmatpush.msra.mxu3 %v10913_v15  ;;  %3720 = vmatpush.msra.mxu1 %v10913_v15 }
 0x6e1   : > { %8298 = vmatmul.msk.f32.vlgmr.msra.gmra.mxu3 %vm12971_vm7, %v8294_v58  ;;  %8306 = vmatmul.msk.f32.vlgmr.msra.gmra.mxu1 %vm12975_vm10, %v3689_v32  ;;  %vm12977_vm7 = vmmov %vm12974_vm0  ;;  %v3828_v58 = vld [vmem:[#allocation2 + $0x50] sm:$0xff] }
 0x6e2   : > { %vm12980_vm10 = vmmov %vm12974_vm0 }
 0x6e9   : > { %8299 = vmatmul.msk.f32.gmra.mxu3 %vm12972_vm13, %v8295_v3  ;;  %vm12978_vm13 = vmmov %vm12974_vm0  ;;  %v3829_v3 = vld [vmem:[#allocation2 + $0x58] sm:$0xff] }
 0x6ea   : > { %8307 = vmatmul.msk.f32.gmra.mxu1 %vm12978_vm13, %v3690_v40  ;;  %vm12983_vm13 = vmmov %vm12974_vm0 }
 0x6f1   : > { %8300 = vmatmul.msk.f32.gmra.mxu3 %vm12973_vm15, %v8296_v28  ;;  %vm12979_vm15 = vmmov %vm12974_vm0 }
 0x6f9   : > { %8301 = vmatmul.msk.f32.gmra.mxu3 %vm12974_vm0, %v8297_v45 }
 0x73e   : > { %v3544_v11 = vpop.f32.mrf.mxu1 }
 0x744   : > { %v3581_v5 = vpop.f32.mrf.mxu2 }
 0x746   : > { %v3547_v22 = vpop.f32.mrf.mxu1 }
 0x74c   : > { %v3584_v0 = vpop.f32.mrf.mxu2 }
 0x74e   : > { %v3550_v30 = vpop.f32.mrf.mxu1 }
 0x754   : > { %v3587_v29 = vpop.f32.mrf.mxu2 }
 0x756   : > { %v3553_v31 = vpop.f32.mrf.mxu1 }
 0x757   : > { %3671 = vmatpush.msra.mxu0 %v3553_v31  ;;  %3758 = vmatpush.msrb.mxu2 %v3553_v31 }
 0x759   : > { %3672 = vmatpush.msra.mxu0 %v3550_v30  ;;  %3759 = vmatpush.msrb.mxu2 %v3550_v30 }
 0x75b   : > { %3673 = vmatpush.msra.mxu0 %v3547_v22  ;;  %3760 = vmatpush.msrb.mxu2 %v3547_v22 }
 0x75c   : > { %v3590_v21 = vpop.f32.mrf.mxu2 }
 0x75d   : > { %3674 = vmatpush.msra.mxu0 %v3544_v11  ;;  %3761 = vmatpush.msrb.mxu2 %v3544_v11 }
 0x75e   : > { %3804 = vmatpush.msrb.mxu3 %v3590_v21  ;;  %8302 = vmatmul.msk.f32.vlgmr.msra.gmra.mxu0 %vm12976_vm4, %v3593_v56  ;;  %vm12981_vm4 = vmmov %vm12974_vm0 }
 0x75f   : > { %3854 = vmatpush.msrb.mxu0 %v3590_v21  ;;  %8310 = vmatmul.msk.f32.vlgmr.msrb.gmra.mxu2 %vm12977_vm7, %v3597_v63  ;;  %vm12982_vm7 = vmmov %vm12974_vm0 }
 0x760   : > { %3805 = vmatpush.msrb.mxu3 %v3587_v29  ;;  %8308 = vmatmul.msk.f32.gmra.mxu1 %vm12981_vm4, %v3691_v35  ;;  %vm12987_vm4 = vmmov %vm12974_vm0  ;;  %v3887_v35 = vpop.permute.xlu1 %3886 }
 0x761   : > { %3855 = vmatpush.msrb.mxu0 %v3587_v29 }
 0x762   : > { %3806 = vmatpush.msrb.mxu3 %v3584_v0 }
 0x763   : > { %3856 = vmatpush.msrb.mxu0 %v3584_v0  ;;  %v3897_v0 = vpop.permute.xlu2 %3896 }
 0x764   : > { %3807 = vmatpush.msrb.mxu3 %v3581_v5  ;;  %v3635_v28 = vpop.f32.mrf.mxu3 }
 0x765   : > { %8318 = vmatmul.msk.f32.vlgmr.msrb.gmra.mxu3 %vm12979_vm15, %v8314_v19  ;;  %3857 = vmatpush.msrb.mxu0 %v3581_v5  ;;  %vm12985_vm15 = vmmov %vm12974_vm0 }
 0x766   : > { %8303 = vmatmul.msk.f32.gmra.mxu0 %vm12974_vm0, %v3594_v23 }
 0x767   : > { %8311 = vmatmul.msk.f32.gmra.mxu2 %vm12980_vm10, %v3598_v62  ;;  %vm12986_vm10 = vmmov %vm12974_vm0 }
 0x768   : > { %8309 = vmatmul.msk.f32.gmra.mxu1 %vm12985_vm15, %v3692_v59  ;;  %vm12992_vm15 = vmmov %vm12974_vm0 }
 0x76b   : > { %v3882_v56 = vpop.permute.xlu2 %3881 }
 0x76c   : > { %v3638_v45 = vpop.f32.mrf.mxu3 }
 0x76d   : > { %8319 = vmatmul.msk.f32.gmra.mxu3 %vm12982_vm7, %v8315_v41  ;;  %vm12989_vm7 = vmmov %vm12974_vm0 }
 0x76e   : > { %8304 = vmatmul.msk.f32.gmra.mxu0 %vm12983_vm13, %v3595_v24  ;;  %vm12990_vm13 = vmmov %vm12974_vm0 }
 0x76f   : > { %8312 = vmatmul.msk.f32.gmra.mxu2 %vm12984_vm14, %v3599_v13  ;;  %vm12991_vm14 = vmmov %vm12974_vm0 }
 0x774   : > { %v3641_v11 = vpop.f32.mrf.mxu3 }
 0x775   : > { %8320 = vmatmul.msk.f32.gmra.mxu3 %vm12974_vm0, %v8316_v17  ;;  %v10984_v17 = vpop.f32.mrf.mxu1 }
 0x776   : > { %8305 = vmatmul.msk.f32.gmra.mxu0 %vm12986_vm10, %v3596_v18 }
 0x777   : > { %8313 = vmatmul.msk.f32.gmra.mxu2 %vm12987_vm4, %v3600_v39 }
 0x77c   : > { %v3644_v22 = vpop.f32.mrf.mxu3 }
 0x77d   : > { %8321 = vmatmul.msk.f32.gmra.mxu3 %vm12988_vm9, %v8317_v34 }
 0x77e   : > { %8322 = vmatmul.msk.f32.vlgmr.msrb.gmra.mxu0 %vm12989_vm7, %v3826_v25 }
 0x786   : > { %8323 = vmatmul.msk.f32.gmra.mxu0 %vm12990_vm13, %v3827_v27  ;;  %v3892_v27 = vpop.permute.xlu0 %3891 }
 0x78e   : > { %8324 = vmatmul.msk.f32.gmra.mxu0 %vm12991_vm14, %v3828_v58  ;;  %v3925_v46 = vpop.permute.xlu0 %3924 }
 0x796   : > { %8325 = vmatmul.msk.f32.gmra.mxu0 %vm12992_vm15, %v3829_v3 }
 0x7db   : > { %v3676_v5 = vpop.f32.mrf.mxu0 }
 0x7dc   : > { %v3677_v29 = vadd.f32 %v3676_v5, %v3635_v28 }
 0x7e2   : > { %v10986_v18 = vpop.f32.mrf.mxu2 }
 0x7e3   : > { %v3679_v30 = vpop.f32.mrf.mxu0 }
 0x7e4   : > { %v3680_v40 = vadd.f32 %v3679_v30, %v3638_v45 }
 0x7e8   : > { %v3809_v31 = vpop.f32.mrf.mxu3 }
 0x7e9   : > { %v3821_v32 = vadd.f32 %v3809_v31, %v3677_v29 }
 0x7eb   : > { %v3682_v21 = vpop.f32.mrf.mxu0  ;;  %v3899_v63 = vadd.f32 %v3882_v56, %v3821_v32  ;;  %v3725_v32 = vpop.f32.mrf.mxu1 }
 0x7ec   : > { %v3683_v59 = vadd.f32 %v3682_v21, %v3641_v11  ;;  %v3766_v56 = vpop.f32.mrf.mxu2 }
 0x7ed   : > { %v8326_v19 = vmul.f32 -1.442695, %v3899_v63 }
 0x7ef   : > { %8971 = vpow2.f32 %v8326_v19 }
 0x7f0   : > { %v3812_v23 = vpop.f32.mrf.mxu3 }
 0x7f1   : > { %v3822_v62 = vadd.f32 %v3812_v23, %v3680_v40 }
 0x7f3   : > { %v3900_v41 = vadd.f32 %v3887_v35, %v3822_v62  ;;  %v3685_v24 = vpop.f32.mrf.mxu0 }
 0x7f4   : > { %v3686_v29 = vadd.f32 %v3685_v24, %v3644_v22  ;;  %v3728_v24 = vpop.f32.mrf.mxu1 }
 0x7f5   : > { %v8327_v13 = vmul.f32 -1.442695, %v3900_v41  ;;  %v8972_v25 = vpop.eup %8971 }
 0x7f6   : > { %v10990_v45 = vadd.f32 1.0, %v8972_v25 }
 0x7f7   : > { %8973 = vpow2.f32 %v8327_v13  ;;  %v3769_v13 = vpop.f32.mrf.mxu2 }
 0x7f8   : > { %v3815_v39 = vpop.f32.mrf.mxu3  ;;  %vm3952_vm9 = vweird.f32 %v10990_v45 }
 0x7f9   : > { %v3823_v34 = vadd.f32 %v3815_v39, %v3683_v59 }
 0x7fb   : > { %v3901_v58 = vadd.f32 %v3892_v27, %v3823_v34  ;;  %v10988_v3 = vpop.f32.mrf.mxu0 }
 0x7fd   : > { %v8974_v28 = vpop.eup %8973  ;;  %v8328_v5 = vmul.f32 -1.442695, %v3901_v58 }
 0x7fe   : > { %v10992_v30 = vadd.f32 1.0, %v8974_v28 }
 0x7ff   : > { %8975 = vpow2.f32 %v8328_v5 }
 0x800   : > { %v3818_v11 = vpop.f32.mrf.mxu3  ;;  %8977 = vrcp.f32 %v10990_v45  ;;  %vm3967_vm15 = vweird.f32 %v10992_v30 }
 0x801   : > { %v3824_v31 = vadd.f32 %v3818_v11, %v3686_v29  ;;  %8979 = vrcp.f32 %v10992_v30 }
 0x803   : > { %v3902_v21 = vadd.f32 %v3897_v0, %v3824_v31  ;;  %v10996_v23 = vpop.f32.mrf.mxu0  ;;  %v3767_v31 = vadd.f32 %v3766_v56, %v3725_v32  ;;  %v3956_v56 = vand.u32 2147483647, %v10990_v45 }
 0x805   : > { %v8976_v63 = vpop.eup %8975  ;;  %v8329_v40 = vmul.f32 -1.442695, %v3902_v21  ;;  %v3770_v21 = vadd.f32 %v3769_v13, %v3728_v24  ;;  %v3958_v24 = vand.u32 2147483648, %v10990_v45  ;;  %v3973_v13 = vand.u32 2147483648, %v10992_v30 }
 0x806   : > { %v3945_v19 = vadd.f32 1.0, %v8976_v63  ;;  %v10998_v62 = vpop.eup %8977 }
 0x807   : > { %8981 = vpow2.f32 %v8329_v40  ;;  %v11000_v35 = vpop.eup %8979  ;;  %v3948_v22 = vmul.f32 %v10998_v62, %v10990_v45  ;;  %v3731_v40 = vpop.f32.mrf.mxu1  ;;  %vm3953_vm10 = vweird.f32 %v10998_v62 }
 0x808   : > { %8983 = vrcp.f32 %v3945_v19  ;;  %v3963_v41 = vmul.f32 %v11000_v35, %v10992_v30  ;;  %v3986_v54 = vand.u32 2147483647, %v3945_v19  ;;  %vm3968_vm4 = vweird.f32 %v11000_v35  ;;  %vm11027_vm14 = vmor %vm3952_vm9, %vm3953_vm10 }
 0x809   : > { %v3949_v39 = vsub.f32 1.0, %v3948_v22  ;;  %v3772_v22 = vpop.f32.mrf.mxu2  ;;  %vm3982_vm7 = vweird.f32 %v3945_v19 }
 0x80a   : > { %v3964_v25 = vsub.f32 1.0, %v3963_v41  ;;  %vm3987_vm9 = vcmp.eq.f32.partialorder %v3986_v54, 8.507059e+37 }
 0x80b   : > { %v3865_v58 = vpop.f32.mrf.mxu0  ;;  %v3950_v5 = vmul.f32 %v10998_v62, %v3949_v39 }
 0x80c   : > { %v3965_v29 = vmul.f32 %v11000_v35, %v3964_v25 }
 0x80d   : > { %v8982_v0 = vpop.eup %8981  ;;  %v3951_v41 = vadd.f32 %v10998_v62, %v3950_v5 }
 0x80e   : > { %v8984_v59 = vpop.eup %8983  ;;  %v11006_v34 = vadd.f32 1.0, %v8982_v0  ;;  %v3966_v39 = vadd.f32 %v11000_v35, %v3965_v29 }
 0x80f   : > { %v3978_v27 = vmul.f32 %v8984_v59, %v3945_v19  ;;  %vm3983_vm0 = vweird.f32 %v8984_v59  ;;  %v3955_v49 = vsel %vm11027_vm14, %v10998_v62, %v3951_v41  ;;  %v3959_v62 = vor.u32 1.1754944e-38, %v3958_v24 }
 0x810   : > { %8985 = vrcp.f32 %v11006_v34  ;;  %vm11021_vm13 = vmor %vm3982_vm7, %vm3983_vm0  ;;  %v4003_v48 = vand.u32 2147483648, %v11006_v34  ;;  %vm3957_vm7 = vcmp.eq.f32.partialorder %v3956_v56, 8.507059e+37  ;;  %v3974_v41 = vor.u32 1.1754944e-38, %v3973_v13 }
 0x811   : > { %v3979_v28 = vsub.f32 1.0, %v3978_v27  ;;  %v3988_v27 = vand.u32 2147483648, %v3945_v19  ;;  %v3971_v19 = vand.u32 2147483647, %v10992_v30  ;;  %vm11038_vm0 = vmor %vm3967_vm15, %vm3968_vm4  ;;  %v3960_v5 = vsel %vm3957_vm7, %v3959_v62, %v3955_v49 }
 0x812   : > { %v3970_v30 = vsel %vm11038_vm0, %v11000_v35, %v3966_v39  ;;  %v4004_v35 = vor.u32 1.1754944e-38, %v4003_v48  ;;  %v3873_v39 = vadd.f32 %v3865_v58, %v3770_v21  ;;  %v3872_v24 = vadd.f32 %v10996_v23, %v3767_v31  ;;  %v3910_v58 = vpop.permute.xlu0 %3909 }
 0x813   : > { %v3980_v11 = vmul.f32 %v8984_v59, %v3979_v28  ;;  %v3773_v28 = vadd.f32 %v3772_v22, %v3731_v40  ;;  %v3989_v45 = vor.u32 1.1754944e-38, %v3988_v27  ;;  %v3868_v22 = vpop.f32.mrf.mxu0  ;;  %vm3972_vm4 = vcmp.eq.f32.partialorder %v3971_v19, 8.507059e+37 }
 0x814   : > { %v3764_v27 = vadd.f32 %v10986_v18, %v10984_v17  ;;  %v3975_v2 = vsel %vm3972_vm4, %v3974_v41, %v3970_v30  ;;  %v3915_v18 = vpop.permute.xlu2 %3914 }
 0x815   : > { %v3981_v63 = vadd.f32 %v8984_v59, %v3980_v11  ;;  %v3874_v25 = vadd.f32 %v3868_v22, %v3773_v28  ;;  %v4012_v13 = vsub.f32 1.0, %v3975_v2  ;;  %v3928_v21 = vadd.f32 %v3915_v18, %v3872_v24 }
 0x816   : > { %v8986_v0 = vpop.eup %8985 }
 0x817   : > { %v3993_v32 = vmul.f32 %v8986_v0, %v11006_v34  ;;  %v3985_v29 = vsel %vm11021_vm13, %v8984_v59, %v3981_v63  ;;  %vm3998_vm10 = vweird.f32 %v8986_v0  ;;  %v4001_v63 = vand.u32 2147483647, %v11006_v34 }
 0x818   : > { %vm3997_vm13 = vweird.f32 %v11006_v34  ;;  %v3930_v19 = vadd.f32 %v3925_v46, %v3874_v25  ;;  %v3871_v34 = vadd.f32 %v10988_v3, %v3764_v27  ;;  %v4016_v23 = vmul.f32 %v4012_v13, %v10920_v52  ;;  %v4023_v27 = vld [vmem:[%s12999_s15] sm:$0xff]  ;;  %s13283_s15 = sld [smem:[#allocation61_spill]] }
 0x819   : > { %v3994_v11 = vsub.f32 1.0, %v3993_v32  ;;  %v3990_v32 = vsel %vm3987_vm9, %v3989_v45, %v3985_v29  ;;  %vm3999_vm14 = vmor %vm3997_vm13, %vm3998_vm10  ;;  %vm4002_vm15 = vcmp.eq.f32.partialorder %v4001_v63, 8.507059e+37  ;;  %v3920_v29 = vpop.permute.xlu1 %3919  ;;  %v4011_v45 = vsub.f32 1.0, %v3960_v5 }
 0x81a   : > { %v3929_v22 = vadd.f32 %v3920_v29, %v3873_v39  ;;  %v3927_v31 = vadd.f32 %v3910_v58, %v3871_v34  ;;  %v4141_v46 = vmul.u32 2, %v10669_v38  ;;  %v4008_v3 = vmul.f32 %v3975_v2, %v3928_v21  ;;  %v8335_v39 = vld [vmem:[%s13000_s1 + $0x28] sm:$0xff]  ;;  %v4044_v18 = vpop.permute.xlu0 %4043 }
 0x81b   : > { %v3995_v59 = vmul.f32 %v8986_v0, %v3994_v11  ;;  %v4013_v11 = vsub.f32 1.0, %v3990_v32  ;;  %v13001_v2 = vmov 1.0   ;;  %vm13002_vm13 = vcmask 261120  }
 0x81c   : > { %vm4145_vm0 = vcmp.eq.s32.totalorder %v10081_v44, %v4141_v46  ;;  %v4153_v62 = vadd.s32 1, %v4141_v46  ;;  %v4007_v41 = vmul.f32 %v3960_v5, %v3927_v31  ;;  %v4020_v52 = vadd.f32 %v4016_v23, %v4008_v3  ;;  %v4024_v5 = vld [vmem:[%s13000_s1 + $0x8] sm:$0xff]  ;;  %v4039_v29 = vpop.permute.xlu2 %4038 }
 0x81d   : > { %v3996_v54 = vadd.f32 %v8986_v0, %v3995_v59  ;;  %v4017_v48 = vmul.f32 %v4013_v11, %v10927_v53  ;;  %v4140_v59 = vmul.u32 2, %v10676_v26  ;;  %v4139_v53 = vmul.u32 2, %v10679_v20  ;;  %8354 = vmatpush.msk.msra.mxu0 %vm4145_vm0, %v13001_v2  ;;  %v4025_v11 = vld [vmem:[%s13000_s1 + $0x10] sm:$0xff] }
 0x81e   : > { %vm4157_vm10 = vcmp.eq.s32.totalorder %v10081_v44, %v4153_v62  ;;  %v11124_v13 = vadd.s32 112, %v10079_v43  ;;  %s13284_s2 = smov %s13283_s15 }
 0x81f   : > { %v4000_v40 = vsel %vm3999_vm14, %v8986_v0, %v3996_v54  ;;  %v4009_v0 = vmul.f32 %v3990_v32, %v3929_v22  ;;  %vm4144_vm9 = vcmp.eq.s32.totalorder %v10081_v44, %v4140_v59  ;;  %v4152_v32 = vadd.s32 1, %v4140_v59  ;;  %8342 = vmatpush.msk.msra.mxu3 %vm4157_vm10, %v13001_v2  ;;  %vm13003_vm14 = vmmov %vm13002_vm13 }
 0x820   : > { %v4005_v56 = vsel %vm4002_vm15, %v4004_v35, %v4000_v40  ;;  %v4151_v25 = vadd.s32 1, %v4139_v53  ;;  %v8334_v35 = vld [vmem:[%s13000_s1 + $0x20] sm:$0xff]  ;;  %8355 = vmatpush.msk.msra.mxu0 %vm4144_vm9, %v13001_v2  ;;  %vm4143_vm7 = vcmp.eq.s32.totalorder %v10081_v44, %v4139_v53  ;;  %vm13004_vm9 = vnez %v12908_v6  ;;  %v8336_v40 = vld [vmem:[%s13000_s1 + $0x30] sm:$0xff]  ;;  %v4026_v6 = vld [vmem:[%s13000_s1 + $0x18] sm:$0xff] }
 0x821   : > { %v4014_v28 = vsub.f32 1.0, %v4005_v56  ;;  %v4010_v17 = vmul.f32 %v4005_v56, %v3930_v19  ;;  %v4021_v63 = vadd.f32 %v4017_v48, %v4009_v0  ;;  %vm4156_vm4 = vcmp.eq.s32.totalorder %v10081_v44, %v4152_v32  ;;  %v4034_v60 = vpop.permute.xlu1 %4033 }
 0x822   : > { %vm4155_vm0 = vcmp.eq.s32.totalorder %v10081_v44, %v4151_v25  ;;  %8356 = vmatpush.msk.msra.mxu0 %vm4143_vm7, %v13001_v2  ;;  %8343 = vmatpush.msk.msra.mxu3 %vm4156_vm4, %v13001_v2  ;;  %vm13005_vm10 = vnez %v12910_v36  ;;  %vm13006_vm7 = vmmov %vm13002_vm13  ;;  %v8337_v36 = vld [vmem:[%s13000_s1 + $0x38] sm:$0xff]  ;;  %v11185_v22 = vadd.s32 72, %v10079_v43  ;;  %s13126_s1 = smov %s13125_s18 }
 0x823   : > { %v4018_v49 = vmul.f32 %v4014_v28, %v10934_v33  ;;  %v4015_v33 = vmul.f32 %v4011_v45, %v10913_v15  ;;  %v4138_v15 = vmul.u32 2, %v10690_v42  ;;  %vm13007_vm4 = vmmov %vm13006_vm7  ;;  %v11169_v28 = vadd.s32 80, %v10079_v43 }
 0x824   : > { %8344 = vmatpush.msk.msra.mxu3 %vm4155_vm0, %v13001_v2  ;;  %vm13010_vm0 = vmmov %vm13007_vm4 }
 0x825   : > { %v4022_v30 = vadd.f32 %v4018_v49, %v4010_v17  ;;  %v4019_v54 = vadd.f32 %v4015_v33, %v4007_v41  ;;  %vm4142_vm15 = vcmp.eq.s32.totalorder %v10081_v44, %v4138_v15  ;;  %v4150_v56 = vadd.s32 1, %v4138_v15 }
 0x826   : > { %8357 = vmatpush.msk.msra.mxu0 %vm4142_vm15, %v13001_v2  ;;  %vm13009_vm15 = vmmov %vm13007_vm4  ;;  %v11201_v17 = vadd.s32 64, %v10079_v43 }
 0x827   : > { %4075 = vmatpush.msrb.mxu1 %v4022_v30  ;;  %4121 = vmatpush.msra.mxu2 %v4022_v30 }
 0x828   : > { %8358 = vmatpush.msk.msra.mxu0 %vm13004_vm9, %v13001_v2  ;;  %vm4154_vm9 = vcmp.eq.s32.totalorder %v10081_v44, %v4150_v56 }
 0x829   : > { %4076 = vmatpush.msrb.mxu1 %v4021_v63  ;;  %4122 = vmatpush.msra.mxu2 %v4021_v63  ;;  %v4049_v23 = vpop.permute.xlu1 %4048 }
 0x82a   : > { %8359 = vmatpush.msk.msra.mxu0 %vm13005_vm10, %v13001_v2  ;;  %8345 = vmatpush.msk.msra.mxu3 %vm4154_vm9, %v13001_v2  ;;  %vm13013_vm10 = vcmp.eq.s32.totalorder %v10081_v44, %v10640_v10  ;;  %v11130_v10 = vadd.s32 96, %v10079_v43 }
 0x82b   : > { %4077 = vmatpush.msrb.mxu1 %v4020_v52  ;;  %4123 = vmatpush.msra.mxu2 %v4020_v52 }
 0x82c   : > { %8360 = vmatpush.msk.msra.mxu0 %vm10612_vm11, %v13001_v2  ;;  %vm13011_vm11 = vcmp.eq.s32.totalorder %v10081_v44, %v10616_v61  ;;  %v11121_v61 = vadd.s32 120, %v10079_v43 }
 0x82d   : > { %4078 = vmatpush.msrb.mxu1 %v4019_v54  ;;  %4124 = vmatpush.msra.mxu2 %v4019_v54 }
 0x82e   : > { %8330 = vmatmul.msk.f32.vlgmr.msrb.gmra.mxu1 %vm13002_vm13, %v4023_v27  ;;  %8338 = vmatmul.msk.f32.vlgmr.msra.gmra.mxu2 %vm13003_vm14, %v8334_v35  ;;  %vm13008_vm14 = vmmov %vm13007_vm4 }
 0x82f   : > { %8361 = vmatpush.msk.msra.mxu0 %vm10625_vm12, %v13001_v2  ;;  %8346 = vmatpush.msk.msra.mxu3 %vm13011_vm11, %v13001_v2  ;;  %vm13012_vm12 = vcmp.eq.s32.totalorder %v10081_v44, %v10629_v37  ;;  %v11127_v37 = vadd.s32 104, %v10079_v43 }
 0x831   : > { %8347 = vmatpush.msk.msra.mxu3 %vm13012_vm12, %v13001_v2  ;;  %vm12751_vm9 = vcmp.eq.s32.totalorder %v11127_v37, %v10088_v47  ;;  %vm12750_vm11 = vcmp.eq.s32.totalorder %v11127_v37, %v10157_v4  ;;  %vm12761_vm12 = vcmp.eq.s32.totalorder %v11130_v10, %v10088_v47 }
 0x833   : > { %8348 = vmatpush.msk.msra.mxu3 %vm13013_vm10, %v13001_v2  ;;  %vm12752_vm10 = vcmp.eq.s32.totalorder %v11130_v10, %v10157_v4 }
 0x836   : > { %8331 = vmatmul.msk.f32.gmra.mxu1 %vm13002_vm13, %v4024_v5  ;;  %8339 = vmatmul.msk.f32.gmra.mxu2 %vm13006_vm7, %v8335_v39  ;;  %vm13014_vm13 = vcmp.eq.s32.totalorder %v10081_v44, %v10648_v16  ;;  %vm13015_vm7 = vcmask 523264   ;;  %v11154_v44 = vadd.s32 88, %v10079_v43  ;;  %v4351_v5 = vld [vmem:[#allocation5 + $0x20] sm:$0xff]  ;;  %v4352_v39 = vld [vmem:[#allocation5 + $0x28] sm:$0xff] }
 0x837   : > { %8349 = vmatpush.msk.msra.mxu3 %vm13014_vm13, %v13001_v2  ;;  %vm13016_vm13 = vmmov %vm13015_vm7 }
 0x83e   : > { %8332 = vmatmul.msk.f32.gmra.mxu1 %vm13007_vm4, %v4025_v11  ;;  %8340 = vmatmul.msk.f32.gmra.mxu2 %vm13008_vm14, %v8336_v40  ;;  %vm12764_vm4 = vcmp.eq.s32.totalorder %v11121_v61, %v10088_v47  ;;  %vm12762_vm14 = vcmp.eq.s32.totalorder %v11121_v61, %v10157_v4  ;;  %v4353_v11 = vld [vmem:[#allocation5 + $0x30] sm:$0xff]  ;;  %v4354_v40 = vld [vmem:[#allocation5 + $0x38] sm:$0xff] }
 0x83f   : > { %8366 = vmatpush.msk.msra.mxu1 %vm12764_vm4, %v13001_v2  ;;  %8382 = vmatpush.msk.msrb.mxu2 %vm12762_vm14, %v13001_v2 }
 0x846   : > { %8333 = vmatmul.msk.f32.gmra.mxu1 %vm13009_vm15, %v4026_v6  ;;  %8341 = vmatmul.msk.f32.gmra.mxu2 %vm13010_vm0, %v8337_v36  ;;  %vm12763_vm15 = vcmp.eq.s32.totalorder %v11124_v13, %v10088_v47  ;;  %vm12749_vm0 = vcmp.eq.s32.totalorder %v11124_v13, %v10157_v4 }
 0x847   : > { %8367 = vmatpush.msk.msra.mxu1 %vm12763_vm15, %v13001_v2  ;;  %8383 = vmatpush.msk.msrb.mxu2 %vm12749_vm0, %v13001_v2  ;;  %vm12753_vm0 = vcmp.eq.s32.totalorder %v11154_v44, %v10157_v4 }
 0x849   : > { %8368 = vmatpush.msk.msra.mxu1 %vm12751_vm9, %v13001_v2  ;;  %8384 = vmatpush.msk.msrb.mxu2 %vm12750_vm11, %v13001_v2  ;;  %vm12756_vm11 = vcmp.eq.s32.totalorder %v11169_v28, %v10088_v47  ;;  %vm12755_vm9 = vcmp.eq.s32.totalorder %v11169_v28, %v10157_v4 }
 0x84b   : > { %8369 = vmatpush.msk.msra.mxu1 %vm12761_vm12, %v13001_v2  ;;  %8385 = vmatpush.msk.msrb.mxu2 %vm12752_vm10, %v13001_v2  ;;  %vm12760_vm10 = vcmp.eq.s32.totalorder %v11185_v22, %v10157_v4 }
 0x84d   : > { %8386 = vmatpush.msk.msrb.mxu2 %vm12753_vm0, %v13001_v2  ;;  %vm12758_vm0 = vcmp.eq.s32.totalorder %v11201_v17, %v10088_v47 }
 0x84f   : > { %8387 = vmatpush.msk.msrb.mxu2 %vm12755_vm9, %v13001_v2  ;;  %vm13017_vm9 = vcmask 523264  }
 0x851   : > { %8388 = vmatpush.msk.msrb.mxu2 %vm12760_vm10, %v13001_v2 }
 0x8ab   : > { %v4080_v9 = vpop.f32.mrf.mxu1 }
 0x8ac   : > { %v4081_v24 = vadd.f32 %v4080_v9, %v4034_v60 }
 0x8ae   : > { %8362 = vmatmul.msk.f32.vlgmr.msra.gmra.mxu0 %vm13015_vm7, %v4081_v24  ;;  %vm12754_vm7 = vcmp.eq.s32.totalorder %v11154_v44, %v10088_v47 }
 0x8af   : > { %8370 = vmatpush.msk.msra.mxu1 %vm12754_vm7, %v13001_v2  ;;  %vm12759_vm7 = vcmp.eq.s32.totalorder %v11201_v17, %v10157_v4 }
 0x8b0   : > { %8389 = vmatpush.msk.msrb.mxu2 %vm12759_vm7, %v13001_v2  ;;  %vm13027_vm7 = vcmp.eq.s32.totalorder %v10690_v42, %v10157_v4 }
 0x8b1   : > { %v4126_v16 = vpop.f32.mrf.mxu2  ;;  %8371 = vmatpush.msk.msra.mxu1 %vm12756_vm11, %v13001_v2  ;;  %vm13018_vm11 = vmmov %vm13017_vm9 }
 0x8b2   : > { %v4127_v19 = vadd.f32 %v4126_v16, %v4034_v60 }
 0x8b3   : > { %v4083_v34 = vpop.f32.mrf.mxu1 }
 0x8b4   : > { %v4084_v45 = vadd.f32 %v4083_v34, %v4039_v29  ;;  %8350 = vmatmul.msk.f32.vlgmr.msra.gmra.mxu3 %vm13016_vm13, %v4127_v19  ;;  %v4438_v19 = vld [vmem:[#allocation7 + $0x20] sm:$0xff] }
 0x8b6   : > { %8363 = vmatmul.msk.f32.gmra.mxu0 %vm13016_vm13, %v4084_v45  ;;  %vm12757_vm13 = vcmp.eq.s32.totalorder %v11185_v22, %v10088_v47  ;;  %v4346_v45 = vld [vmem:[#allocation7] sm:$0xff] }
 0x8b7   : > { %8372 = vmatpush.msk.msra.mxu1 %vm12757_vm13, %v13001_v2  ;;  %vm13019_vm13 = vcmp.eq.s32.totalorder %v10669_v38, %v10088_v47 }
 0x8b9   : > { %v4129_v49 = vpop.f32.mrf.mxu2  ;;  %8373 = vmatpush.msk.msra.mxu1 %vm12758_vm0, %v13001_v2  ;;  %vm13021_vm0 = vcmp.eq.s32.totalorder %v10676_v26, %v10088_v47 }
 0x8ba   : > { %v4130_v48 = vadd.f32 %v4129_v49, %v4039_v29  ;;  %v4342_v29 = vld [vmem:[#allocation5] sm:$0xff]  ;;  %v4439_v49 = vld [vmem:[#allocation7 + $0x28] sm:$0xff] }
 0x8bb   : > { %v4086_v58 = vpop.f32.mrf.mxu1  ;;  %8374 = vmatpush.msk.msra.mxu1 %vm13019_vm13, %v13001_v2  ;;  %vm13023_vm13 = vcmp.eq.s32.totalorder %v10679_v20, %v10088_v47 }
 0x8bc   : > { %v4087_v21 = vadd.f32 %v4086_v58, %v4044_v18  ;;  %8351 = vmatmul.msk.f32.gmra.mxu3 %vm13017_vm9, %v4130_v48  ;;  %vm13020_vm9 = vcmp.eq.s32.totalorder %v10669_v38, %v10157_v4  ;;  %v4525_v48 = vld [vmem:[#allocation5 + $0x40] sm:$0xff]  ;;  %v4347_v58 = vld [vmem:[#allocation7 + $0x8] sm:$0xff] }
 0x8bd   : > { %8390 = vmatpush.msk.msrb.mxu2 %vm13020_vm9, %v13001_v2  ;;  %8375 = vmatpush.msk.msra.mxu1 %vm13021_vm0, %v13001_v2  ;;  %vm13024_vm9 = vcmp.eq.s32.totalorder %v10679_v20, %v10157_v4  ;;  %vm13025_vm0 = vcmask 523264  }
 0x8be   : > { %8364 = vmatmul.msk.f32.gmra.mxu0 %vm13018_vm11, %v4087_v21  ;;  %vm13022_vm11 = vcmp.eq.s32.totalorder %v10676_v26, %v10157_v4  ;;  %vm13028_vm10 = vmmov %vm13025_vm0  ;;  %v4440_v21 = vld [vmem:[#allocation7 + $0x30] sm:$0xff] }
 0x8bf   : > { %8391 = vmatpush.msk.msrb.mxu2 %vm13022_vm11, %v13001_v2  ;;  %8376 = vmatpush.msk.msra.mxu1 %vm13023_vm13, %v13001_v2  ;;  %vm13026_vm11 = vcmp.eq.s32.totalorder %v10690_v42, %v10088_v47  ;;  %vm13031_vm13 = vnez %v12871_v14  ;;  %v5502_v14 = vld [vmem:[#allocation11 + $0x38] sm:$0xff] }
 0x8c1   : > { %v4132_v0 = vpop.f32.mrf.mxu2  ;;  %8392 = vmatpush.msk.msrb.mxu2 %vm13024_vm9, %v13001_v2  ;;  %8377 = vmatpush.msk.msra.mxu1 %vm13026_vm11, %v13001_v2  ;;  %vm13032_vm9 = vcmask 261120  }
 0x8c2   : > { %v4133_v30 = vadd.f32 %v4132_v0, %v4044_v18  ;;  %v4343_v18 = vld [vmem:[#allocation5 + $0x8] sm:$0xff] }
 0x8c3   : > { %v4089_v31 = vpop.f32.mrf.mxu1  ;;  %8393 = vmatpush.msk.msrb.mxu2 %vm13027_vm7, %v13001_v2  ;;  %8378 = vmatpush.msk.msra.mxu1 %vm10098_vm1, %v13001_v2  ;;  %vm13030_vm7 = vnez %v12859_v57  ;;  %v4526_v0 = vld [vmem:[#allocation5 + $0x48] sm:$0xff]  ;;  %v5516_v57 = vld [vmem:[#allocation11 + $0x60] sm:$0xff] }
 0x8c4   : > { %v4090_v46 = vadd.f32 %v4089_v31, %v4049_v23  ;;  %8352 = vmatmul.msk.f32.gmra.mxu3 %vm13025_vm0, %v4133_v30  ;;  %v4344_v30 = vld [vmem:[#allocation5 + $0x10] sm:$0xff]  ;;  %v4441_v31 = vld [vmem:[#allocation7 + $0x38] sm:$0xff] }
 0x8c5   : > { %8394 = vmatpush.msk.msrb.mxu2 %vm10163_vm5, %v13001_v2  ;;  %8379 = vmatpush.msk.msra.mxu1 %vm10104_vm2, %v13001_v2 }
 0x8c6   : > { %8365 = vmatmul.msk.f32.gmra.mxu0 %vm13028_vm10, %v4090_v46  ;;  %vm13029_vm10 = vmmov %vm13025_vm0  ;;  %v4527_v46 = vld [vmem:[#allocation5 + $0x50] sm:$0xff] }
 0x8c7   : > { %8395 = vmatpush.msk.msrb.mxu2 %vm10172_vm6, %v13001_v2  ;;  %8380 = vmatpush.msk.msra.mxu1 %vm10118_vm3, %v13001_v2  ;;  %vm13033_vm0 = vmmov %vm13032_vm9 }
 0x8c8   : > { %vm13034_vm11 = vmmov %vm13033_vm0 }
 0x8c9   : > { %v4135_v59 = vpop.f32.mrf.mxu2  ;;  %8396 = vmatpush.msk.msrb.mxu2 %vm10182_vm8, %v13001_v2  ;;  %8381 = vmatpush.msk.msra.mxu1 %vm13030_vm7, %v13001_v2  ;;  %vm13040_vm12 = vmmov %vm13033_vm0 }
 0x8ca   : > { %v4136_v3 = vadd.f32 %v4135_v59, %v4049_v23  ;;  %vm13041_vm14 = vmmov %vm13033_vm0  ;;  %v4348_v23 = vld [vmem:[#allocation7 + $0x10] sm:$0xff]  ;;  %v4345_v59 = vld [vmem:[#allocation5 + $0x18] sm:$0xff] }
 0x8cb   : > { %8397 = vmatpush.msk.msrb.mxu2 %vm13031_vm13, %v13001_v2  ;;  %vm13044_vm15 = vmmov %vm13033_vm0 }
 0x8cc   : > { %8353 = vmatmul.msk.f32.gmra.mxu3 %vm13029_vm10, %v4136_v3  ;;  %vm13035_vm10 = vmmov %vm13033_vm0  ;;  %v4349_v3 = vld [vmem:[#allocation7 + $0x18] sm:$0xff] }
 0x8cd   : > { %vm13045_vm4 = vmmov %vm13033_vm0 }
 0x92b   : > { %v4232_v63 = vpop.f32.mrf.mxu0 }
 0x933   : > { %v4235_v62 = vpop.f32.mrf.mxu0 }
 0x937   : > { %v4191_v33 = vpop.f32.mrf.mxu3 }
 0x938   : > { %v11304_v53 = vadd.f32 %v4232_v63, %v4191_v33  ;;  %v4528_v63 = vld [vmem:[#allocation5 + $0x58] sm:$0xff]  ;;  %v4575_v33 = vld [vmem:[#allocation7 + $0x40] sm:$0xff] }
 0x93a   : > { %4284 = vmatmul.f32.vlgmr.msra.gmra.mxu1 %v11304_v53  ;;  %4329 = vmatmul.f32.vlgmr.msrb.gmra.mxu2 %v11304_v53 }
 0x93b   : > { %v4238_v32 = vpop.f32.mrf.mxu0 }
 0x93f   : > { %v4194_v41 = vpop.f32.mrf.mxu3 }
 0x940   : > { %v11308_v52 = vadd.f32 %v4235_v62, %v4194_v41  ;;  %v4576_v62 = vld [vmem:[#allocation7 + $0x48] sm:$0xff]  ;;  %v4577_v41 = vld [vmem:[#allocation7 + $0x50] sm:$0xff] }
 0x942   : > { %4287 = vmatmul.f32.gmra.mxu1 %v11308_v52  ;;  %4332 = vmatmul.f32.gmra.mxu2 %v11308_v52 }
 0x943   : > { %v4241_v54 = vpop.f32.mrf.mxu0 }
 0x947   : > { %v4197_v15 = vpop.f32.mrf.mxu3 }
 0x948   : > { %v11312_v25 = vadd.f32 %v4238_v32, %v4197_v15  ;;  %v4578_v32 = vld [vmem:[#allocation7 + $0x58] sm:$0xff] }
 0x94a   : > { %4290 = vmatmul.f32.gmra.mxu1 %v11312_v25  ;;  %4335 = vmatmul.f32.gmra.mxu2 %v11312_v25 }
 0x94f   : > { %v4200_v27 = vpop.f32.mrf.mxu3 }
 0x950   : > { %v11316_v35 = vadd.f32 %v4241_v54, %v4200_v27  ;;  %v13053_v27 = vld [vmem:[#allocation78_spill] sm:$0xff] }
 0x952   : > { %4293 = vmatmul.f32.gmra.mxu1 %v11316_v35  ;;  %4338 = vmatmul.f32.gmra.mxu2 %v11316_v35 }
 0x953   : > { %4379 = vmatpush.msrb.mxu3 %v11316_v35  ;;  %4466 = vmatpush.msrb.mxu1 %v11316_v35 }
 0x955   : > { %4380 = vmatpush.msrb.mxu3 %v11312_v25  ;;  %4467 = vmatpush.msrb.mxu1 %v11312_v25 }
 0x957   : > { %4381 = vmatpush.msrb.mxu3 %v11308_v52  ;;  %4468 = vmatpush.msrb.mxu1 %v11308_v52 }
 0x959   : > { %4382 = vmatpush.msrb.mxu3 %v11304_v53  ;;  %4469 = vmatpush.msrb.mxu1 %v11304_v53 }
 0x95a   : > { %8398 = vmatmul.msk.f32.vlgmr.msrb.gmra.mxu3 %vm13032_vm9, %v4351_v5  ;;  %vm13036_vm9 = vmmov %vm13033_vm0 }
 0x95b   : > { %8406 = vmatmul.msk.f32.vlgmr.msrb.gmra.mxu1 %vm13036_vm9, %v4438_v19  ;;  %vm13039_vm9 = vmmov %vm13033_vm0 }
 0x962   : > { %8399 = vmatmul.msk.f32.gmra.mxu3 %vm13033_vm0, %v4352_v39 }
 0x96a   : > { %8400 = vmatmul.msk.f32.gmra.mxu3 %vm13034_vm11, %v4353_v11  ;;  %vm13037_vm11 = vmmov %vm13033_vm0 }
 0x972   : > { %8401 = vmatmul.msk.f32.gmra.mxu3 %vm13035_vm10, %v4354_v40  ;;  %vm13038_vm10 = vmmov %vm13033_vm0 }
 0x973   : > { %8407 = vmatmul.msk.f32.gmra.mxu1 %vm13038_vm10, %v4439_v49  ;;  %vm13043_vm10 = vmmov %vm13033_vm0 }
 0x97b   : > { %8408 = vmatmul.msk.f32.gmra.mxu1 %vm13041_vm14, %v4440_v21  ;;  %vm13048_vm14 = vmmov %vm13033_vm0 }
 0x983   : > { %8409 = vmatmul.msk.f32.gmra.mxu1 %vm13045_vm4, %v4441_v31  ;;  %vm13051_vm4 = vmmov %vm13033_vm0 }
 0x9b7   : > { %v4285_v6 = vpop.f32.mrf.mxu1 }
 0x9bd   : > { %v4330_v36 = vpop.f32.mrf.mxu2 }
 0x9bf   : > { %v4288_v56 = vpop.f32.mrf.mxu1 }
 0x9c5   : > { %v4333_v60 = vpop.f32.mrf.mxu2 }
 0x9c7   : > { %v4291_v9 = vpop.f32.mrf.mxu1 }
 0x9cd   : > { %v4336_v24 = vpop.f32.mrf.mxu2 }
 0x9cf   : > { %v4294_v16 = vpop.f32.mrf.mxu1 }
 0x9d0   : > { %4420 = vmatpush.msrb.mxu0 %v4294_v16  ;;  %4507 = vmatpush.msra.mxu2 %v4294_v16 }
 0x9d2   : > { %4421 = vmatpush.msrb.mxu0 %v4291_v9  ;;  %4508 = vmatpush.msra.mxu2 %v4291_v9  ;;  %v4631_v9 = vpop.permute.xlu2 %4630 }
 0x9d4   : > { %4422 = vmatpush.msrb.mxu0 %v4288_v56  ;;  %4509 = vmatpush.msra.mxu2 %v4288_v56  ;;  %v13062_v56 = vld [vmem:[#allocation75_spill] sm:$0xff] }
 0x9d5   : > { %v4339_v34 = vpop.f32.mrf.mxu2 }
 0x9d6   : > { %4423 = vmatpush.msrb.mxu0 %v4285_v6  ;;  %4510 = vmatpush.msra.mxu2 %v4285_v6 }
 0x9d7   : > { %4553 = vmatpush.msra.mxu3 %v4339_v34  ;;  %8402 = vmatmul.msk.f32.vlgmr.msrb.gmra.mxu0 %vm13033_vm0, %v4342_v29  ;;  %v13068_v29 = vld [vmem:[#allocation77_spill] sm:$0xff] }
 0x9d8   : > { %4603 = vmatpush.msra.mxu0 %v4339_v34  ;;  %8410 = vmatmul.msk.f32.vlgmr.msra.gmra.mxu2 %vm13037_vm11, %v4346_v45  ;;  %vm13042_vm11 = vmmov %vm13033_vm0 }
 0x9d9   : > { %4554 = vmatpush.msra.mxu3 %v4336_v24 }
 0x9da   : > { %4604 = vmatpush.msra.mxu0 %v4336_v24  ;;  %v13065_v24 = vld [vmem:[#allocation76_spill] sm:$0xff] }
 0x9db   : > { %4555 = vmatpush.msra.mxu3 %v4333_v60 }
 0x9dc   : > { %4605 = vmatpush.msra.mxu0 %v4333_v60 }
 0x9dd   : > { %4556 = vmatpush.msra.mxu3 %v4330_v36  ;;  %v4384_v15 = vpop.f32.mrf.mxu3 }
 0x9de   : > { %8414 = vmatmul.msk.f32.vlgmr.msra.gmra.mxu3 %vm13039_vm9, %v4525_v48  ;;  %4606 = vmatpush.msra.mxu0 %v4330_v36  ;;  %vm13047_vm9 = vmmov %vm13033_vm0 }
 0x9df   : > { %8403 = vmatmul.msk.f32.gmra.mxu0 %vm13040_vm12, %v4343_v18  ;;  %vm13046_vm12 = vmmov %vm13033_vm0  ;;  %v4636_v18 = vpop.permute.xlu0 %4635 }
 0x9e0   : > { %8411 = vmatmul.msk.f32.gmra.mxu2 %vm13033_vm0, %v4347_v58 }
 0x9e5   : > { %v4387_v54 = vpop.f32.mrf.mxu3 }
 0x9e6   : > { %8415 = vmatmul.msk.f32.gmra.mxu3 %vm13042_vm11, %v4526_v0  ;;  %vm13049_vm11 = vmmov %vm13033_vm0 }
 0x9e7   : > { %8404 = vmatmul.msk.f32.gmra.mxu0 %vm13043_vm10, %v4344_v30  ;;  %vm13050_vm10 = vmmov %vm13033_vm0 }
 0x9e8   : > { %8412 = vmatmul.msk.f32.gmra.mxu2 %vm13044_vm15, %v4348_v23  ;;  %vm13052_vm15 = vmmov %vm13033_vm0 }
 0x9ed   : > { %v4390_v5 = vpop.f32.mrf.mxu3 }
 0x9ee   : > { %8416 = vmatmul.msk.f32.gmra.mxu3 %vm13046_vm12, %v4527_v46  ;;  %vm4779_vm12 = vcmp.eq.s32.totalorder %v11121_v61, %v10360_v1  ;;  %v4471_v46 = vpop.f32.mrf.mxu1 }
 0x9ef   : > { %8405 = vmatmul.msk.f32.gmra.mxu0 %vm13047_vm9, %v4345_v59  ;;  %vm4824_vm9 = vcmp.eq.s32.totalorder %v11121_v61, %v13053_v27  ;;  %8426 = vmatpush.msk.msra.mxu1 %vm4779_vm12, %v13001_v2  ;;  %vm4775_vm12 = vcmp.eq.s32.totalorder %v11154_v44, %v10360_v1 }
 0x9f0   : > { %8413 = vmatmul.msk.f32.gmra.mxu2 %vm13048_vm14, %v4349_v3  ;;  %vm4778_vm14 = vcmp.eq.s32.totalorder %v11124_v13, %v10360_v1 }
 0x9f1   : > { %8442 = vmatpush.msk.msrb.mxu2 %vm4824_vm9, %v13001_v2  ;;  %8427 = vmatpush.msk.msra.mxu1 %vm4778_vm14, %v13001_v2  ;;  %vm4820_vm9 = vcmp.eq.s32.totalorder %v11154_v44, %v13053_v27  ;;  %vm4774_vm14 = vcmp.eq.s32.totalorder %v11169_v28, %v10360_v1 }
 0x9f5   : > { %v4393_v11 = vpop.f32.mrf.mxu3 }
 0x9f6   : > { %8417 = vmatmul.msk.f32.gmra.mxu3 %vm13033_vm0, %v4528_v63  ;;  %vm4823_vm0 = vcmp.eq.s32.totalorder %v11124_v13, %v13053_v27  ;;  %v4641_v63 = vpop.permute.xlu1 %4640 }
 0x9f7   : > { %8418 = vmatmul.msk.f32.vlgmr.msra.gmra.mxu0 %vm13049_vm11, %v4575_v33  ;;  %8443 = vmatpush.msk.msrb.mxu2 %vm4823_vm0, %v13001_v2  ;;  %vm4777_vm11 = vcmp.eq.s32.totalorder %v11127_v37, %v10360_v1  ;;  %vm4819_vm0 = vcmp.eq.s32.totalorder %v11169_v28, %v13053_v27 }
 0x9f8   : > { %8428 = vmatpush.msk.msra.mxu1 %vm4777_vm11, %v13001_v2  ;;  %vm4773_vm11 = vcmp.eq.s32.totalorder %v11185_v22, %v10360_v1 }
 0x9ff   : > { %8419 = vmatmul.msk.f32.gmra.mxu0 %vm13050_vm10, %v4576_v62  ;;  %vm4822_vm10 = vcmp.eq.s32.totalorder %v11127_v37, %v13053_v27 }
 0xa00   : > { %8444 = vmatpush.msk.msrb.mxu2 %vm4822_vm10, %v13001_v2  ;;  %vm4818_vm10 = vcmp.eq.s32.totalorder %v11185_v22, %v13053_v27 }
 0xa07   : > { %8420 = vmatmul.msk.f32.gmra.mxu0 %vm13051_vm4, %v4577_v41  ;;  %vm4776_vm4 = vcmp.eq.s32.totalorder %v11130_v10, %v10360_v1 }
 0xa08   : > { %8429 = vmatpush.msk.msra.mxu1 %vm4776_vm4, %v13001_v2  ;;  %vm4772_vm4 = vcmp.eq.s32.totalorder %v11201_v17, %v10360_v1 }
 0xa0a   : > { %8430 = vmatpush.msk.msra.mxu1 %vm4775_vm12, %v13001_v2  ;;  %vm13054_vm12 = vcmp.eq.s32.totalorder %v10669_v38, %v10360_v1 }
 0xa0c   : > { %8431 = vmatpush.msk.msra.mxu1 %vm4774_vm14, %v13001_v2  ;;  %vm13056_vm14 = vcmp.eq.s32.totalorder %v10676_v26, %v10360_v1 }
 0xa0e   : > { %8432 = vmatpush.msk.msra.mxu1 %vm4773_vm11, %v13001_v2  ;;  %vm13058_vm11 = vcmp.eq.s32.totalorder %v10679_v20, %v10360_v1 }
 0xa0f   : > { %8421 = vmatmul.msk.f32.gmra.mxu0 %vm13052_vm15, %v4578_v32  ;;  %vm4821_vm15 = vcmp.eq.s32.totalorder %v11130_v10, %v13053_v27 }
 0xa10   : > { %8445 = vmatpush.msk.msrb.mxu2 %vm4821_vm15, %v13001_v2  ;;  %vm4817_vm15 = vcmp.eq.s32.totalorder %v11201_v17, %v13053_v27  ;;  %8433 = vmatpush.msk.msra.mxu1 %vm4772_vm4, %v13001_v2  ;;  %vm13060_vm4 = vcmp.eq.s32.totalorder %v10690_v42, %v10360_v1 }
 0xa12   : > { %8446 = vmatpush.msk.msrb.mxu2 %vm4820_vm9, %v13001_v2  ;;  %8434 = vmatpush.msk.msra.mxu1 %vm13054_vm12, %v13001_v2  ;;  %vm13055_vm9 = vcmp.eq.s32.totalorder %v10669_v38, %v13053_v27  ;;  %vm13063_vm12 = vcmp.eq.s32.totalorder %v13062_v56, %v10360_v1 }
 0xa14   : > { %8447 = vmatpush.msk.msrb.mxu2 %vm4819_vm0, %v13001_v2  ;;  %8435 = vmatpush.msk.msra.mxu1 %vm13056_vm14, %v13001_v2  ;;  %vm13057_vm0 = vcmp.eq.s32.totalorder %v10676_v26, %v13053_v27  ;;  %vm13066_vm14 = vcmp.eq.s32.totalorder %v13065_v24, %v10360_v1 }
 0xa16   : > { %8448 = vmatpush.msk.msrb.mxu2 %vm4818_vm10, %v13001_v2  ;;  %8436 = vmatpush.msk.msra.mxu1 %vm13058_vm11, %v13001_v2  ;;  %vm13059_vm10 = vcmp.eq.s32.totalorder %v10679_v20, %v13053_v27  ;;  %vm13069_vm11 = vcmp.eq.s32.totalorder %v13068_v29, %v10360_v1 }
 0xa18   : > { %8449 = vmatpush.msk.msrb.mxu2 %vm4817_vm15, %v13001_v2  ;;  %8437 = vmatpush.msk.msra.mxu1 %vm13060_vm4, %v13001_v2  ;;  %vm13061_vm15 = vcmp.eq.s32.totalorder %v10690_v42, %v13053_v27  ;;  %vm13071_vm4 = vcmp.eq.s32.totalorder %v10079_v43, %v10360_v1 }
 0xa1a   : > { %8450 = vmatpush.msk.msrb.mxu2 %vm13055_vm9, %v13001_v2  ;;  %8438 = vmatpush.msk.msra.mxu1 %vm13063_vm12, %v13001_v2  ;;  %vm13064_vm9 = vcmp.eq.s32.totalorder %v13062_v56, %v13053_v27 }
 0xa1c   : > { %8451 = vmatpush.msk.msrb.mxu2 %vm13057_vm0, %v13001_v2  ;;  %8439 = vmatpush.msk.msra.mxu1 %vm13066_vm14, %v13001_v2  ;;  %vm13067_vm0 = vcmp.eq.s32.totalorder %v13065_v24, %v13053_v27 }
 0xa1e   : > { %8452 = vmatpush.msk.msrb.mxu2 %vm13059_vm10, %v13001_v2  ;;  %8440 = vmatpush.msk.msra.mxu1 %vm13069_vm11, %v13001_v2  ;;  %vm13070_vm10 = vcmp.eq.s32.totalorder %v13068_v29, %v13053_v27 }
 0xa20   : > { %8453 = vmatpush.msk.msrb.mxu2 %vm13061_vm15, %v13001_v2  ;;  %8441 = vmatpush.msk.msra.mxu1 %vm13071_vm4, %v13001_v2  ;;  %vm13072_vm15 = vcmp.eq.s32.totalorder %v10079_v43, %v13053_v27 }
 0xa22   : > { %8454 = vmatpush.msk.msrb.mxu2 %vm13064_vm9, %v13001_v2 }
 0xa24   : > { %8455 = vmatpush.msk.msrb.mxu2 %vm13067_vm0, %v13001_v2 }
 0xa26   : > { %8456 = vmatpush.msk.msrb.mxu2 %vm13070_vm10, %v13001_v2 }
 0xa28   : > { %8457 = vmatpush.msk.msrb.mxu2 %vm13072_vm15, %v13001_v2 }
 0xa54   : > { %v4425_v39 = vpop.f32.mrf.mxu0 }
 0xa55   : > { %v4426_v6 = vadd.f32 %v4425_v39, %v4384_v15 }
 0xa5b   : > { %v4512_v59 = vpop.f32.mrf.mxu2 }
 0xa5c   : > { %v4428_v40 = vpop.f32.mrf.mxu0 }
 0xa5d   : > { %v4429_v45 = vadd.f32 %v4428_v40, %v4387_v54  ;;  %v4646_v40 = vpop.permute.xlu2 %4645 }
 0xa61   : > { %v4558_v36 = vpop.f32.mrf.mxu3 }
 0xa62   : > { %v4570_v60 = vadd.f32 %v4558_v36, %v4426_v6 }
 0xa64   : > { %v4648_v16 = vadd.f32 %v4631_v9, %v4570_v60  ;;  %v4431_v19 = vpop.f32.mrf.mxu0  ;;  %v4474_v60 = vpop.f32.mrf.mxu1 }
 0xa65   : > { %v4432_v31 = vadd.f32 %v4431_v19, %v4390_v5  ;;  %v4513_v5 = vadd.f32 %v4512_v59, %v4471_v46  ;;  %v4515_v9 = vpop.f32.mrf.mxu2 }
 0xa66   : > { %v8422_v34 = vmul.f32 -1.442695, %v4648_v16  ;;  %v4516_v59 = vadd.f32 %v4515_v9, %v4474_v60 }
 0xa68   : > { %8987 = vpow2.f32 %v8422_v34 }
 0xa69   : > { %v4561_v49 = vpop.f32.mrf.mxu3 }
 0xa6a   : > { %v4571_v48 = vadd.f32 %v4561_v49, %v4429_v45 }
 0xa6c   : > { %v4649_v58 = vadd.f32 %v4636_v18, %v4571_v48  ;;  %v4434_v21 = vpop.f32.mrf.mxu0 }
 0xa6d   : > { %v4435_v54 = vadd.f32 %v4434_v21, %v4393_v11 }
 0xa6e   : > { %v8988_v0 = vpop.eup %8987  ;;  %v8423_v30 = vmul.f32 -1.442695, %v4649_v58 }
 0xa6f   : > { %v4692_v23 = vadd.f32 1.0, %v8988_v0 }
 0xa70   : > { %8989 = vpow2.f32 %v8423_v30  ;;  %v4659_v30 = vpop.permute.xlu0 %4658 }
 0xa71   : > { %8991 = vrcp.f32 %v4692_v23  ;;  %v4564_v1 = vpop.f32.mrf.mxu3  ;;  %v4707_v56 = vand.u32 2147483648, %v4692_v23  ;;  %v4705_v16 = vand.u32 2147483647, %v4692_v23  ;;  %vm4701_vm9 = vweird.f32 %v4692_v23 }
 0xa72   : > { %v4572_v3 = vadd.f32 %v4564_v1, %v4432_v31 }
 0xa73   : > { %v4708_v18 = vor.u32 1.1754944e-38, %v4707_v56  ;;  %vm4706_vm0 = vcmp.eq.f32.partialorder %v4705_v16, 8.507059e+37 }
 0xa74   : > { %v4650_v43 = vadd.f32 %v4641_v63, %v4572_v3  ;;  %v4608_v33 = vpop.f32.mrf.mxu0 }
 0xa75   : > { %v4620_v34 = vadd.f32 %v4608_v33, %v4513_v5 }
 0xa76   : > { %v8990_v62 = vpop.eup %8989  ;;  %v8424_v41 = vmul.f32 -1.442695, %v4650_v43 }
 0xa77   : > { %v8992_v32 = vpop.eup %8991  ;;  %v4693_v15 = vadd.f32 1.0, %v8990_v62  ;;  %v4676_v46 = vadd.f32 %v4659_v30, %v4620_v34 }
 0xa78   : > { %8993 = vpow2.f32 %v8424_v41  ;;  %v4697_v27 = vmul.f32 %v8992_v32, %v4692_v23  ;;  %vm4702_vm12 = vweird.f32 %v8992_v32  ;;  %v4477_v41 = vpop.f32.mrf.mxu1 }
 0xa79   : > { %8995 = vrcp.f32 %v4693_v15  ;;  %v4567_v39 = vpop.f32.mrf.mxu3  ;;  %vm4703_vm14 = vmor %vm4701_vm9, %vm4702_vm12  ;;  %v4720_v63 = vand.u32 2147483647, %v4693_v15  ;;  %v4722_v43 = vand.u32 2147483648, %v4693_v15  ;;  %vm4716_vm10 = vweird.f32 %v4693_v15 }
 0xa7a   : > { %v4698_v6 = vsub.f32 1.0, %v4697_v27  ;;  %v4573_v36 = vadd.f32 %v4567_v39, %v4435_v54  ;;  %v4518_v54 = vpop.f32.mrf.mxu2 }
 0xa7b   : > { %vm4721_vm15 = vcmp.eq.f32.partialorder %v4720_v63, 8.507059e+37 }
 0xa7c   : > { %v4699_v24 = vmul.f32 %v8992_v32, %v4698_v6  ;;  %v4651_v19 = vadd.f32 %v4646_v40, %v4573_v36  ;;  %v4611_v58 = vpop.f32.mrf.mxu0  ;;  %v4723_v36 = vor.u32 1.1754944e-38, %v4722_v43 }
 0xa7d   : > { %v4621_v39 = vadd.f32 %v4611_v58, %v4516_v59 }
 0xa7e   : > { %v8994_v29 = vpop.eup %8993  ;;  %v4700_v45 = vadd.f32 %v8992_v32, %v4699_v24  ;;  %v8425_v11 = vmul.f32 -1.442695, %v4651_v19 }
 0xa7f   : > { %v8996_v49 = vpop.eup %8995  ;;  %v4694_v48 = vadd.f32 1.0, %v8994_v29  ;;  %v4519_v29 = vadd.f32 %v4518_v54, %v4477_v41 }
 0xa80   : > { %v4704_v21 = vsel %vm4703_vm14, %v8992_v32, %v4700_v45  ;;  %8997 = vpow2.f32 %v8425_v11  ;;  %v4712_v0 = vmul.f32 %v8996_v49, %v4693_v15  ;;  %vm4717_vm11 = vweird.f32 %v8996_v49 }
 0xa81   : > { %8999 = vrcp.f32 %v4694_v48  ;;  %v4709_v31 = vsel %vm4706_vm0, %v4708_v18, %v4704_v21  ;;  %vm4718_vm4 = vmor %vm4716_vm10, %vm4717_vm11  ;;  %v4735_v15 = vand.u32 2147483647, %v4694_v48  ;;  %v4737_v45 = vand.u32 2147483648, %v4694_v48 }
 0xa82   : > { %v4760_v1 = vsub.f32 1.0, %v4709_v31  ;;  %v4713_v3 = vsub.f32 1.0, %v4712_v0  ;;  %v4756_v23 = vmul.f32 %v4709_v31, %v4676_v46  ;;  %vm4731_vm9 = vweird.f32 %v4694_v48  ;;  %v4480_v46 = vpop.f32.mrf.mxu1 }
 0xa83   : > { %v4738_v31 = vor.u32 1.1754944e-38, %v4737_v45  ;;  %vm4736_vm0 = vcmp.eq.f32.partialorder %v4735_v15, 8.507059e+37  ;;  %v4873_v15 = vld [vmem:[#allocation8 + $0x30] sm:$0xff]  ;;  %v4874_v45 = vld [vmem:[#allocation8 + $0x38] sm:$0xff] }
 0xa84   : > { %v4764_v33 = vmul.f32 %v4760_v1, %v11304_v53  ;;  %v4714_v62 = vmul.f32 %v8996_v49, %v4713_v3  ;;  %v4664_v53 = vpop.permute.xlu1 %4663  ;;  %v4614_v24 = vpop.f32.mrf.mxu0 }
 0xa85   : > { %v4677_v16 = vadd.f32 %v4664_v53, %v4621_v39  ;;  %v4622_v21 = vadd.f32 %v4614_v24, %v4519_v29  ;;  %v4521_v1 = vpop.f32.mrf.mxu2 }
 0xa86   : > { %v8998_v32 = vpop.eup %8997  ;;  %v11465_v27 = vadd.f32 %v4764_v33, %v4756_v23  ;;  %v4715_v40 = vadd.f32 %v8996_v49, %v4714_v62  ;;  %v4522_v33 = vadd.f32 %v4521_v1, %v4480_v46  ;;  %v4958_v46 = vld [vmem:[#allocation10 + $0x20] sm:$0xff] }
 0xa87   : > { %v9000_v5 = vpop.eup %8999  ;;  %v4695_v6 = vadd.f32 1.0, %v8998_v32  ;;  %v4862_v1 = vld [vmem:[#allocation8] sm:$0xff] }
 0xa88   : > { %v4719_v56 = vsel %vm4718_vm4, %v8996_v49, %v4715_v40  ;;  %v4727_v60 = vmul.f32 %v9000_v5, %v4694_v48  ;;  %4804 = vmatmul.f32.vlgmr.msra.gmra.mxu1 %v11465_v27  ;;  %4849 = vmatmul.f32.vlgmr.msrb.gmra.mxu2 %v11465_v27  ;;  %vm4732_vm12 = vweird.f32 %v9000_v5 }
 0xa89   : > { %9001 = vrcp.f32 %v4695_v6  ;;  %v4724_v9 = vsel %vm4721_vm15, %v4723_v36, %v4719_v56  ;;  %vm4733_vm14 = vmor %vm4731_vm9, %vm4732_vm12  ;;  %v4750_v48 = vand.u32 2147483647, %v4695_v6  ;;  %v4752_v54 = vand.u32 2147483648, %v4695_v6 }
 0xa8a   : > { %v4761_v19 = vsub.f32 1.0, %v4724_v9  ;;  %v4728_v34 = vsub.f32 1.0, %v4727_v60  ;;  %v4757_v11 = vmul.f32 %v4724_v9, %v4677_v16  ;;  %vm4746_vm10 = vweird.f32 %v4695_v6  ;;  %v4674_v9 = vpop.permute.xlu0 %4673 }
 0xa8b   : > { %v4753_v60 = vor.u32 1.1754944e-38, %v4752_v54  ;;  %vm4751_vm15 = vcmp.eq.f32.partialorder %v4750_v48, 8.507059e+37  ;;  %vm13073_vm12 = vcmask 261120   ;;  %v4868_v48 = vld [vmem:[#allocation10 + $0x10] sm:$0xff]  ;;  %v4961_v54 = vld [vmem:[#allocation10 + $0x38] sm:$0xff] }
 0xa8c   : > { %v4765_v18 = vmul.f32 %v4761_v19, %v11308_v52  ;;  %v4729_v49 = vmul.f32 %v9000_v5, %v4728_v34  ;;  %v4669_v52 = vpop.permute.xlu2 %4668  ;;  %v4617_v41 = vpop.f32.mrf.mxu0  ;;  %vm13074_vm9 = vmmov %vm13073_vm12 }
 0xa8d   : > { %v4678_v43 = vadd.f32 %v4669_v52, %v4622_v21  ;;  %v4623_v36 = vadd.f32 %v4617_v41, %v4522_v33  ;;  %v4959_v52 = vld [vmem:[#allocation10 + $0x28] sm:$0xff]  ;;  %v4960_v33 = vld [vmem:[#allocation10 + $0x30] sm:$0xff] }
 0xa8e   : > { %v11470_v58 = vadd.f32 %v4765_v18, %v4757_v11  ;;  %v4730_v0 = vadd.f32 %v9000_v5, %v4729_v49  ;;  %v4864_v41 = vld [vmem:[#allocation8 + $0x10] sm:$0xff] }
 0xa8f   : > { %v9002_v30 = vpop.eup %9001  ;;  %v4679_v16 = vadd.f32 %v4674_v9, %v4623_v36  ;;  %v5048_v36 = vld [vmem:[#allocation8 + $0x58] sm:$0xff] }
 0xa90   : > { %v4734_v59 = vsel %vm4733_vm14, %v9000_v5, %v4730_v0  ;;  %v4742_v3 = vmul.f32 %v9002_v30, %v4695_v6  ;;  %4807 = vmatmul.f32.gmra.mxu1 %v11470_v58  ;;  %4852 = vmatmul.f32.gmra.mxu2 %v11470_v58  ;;  %vm4747_vm11 = vweird.f32 %v9002_v30  ;;  %v4872_v6 = vld [vmem:[#allocation8 + $0x28] sm:$0xff]  ;;  %vm13075_vm14 = vmmov %vm13074_vm9  ;;  %v5098_v9 = vld [vmem:[#allocation10 + $0x58] sm:$0xff] }
 0xa91   : > { %v4739_v63 = vsel %vm4736_vm0, %v4738_v31, %v4734_v59  ;;  %vm4748_vm4 = vmor %vm4746_vm10, %vm4747_vm11 }
 0xa92   : > { %v4762_v23 = vsub.f32 1.0, %v4739_v63  ;;  %v4743_v62 = vsub.f32 1.0, %v4742_v3  ;;  %v4758_v32 = vmul.f32 %v4739_v63, %v4678_v43  ;;  %vm13076_vm0 = vmmov %vm13074_vm9  ;;  %v4866_v3 = vld [vmem:[#allocation10] sm:$0xff]  ;;  %v4863_v43 = vld [vmem:[#allocation8 + $0x8] sm:$0xff] }
 0xa93   : > { %vm13077_vm11 = vmmov %vm13076_vm0  ;;  %v5045_v63 = vld [vmem:[#allocation8 + $0x40] sm:$0xff] }
 0xa94   : > { %v4766_v39 = vmul.f32 %v4762_v23, %v11312_v25  ;;  %v4744_v40 = vmul.f32 %v9002_v30, %v4743_v62  ;;  %vm13078_vm10 = vmmov %vm13076_vm0  ;;  %v4867_v23 = vld [vmem:[#allocation10 + $0x8] sm:$0xff] }
 0xa95   : > { %v5046_v62 = vld [vmem:[#allocation8 + $0x48] sm:$0xff] }
 0xa96   : > { %v11475_v5 = vadd.f32 %v4766_v39, %v4758_v32  ;;  %v4745_v56 = vadd.f32 %v9002_v30, %v4744_v40  ;;  %v5047_v32 = vld [vmem:[#allocation8 + $0x50] sm:$0xff]  ;;  %v4865_v39 = vld [vmem:[#allocation8 + $0x18] sm:$0xff] }
 0xa97   : > { %v4869_v40 = vld [vmem:[#allocation10 + $0x18] sm:$0xff] }
 0xa98   : > { %v4749_v53 = vsel %vm4748_vm4, %v9002_v30, %v4745_v56  ;;  %4810 = vmatmul.f32.gmra.mxu1 %v11475_v5  ;;  %4855 = vmatmul.f32.gmra.mxu2 %v11475_v5  ;;  %vm13079_vm4 = vmmov %vm13076_vm0  ;;  %v5095_v56 = vld [vmem:[#allocation10 + $0x40] sm:$0xff] }
 0xa99   : > { %v4754_v24 = vsel %vm4751_vm15, %v4753_v60, %v4749_v53  ;;  %vm13080_vm15 = vmmov %vm13076_vm0  ;;  %v5096_v60 = vld [vmem:[#allocation10 + $0x48] sm:$0xff]  ;;  %v5097_v53 = vld [vmem:[#allocation10 + $0x50] sm:$0xff] }
 0xa9a   : > { %v4763_v19 = vsub.f32 1.0, %v4754_v24  ;;  %v4759_v25 = vmul.f32 %v4754_v24, %v4679_v16 }
 0xa9c   : > { %v4767_v29 = vmul.f32 %v4763_v19, %v11316_v35  ;;  %v4871_v35 = vld [vmem:[#allocation8 + $0x20] sm:$0xff] }
 0xa9e   : > { %v11480_v34 = vadd.f32 %v4767_v29, %v4759_v25 }
 0xaa0   : > { %4813 = vmatmul.f32.gmra.mxu1 %v11480_v34  ;;  %4858 = vmatmul.f32.gmra.mxu2 %v11480_v34 }
 0xaa1   : > { %4899 = vmatpush.msrb.mxu3 %v11480_v34  ;;  %4986 = vmatpush.msrb.mxu1 %v11480_v34 }
 0xaa3   : > { %4900 = vmatpush.msrb.mxu3 %v11475_v5  ;;  %4987 = vmatpush.msrb.mxu1 %v11475_v5 }
 0xaa5   : > { %4901 = vmatpush.msrb.mxu3 %v11470_v58  ;;  %4988 = vmatpush.msrb.mxu1 %v11470_v58 }
 0xaa7   : > { %4902 = vmatpush.msrb.mxu3 %v11465_v27  ;;  %4989 = vmatpush.msrb.mxu1 %v11465_v27 }
 0xaa8   : > { %8458 = vmatmul.msk.f32.vlgmr.msrb.gmra.mxu3 %vm13073_vm12, %v4871_v35  ;;  %8466 = vmatmul.msk.f32.vlgmr.msrb.gmra.mxu1 %vm13077_vm11, %v4958_v46  ;;  %vm13081_vm12 = vcmp.eq.s32.totalorder %v11121_v61, %v10088_v47  ;;  %vm13084_vm11 = vcmp.eq.s32.totalorder %v11121_v61, %v10157_v4  ;;  %v5166_v35 = vpop.permute.xlu1 %5165 }
 0xab0   : > { %8459 = vmatmul.msk.f32.gmra.mxu3 %vm13074_vm9, %v4872_v6  ;;  %8467 = vmatmul.msk.f32.gmra.mxu1 %vm13080_vm15, %v4959_v52  ;;  %vm13082_vm9 = vcmp.eq.s32.totalorder %v11124_v13, %v10088_v47  ;;  %vm13087_vm15 = vcmp.eq.s32.totalorder %v11124_v13, %v10157_v4 }
 0xab8   : > { %8460 = vmatmul.msk.f32.gmra.mxu3 %vm13075_vm14, %v4873_v15  ;;  %vm13083_vm14 = vmmov %vm13076_vm0 }
 0xac0   : > { %8461 = vmatmul.msk.f32.gmra.mxu3 %vm13076_vm0, %v4874_v45 }
 0xb05   : > { %v4805_v11 = vpop.f32.mrf.mxu1 }
 0xb0b   : > { %v4850_v18 = vpop.f32.mrf.mxu2 }
 0xb0d   : > { %v4808_v49 = vpop.f32.mrf.mxu1 }
 0xb13   : > { %v4853_v21 = vpop.f32.mrf.mxu2 }
 0xb15   : > { %v4811_v0 = vpop.f32.mrf.mxu1 }
 0xb1b   : > { %v4856_v30 = vpop.f32.mrf.mxu2 }
 0xb1d   : > { %v4814_v31 = vpop.f32.mrf.mxu1 }
 0xb1e   : > { %4940 = vmatpush.msrb.mxu0 %v4814_v31  ;;  %5027 = vmatpush.msra.mxu2 %v4814_v31 }
 0xb20   : > { %4941 = vmatpush.msrb.mxu0 %v4811_v0  ;;  %5028 = vmatpush.msra.mxu2 %v4811_v0 }
 0xb22   : > { %4942 = vmatpush.msrb.mxu0 %v4808_v49  ;;  %5029 = vmatpush.msra.mxu2 %v4808_v49 }
 0xb23   : > { %v4859_v59 = vpop.f32.mrf.mxu2 }
 0xb24   : > { %4943 = vmatpush.msrb.mxu0 %v4805_v11  ;;  %5030 = vmatpush.msra.mxu2 %v4805_v11 }
 0xb25   : > { %5073 = vmatpush.msra.mxu3 %v4859_v59  ;;  %8462 = vmatmul.msk.f32.vlgmr.msrb.gmra.mxu0 %vm13078_vm10, %v4862_v1  ;;  %vm13085_vm10 = vmmov %vm13076_vm0  ;;  %v5156_v1 = vpop.permute.xlu0 %5155 }
 0xb26   : > { %5123 = vmatpush.msra.mxu0 %v4859_v59  ;;  %8470 = vmatmul.msk.f32.vlgmr.msra.gmra.mxu2 %vm13079_vm4, %v4866_v3  ;;  %vm13086_vm4 = vmmov %vm13076_vm0 }
 0xb27   : > { %5074 = vmatpush.msra.mxu3 %v4856_v30  ;;  %8494 = vmatpush.msk.msrb.mxu2 %vm13081_vm12, %v13001_v2  ;;  %vm13088_vm12 = vcmp.eq.s32.totalorder %v11127_v37, %v10088_v47 }
 0xb28   : > { %5124 = vmatpush.msra.mxu0 %v4856_v30  ;;  %8468 = vmatmul.msk.f32.gmra.mxu1 %vm13086_vm4, %v4960_v33 }
 0xb29   : > { %5075 = vmatpush.msra.mxu3 %v4853_v21  ;;  %8495 = vmatpush.msk.msrb.mxu2 %vm13082_vm9, %v13001_v2  ;;  %vm13089_vm9 = vcmp.eq.s32.totalorder %v11127_v37, %v10157_v4 }
 0xb2a   : > { %5125 = vmatpush.msra.mxu0 %v4853_v21 }
 0xb2b   : > { %5076 = vmatpush.msra.mxu3 %v4850_v18  ;;  %8496 = vmatpush.msk.msrb.mxu2 %vm13088_vm12, %v13001_v2  ;;  %vm13095_vm12 = vmmov %vm13086_vm4  ;;  %v4904_v24 = vpop.f32.mrf.mxu3 }
 0xb2c   : > { %8474 = vmatmul.msk.f32.vlgmr.msra.gmra.mxu3 %vm13083_vm14, %v5045_v63  ;;  %5126 = vmatpush.msra.mxu0 %v4850_v18  ;;  %vm13090_vm14 = vcmp.eq.s32.totalorder %v11130_v10, %v10088_v47  ;;  %v5151_v18 = vpop.permute.xlu1 %5150 }
 0xb2d   : > { %8463 = vmatmul.msk.f32.gmra.mxu0 %vm13076_vm0, %v4863_v43  ;;  %8510 = vmatpush.msk.msrb.mxu3 %vm13084_vm11, %v13001_v2  ;;  %vm13091_vm0 = vcmp.eq.s32.totalorder %v11130_v10, %v10157_v4  ;;  %vm13092_vm11 = vmmov %vm13086_vm4  ;;  %v11636_v43 = vpop.f32.mrf.mxu1 }
 0xb2e   : > { %8471 = vmatmul.msk.f32.gmra.mxu2 %vm13085_vm10, %v4867_v23  ;;  %vm13093_vm10 = vcmp.eq.s32.totalorder %v11154_v44, %v10088_v47 }
 0xb2f   : > { %8511 = vmatpush.msk.msrb.mxu3 %vm13087_vm15, %v13001_v2  ;;  %8497 = vmatpush.msk.msrb.mxu2 %vm13090_vm14, %v13001_v2  ;;  %vm13094_vm15 = vcmp.eq.s32.totalorder %v11154_v44, %v10157_v4  ;;  %vm13097_vm14 = vcmp.eq.s32.totalorder %v11169_v28, %v10088_v47 }
 0xb31   : > { %8512 = vmatpush.msk.msrb.mxu3 %vm13089_vm9, %v13001_v2  ;;  %8498 = vmatpush.msk.msrb.mxu2 %vm13093_vm10, %v13001_v2  ;;  %vm13096_vm9 = vmmov %vm13086_vm4  ;;  %vm13100_vm10 = vcmp.eq.s32.totalorder %v11185_v22, %v10157_v4 }
 0xb32   : > { %8469 = vmatmul.msk.f32.gmra.mxu1 %vm13096_vm9, %v4961_v54 }
 0xb33   : > { %8513 = vmatpush.msk.msrb.mxu3 %vm13091_vm0, %v13001_v2  ;;  %8499 = vmatpush.msk.msrb.mxu2 %vm13097_vm14, %v13001_v2  ;;  %vm13098_vm0 = vcmp.eq.s32.totalorder %v11169_v28, %v10157_v4  ;;  %v4907_v16 = vpop.f32.mrf.mxu3 }
 0xb34   : > { %8475 = vmatmul.msk.f32.gmra.mxu3 %vm13092_vm11, %v5046_v62  ;;  %vm13099_vm11 = vcmp.eq.s32.totalorder %v11185_v22, %v10088_v47 }
 0xb35   : > { %8464 = vmatmul.msk.f32.gmra.mxu0 %vm13086_vm4, %v4864_v41  ;;  %8514 = vmatpush.msk.msrb.mxu3 %vm13094_vm15, %v13001_v2  ;;  %vm13101_vm4 = vcmp.eq.s32.totalorder %v11201_v17, %v10088_v47  ;;  %vm13102_vm15 = vmmov %vm13096_vm9 }
 0xb36   : > { %8472 = vmatmul.msk.f32.gmra.mxu2 %vm13095_vm12, %v4868_v48  ;;  %vm13103_vm12 = vmmov %vm13096_vm9  ;;  %vm13104_vm9 = vcmp.eq.s32.totalorder %v11201_v17, %v10157_v4  ;;  %v5161_v48 = vpop.permute.xlu2 %5160 }
 0xb37   : > { %8515 = vmatpush.msk.msrb.mxu3 %vm13098_vm0, %v13001_v2  ;;  %8500 = vmatpush.msk.msrb.mxu2 %vm13099_vm11, %v13001_v2  ;;  %vm13105_vm14 = vmmov %vm13103_vm12  ;;  %vm13106_vm0 = vcmp.eq.s32.totalorder %v10669_v38, %v10088_v47  ;;  %vm13107_vm11 = vcmp.eq.s32.totalorder %v10669_v38, %v10157_v4 }
 0xb39   : > { %8516 = vmatpush.msk.msrb.mxu3 %vm13100_vm10, %v13001_v2  ;;  %8501 = vmatpush.msk.msrb.mxu2 %vm13101_vm4, %v13001_v2  ;;  %vm13108_vm10 = vcmp.eq.s32.totalorder %v10676_v26, %v10088_v47  ;;  %vm13109_vm4 = vcmp.eq.s32.totalorder %v10676_v26, %v10157_v4 }
 0xb3b   : > { %8517 = vmatpush.msk.msrb.mxu3 %vm13104_vm9, %v13001_v2  ;;  %8502 = vmatpush.msk.msrb.mxu2 %vm13106_vm0, %v13001_v2  ;;  %vm13112_vm9 = vmmov %vm13105_vm14  ;;  %vm13114_vm0 = vcmp.eq.s32.totalorder %v10690_v42, %v10088_v47  ;;  %v4910_v19 = vpop.f32.mrf.mxu3 }
 0xb3c   : > { %8476 = vmatmul.msk.f32.gmra.mxu3 %vm13102_vm15, %v5047_v32  ;;  %vm13110_vm15 = vcmp.eq.s32.totalorder %v10679_v20, %v10088_v47 }
 0xb3d   : > { %8465 = vmatmul.msk.f32.gmra.mxu0 %vm13103_vm12, %v4865_v39  ;;  %8518 = vmatpush.msk.msrb.mxu3 %vm13107_vm11, %v13001_v2  ;;  %vm13111_vm12 = vcmp.eq.s32.totalorder %v10679_v20, %v10157_v4  ;;  %vm13115_vm11 = vcmp.eq.s32.totalorder %v10690_v42, %v10157_v4 }
 0xb3e   : > { %8473 = vmatmul.msk.f32.gmra.mxu2 %vm13105_vm14, %v4869_v40  ;;  %vm13113_vm14 = vmmov %vm13112_vm9 }
 0xb3f   : > { %8503 = vmatpush.msk.msrb.mxu2 %vm13108_vm10, %v13001_v2  ;;  %8519 = vmatpush.msk.msrb.mxu3 %vm13109_vm4, %v13001_v2  ;;  %vm13116_vm10 = vmmov %vm13112_vm9 }
 0xb40   : > { %vm13117_vm4 = vmmov %vm13112_vm9 }
 0xb41   : > { %8504 = vmatpush.msk.msrb.mxu2 %vm13110_vm15, %v13001_v2  ;;  %8520 = vmatpush.msk.msrb.mxu3 %vm13111_vm12, %v13001_v2  ;;  %vm13118_vm15 = vmmov %vm13117_vm4 }
 0xb43   : > { %8505 = vmatpush.msk.msrb.mxu2 %vm13114_vm0, %v13001_v2  ;;  %8521 = vmatpush.msk.msrb.mxu3 %vm13115_vm11, %v13001_v2  ;;  %v4913_v29 = vpop.f32.mrf.mxu3 }
 0xb44   : > { %8477 = vmatmul.msk.f32.gmra.mxu3 %vm13112_vm9, %v5048_v36 }
 0xb45   : > { %8478 = vmatmul.msk.f32.vlgmr.msra.gmra.mxu0 %vm13113_vm14, %v5095_v56  ;;  %8506 = vmatpush.msk.msrb.mxu2 %vm10098_vm1, %v13001_v2 }
 0xb46   : > { %8522 = vmatpush.msk.msrb.mxu3 %vm10163_vm5, %v13001_v2 }
 0xb47   : > { %8507 = vmatpush.msk.msrb.mxu2 %vm10104_vm2, %v13001_v2 }
 0xb48   : > { %8523 = vmatpush.msk.msrb.mxu3 %vm10172_vm6, %v13001_v2 }
 0xb49   : > { %8508 = vmatpush.msk.msrb.mxu2 %vm10118_vm3, %v13001_v2 }
 0xb4a   : > { %8524 = vmatpush.msk.msrb.mxu3 %vm10182_vm8, %v13001_v2 }
 0xb4b   : > { %8509 = vmatpush.msk.msrb.mxu2 %vm13030_vm7, %v13001_v2 }
 0xb4c   : > { %8525 = vmatpush.msk.msrb.mxu3 %vm13031_vm13, %v13001_v2 }
 0xb4d   : > { %8479 = vmatmul.msk.f32.gmra.mxu0 %vm13116_vm10, %v5096_v60 }
 0xb55   : > { %8480 = vmatmul.msk.f32.gmra.mxu0 %vm13117_vm4, %v5097_v53 }
 0xb5d   : > { %8481 = vmatmul.msk.f32.gmra.mxu0 %vm13118_vm15, %v5098_v9 }
 0xba2   : > { %v4945_v25 = vpop.f32.mrf.mxu0 }
 0xba3   : > { %v4946_v15 = vadd.f32 %v4945_v25, %v4904_v24  ;;  %v4994_v24 = vpop.f32.mrf.mxu1 }
 0xba9   : > { %v11638_v23 = vpop.f32.mrf.mxu2 }
 0xbaa   : > { %v4948_v6 = vpop.f32.mrf.mxu0 }
 0xbab   : > { %v4949_v0 = vadd.f32 %v4948_v6, %v4907_v16 }
 0xbaf   : > { %v5078_v45 = vpop.f32.mrf.mxu3 }
 0xbb0   : > { %v5090_v11 = vadd.f32 %v5078_v45, %v4946_v15 }
 0xbb1   : > { %v5035_v16 = vpop.f32.mrf.mxu2 }
 0xbb2   : > { %v4951_v49 = vpop.f32.mrf.mxu0  ;;  %v5168_v21 = vadd.f32 %v5151_v18, %v5090_v11 }
 0xbb3   : > { %v4952_v63 = vadd.f32 %v4951_v49, %v4910_v19 }
 0xbb4   : > { %v8482_v30 = vmul.f32 -1.442695, %v5168_v21  ;;  %v4997_v21 = vpop.f32.mrf.mxu1 }
 0xbb6   : > { %9003 = vpow2.f32 %v8482_v30 }
 0xbb7   : > { %v5081_v31 = vpop.f32.mrf.mxu3 }
 0xbb8   : > { %v5091_v46 = vadd.f32 %v5081_v31, %v4949_v0 }
 0xbb9   : > { %v5038_v0 = vpop.f32.mrf.mxu2 }
 0xbba   : > { %v5169_v59 = vadd.f32 %v5156_v1, %v5091_v46  ;;  %v4954_v3 = vpop.f32.mrf.mxu0 }
 0xbbb   : > { %v4955_v60 = vadd.f32 %v4954_v3, %v4913_v29 }
 0xbbc   : > { %v8483_v52 = vmul.f32 -1.442695, %v5169_v59  ;;  %v9004_v41 = vpop.eup %9003 }
 0xbbd   : > { %v11642_v40 = vadd.f32 1.0, %v9004_v41  ;;  %v5036_v41 = vadd.f32 %v5035_v16, %v4994_v24 }
 0xbbe   : > { %9005 = vpow2.f32 %v8483_v52 }
 0xbbf   : > { %v5084_v33 = vpop.f32.mrf.mxu3  ;;  %vm5221_vm12 = vweird.f32 %v11642_v40  ;;  %v5225_v16 = vand.u32 2147483647, %v11642_v40 }
 0xbc0   : > { %v5092_v62 = vadd.f32 %v5084_v33, %v4952_v63 }
 0xbc2   : > { %v5170_v54 = vadd.f32 %v5161_v48, %v5092_v62  ;;  %v11640_v32 = vpop.f32.mrf.mxu0  ;;  %v5039_v48 = vadd.f32 %v5038_v0, %v4997_v21 }
 0xbc4   : > { %v9006_v39 = vpop.eup %9005  ;;  %v8484_v36 = vmul.f32 -1.442695, %v5170_v54 }
 0xbc5   : > { %v11644_v56 = vadd.f32 1.0, %v9006_v39  ;;  %v5000_v39 = vpop.f32.mrf.mxu1 }
 0xbc6   : > { %9007 = vpow2.f32 %v8484_v36  ;;  %v5041_v36 = vpop.f32.mrf.mxu2 }
 0xbc7   : > { %v5087_v53 = vpop.f32.mrf.mxu3  ;;  %9009 = vrcp.f32 %v11642_v40  ;;  %v5042_v21 = vadd.f32 %v5041_v36, %v5000_v39  ;;  %vm5236_vm15 = vweird.f32 %v11644_v56 }
 0xbc8   : > { %v5093_v9 = vadd.f32 %v5087_v53, %v4955_v60  ;;  %9011 = vrcp.f32 %v11644_v56 }
 0xbca   : > { %v5171_v19 = vadd.f32 %v5166_v35, %v5093_v9  ;;  %v11648_v45 = vpop.f32.mrf.mxu0 }
 0xbcc   : > { %v9008_v25 = vpop.eup %9007  ;;  %v8485_v6 = vmul.f32 -1.442695, %v5171_v19 }
 0xbcd   : > { %v5214_v15 = vadd.f32 1.0, %v9008_v25  ;;  %v11650_v11 = vpop.eup %9009 }
 0xbce   : > { %9013 = vpow2.f32 %v8485_v6  ;;  %v11652_v18 = vpop.eup %9011  ;;  %v5217_v29 = vmul.f32 %v11650_v11, %v11642_v40  ;;  %vm5222_vm14 = vweird.f32 %v11650_v11  ;;  %v5227_v6 = vand.u32 2147483648, %v11642_v40 }
 0xbcf   : > { %9015 = vrcp.f32 %v5214_v15  ;;  %v5232_v49 = vmul.f32 %v11652_v18, %v11644_v56  ;;  %v5255_v9 = vand.u32 2147483647, %v5214_v15  ;;  %v5257_v19 = vand.u32 2147483648, %v5214_v15  ;;  %vm11679_vm4 = vmor %vm5221_vm12, %vm5222_vm14 }
 0xbd0   : > { %v5218_v31 = vsub.f32 1.0, %v5217_v29  ;;  %vm5237_vm0 = vweird.f32 %v11652_v18  ;;  %vm5251_vm11 = vweird.f32 %v5214_v15  ;;  %v5242_v29 = vand.u32 2147483648, %v11644_v56 }
 0xbd1   : > { %v5233_v1 = vsub.f32 1.0, %v5232_v49  ;;  %vm5256_vm12 = vcmp.eq.f32.partialorder %v5255_v9, 8.507059e+37  ;;  %v5258_v40 = vor.u32 1.1754944e-38, %v5257_v19  ;;  %v5033_v9 = vadd.f32 %v11638_v23, %v11636_v43 }
 0xbd2   : > { %v5134_v3 = vpop.f32.mrf.mxu0  ;;  %v5219_v63 = vmul.f32 %v11650_v11, %v5218_v31 }
 0xbd3   : > { %v5234_v33 = vmul.f32 %v11652_v18, %v5233_v1 }
 0xbd4   : > { %v9014_v35 = vpop.eup %9013  ;;  %v5220_v53 = vadd.f32 %v11650_v11, %v5219_v63 }
 0xbd5   : > { %v9016_v30 = vpop.eup %9015  ;;  %v11658_v46 = vadd.f32 1.0, %v9014_v35  ;;  %v5235_v25 = vadd.f32 %v11652_v18, %v5234_v33 }
 0xbd6   : > { %v5247_v59 = vmul.f32 %v9016_v30, %v5214_v15  ;;  %vm5252_vm9 = vweird.f32 %v9016_v30  ;;  %v5240_v15 = vand.u32 2147483647, %v11644_v56  ;;  %v5224_v1 = vsel %vm11679_vm4, %v11650_v11, %v5220_v53 }
 0xbd7   : > { %9017 = vrcp.f32 %v11658_v46  ;;  %vm11673_vm10 = vmor %vm5251_vm11, %vm5252_vm9  ;;  %v5272_v63 = vand.u32 2147483648, %v11658_v46  ;;  %vm5226_vm11 = vcmp.eq.f32.partialorder %v5225_v16, 8.507059e+37  ;;  %v5228_v11 = vor.u32 1.1754944e-38, %v5227_v6 }
 0xbd8   : > { %v5248_v52 = vsub.f32 1.0, %v5247_v59  ;;  %vm11690_vm9 = vmor %vm5236_vm15, %vm5237_vm0  ;;  %vm5241_vm0 = vcmp.eq.f32.partialorder %v5240_v15, 8.507059e+37  ;;  %v5141_v6 = vadd.f32 %v11648_v45, %v5036_v41 }
 0xbd9   : > { %v5239_v56 = vsel %vm11690_vm9, %v11652_v18, %v5235_v25  ;;  %v5229_v19 = vsel %vm5226_vm11, %v5228_v11, %v5224_v1  ;;  %v5273_v18 = vor.u32 1.1754944e-38, %v5272_v63  ;;  %v5142_v25 = vadd.f32 %v5134_v3, %v5039_v48  ;;  %v5184_v3 = vpop.permute.xlu1 %5183  ;;  %v5295_v11 = vld [vmem:[%s13126_s1 + $0x18] sm:$0xff] }
 0xbda   : > { %v5249_v62 = vmul.f32 %v9016_v30, %v5248_v52  ;;  %v5137_v52 = vpop.f32.mrf.mxu0  ;;  %v5197_v48 = vadd.f32 %v5184_v3, %v5141_v6  ;;  %vm13127_vm9 = vcmask 261120  }
 0xbdb   : > { %v5143_v36 = vadd.f32 %v5137_v52, %v5042_v21  ;;  %vm13130_vm11 = vmmov %vm13127_vm9 }
 0xbdc   : > { %v5250_v54 = vadd.f32 %v9016_v30, %v5249_v62  ;;  %v5194_v62 = vpop.permute.xlu2 %5193 }
 0xbdd   : > { %v9018_v60 = vpop.eup %9017  ;;  %v5199_v15 = vadd.f32 %v5194_v62, %v5143_v36  ;;  %v5294_v62 = vld [vmem:[%s13126_s1 + $0x10] sm:$0xff]  ;;  %v5299_v36 = vld [vmem:[%s13126_s1 + $0x38] sm:$0xff] }
 0xbde   : > { %v5262_v24 = vmul.f32 %v9018_v60, %v11658_v46  ;;  %v5254_v35 = vsel %vm11673_vm10, %v9016_v30, %v5250_v54  ;;  %vm5267_vm14 = vweird.f32 %v9018_v60  ;;  %v5270_v30 = vand.u32 2147483647, %v11658_v46 }
 0xbdf   : > { %v5243_v54 = vor.u32 1.1754944e-38, %v5242_v29  ;;  %v5259_v39 = vsel %vm5256_vm12, %v5258_v40, %v5254_v35  ;;  %vm5266_vm10 = vweird.f32 %v11658_v46  ;;  %v5189_v35 = vpop.permute.xlu0 %5188  ;;  %v5140_v46 = vadd.f32 %v11640_v32, %v5033_v9  ;;  %vm13128_vm12 = vmmov %vm13127_vm9 }
 0xbe0   : > { %v5263_v31 = vsub.f32 1.0, %v5262_v24  ;;  %vm5268_vm4 = vmor %vm5266_vm10, %vm5267_vm14  ;;  %v5282_v49 = vsub.f32 1.0, %v5259_v39  ;;  %vm5271_vm15 = vcmp.eq.f32.partialorder %v5270_v30, 8.507059e+37  ;;  %v5198_v59 = vadd.f32 %v5189_v35, %v5142_v25  ;;  %v5292_v30 = vld [vmem:[%s13125_s18] sm:$0xff]  ;;  %s13293_s18 = sld [smem:[#allocation63_spill]] }
 0xbe1   : > { %v5244_v24 = vsel %vm5241_vm0, %v5243_v54, %v5239_v56  ;;  %vm13129_vm14 = vmmov %vm13127_vm9  ;;  %v5297_v54 = vld [vmem:[%s13126_s1 + $0x28] sm:$0xff] }
 0xbe2   : > { %v5264_v33 = vmul.f32 %v9018_v60, %v5263_v31  ;;  %v5281_v29 = vsub.f32 1.0, %v5244_v24  ;;  %v5280_v31 = vsub.f32 1.0, %v5229_v19  ;;  %v5286_v1 = vmul.f32 %v5282_v49, %v11475_v5  ;;  %vm13131_vm0 = vmmov %vm13127_vm9 }
 0xbe3   : > { %v5277_v63 = vmul.f32 %v5244_v24, %v5197_v48  ;;  %vm13132_vm10 = vmmov %vm13131_vm0  ;;  %v5316_v24 = vpop.permute.xlu1 %5315 }
 0xbe4   : > { %v5265_v53 = vadd.f32 %v9018_v60, %v5264_v33  ;;  %v5285_v45 = vmul.f32 %v5281_v29, %v11470_v58  ;;  %v5179_v41 = vpop.permute.xlu2 %5178  ;;  %v5293_v58 = vld [vmem:[%s13126_s1 + $0x8] sm:$0xff] }
 0xbe5   : > { %v5196_v52 = vadd.f32 %v5179_v41, %v5140_v46 }
 0xbe6   : > { %v5269_v0 = vsel %vm5268_vm4, %v9018_v60, %v5265_v53  ;;  %v5278_v60 = vmul.f32 %v5259_v39, %v5198_v59  ;;  %v5289_v5 = vadd.f32 %v5285_v45, %v5277_v63  ;;  %v5298_v39 = vld [vmem:[%s13126_s1 + $0x30] sm:$0xff]  ;;  %vm13133_vm4 = vmmov %vm13131_vm0  ;;  %v5512_v45 = vld [vmem:[#allocation11 + $0x40] sm:$0xff] }
 0xbe7   : > { %v5274_v16 = vsel %vm5271_vm15, %v5273_v18, %v5269_v0  ;;  %v5276_v56 = vmul.f32 %v5229_v19, %v5196_v52  ;;  %vm13134_vm15 = vmmov %vm13131_vm0  ;;  %v5311_v53 = vpop.permute.xlu0 %5310  ;;  %v5515_v52 = vld [vmem:[#allocation11 + $0x58] sm:$0xff] }
 0xbe8   : > { %v5283_v21 = vsub.f32 1.0, %v5274_v16  ;;  %v5279_v43 = vmul.f32 %v5274_v16, %v5199_v15  ;;  %v5290_v32 = vadd.f32 %v5286_v1, %v5278_v60 }
 0xbea   : > { %v5287_v23 = vmul.f32 %v5283_v21, %v11480_v34  ;;  %v5284_v34 = vmul.f32 %v5280_v31, %v11465_v27  ;;  %v5296_v27 = vld [vmem:[%s13126_s1 + $0x20] sm:$0xff]  ;;  %s13274_s1 = smov %s13273_s22 }
 0xbeb   : > { %v5331_v21 = vpop.permute.xlu1 %5330 }
 0xbec   : > { %v5291_v40 = vadd.f32 %v5287_v23, %v5279_v43  ;;  %v5288_v33 = vadd.f32 %v5284_v34, %v5276_v56  ;;  %v5321_v49 = vpop.permute.xlu2 %5320  ;;  %v5517_v56 = vld [vmem:[#allocation11 + $0x68] sm:$0xff] }
 0xbee   : > { %5384 = vmatpush.msra.mxu1 %v5291_v40 }
 0xbef   : > { %v5326_v6 = vpop.permute.xlu0 %5325 }
 0xbf0   : > { %5385 = vmatpush.msra.mxu1 %v5290_v32 }
 0xbf2   : > { %5386 = vmatpush.msra.mxu1 %v5289_v5 }
 0xbf3   : > { %v5346_v48 = vpop.permute.xlu1 %5345 }
 0xbf4   : > { %5387 = vmatpush.msra.mxu1 %v5288_v33  ;;  %v5336_v31 = vpop.permute.xlu2 %5335 }
 0xbf5   : > { %8486 = vmatmul.msk.f32.vlgmr.msra.gmra.mxu1 %vm13127_vm9, %v5292_v30  ;;  %vm13135_vm9 = vcmp.eq.s32.totalorder %v11121_v61, %v10088_v47  ;;  %v5518_v30 = vld [vmem:[#allocation11 + $0x70] sm:$0xff] }
 0xbf7   : > { %v5341_v23 = vpop.permute.xlu0 %5340 }
 0xbfd   : > { %8487 = vmatmul.msk.f32.gmra.mxu1 %vm13128_vm12, %v5293_v58  ;;  %vm13136_vm12 = vcmp.eq.s32.totalorder %v11124_v13, %v10088_v47 }
 0xc05   : > { %8488 = vmatmul.msk.f32.gmra.mxu1 %vm13129_vm14, %v5294_v62  ;;  %vm13137_vm14 = vcmp.eq.s32.totalorder %v11127_v37, %v10088_v47 }
 0xc0d   : > { %8489 = vmatmul.msk.f32.gmra.mxu1 %vm13130_vm11, %v5295_v11  ;;  %vm13138_vm11 = vcmp.eq.s32.totalorder %v11130_v10, %v10088_v47  ;;  %v5519_v11 = vld [vmem:[#allocation11 + $0x78] sm:$0xff] }
 0xc15   : > { %8490 = vmatmul.msk.f32.gmra.mxu1 %vm13131_vm0, %v5296_v27  ;;  %vm13139_vm0 = vcmp.eq.s32.totalorder %v11154_v44, %v10088_v47 }
 0xc1d   : > { %8491 = vmatmul.msk.f32.gmra.mxu1 %vm13132_vm10, %v5297_v54  ;;  %vm13140_vm10 = vcmp.eq.s32.totalorder %v11169_v28, %v10088_v47 }
 0xc25   : > { %8492 = vmatmul.msk.f32.gmra.mxu1 %vm13133_vm4, %v5298_v39  ;;  %vm13141_vm4 = vcmp.eq.s32.totalorder %v11185_v22, %v10088_v47 }
 0xc2d   : > { %8493 = vmatmul.msk.f32.gmra.mxu1 %vm13134_vm15, %v5299_v36  ;;  %vm13142_vm15 = vcmp.eq.s32.totalorder %v11201_v17, %v10088_v47 }
 0xc72   : > { %v5389_v9 = vpop.f32.mrf.mxu1 }
 0xc73   : > { %v11724_v19 = vadd.f32 %v5389_v9, %v5311_v53 }
 0xc75   : > { %5429 = vmatmul.f32.vlgmr.msrb.gmra.mxu2 %v11724_v19  ;;  %5470 = vmatmul.f32.vlgmr.msrb.gmra.mxu3 %v11724_v19 }
 0xc7a   : > { %v5392_v18 = vpop.f32.mrf.mxu1 }
 0xc7b   : > { %v11728_v25 = vadd.f32 %v5392_v18, %v5316_v24  ;;  %v5495_v24 = vld [vmem:[#allocation11] sm:$0xff] }
 0xc7c   : > { %v5790_v18 = vld [vmem:[#allocation11 + $0x80] sm:$0xff] }
 0xc7d   : > { %5432 = vmatmul.f32.gmra.mxu2 %v11728_v25  ;;  %5473 = vmatmul.f32.gmra.mxu3 %v11728_v25 }
 0xc82   : > { %v5395_v0 = vpop.f32.mrf.mxu1 }
 0xc83   : > { %v11732_v16 = vadd.f32 %v5395_v0, %v5321_v49  ;;  %v5496_v49 = vld [vmem:[#allocation11 + $0x8] sm:$0xff] }
 0xc84   : > { %v5791_v0 = vld [vmem:[#allocation11 + $0x88] sm:$0xff] }
 0xc85   : > { %5435 = vmatmul.f32.gmra.mxu2 %v11732_v16  ;;  %5476 = vmatmul.f32.gmra.mxu3 %v11732_v16 }
 0xc8a   : > { %v5398_v29 = vpop.f32.mrf.mxu1 }
 0xc8b   : > { %v11736_v15 = vadd.f32 %v5398_v29, %v5326_v6  ;;  %v5654_v29 = vld [vmem:[#allocation13 + $0x58] sm:$0xff] }
 0xc8d   : > { %5438 = vmatmul.f32.gmra.mxu2 %v11736_v15  ;;  %5479 = vmatmul.f32.gmra.mxu3 %v11736_v15 }
 0xc92   : > { %v5401_v35 = vpop.f32.mrf.mxu1 }
 0xc93   : > { %v11740_v46 = vadd.f32 %v5401_v35, %v5331_v21  ;;  %v5506_v21 = vld [vmem:[#allocation13 + $0x18] sm:$0xff]  ;;  %v5655_v35 = vld [vmem:[#allocation13 + $0x60] sm:$0xff] }
 0xc95   : > { %5441 = vmatmul.f32.gmra.mxu2 %v11740_v46  ;;  %5482 = vmatmul.f32.gmra.mxu3 %v11740_v46 }
 0xc9a   : > { %v5404_v59 = vpop.f32.mrf.mxu1 }
 0xc9b   : > { %v11744_v43 = vadd.f32 %v5404_v59, %v5336_v31  ;;  %v5507_v31 = vld [vmem:[#allocation13 + $0x20] sm:$0xff] }
 0xc9d   : > { %5444 = vmatmul.f32.gmra.mxu2 %v11744_v43  ;;  %5485 = vmatmul.f32.gmra.mxu3 %v11744_v43 }
 0xca2   : > { %v5407_v1 = vpop.f32.mrf.mxu1 }
 0xca3   : > { %v11748_v3 = vadd.f32 %v5407_v1, %v5341_v23  ;;  %v5872_v23 = vld [vmem:[#allocation13 + $0x80] sm:$0xff]  ;;  %v5656_v1 = vld [vmem:[#allocation13 + $0x68] sm:$0xff] }
 0xca5   : > { %5447 = vmatmul.f32.gmra.mxu2 %v11748_v3  ;;  %5488 = vmatmul.f32.gmra.mxu3 %v11748_v3 }
 0xcaa   : > { %v5410_v60 = vpop.f32.mrf.mxu1 }
 0xcab   : > { %v11752_v40 = vadd.f32 %v5410_v60, %v5346_v48  ;;  %v5508_v48 = vld [vmem:[#allocation13 + $0x28] sm:$0xff] }
 0xcad   : > { %5450 = vmatmul.f32.gmra.mxu2 %v11752_v40  ;;  %5491 = vmatmul.f32.gmra.mxu3 %v11752_v40 }
 0xcae   : > { %5552 = vmatpush.msrb.mxu0 %v11752_v40  ;;  %5691 = vmatpush.msra.mxu2 %v11752_v40 }
 0xcb0   : > { %5553 = vmatpush.msrb.mxu0 %v11748_v3  ;;  %5692 = vmatpush.msra.mxu2 %v11748_v3 }
 0xcb2   : > { %5554 = vmatpush.msrb.mxu0 %v11744_v43  ;;  %5693 = vmatpush.msra.mxu2 %v11744_v43 }
 0xcb4   : > { %5555 = vmatpush.msrb.mxu0 %v11740_v46  ;;  %5694 = vmatpush.msra.mxu2 %v11740_v46 }
 0xcb6   : > { %5556 = vmatpush.msrb.mxu0 %v11736_v15  ;;  %5695 = vmatpush.msra.mxu2 %v11736_v15 }
 0xcb8   : > { %5557 = vmatpush.msrb.mxu0 %v11732_v16  ;;  %5696 = vmatpush.msra.mxu2 %v11732_v16 }
 0xcba   : > { %5558 = vmatpush.msrb.mxu0 %v11728_v25  ;;  %5697 = vmatpush.msra.mxu2 %v11728_v25 }
 0xcbc   : > { %5559 = vmatpush.msrb.mxu0 %v11724_v19  ;;  %5698 = vmatpush.msra.mxu2 %v11724_v19 }
 0xcbe   : > { %8582 = vmatpush.msk.msrb.mxu2 %vm13135_vm9, %v13001_v2  ;;  %vm13143_vm9 = vcmp.eq.s32.totalorder %v10669_v38, %v10088_v47 }
 0xcc0   : > { %8583 = vmatpush.msk.msrb.mxu2 %vm13136_vm12, %v13001_v2  ;;  %vm13144_vm12 = vcmp.eq.s32.totalorder %v10676_v26, %v10088_v47 }
 0xcc2   : > { %8584 = vmatpush.msk.msrb.mxu2 %vm13137_vm14, %v13001_v2  ;;  %vm13145_vm14 = vcmp.eq.s32.totalorder %v10679_v20, %v10088_v47 }
 0xcc4   : > { %8585 = vmatpush.msk.msrb.mxu2 %vm13138_vm11, %v13001_v2  ;;  %vm13146_vm11 = vcmp.eq.s32.totalorder %v10690_v42, %v10088_v47  ;;  %v5513_v47 = vld [vmem:[#allocation11 + $0x48] sm:$0xff] }
 0xcc6   : > { %8586 = vmatpush.msk.msrb.mxu2 %vm13139_vm0, %v13001_v2  ;;  %vm13147_vm0 = vcmask 523264  }
 0xcc7   : > { %8526 = vmatmul.msk.f32.vlgmr.msrb.gmra.mxu0 %vm13147_vm0, %v5512_v45  ;;  %v5873_v45 = vld [vmem:[#allocation13 + $0x88] sm:$0xff] }
 0xcc8   : > { %8587 = vmatpush.msk.msrb.mxu2 %vm13140_vm10, %v13001_v2  ;;  %vm13148_vm10 = vmmov %vm13147_vm0 }
 0xcca   : > { %8588 = vmatpush.msk.msrb.mxu2 %vm13141_vm4, %v13001_v2  ;;  %vm13153_vm4 = vmmov %vm13147_vm0 }
 0xccc   : > { %8589 = vmatpush.msk.msrb.mxu2 %vm13142_vm15, %v13001_v2  ;;  %vm13154_vm15 = vmmov %vm13147_vm0 }
 0xcce   : > { %8590 = vmatpush.msk.msrb.mxu2 %vm13143_vm9, %v13001_v2  ;;  %vm13155_vm9 = vmmov %vm13147_vm0 }
 0xccf   : > { %8527 = vmatmul.msk.f32.gmra.mxu0 %vm13148_vm10, %v5513_v47  ;;  %v5657_v47 = vld [vmem:[#allocation13 + $0x70] sm:$0xff] }
 0xcd0   : > { %8591 = vmatpush.msk.msrb.mxu2 %vm13144_vm12, %v13001_v2  ;;  %vm13156_vm12 = vmmov %vm13147_vm0 }
 0xcd2   : > { %8592 = vmatpush.msk.msrb.mxu2 %vm13145_vm14, %v13001_v2  ;;  %vm13157_vm14 = vcmp.eq.s32.totalorder %v11121_v61, %v10157_v4  ;;  %v5497_v61 = vld [vmem:[#allocation11 + $0x10] sm:$0xff] }
 0xcd4   : > { %8593 = vmatpush.msk.msrb.mxu2 %vm13146_vm11, %v13001_v2  ;;  %vm13158_vm11 = vcmp.eq.s32.totalorder %v11124_v13, %v10157_v4  ;;  %v5792_v13 = vld [vmem:[#allocation11 + $0x90] sm:$0xff] }
 0xcd6   : > { %8594 = vmatpush.msk.msrb.mxu2 %vm10098_vm1, %v13001_v2  ;;  %vm13149_vm1 = vmmov %vm13147_vm0 }
 0xcd7   : > { %8528 = vmatmul.msk.f32.gmra.mxu0 %vm13149_vm1, %v5514_v50  ;;  %vm13160_vm10 = vmmov %vm13149_vm1  ;;  %vm13161_vm1 = vcmp.eq.s32.totalorder %v11130_v10, %v10157_v4  ;;  %v5793_v10 = vld [vmem:[#allocation11 + $0x98] sm:$0xff]  ;;  %v5509_v50 = vld [vmem:[#allocation13 + $0x30] sm:$0xff] }
 0xcd8   : > { %8595 = vmatpush.msk.msrb.mxu2 %vm10104_vm2, %v13001_v2  ;;  %vm13150_vm2 = vmmov %vm13147_vm0 }
 0xcda   : > { %8596 = vmatpush.msk.msrb.mxu2 %vm10118_vm3, %v13001_v2  ;;  %vm13151_vm3 = vmmov %vm13147_vm0 }
 0xcdc   : > { %8597 = vmatpush.msk.msrb.mxu2 %vm13030_vm7, %v13001_v2  ;;  %vm13152_vm7 = vmmov %vm13147_vm0  ;;  %vm13159_vm0 = vcmp.eq.s32.totalorder %v11127_v37, %v10157_v4  ;;  %v5498_v37 = vld [vmem:[#allocation11 + $0x18] sm:$0xff] }
 0xcdf   : > { %8529 = vmatmul.msk.f32.gmra.mxu0 %vm13150_vm2, %v5515_v52  ;;  %v5658_v52 = vld [vmem:[#allocation13 + $0x78] sm:$0xff] }
 0xce7   : > { %8530 = vmatmul.msk.f32.gmra.mxu0 %vm13151_vm3, %v5516_v57  ;;  %vm13162_vm3 = vcmp.eq.s32.totalorder %v11154_v44, %v10157_v4  ;;  %v5651_v44 = vld [vmem:[#allocation13 + $0x40] sm:$0xff] }
 0xcef   : > { %8531 = vmatmul.msk.f32.gmra.mxu0 %vm13152_vm7, %v5517_v56  ;;  %vm13163_vm7 = vcmp.eq.s32.totalorder %v11169_v28, %v10157_v4  ;;  %v5503_v28 = vld [vmem:[#allocation13] sm:$0xff]  ;;  %v5877_v56 = vld [vmem:[#allocation13 + $0xa8] sm:$0xff] }
 0xcf7   : > { %8532 = vmatmul.msk.f32.gmra.mxu0 %vm13153_vm4, %v5518_v30  ;;  %vm13164_vm4 = vcmp.eq.s32.totalorder %v11185_v22, %v10157_v4  ;;  %v5504_v22 = vld [vmem:[#allocation13 + $0x8] sm:$0xff] }
 0xcf8   : > { %v5430_v41 = vpop.f32.mrf.mxu2  ;;  %v11835_v51 = vpop.f32.mrf.mxu3 }
 0xcff   : > { %8533 = vmatmul.msk.f32.gmra.mxu0 %vm13154_vm15, %v5519_v11  ;;  %vm13165_vm15 = vmmov %vm13150_vm2 }
 0xd00   : > { %v5433_v55 = vpop.f32.mrf.mxu2  ;;  %v11838_v63 = vpop.f32.mrf.mxu3 }
 0xd08   : > { %v5436_v32 = vpop.f32.mrf.mxu2  ;;  %v5477_v34 = vpop.f32.mrf.mxu3 }
 0xd10   : > { %v5439_v5 = vpop.f32.mrf.mxu2  ;;  %v5480_v33 = vpop.f32.mrf.mxu3 }
 0xd18   : > { %v5442_v58 = vpop.f32.mrf.mxu2  ;;  %v5483_v62 = vpop.f32.mrf.mxu3 }
 0xd20   : > { %v5445_v27 = vpop.f32.mrf.mxu2  ;;  %v5486_v54 = vpop.f32.mrf.mxu3 }
 0xd28   : > { %v5448_v39 = vpop.f32.mrf.mxu2  ;;  %v5489_v36 = vpop.f32.mrf.mxu3 }
 0xd30   : > { %v5451_v53 = vpop.f32.mrf.mxu2  ;;  %v5492_v9 = vpop.f32.mrf.mxu3 }
 0xd31   : > { %5617 = vmatpush.msrb.mxu1 %v5451_v53  ;;  %5756 = vmatpush.msra.mxu3 %v5451_v53  ;;  %v5964_v53 = vpop.permute.xlu2 %5963 }
 0xd32   : > { %5830 = vmatpush.msra.mxu0 %v5492_v9 }
 0xd33   : > { %5618 = vmatpush.msrb.mxu1 %v5448_v39  ;;  %5757 = vmatpush.msra.mxu3 %v5448_v39 }
 0xd34   : > { %5831 = vmatpush.msra.mxu0 %v5489_v36 }
 0xd35   : > { %5619 = vmatpush.msrb.mxu1 %v5445_v27  ;;  %5758 = vmatpush.msra.mxu3 %v5445_v27 }
 0xd36   : > { %5832 = vmatpush.msra.mxu0 %v5486_v54 }
 0xd37   : > { %5620 = vmatpush.msrb.mxu1 %v5442_v58  ;;  %5759 = vmatpush.msra.mxu3 %v5442_v58  ;;  %v5879_v58 = vld [vmem:[#allocation13 + $0xb8] sm:$0xff] }
 0xd38   : > { %5833 = vmatpush.msra.mxu0 %v5483_v62 }
 0xd39   : > { %5621 = vmatpush.msrb.mxu1 %v5439_v5  ;;  %5760 = vmatpush.msra.mxu3 %v5439_v5 }
 0xd3a   : > { %5834 = vmatpush.msra.mxu0 %v5480_v33 }
 0xd3b   : > { %5622 = vmatpush.msrb.mxu1 %v5436_v32  ;;  %5761 = vmatpush.msra.mxu3 %v5436_v32  ;;  %v5876_v32 = vld [vmem:[#allocation13 + $0xa0] sm:$0xff] }
 0xd3c   : > { %5835 = vmatpush.msra.mxu0 %v5477_v34 }
 0xd3d   : > { %5623 = vmatpush.msrb.mxu1 %v5433_v55  ;;  %5762 = vmatpush.msra.mxu3 %v5433_v55  ;;  %v5510_v55 = vld [vmem:[#allocation13 + $0x38] sm:$0xff] }
 0xd3e   : > { %5836 = vmatpush.msra.mxu0 %v11838_v63 }
 0xd3f   : > { %5624 = vmatpush.msrb.mxu1 %v5430_v41  ;;  %5763 = vmatpush.msra.mxu3 %v5430_v41 }
 0xd40   : > { %5837 = vmatpush.msra.mxu0 %v11835_v51  ;;  %8534 = vmatmul.msk.f32.vlgmr.msrb.gmra.mxu1 %vm13155_vm9, %v5495_v24  ;;  %vm13166_vm9 = vcmp.eq.s32.totalorder %v11201_v17, %v10157_v4  ;;  %v5796_v17 = vld [vmem:[#allocation11 + $0xb0] sm:$0xff] }
 0xd41   : > { %5912 = vmatpush.msra.mxu1 %v5492_v9  ;;  %8558 = vmatmul.msk.f32.vlgmr.msra.gmra.mxu0 %vm13156_vm12, %v5790_v18  ;;  %vm13167_vm12 = vmmov %vm13150_vm2 }
 0xd42   : > { %8598 = vmatpush.msk.msrb.mxu3 %vm13157_vm14, %v13001_v2  ;;  %vm13168_vm14 = vcmp.eq.s32.totalorder %v10669_v38, %v10157_v4  ;;  %v5499_v38 = vld [vmem:[#allocation11 + $0x20] sm:$0xff] }
 0xd43   : > { %5913 = vmatpush.msra.mxu1 %v5489_v36 }
 0xd44   : > { %8599 = vmatpush.msk.msrb.mxu3 %vm13158_vm11, %v13001_v2  ;;  %vm13169_vm11 = vcmp.eq.s32.totalorder %v10676_v26, %v10157_v4  ;;  %v5794_v26 = vld [vmem:[#allocation11 + $0xa0] sm:$0xff]  ;;  %v5561_v6 = vpop.f32.mrf.mxu0 }
 0xd45   : > { %5914 = vmatpush.msra.mxu1 %v5486_v54 }
 0xd46   : > { %8600 = vmatpush.msk.msrb.mxu3 %vm13159_vm0, %v13001_v2  ;;  %vm13170_vm0 = vcmp.eq.s32.totalorder %v10679_v20, %v10157_v4  ;;  %v5652_v20 = vld [vmem:[#allocation13 + $0x48] sm:$0xff] }
 0xd47   : > { %5915 = vmatpush.msra.mxu1 %v5483_v62 }
 0xd48   : > { %8535 = vmatmul.msk.f32.gmra.mxu1 %vm13160_vm10, %v5496_v49  ;;  %8601 = vmatpush.msk.msrb.mxu3 %vm13161_vm1, %v13001_v2  ;;  %vm13171_vm10 = vmmov %vm13150_vm2  ;;  %vm13172_vm1 = vcmp.eq.s32.totalorder %v10690_v42, %v10157_v4  ;;  %v5500_v4 = vld [vmem:[#allocation11 + $0x28] sm:$0xff]  ;;  %v5505_v42 = vld [vmem:[#allocation13 + $0x10] sm:$0xff] }
 0xd49   : > { %5916 = vmatpush.msra.mxu1 %v5480_v33  ;;  %8559 = vmatmul.msk.f32.gmra.mxu0 %vm13150_vm2, %v5791_v0  ;;  %v5878_v33 = vld [vmem:[#allocation13 + $0xb0] sm:$0xff] }
 0xd4a   : > { %8602 = vmatpush.msk.msrb.mxu3 %vm13162_vm3, %v13001_v2  ;;  %vm13173_vm3 = vmmov %vm13150_vm2 }
 0xd4b   : > { %5917 = vmatpush.msra.mxu1 %v5477_v34  ;;  %8542 = vmatmul.msk.f32.vlgmr.msra.gmra.mxu2 %vm13173_vm3, %v5651_v44 }
 0xd4c   : > { %8603 = vmatpush.msk.msrb.mxu3 %vm13163_vm7, %v13001_v2  ;;  %vm13174_vm7 = vmmov %vm13150_vm2  ;;  %v5564_v59 = vpop.f32.mrf.mxu0 }
 0xd4d   : > { %5918 = vmatpush.msra.mxu1 %v11838_v63  ;;  %8550 = vmatmul.msk.f32.vlgmr.msra.gmra.mxu3 %vm13174_vm7, %v5503_v28  ;;  %v5875_v63 = vld [vmem:[#allocation13 + $0x98] sm:$0xff] }
 0xd4e   : > { %8604 = vmatpush.msk.msrb.mxu3 %vm13164_vm4, %v13001_v2  ;;  %vm13175_vm4 = vmmov %vm13150_vm2 }
 0xd4f   : > { %5919 = vmatpush.msra.mxu1 %v11835_v51  ;;  %v5874_v51 = vld [vmem:[#allocation13 + $0x90] sm:$0xff] }
 0xd50   : > { %8536 = vmatmul.msk.f32.gmra.mxu1 %vm13165_vm15, %v5497_v61  ;;  %8605 = vmatpush.msk.msrb.mxu3 %vm13166_vm9, %v13001_v2  ;;  %vm13176_vm15 = vmmov %vm13150_vm2 }
 0xd51   : > { %8560 = vmatmul.msk.f32.gmra.mxu0 %vm13167_vm12, %v5792_v13  ;;  %vm13177_vm9 = vmmov %vm13150_vm2  ;;  %v5969_v13 = vpop.permute.xlu0 %5968 }
 0xd52   : > { %8606 = vmatpush.msk.msrb.mxu3 %vm13168_vm14, %v13001_v2  ;;  %vm13178_vm12 = vmmov %vm13150_vm2 }
 0xd53   : > { %8543 = vmatmul.msk.f32.gmra.mxu2 %vm13177_vm9, %v5652_v20  ;;  %vm13182_vm14 = vmmov %vm13150_vm2 }
 0xd54   : > { %8607 = vmatpush.msk.msrb.mxu3 %vm13169_vm11, %v13001_v2  ;;  %vm13183_vm11 = vmmov %vm13150_vm2  ;;  %v5567_v60 = vpop.f32.mrf.mxu0 }
 0xd55   : > { %8551 = vmatmul.msk.f32.gmra.mxu3 %vm13178_vm12, %v5504_v22  ;;  %v5974_v22 = vpop.permute.xlu1 %5973 }
 0xd56   : > { %8608 = vmatpush.msk.msrb.mxu3 %vm13170_vm0, %v13001_v2  ;;  %vm13185_vm0 = vmmov %vm13150_vm2 }
 0xd57   : > { %vm13189_vm3 = vmmov %vm13185_vm0 }
 0xd58   : > { %8537 = vmatmul.msk.f32.gmra.mxu1 %vm13171_vm10, %v5498_v37  ;;  %8609 = vmatpush.msk.msrb.mxu3 %vm13172_vm1, %v13001_v2  ;;  %vm13186_vm10 = vmmov %vm13185_vm0 }
 0xd59   : > { %8561 = vmatmul.msk.f32.gmra.mxu0 %vm13150_vm2, %v5793_v10  ;;  %vm13187_vm1 = vmmov %vm13185_vm0 }
 0xd5a   : > { %8610 = vmatpush.msk.msrb.mxu3 %vm10163_vm5, %v13001_v2  ;;  %vm13179_vm5 = vmmov %vm13150_vm2 }
 0xd5b   : > { %vm13190_vm7 = vmmov %vm13185_vm0 }
 0xd5c   : > { %8611 = vmatpush.msk.msrb.mxu3 %vm10172_vm6, %v13001_v2  ;;  %vm13180_vm6 = vmmov %vm13150_vm2  ;;  %v5570_v41 = vpop.f32.mrf.mxu0 }
 0xd5d   : > { %8552 = vmatmul.msk.f32.gmra.mxu3 %vm13182_vm14, %v5505_v42  ;;  %vm13193_vm9 = vmmov %vm13185_vm0 }
 0xd5e   : > { %8612 = vmatpush.msk.msrb.mxu3 %vm10182_vm8, %v13001_v2  ;;  %vm13181_vm8 = vmmov %vm13150_vm2 }
 0xd5f   : > { %8544 = vmatmul.msk.f32.gmra.mxu2 %vm13181_vm8, %v5653_v8  ;;  %vm13194_vm12 = vmmov %vm13185_vm0 }
 0xd60   : > { %8538 = vmatmul.msk.f32.gmra.mxu1 %vm13175_vm4, %v5499_v38  ;;  %8613 = vmatpush.msk.msrb.mxu3 %vm13031_vm13, %v13001_v2  ;;  %vm13184_vm13 = vmmov %vm13150_vm2  ;;  %v5797_v2 = vld [vmem:[#allocation11 + $0xb8] sm:$0xff] }
 0xd61   : > { %8562 = vmatmul.msk.f32.gmra.mxu0 %vm13176_vm15, %v5794_v26  ;;  %vm13188_vm2 = vmmov %vm13185_vm0 }
 0xd62   : > { %vm13191_vm4 = vmmov %vm13185_vm0 }
 0xd63   : > { %vm13192_vm15 = vmmov %vm13185_vm0 }
 0xd64   : > { %vm13197_vm8 = vmmov %vm13185_vm0  ;;  %v5573_v57 = vpop.f32.mrf.mxu0 }
 0xd65   : > { %8553 = vmatmul.msk.f32.gmra.mxu3 %vm13186_vm10, %v5506_v21  ;;  %vm13198_vm14 = vmmov %vm13185_vm0  ;;  %v5979_v21 = vpop.permute.xlu2 %5978 }
 0xd66   : > { %vm13201_vm10 = vmmov %vm13185_vm0 }
 0xd67   : > { %8545 = vmatmul.msk.f32.gmra.mxu2 %vm13185_vm0, %v5654_v29 }
 0xd68   : > { %8539 = vmatmul.msk.f32.gmra.mxu1 %vm13179_vm5, %v5500_v4  ;;  %vm13195_vm5 = vmmov %vm13185_vm0 }
 0xd69   : > { %8563 = vmatmul.msk.f32.gmra.mxu0 %vm13180_vm6, %v5795_v7  ;;  %vm13196_vm6 = vmmov %vm13185_vm0 }
 0xd6c   : > { %v5576_v34 = vpop.f32.mrf.mxu0 }
 0xd6d   : > { %8554 = vmatmul.msk.f32.gmra.mxu3 %vm13190_vm7, %v5507_v31 }
 0xd6f   : > { %8546 = vmatmul.msk.f32.gmra.mxu2 %vm13189_vm3, %v5655_v35 }
 0xd70   : > { %8540 = vmatmul.msk.f32.gmra.mxu1 %vm13183_vm11, %v5501_v12  ;;  %vm13199_vm11 = vmmov %vm13185_vm0 }
 0xd71   : > { %8564 = vmatmul.msk.f32.gmra.mxu0 %vm13184_vm13, %v5796_v17  ;;  %vm13200_vm13 = vmmov %vm13185_vm0 }
 0xd74   : > { %v11946_v5 = vpop.f32.mrf.mxu0 }
 0xd75   : > { %8555 = vmatmul.msk.f32.gmra.mxu3 %vm13193_vm9, %v5508_v48  ;;  %v11957_v48 = vpop.permute.xlu0 %6019 }
 0xd77   : > { %8547 = vmatmul.msk.f32.gmra.mxu2 %vm13192_vm15, %v5656_v1 }
 0xd78   : > { %8541 = vmatmul.msk.f32.gmra.mxu1 %vm13187_vm1, %v5502_v14  ;;  %vm13202_vm1 = vmmov %vm13185_vm0 }
 0xd79   : > { %8565 = vmatmul.msk.f32.gmra.mxu0 %vm13188_vm2, %v5797_v2  ;;  %vm13203_vm2 = vmmov %vm13185_vm0 }
 0xd7c   : > { %v11949_v30 = vpop.f32.mrf.mxu0 }
 0xd7d   : > { %8556 = vmatmul.msk.f32.gmra.mxu3 %vm13196_vm6, %v5509_v50 }
 0xd7f   : > { %8548 = vmatmul.msk.f32.gmra.mxu2 %vm13195_vm5, %v5657_v47 }
 0xd80   : > { %8566 = vmatmul.msk.f32.vlgmr.msra.gmra.mxu1 %vm13191_vm4, %v5872_v23 }
 0xd85   : > { %8557 = vmatmul.msk.f32.gmra.mxu3 %vm13199_vm11, %v5510_v55 }
 0xd87   : > { %8549 = vmatmul.msk.f32.gmra.mxu2 %vm13198_vm14, %v5658_v52 }
 0xd88   : > { %8567 = vmatmul.msk.f32.gmra.mxu1 %vm13194_vm12, %v5873_v45 }
 0xd90   : > { %8568 = vmatmul.msk.f32.gmra.mxu1 %vm13197_vm8, %v5874_v51 }
 0xd98   : > { %8569 = vmatmul.msk.f32.gmra.mxu1 %vm13200_vm13, %v5875_v63 }
 0xda0   : > { %8570 = vmatmul.msk.f32.gmra.mxu1 %vm13185_vm0, %v5876_v32 }
 0xda8   : > { %8571 = vmatmul.msk.f32.gmra.mxu1 %vm13201_vm10, %v5877_v56 }
 0xdb0   : > { %8572 = vmatmul.msk.f32.gmra.mxu1 %vm13202_vm1, %v5878_v33 }
 0xdb8   : > { %8573 = vmatmul.msk.f32.gmra.mxu1 %vm13203_vm2, %v5879_v58 }
 0xdbd   : > { %v5626_v62 = vpop.f32.mrf.mxu1 }
 0xdbe   : > { %v5839_v11 = vpop.f32.mrf.mxu0  ;;  %v5627_v27 = vadd.f32 %v5626_v62, %v5561_v6  ;;  %v11965_v62 = vpop.permute.xlu2 %6024 }
 0xdc0   : > { %v5863_v54 = vadd.f32 %v5839_v11, %v5627_v27 }
 0xdc2   : > { %v6001_v9 = vadd.f32 %v5964_v53, %v5863_v54 }
 0xdc4   : > { %v8574_v18 = vmul.f32 -1.442695, %v6001_v9 }
 0xdc5   : > { %v5629_v39 = vpop.f32.mrf.mxu1 }
 0xdc6   : > { %v5842_v36 = vpop.f32.mrf.mxu0  ;;  %v5630_v24 = vadd.f32 %v5629_v39, %v5564_v59  ;;  %9019 = vpow2.f32 %v8574_v18  ;;  %v5989_v39 = vpop.permute.xlu0 %5988 }
 0xdc8   : > { %v5864_v0 = vadd.f32 %v5842_v36, %v5630_v24 }
 0xdca   : > { %v6002_v37 = vadd.f32 %v5969_v13, %v5864_v0 }
 0xdcc   : > { %v8575_v28 = vmul.f32 -1.442695, %v6002_v37  ;;  %v9020_v20 = vpop.eup %9019 }
 0xdcd   : > { %v5632_v49 = vpop.f32.mrf.mxu1  ;;  %v11952_v4 = vadd.f32 1.0, %v9020_v20 }
 0xdce   : > { %v5845_v61 = vpop.f32.mrf.mxu0  ;;  %v5633_v10 = vadd.f32 %v5632_v49, %v5567_v60  ;;  %9021 = vpow2.f32 %v8575_v28  ;;  %v5700_v50 = vpop.f32.mrf.mxu2 }
 0xdcf   : > { %9023 = vrcp.f32 %v11952_v4  ;;  %v6108_v0 = vand.u32 2147483648, %v11952_v4  ;;  %vm6102_vm7 = vweird.f32 %v11952_v4 }
 0xdd0   : > { %v5865_v38 = vadd.f32 %v5845_v61, %v5633_v10  ;;  %v5765_v51 = vpop.f32.mrf.mxu3  ;;  %v6106_v10 = vand.u32 2147483647, %v11952_v4 }
 0xdd1   : > { %v6109_v20 = vor.u32 1.1754944e-38, %v6108_v0 }
 0xdd2   : > { %v6003_v7 = vadd.f32 %v5974_v22, %v5865_v38  ;;  %vm6107_vm15 = vcmp.eq.f32.partialorder %v6106_v10, 8.507059e+37 }
 0xdd4   : > { %v8576_v12 = vmul.f32 -1.442695, %v6003_v7  ;;  %v9022_v29 = vpop.eup %9021 }
 0xdd5   : > { %v5635_v44 = vpop.f32.mrf.mxu1  ;;  %v11955_v35 = vadd.f32 1.0, %v9022_v29  ;;  %v9024_v31 = vpop.eup %9023 }
 0xdd6   : > { %v5848_v26 = vpop.f32.mrf.mxu0  ;;  %v5636_v8 = vadd.f32 %v5635_v44, %v5570_v41  ;;  %9025 = vpow2.f32 %v8576_v12  ;;  %v6098_v45 = vmul.f32 %v9024_v31, %v11952_v4  ;;  %v5984_v41 = vpop.permute.xlu1 %5983  ;;  %vm6103_vm3 = vweird.f32 %v9024_v31 }
 0xdd7   : > { %9027 = vrcp.f32 %v11955_v35  ;;  %v5703_v9 = vpop.f32.mrf.mxu2  ;;  %vm6104_vm4 = vmor %vm6102_vm7, %vm6103_vm3  ;;  %vm6117_vm12 = vweird.f32 %v11955_v35 }
 0xdd8   : > { %v5866_v17 = vadd.f32 %v5848_v26, %v5636_v8  ;;  %v5768_v49 = vpop.f32.mrf.mxu3  ;;  %v5994_v8 = vpop.permute.xlu2 %5993 }
 0xdda   : > { %v6004_v14 = vadd.f32 %v5979_v21, %v5866_v17 }
 0xddc   : > { %v8577_v23 = vmul.f32 -1.442695, %v6004_v14  ;;  %v9026_v47 = vpop.eup %9025 }
 0xddd   : > { %v5638_v42 = vpop.f32.mrf.mxu1  ;;  %v11961_v63 = vadd.f32 1.0, %v9026_v47  ;;  %v11963_v32 = vpop.eup %9027 }
 0xdde   : > { %v5851_v6 = vpop.f32.mrf.mxu0  ;;  %v5639_v2 = vadd.f32 %v5638_v42, %v5573_v57  ;;  %9029 = vpow2.f32 %v8577_v23  ;;  %v6099_v57 = vsub.f32 1.0, %v6098_v45  ;;  %v6113_v54 = vmul.f32 %v11963_v32, %v11955_v35 }
 0xddf   : > { %9031 = vrcp.f32 %v11961_v63  ;;  %v5766_v42 = vadd.f32 %v5765_v51, %v5700_v50  ;;  %vm6118_vm9 = vweird.f32 %v11963_v32  ;;  %v6138_v0 = vand.u32 2147483648, %v11961_v63 }
 0xde0   : > { %v5867_v1 = vadd.f32 %v5851_v6, %v5639_v2  ;;  %v6100_v11 = vmul.f32 %v9024_v31, %v6099_v57  ;;  %v6114_v61 = vsub.f32 1.0, %v6113_v54  ;;  %v5771_v45 = vpop.f32.mrf.mxu3  ;;  %vm11995_vm5 = vmor %vm6117_vm12, %vm6118_vm9  ;;  %v5769_v54 = vadd.f32 %v5768_v49, %v5703_v9 }
 0xde1   : > { %vm6132_vm14 = vweird.f32 %v11961_v63 }
 0xde2   : > { %v6005_v52 = vadd.f32 %v5984_v41, %v5867_v1  ;;  %v6101_v18 = vadd.f32 %v9024_v31, %v6100_v11  ;;  %v6115_v22 = vmul.f32 %v11963_v32, %v6114_v61  ;;  %v5706_v14 = vpop.f32.mrf.mxu2  ;;  %v6121_v1 = vand.u32 2147483647, %v11955_v35 }
 0xde4   : > { %v8578_v33 = vmul.f32 -1.442695, %v6005_v52  ;;  %v9030_v27 = vpop.eup %9029  ;;  %v6105_v38 = vsel %vm6104_vm4, %v9024_v31, %v6101_v18  ;;  %v6116_v21 = vadd.f32 %v11963_v32, %v6115_v22  ;;  %vm6122_vm6 = vcmp.eq.f32.partialorder %v6121_v1, 8.507059e+37 }
 0xde5   : > { %v5641_v59 = vpop.f32.mrf.mxu1  ;;  %v11971_v24 = vadd.f32 1.0, %v9030_v27  ;;  %v11974_v13 = vpop.eup %9031  ;;  %v6110_v17 = vsel %vm6107_vm15, %v6109_v20, %v6105_v38  ;;  %v6139_v22 = vor.u32 1.1754944e-38, %v6138_v0 }
 0xde6   : > { %v5854_v60 = vpop.f32.mrf.mxu0  ;;  %v5642_v55 = vadd.f32 %v5641_v59, %v5576_v34  ;;  %9033 = vpow2.f32 %v8578_v33  ;;  %v6128_v7 = vmul.f32 %v11974_v13, %v11961_v63  ;;  %v6225_v23 = vsub.f32 1.0, %v6110_v17 }
 0xde7   : > { %9035 = vrcp.f32 %v11971_v24  ;;  %vm6133_vm8 = vweird.f32 %v11974_v13  ;;  %vm6147_vm10 = vweird.f32 %v11971_v24 }
 0xde8   : > { %v5868_v58 = vadd.f32 %v5854_v60, %v5642_v55  ;;  %v6129_v2 = vsub.f32 1.0, %v6128_v7  ;;  %v6123_v60 = vand.u32 2147483648, %v11955_v35  ;;  %v6120_v55 = vsel %vm11995_vm5, %v11963_v32, %v6116_v21  ;;  %vm6134_vm11 = vmor %vm6132_vm14, %vm6133_vm8  ;;  %v5774_v10 = vpop.f32.mrf.mxu3 }
 0xde9   : > { %v6233_v35 = vmul.f32 %v6225_v23, %v11724_v19  ;;  %v6136_v19 = vand.u32 2147483647, %v11961_v63  ;;  %v6153_v21 = vand.u32 2147483648, %v11971_v24 }
 0xdea   : > { %v6006_v34 = vadd.f32 %v5989_v39, %v5868_v58  ;;  %v6130_v57 = vmul.f32 %v11974_v13, %v6129_v2  ;;  %v6124_v58 = vor.u32 1.1754944e-38, %v6123_v60  ;;  %v5709_v49 = vpop.f32.mrf.mxu2 }
 0xdeb   : > { %vm6137_vm13 = vcmp.eq.f32.partialorder %v6136_v19, 8.507059e+37 }
 0xdec   : > { %v8579_v44 = vmul.f32 -1.442695, %v6006_v34  ;;  %v9034_v26 = vpop.eup %9033  ;;  %v6131_v32 = vadd.f32 %v11974_v13, %v6130_v57 }
 0xded   : > { %v5644_v56 = vpop.f32.mrf.mxu1  ;;  %v11985_v6 = vadd.f32 1.0, %v9034_v26  ;;  %v11989_v31 = vpop.eup %9035 }
 0xdee   : > { %v5857_v36 = vpop.f32.mrf.mxu0  ;;  %v5645_v53 = vadd.f32 %v5644_v56, %v11946_v5  ;;  %v11978_v5 = vpop.permute.xlu1 %6029  ;;  %9037 = vpow2.f32 %v8579_v44  ;;  %v6143_v56 = vmul.f32 %v11989_v31, %v11971_v24  ;;  %v6135_v38 = vsel %vm6134_vm11, %v11974_v13, %v6131_v32 }
 0xdef   : > { %9039 = vrcp.f32 %v11985_v6  ;;  %vm6148_vm0 = vweird.f32 %v11989_v31  ;;  %vm6162_vm7 = vweird.f32 %v11985_v6 }
 0xdf0   : > { %v5869_v28 = vadd.f32 %v5857_v36, %v5645_v53  ;;  %v6144_v34 = vsub.f32 1.0, %v6143_v56  ;;  %vm6149_vm1 = vmor %vm6147_vm10, %vm6148_vm0 }
 0xdf2   : > { %v6007_v4 = vadd.f32 %v5994_v8, %v5869_v28  ;;  %v6145_v26 = vmul.f32 %v11989_v31, %v6144_v34  ;;  %v5772_v8 = vadd.f32 %v5771_v45, %v5706_v14  ;;  %v5712_v60 = vpop.f32.mrf.mxu2 }
 0xdf4   : > { %v9038_v51 = vpop.eup %9037 }
 0xdf5   : > { %v5647_v37 = vpop.f32.mrf.mxu1  ;;  %v12007_v39 = vadd.f32 1.0, %v9038_v51  ;;  %v12013_v53 = vpop.eup %9039 }
 0xdf6   : > { %v5648_v12 = vadd.f32 %v5647_v37, %v11949_v30  ;;  %v5860_v29 = vpop.f32.mrf.mxu0  ;;  %v8580_v30 = vmul.f32 -1.442695, %v6007_v4  ;;  %v5999_v33 = vpop.permute.xlu1 %5998  ;;  %v6158_v20 = vmul.f32 %v12013_v53, %v11985_v6  ;;  %v6140_v4 = vsel %vm6137_vm13, %v6139_v22, %v6135_v38 }
 0xdf7   : > { %vm6163_vm3 = vweird.f32 %v12013_v53  ;;  %v6183_v38 = vand.u32 2147483648, %v12007_v39  ;;  %vm6177_vm12 = vweird.f32 %v12007_v39  ;;  %v6040_v22 = vpop.permute.xlu2 %6039 }
 0xdf8   : > { %v5870_v47 = vadd.f32 %v5860_v29, %v5648_v12  ;;  %9041 = vpow2.f32 %v8580_v30  ;;  %v6159_v13 = vsub.f32 1.0, %v6158_v20  ;;  %vm6164_vm4 = vmor %vm6162_vm7, %vm6163_vm3  ;;  %vm13206_vm3 = vcmask 523264  }
 0xdf9   : > { %9043 = vrcp.f32 %v12007_v39  ;;  %vm13207_vm7 = vmmov %vm13206_vm3 }
 0xdfa   : > { %v6008_v11 = vadd.f32 %v5999_v33, %v5870_v47  ;;  %v6160_v45 = vmul.f32 %v12013_v53, %v6159_v13  ;;  %v6154_v47 = vor.u32 1.1754944e-38, %v6153_v21 }
 0xdfc   : > { %v8581_v61 = vmul.f32 -1.442695, %v6008_v11 }
 0xdfd   : > { %v5921_v59 = vpop.f32.mrf.mxu1 }
 0xdfe   : > { %v5945_v50 = vadd.f32 %v5921_v59, %v5766_v42  ;;  %v9042_v44 = vpop.eup %9041  ;;  %9045 = vpow2.f32 %v8581_v61  ;;  %v6227_v59 = vsub.f32 1.0, %v6140_v4 }
 0xdff   : > { %v12027_v42 = vadd.f32 1.0, %v9042_v44 }
 0xe00   : > { %v6057_v52 = vadd.f32 %v11957_v48, %v5945_v50  ;;  %v6125_v48 = vsel %vm6122_vm6, %v6124_v58, %v6120_v55  ;;  %v5777_v50 = vpop.f32.mrf.mxu3  ;;  %v6235_v51 = vmul.f32 %v6227_v59, %v11732_v16  ;;  %v6166_v16 = vand.u32 2147483647, %v11985_v6 }
 0xe01   : > { %v6226_v9 = vsub.f32 1.0, %v6125_v48  ;;  %9047 = vrcp.f32 %v12027_v42  ;;  %v5778_v61 = vadd.f32 %v5777_v50, %v5712_v60  ;;  %vm6192_vm14 = vweird.f32 %v12027_v42 }
 0xe02   : > { %v6217_v27 = vmul.f32 %v6110_v17, %v6057_v52  ;;  %v12033_v17 = vpop.eup %9043  ;;  %vm6167_vm15 = vcmp.eq.f32.partialorder %v6166_v16, 8.507059e+37 }
 0xe03   : > { %v6234_v63 = vmul.f32 %v6226_v9, %v11728_v25  ;;  %v6151_v25 = vand.u32 2147483647, %v11971_v24  ;;  %v6173_v30 = vmul.f32 %v12033_v17, %v12007_v39  ;;  %v5775_v24 = vadd.f32 %v5774_v10, %v5709_v49 }
 0xe04   : > { %v12009_v36 = vadd.f32 %v6233_v35, %v6217_v27  ;;  %v9046_v14 = vpop.eup %9045  ;;  %v6168_v35 = vand.u32 2147483648, %v11985_v6  ;;  %v6035_v27 = vpop.permute.xlu0 %6034  ;;  %vm6178_vm9 = vweird.f32 %v12033_v17 }
 0xe05   : > { %v5924_v18 = vpop.f32.mrf.mxu1  ;;  %vm6152_vm2 = vcmp.eq.f32.partialorder %v6151_v25, 8.507059e+37  ;;  %v12047_v52 = vadd.f32 1.0, %v9046_v14  ;;  %vm6179_vm5 = vmor %vm6177_vm12, %vm6178_vm9 }
 0xe06   : > { %v5946_v37 = vadd.f32 %v5924_v18, %v5769_v54  ;;  %6265 = vmatmul.f32.vlgmr.msrb.gmra.mxu2 %v12009_v36  ;;  %6306 = vmatmul.f32.vlgmr.msrb.gmra.mxu3 %v12009_v36  ;;  %v6169_v18 = vor.u32 1.1754944e-38, %v6168_v35  ;;  %vm13210_vm9 = vmmov %vm13206_vm3 }
 0xe07   : > { %v12053_v56 = vpop.eup %9047  ;;  %9049 = vrcp.f32 %v12047_v52  ;;  %vm6207_vm10 = vweird.f32 %v12047_v52  ;;  %vm13211_vm12 = vmmov %vm13206_vm3 }
 0xe08   : > { %v6058_v28 = vadd.f32 %v11965_v62, %v5946_v37  ;;  %v6146_v62 = vadd.f32 %v11989_v31, %v6145_v26  ;;  %v6188_v34 = vmul.f32 %v12053_v56, %v12027_v42  ;;  %v5715_v37 = vpop.f32.mrf.mxu2  ;;  %v5780_v9 = vpop.f32.mrf.mxu3  ;;  %vm6193_vm8 = vweird.f32 %v12053_v56 }
 0xe09   : > { %v5781_v21 = vadd.f32 %v5780_v9, %v5715_v37  ;;  %vm6194_vm11 = vmor %vm6192_vm14, %vm6193_vm8 }
 0xe0a   : > { %v6218_v7 = vmul.f32 %v6125_v48, %v6058_v28  ;;  %v6150_v1 = vsel %vm6149_vm1, %v11989_v31, %v6146_v62  ;;  %v6174_v31 = vsub.f32 1.0, %v6173_v30  ;;  %v6184_v62 = vor.u32 1.1754944e-38, %v6183_v38  ;;  %vm13214_vm8 = vmmov %vm13206_vm3 }
 0xe0b   : > { %v6155_v55 = vsel %vm6152_vm2, %v6154_v47, %v6150_v1  ;;  %v6198_v1 = vand.u32 2147483648, %v12027_v42  ;;  %vm13215_vm14 = vmmov %vm13206_vm3 }
 0xe0c   : > { %v12029_v12 = vadd.f32 %v6234_v63, %v6218_v7  ;;  %v6228_v11 = vsub.f32 1.0, %v6155_v55  ;;  %v6175_v32 = vmul.f32 %v12033_v17, %v6174_v31  ;;  %v6045_v30 = vpop.permute.xlu0 %6044 }
 0xe0d   : > { %v5927_v29 = vpop.f32.mrf.mxu1  ;;  %v12070_v44 = vpop.eup %9049 }
 0xe0e   : > { %v5947_v2 = vadd.f32 %v5927_v29, %v5772_v8  ;;  %6268 = vmatmul.f32.gmra.mxu2 %v12029_v12  ;;  %6309 = vmatmul.f32.gmra.mxu3 %v12029_v12  ;;  %v6236_v0 = vmul.f32 %v6228_v11, %v11736_v15  ;;  %v6176_v10 = vadd.f32 %v12033_v17, %v6175_v32  ;;  %v6181_v15 = vand.u32 2147483647, %v12007_v39  ;;  %v6050_v11 = vpop.permute.xlu1 %6049 }
 0xe0f   : > { %vm6208_vm0 = vweird.f32 %v12070_v44 }
 0xe10   : > { %v6059_v23 = vadd.f32 %v11978_v5, %v5947_v2  ;;  %v6161_v5 = vadd.f32 %v12013_v53, %v6160_v45  ;;  %v6180_v63 = vsel %vm6179_vm5, %v12033_v17, %v6176_v10  ;;  %vm6182_vm6 = vcmp.eq.f32.partialorder %v6181_v15, 8.507059e+37  ;;  %v5718_v39 = vpop.f32.mrf.mxu2  ;;  %vm6209_vm1 = vmor %vm6207_vm10, %vm6208_vm0 }
 0xe11   : > { %v6185_v2 = vsel %vm6182_vm6, %v6184_v62, %v6180_v63  ;;  %vm13212_vm5 = vmmov %vm13206_vm3 }
 0xe12   : > { %v6219_v41 = vmul.f32 %v6140_v4, %v6059_v23  ;;  %v6165_v48 = vsel %vm6164_vm4, %v12013_v53, %v6161_v5  ;;  %v6189_v53 = vsub.f32 1.0, %v6188_v34  ;;  %v6203_v4 = vmul.f32 %v12070_v44, %v12047_v52  ;;  %v5783_v23 = vpop.f32.mrf.mxu3  ;;  %vm13208_vm4 = vmmov %vm13206_vm3 }
 0xe13   : > { %v6170_v6 = vsel %vm6167_vm15, %v6169_v18, %v6165_v48  ;;  %v6230_v45 = vsub.f32 1.0, %v6185_v2  ;;  %v5784_v5 = vadd.f32 %v5783_v23, %v5718_v39  ;;  %vm13209_vm15 = vmmov %vm13206_vm3 }
 0xe14   : > { %v12049_v57 = vadd.f32 %v6235_v51, %v6219_v41  ;;  %v6229_v20 = vsub.f32 1.0, %v6170_v6  ;;  %v6190_v8 = vmul.f32 %v12053_v56, %v6189_v53  ;;  %v6204_v17 = vsub.f32 1.0, %v6203_v4  ;;  %vm13213_vm6 = vmmov %vm13206_vm3 }
 0xe15   : > { %v5930_v33 = vpop.f32.mrf.mxu1  ;;  %v6199_v51 = vor.u32 1.1754944e-38, %v6198_v1  ;;  %vm13218_vm0 = vmmov %vm13206_vm3 }
 0xe16   : > { %v5948_v58 = vadd.f32 %v5930_v33, %v5775_v24  ;;  %6271 = vmatmul.f32.gmra.mxu2 %v12049_v57  ;;  %6312 = vmatmul.f32.gmra.mxu3 %v12049_v57  ;;  %v6237_v29 = vmul.f32 %v6229_v20, %v11740_v46  ;;  %v6191_v25 = vadd.f32 %v12053_v56, %v6190_v8  ;;  %v6196_v46 = vand.u32 2147483647, %v12027_v42  ;;  %v6352_v8 = vld [vmem:[#allocation14 + $0x60] sm:$0xff]  ;;  %vm13219_vm10 = vmmov %vm13218_vm0 }
 0xe17   : > { %v6205_v41 = vmul.f32 %v12070_v44, %v6204_v17  ;;  %v6355_v17 = vld [vmem:[#allocation14 + $0x78] sm:$0xff] }
 0xe18   : > { %v6060_v54 = vadd.f32 %v6035_v27, %v5948_v58  ;;  %v6195_v50 = vsel %vm6194_vm11, %v12053_v56, %v6191_v25  ;;  %vm6197_vm13 = vcmp.eq.f32.partialorder %v6196_v46, 8.507059e+37  ;;  %v6213_v58 = vand.u32 2147483648, %v12047_v52  ;;  %v5721_v27 = vpop.f32.mrf.mxu2  ;;  %vm13216_vm11 = vmmov %vm13206_vm3 }
 0xe19   : > { %v6200_v31 = vsel %vm6197_vm13, %v6199_v51, %v6195_v50  ;;  %v6206_v35 = vadd.f32 %v12070_v44, %v6205_v41  ;;  %v6332_v50 = vld [vmem:[#allocation14 + $0x8] sm:$0xff]  ;;  %vm13217_vm13 = vmmov %vm13206_vm3  ;;  %v6333_v51 = vld [vmem:[#allocation14 + $0x10] sm:$0xff] }
 0xe1a   : > { %v6220_v19 = vmul.f32 %v6155_v55, %v6060_v54  ;;  %v6238_v55 = vmul.f32 %v6230_v45, %v11744_v43  ;;  %v6231_v16 = vsub.f32 1.0, %v6200_v31  ;;  %v6211_v43 = vand.u32 2147483647, %v12047_v52  ;;  %v5786_v54 = vpop.f32.mrf.mxu3  ;;  %v6055_v52 = vpop.permute.xlu2 %6054  ;;  %v6627_v41 = vld [vmem:[#allocation14 + $0x88] sm:$0xff] }
 0xe1b   : > { %v6210_v32 = vsel %vm6209_vm1, %v12070_v44, %v6206_v35  ;;  %v6214_v34 = vor.u32 1.1754944e-38, %v6213_v58  ;;  %vm13220_vm1 = vmmov %vm13218_vm0  ;;  %v6339_v35 = vld [vmem:[#allocation16] sm:$0xff] }
 0xe1c   : > { %v12066_v49 = vadd.f32 %v6236_v0, %v6220_v19  ;;  %v6239_v19 = vmul.f32 %v6231_v16, %v11748_v3  ;;  %v5787_v0 = vadd.f32 %v5786_v54, %v5721_v27  ;;  %vm6212_vm2 = vcmp.eq.f32.partialorder %v6211_v43, 8.507059e+37  ;;  %v6348_v3 = vld [vmem:[#allocation14 + $0x40] sm:$0xff]  ;;  %v6336_v16 = vld [vmem:[#allocation14 + $0x28] sm:$0xff]  ;;  %v6489_v27 = vld [vmem:[#allocation16 + $0x50] sm:$0xff] }
 0xe1d   : > { %v5933_v28 = vpop.f32.mrf.mxu1  ;;  %v6630_v58 = vld [vmem:[#allocation14 + $0xa0] sm:$0xff]  ;;  %v6631_v43 = vld [vmem:[#allocation14 + $0xa8] sm:$0xff]  ;;  %v6341_v54 = vld [vmem:[#allocation16 + $0x10] sm:$0xff] }
 0xe1e   : > { %v5949_v26 = vadd.f32 %v5933_v28, %v5778_v61  ;;  %6274 = vmatmul.f32.gmra.mxu2 %v12066_v49  ;;  %6315 = vmatmul.f32.gmra.mxu3 %v12066_v49  ;;  %v6215_v61 = vsel %vm6212_vm2, %v6214_v34, %v6210_v32  ;;  %vm13221_vm2 = vmmov %vm13218_vm0  ;;  %v6632_v32 = vld [vmem:[#allocation14 + $0xb0] sm:$0xff] }
 0xe1f   : > { %v6232_v10 = vsub.f32 1.0, %v6215_v61 }
 0xe20   : > { %v6061_v7 = vadd.f32 %v6040_v22, %v5949_v26  ;;  %v6350_v26 = vld [vmem:[#allocation14 + $0x50] sm:$0xff]  ;;  %v6351_v22 = vld [vmem:[#allocation14 + $0x58] sm:$0xff] }
 0xe21   : > { %v6240_v44 = vmul.f32 %v6232_v10, %v11752_v40  ;;  %v6349_v40 = vld [vmem:[#allocation14 + $0x48] sm:$0xff] }
 0xe22   : > { %v6221_v13 = vmul.f32 %v6170_v6, %v6061_v7 }
 0xe24   : > { %v12082_v59 = vadd.f32 %v6237_v29, %v6221_v13  ;;  %v6353_v13 = vld [vmem:[#allocation14 + $0x68] sm:$0xff] }
 0xe25   : > { %v5936_v14 = vpop.f32.mrf.mxu1 }
 0xe26   : > { %v5950_v60 = vadd.f32 %v5936_v14, %v5781_v21  ;;  %6277 = vmatmul.f32.gmra.mxu2 %v12082_v59  ;;  %6318 = vmatmul.f32.gmra.mxu3 %v12082_v59 }
 0xe28   : > { %v6062_v47 = vadd.f32 %v6045_v30, %v5950_v60  ;;  %v6331_v30 = vld [vmem:[#allocation14] sm:$0xff] }
 0xe2a   : > { %v6222_v24 = vmul.f32 %v6185_v2, %v6062_v47  ;;  %v6354_v2 = vld [vmem:[#allocation14 + $0x70] sm:$0xff]  ;;  %v6626_v47 = vld [vmem:[#allocation14 + $0x80] sm:$0xff] }
 0xe2c   : > { %v12094_v33 = vadd.f32 %v6238_v55, %v6222_v24  ;;  %v6628_v24 = vld [vmem:[#allocation14 + $0x90] sm:$0xff]  ;;  %v6334_v55 = vld [vmem:[#allocation14 + $0x18] sm:$0xff] }
 0xe2d   : > { %v5939_v42 = vpop.f32.mrf.mxu1 }
 0xe2e   : > { %v5951_v56 = vadd.f32 %v5939_v42, %v5784_v5  ;;  %6280 = vmatmul.f32.gmra.mxu2 %v12094_v33  ;;  %6321 = vmatmul.f32.gmra.mxu3 %v12094_v33  ;;  %v6629_v5 = vld [vmem:[#allocation14 + $0x98] sm:$0xff]  ;;  %v6335_v42 = vld [vmem:[#allocation14 + $0x20] sm:$0xff] }
 0xe30   : > { %v6063_v48 = vadd.f32 %v6050_v11, %v5951_v56  ;;  %v6488_v11 = vld [vmem:[#allocation16 + $0x48] sm:$0xff] }
 0xe31   : > { %v6340_v56 = vld [vmem:[#allocation16 + $0x8] sm:$0xff] }
 0xe32   : > { %v6223_v18 = vmul.f32 %v6200_v31, %v6063_v48  ;;  %v6487_v31 = vld [vmem:[#allocation16 + $0x40] sm:$0xff]  ;;  %v6337_v48 = vld [vmem:[#allocation14 + $0x30] sm:$0xff] }
 0xe34   : > { %v12105_v37 = vadd.f32 %v6239_v19, %v6223_v18  ;;  %v6490_v18 = vld [vmem:[#allocation16 + $0x58] sm:$0xff] }
 0xe35   : > { %v5942_v6 = vpop.f32.mrf.mxu1  ;;  %v6342_v19 = vld [vmem:[#allocation16 + $0x18] sm:$0xff] }
 0xe36   : > { %v5952_v9 = vadd.f32 %v5942_v6, %v5787_v0  ;;  %6283 = vmatmul.f32.gmra.mxu2 %v12105_v37  ;;  %6324 = vmatmul.f32.gmra.mxu3 %v12105_v37  ;;  %v6338_v0 = vld [vmem:[#allocation14 + $0x38] sm:$0xff]  ;;  %v6491_v6 = vld [vmem:[#allocation16 + $0x60] sm:$0xff] }
 0xe38   : > { %v6064_v53 = vadd.f32 %v6055_v52, %v5952_v9  ;;  %v6343_v9 = vld [vmem:[#allocation16 + $0x20] sm:$0xff] }
 0xe39   : > { %v6708_v52 = vld [vmem:[#allocation16 + $0x80] sm:$0xff] }
 0xe3a   : > { %v6224_v28 = vmul.f32 %v6215_v61, %v6064_v53  ;;  %v6633_v61 = vld [vmem:[#allocation14 + $0xb8] sm:$0xff]  ;;  %v6492_v53 = vld [vmem:[#allocation16 + $0x68] sm:$0xff] }
 0xe3c   : > { %v12110_v38 = vadd.f32 %v6240_v44, %v6224_v28  ;;  %v6344_v28 = vld [vmem:[#allocation16 + $0x28] sm:$0xff] }
 0xe3e   : > { %6286 = vmatmul.f32.gmra.mxu2 %v12110_v38  ;;  %6327 = vmatmul.f32.gmra.mxu3 %v12110_v38 }
 0xe3f   : > { %6388 = vmatpush.msrb.mxu0 %v12110_v38  ;;  %6527 = vmatpush.msra.mxu2 %v12110_v38 }
 0xe41   : > { %6389 = vmatpush.msrb.mxu0 %v12105_v37  ;;  %6528 = vmatpush.msra.mxu2 %v12105_v37 }
 0xe43   : > { %6390 = vmatpush.msrb.mxu0 %v12094_v33  ;;  %6529 = vmatpush.msra.mxu2 %v12094_v33 }
 0xe45   : > { %6391 = vmatpush.msrb.mxu0 %v12082_v59  ;;  %6530 = vmatpush.msra.mxu2 %v12082_v59 }
 0xe47   : > { %6392 = vmatpush.msrb.mxu0 %v12066_v49  ;;  %6531 = vmatpush.msra.mxu2 %v12066_v49 }
 0xe49   : > { %6393 = vmatpush.msrb.mxu0 %v12049_v57  ;;  %6532 = vmatpush.msra.mxu2 %v12049_v57 }
 0xe4b   : > { %6394 = vmatpush.msrb.mxu0 %v12029_v12  ;;  %6533 = vmatpush.msra.mxu2 %v12029_v12 }
 0xe4d   : > { %6395 = vmatpush.msrb.mxu0 %v12009_v36  ;;  %6534 = vmatpush.msra.mxu2 %v12009_v36 }
 0xe4e   : > { %8614 = vmatmul.msk.f32.vlgmr.msrb.gmra.mxu0 %vm13206_vm3, %v6348_v3  ;;  %vm13222_vm3 = vmmov %vm13218_vm0  ;;  %v6709_v3 = vld [vmem:[#allocation16 + $0x88] sm:$0xff] }
 0xe4f   : > { %8630 = vmatmul.msk.f32.vlgmr.msra.gmra.mxu2 %vm13222_vm3, %v6487_v31  ;;  %vm13237_vm3 = vmmov %vm13218_vm0 }
 0xe56   : > { %8615 = vmatmul.msk.f32.gmra.mxu0 %vm13207_vm7, %v6349_v40  ;;  %vm13223_vm7 = vmmov %vm13218_vm0  ;;  %v6493_v40 = vld [vmem:[#allocation16 + $0x70] sm:$0xff] }
 0xe5e   : > { %8616 = vmatmul.msk.f32.gmra.mxu0 %vm13208_vm4, %v6350_v26  ;;  %vm13224_vm4 = vmmov %vm13218_vm0  ;;  %v6345_v26 = vld [vmem:[#allocation16 + $0x30] sm:$0xff] }
 0xe66   : > { %8617 = vmatmul.msk.f32.gmra.mxu0 %vm13209_vm15, %v6351_v22  ;;  %vm13225_vm15 = vmmov %vm13218_vm0  ;;  %v6494_v22 = vld [vmem:[#allocation16 + $0x78] sm:$0xff] }
 0xe6e   : > { %8618 = vmatmul.msk.f32.gmra.mxu0 %vm13210_vm9, %v6352_v8  ;;  %vm13226_vm9 = vmmov %vm13218_vm0 }
 0xe6f   : > { %8631 = vmatmul.msk.f32.gmra.mxu2 %vm13226_vm9, %v6488_v11  ;;  %vm13241_vm9 = vmmov %vm13218_vm0 }
 0xe76   : > { %8619 = vmatmul.msk.f32.gmra.mxu0 %vm13211_vm12, %v6353_v13  ;;  %vm13227_vm12 = vmmov %vm13218_vm0  ;;  %v6713_v13 = vld [vmem:[#allocation16 + $0xa8] sm:$0xff] }
 0xe7e   : > { %8620 = vmatmul.msk.f32.gmra.mxu0 %vm13212_vm5, %v6354_v2  ;;  %vm13228_vm5 = vmmov %vm13218_vm0 }
 0xe86   : > { %8621 = vmatmul.msk.f32.gmra.mxu0 %vm13213_vm6, %v6355_v17  ;;  %vm13229_vm6 = vmmov %vm13218_vm0 }
 0xe89   : > { %v6266_v20 = vpop.f32.mrf.mxu2  ;;  %v12133_v15 = vpop.f32.mrf.mxu3 }
 0xe91   : > { %v6269_v7 = vpop.f32.mrf.mxu2  ;;  %v6310_v63 = vpop.f32.mrf.mxu3 }
 0xe99   : > { %v6272_v4 = vpop.f32.mrf.mxu2  ;;  %v6313_v62 = vpop.f32.mrf.mxu3 }
 0xea1   : > { %v6275_v29 = vpop.f32.mrf.mxu2  ;;  %v6316_v21 = vpop.f32.mrf.mxu3 }
 0xea9   : > { %v6278_v39 = vpop.f32.mrf.mxu2  ;;  %v6319_v25 = vpop.f32.mrf.mxu3 }
 0xeb1   : > { %v6281_v14 = vpop.f32.mrf.mxu2  ;;  %v6322_v23 = vpop.f32.mrf.mxu3 }
 0xeb9   : > { %v6284_v1 = vpop.f32.mrf.mxu2  ;;  %v6325_v60 = vpop.f32.mrf.mxu3 }
 0xec1   : > { %v6287_v45 = vpop.f32.mrf.mxu2  ;;  %v6328_v46 = vpop.f32.mrf.mxu3 }
 0xec2   : > { %6453 = vmatpush.msrb.mxu1 %v6287_v45  ;;  %6592 = vmatpush.msra.mxu3 %v6287_v45 }
 0xec3   : > { %6666 = vmatpush.msra.mxu0 %v6328_v46 }
 0xec4   : > { %6454 = vmatpush.msrb.mxu1 %v6284_v1  ;;  %6593 = vmatpush.msra.mxu3 %v6284_v1 }
 0xec5   : > { %6667 = vmatpush.msra.mxu0 %v6325_v60 }
 0xec6   : > { %6455 = vmatpush.msrb.mxu1 %v6281_v14  ;;  %6594 = vmatpush.msra.mxu3 %v6281_v14 }
 0xec7   : > { %6668 = vmatpush.msra.mxu0 %v6322_v23 }
 0xec8   : > { %6456 = vmatpush.msrb.mxu1 %v6278_v39  ;;  %6595 = vmatpush.msra.mxu3 %v6278_v39  ;;  %v12193_v39 = vpop.permute.xlu1 %6829 }
 0xec9   : > { %6669 = vmatpush.msra.mxu0 %v6319_v25 }
 0xeca   : > { %6457 = vmatpush.msrb.mxu1 %v6275_v29  ;;  %6596 = vmatpush.msra.mxu3 %v6275_v29 }
 0xecb   : > { %6670 = vmatpush.msra.mxu0 %v6316_v21  ;;  %v6397_v34 = vpop.f32.mrf.mxu0 }
 0xecc   : > { %6458 = vmatpush.msrb.mxu1 %v6272_v4  ;;  %6597 = vmatpush.msra.mxu3 %v6272_v4  ;;  %v6712_v4 = vld [vmem:[#allocation16 + $0xa0] sm:$0xff] }
 0xecd   : > { %6671 = vmatpush.msra.mxu0 %v6313_v62 }
 0xece   : > { %6459 = vmatpush.msrb.mxu1 %v6269_v7  ;;  %6598 = vmatpush.msra.mxu3 %v6269_v7  ;;  %v6346_v7 = vld [vmem:[#allocation16 + $0x38] sm:$0xff] }
 0xecf   : > { %6672 = vmatpush.msra.mxu0 %v6310_v63 }
 0xed0   : > { %6460 = vmatpush.msrb.mxu1 %v6266_v20  ;;  %6599 = vmatpush.msra.mxu3 %v6266_v20  ;;  %v12196_v1 = vpop.permute.xlu1 %6814 }
 0xed1   : > { %6673 = vmatpush.msra.mxu0 %v12133_v15  ;;  %8622 = vmatmul.msk.f32.vlgmr.msrb.gmra.mxu1 %vm13214_vm8, %v6331_v30  ;;  %vm13230_vm8 = vmmov %vm13218_vm0 }
 0xed2   : > { %6748 = vmatpush.msra.mxu1 %v6328_v46  ;;  %8646 = vmatmul.msk.f32.vlgmr.msra.gmra.mxu0 %vm13215_vm14, %v6626_v47  ;;  %vm13231_vm14 = vmmov %vm13218_vm0  ;;  %v6536_v11 = vpop.f32.mrf.mxu2 }
 0xed3   : > { %8638 = vmatmul.msk.f32.vlgmr.msra.gmra.mxu3 %vm13223_vm7, %v6339_v35  ;;  %8632 = vmatmul.msk.f32.gmra.mxu2 %vm13230_vm8, %v6489_v27  ;;  %v12165_v10 = vpop.f32.mrf.mxu0  ;;  %vm13238_vm7 = vmmov %vm13218_vm0 }
 0xed4   : > { %6749 = vmatpush.msra.mxu1 %v6325_v60  ;;  %vm13245_vm8 = vmmov %vm13218_vm0 }
 0xed6   : > { %6750 = vmatpush.msra.mxu1 %v6322_v23 }
 0xed8   : > { %6751 = vmatpush.msra.mxu1 %v6319_v25  ;;  %v6715_v25 = vld [vmem:[#allocation16 + $0xb8] sm:$0xff]  ;;  %v6800_v30 = vpop.permute.xlu1 %6799 }
 0xed9   : > { %8623 = vmatmul.msk.f32.gmra.mxu1 %vm13216_vm11, %v6332_v50  ;;  %vm13232_vm11 = vmmov %vm13218_vm0  ;;  %v12198_v50 = vpop.permute.xlu0 %6834 }
 0xeda   : > { %6752 = vmatpush.msra.mxu1 %v6316_v21  ;;  %8647 = vmatmul.msk.f32.gmra.mxu0 %vm13217_vm13, %v6627_v41  ;;  %vm13233_vm13 = vmmov %vm13218_vm0  ;;  %v6714_v21 = vld [vmem:[#allocation16 + $0xb0] sm:$0xff] }
 0xedb   : > { %8639 = vmatmul.msk.f32.gmra.mxu3 %vm13227_vm12, %v6340_v56  ;;  %8633 = vmatmul.msk.f32.gmra.mxu2 %vm13218_vm0, %v6490_v18  ;;  %v12172_v44 = vpop.f32.mrf.mxu0  ;;  %vm13242_vm12 = vmmov %vm13218_vm0 }
 0xedc   : > { %6753 = vmatpush.msra.mxu1 %v6313_v62 }
 0xede   : > { %6754 = vmatpush.msra.mxu1 %v6310_v63  ;;  %v6711_v63 = vld [vmem:[#allocation16 + $0x98] sm:$0xff] }
 0xee0   : > { %6755 = vmatpush.msra.mxu1 %v12133_v15  ;;  %v6710_v15 = vld [vmem:[#allocation16 + $0x90] sm:$0xff] }
 0xee1   : > { %8624 = vmatmul.msk.f32.gmra.mxu1 %vm13218_vm0, %v6333_v51  ;;  %v12200_v31 = vpop.permute.xlu0 %6819 }
 0xee2   : > { %8648 = vmatmul.msk.f32.gmra.mxu0 %vm13219_vm10, %v6628_v24  ;;  %vm13234_vm10 = vmmov %vm13218_vm0 }
 0xee3   : > { %8640 = vmatmul.msk.f32.gmra.mxu3 %vm13231_vm14, %v6341_v54  ;;  %8634 = vmatmul.msk.f32.gmra.mxu2 %vm13237_vm3, %v6491_v6  ;;  %v12178_v20 = vpop.f32.mrf.mxu0  ;;  %vm13246_vm14 = vmmov %vm13218_vm0 }
 0xee9   : > { %8625 = vmatmul.msk.f32.gmra.mxu1 %vm13220_vm1, %v6334_v55  ;;  %vm13235_vm1 = vmmov %vm13218_vm0  ;;  %v6805_v27 = vpop.permute.xlu0 %6804 }
 0xeea   : > { %8649 = vmatmul.msk.f32.gmra.mxu0 %vm13221_vm2, %v6629_v5  ;;  %vm13236_vm2 = vmmov %vm13218_vm0 }
 0xeeb   : > { %8641 = vmatmul.msk.f32.gmra.mxu3 %vm13234_vm10, %v6342_v19  ;;  %v12183_v8 = vpop.f32.mrf.mxu0  ;;  %vm13249_vm10 = vmmov %vm13218_vm0 }
 0xef1   : > { %8626 = vmatmul.msk.f32.gmra.mxu1 %vm13224_vm4, %v6335_v42  ;;  %vm13239_vm4 = vmmov %vm13218_vm0  ;;  %v12202_v18 = vpop.permute.xlu0 %6885 }
 0xef2   : > { %8650 = vmatmul.msk.f32.gmra.mxu0 %vm13225_vm15, %v6630_v58  ;;  %vm13240_vm15 = vmmov %vm13218_vm0 }
 0xef3   : > { %8642 = vmatmul.msk.f32.gmra.mxu3 %vm13238_vm7, %v6343_v9  ;;  %8635 = vmatmul.msk.f32.gmra.mxu2 %vm13240_vm15, %v6492_v53  ;;  %v12187_v62 = vpop.f32.mrf.mxu0  ;;  %v12204_v9 = vpop.f32.mrf.mxu2 }
 0xef4   : > { %v6825_v53 = vpop.permute.xlu2 %6824 }
 0xef9   : > { %8627 = vmatmul.msk.f32.gmra.mxu1 %vm13228_vm5, %v6336_v16  ;;  %vm13243_vm5 = vmmov %vm13218_vm0 }
 0xefa   : > { %8651 = vmatmul.msk.f32.gmra.mxu0 %vm13229_vm6, %v6631_v43  ;;  %vm13244_vm6 = vmmov %vm13218_vm0 }
 0xefb   : > { %8643 = vmatmul.msk.f32.gmra.mxu3 %vm13241_vm9, %v6344_v28  ;;  %8636 = vmatmul.msk.f32.gmra.mxu2 %vm13243_vm5, %v6493_v40  ;;  %v12190_v29 = vpop.f32.mrf.mxu0 }
 0xf01   : > { %8628 = vmatmul.msk.f32.gmra.mxu1 %vm13232_vm11, %v6337_v48  ;;  %vm13247_vm11 = vmmov %vm13218_vm0 }
 0xf02   : > { %8652 = vmatmul.msk.f32.gmra.mxu0 %vm13233_vm13, %v6632_v32  ;;  %vm13248_vm13 = vmmov %vm13218_vm0 }
 0xf03   : > { %8644 = vmatmul.msk.f32.gmra.mxu3 %vm13244_vm6, %v6345_v26  ;;  %8637 = vmatmul.msk.f32.gmra.mxu2 %vm13246_vm14, %v6494_v22  ;;  %v6418_v2 = vpop.f32.mrf.mxu0 }
 0xf09   : > { %8629 = vmatmul.msk.f32.gmra.mxu1 %vm13235_vm1, %v6338_v0  ;;  %vm13250_vm1 = vmmov %vm13218_vm0 }
 0xf0a   : > { %8653 = vmatmul.msk.f32.gmra.mxu0 %vm13236_vm2, %v6633_v61  ;;  %vm13251_vm2 = vmmov %vm13218_vm0 }
 0xf0b   : > { %8645 = vmatmul.msk.f32.gmra.mxu3 %vm13247_vm11, %v6346_v7 }
 0xf11   : > { %8654 = vmatmul.msk.f32.vlgmr.msra.gmra.mxu1 %vm13239_vm4, %v6708_v52 }
 0xf19   : > { %8655 = vmatmul.msk.f32.gmra.mxu1 %vm13242_vm12, %v6709_v3  ;;  %v12208_v3 = vpop.permute.xlu0 %6870 }
 0xf21   : > { %8656 = vmatmul.msk.f32.gmra.mxu1 %vm13245_vm8, %v6710_v15 }
 0xf29   : > { %8657 = vmatmul.msk.f32.gmra.mxu1 %vm13248_vm13, %v6711_v63 }
 0xf31   : > { %8658 = vmatmul.msk.f32.gmra.mxu1 %vm13218_vm0, %v6712_v4 }
 0xf39   : > { %8659 = vmatmul.msk.f32.gmra.mxu1 %vm13249_vm10, %v6713_v13 }
 0xf41   : > { %8660 = vmatmul.msk.f32.gmra.mxu1 %vm13250_vm1, %v6714_v21 }
 0xf49   : > { %8661 = vmatmul.msk.f32.gmra.mxu1 %vm13251_vm2, %v6715_v25 }
 0xf4e   : > { %v6462_v17 = vpop.f32.mrf.mxu1 }
 0xf4f   : > { %v6463_v14 = vadd.f32 %v6462_v17, %v6397_v34  ;;  %v6675_v23 = vpop.f32.mrf.mxu0 }
 0xf51   : > { %v6699_v60 = vadd.f32 %v6675_v23, %v6463_v14 }
 0xf53   : > { %v6837_v47 = vadd.f32 %v6800_v30, %v6699_v60 }
 0xf55   : > { %v8662_v51 = vmul.f32 -1.442695, %v6837_v47 }
 0xf56   : > { %v6465_v45 = vpop.f32.mrf.mxu1  ;;  %v6601_v16 = vpop.f32.mrf.mxu3 }
 0xf57   : > { %v6678_v46 = vpop.f32.mrf.mxu0  ;;  %9051 = vpow2.f32 %v8662_v51  ;;  %v6602_v43 = vadd.f32 %v6601_v16, %v6536_v11  ;;  %v6466_v15 = vadd.f32 %v6465_v45, %v12165_v10  ;;  %v12215_v10 = vpop.f32.mrf.mxu2 }
 0xf59   : > { %v6700_v21 = vadd.f32 %v6678_v46, %v6466_v15 }
 0xf5b   : > { %v6838_v51 = vadd.f32 %v6805_v27, %v6700_v21 }
 0xf5d   : > { %v9052_v35 = vpop.eup %9051 }
 0xf5e   : > { %v6468_v41 = vpop.f32.mrf.mxu1  ;;  %v6925_v42 = vadd.f32 1.0, %v9052_v35  ;;  %v12206_v52 = vpop.f32.mrf.mxu3 }
 0xf5f   : > { %v6681_v24 = vpop.f32.mrf.mxu0  ;;  %v6469_v7 = vadd.f32 %v6468_v41, %v12172_v44 }
 0xf60   : > { %9053 = vrcp.f32 %v6925_v42  ;;  %v6944_v26 = vand.u32 2147483648, %v6925_v42  ;;  %vm6938_vm7 = vweird.f32 %v6925_v42  ;;  %v6942_v22 = vand.u32 2147483647, %v6925_v42 }
 0xf61   : > { %v6701_v17 = vadd.f32 %v6681_v24, %v6469_v7  ;;  %v6856_v24 = vpop.permute.xlu0 %6855 }
 0xf62   : > { %v6945_v13 = vor.u32 1.1754944e-38, %v6944_v26  ;;  %vm6943_vm15 = vcmp.eq.f32.partialorder %v6942_v22, 8.507059e+37 }
 0xf66   : > { %v6471_v55 = vpop.f32.mrf.mxu1  ;;  %v9054_v54 = vpop.eup %9053 }
 0xf67   : > { %v6684_v5 = vpop.f32.mrf.mxu0  ;;  %v6934_v34 = vmul.f32 %v9054_v54, %v6925_v42  ;;  %vm6939_vm3 = vweird.f32 %v9054_v54  ;;  %v6472_v4 = vadd.f32 %v6471_v55, %v12178_v20  ;;  %v12218_v41 = vpop.f32.mrf.mxu3 }
 0xf68   : > { %vm6940_vm4 = vmor %vm6938_vm7, %vm6939_vm3  ;;  %v6810_v20 = vpop.permute.xlu2 %6809 }
 0xf69   : > { %v6935_v19 = vsub.f32 1.0, %v6934_v34  ;;  %v6702_v45 = vadd.f32 %v6684_v5, %v6472_v4  ;;  %v6839_v35 = vadd.f32 %v6810_v20, %v6701_v17 }
 0xf6b   : > { %v6936_v61 = vmul.f32 %v9054_v54, %v6935_v19 }
 0xf6d   : > { %v6937_v28 = vadd.f32 %v9054_v54, %v6936_v61 }
 0xf6e   : > { %v6474_v58 = vpop.f32.mrf.mxu1 }
 0xf6f   : > { %v6687_v56 = vpop.f32.mrf.mxu0  ;;  %v6941_v63 = vsel %vm6940_vm4, %v9054_v54, %v6937_v28  ;;  %v6475_v44 = vadd.f32 %v6474_v58, %v12183_v8  ;;  %v8663_v54 = vmul.f32 -1.442695, %v6838_v51  ;;  %v12231_v61 = vpop.f32.mrf.mxu3 }
 0xf70   : > { %v6946_v60 = vsel %vm6943_vm15, %v6945_v13, %v6941_v63 }
 0xf71   : > { %v7061_v55 = vsub.f32 1.0, %v6946_v60  ;;  %v6703_v16 = vadd.f32 %v6687_v56, %v6475_v44  ;;  %9055 = vpow2.f32 %v8663_v54  ;;  %v12229_v56 = vpop.f32.mrf.mxu2 }
 0xf73   : > { %v7069_v58 = vmul.f32 %v7061_v55, %v12009_v36 }
 0xf76   : > { %v6477_v48 = vpop.f32.mrf.mxu1 }
 0xf77   : > { %v6690_v32 = vpop.f32.mrf.mxu0  ;;  %v6478_v14 = vadd.f32 %v6477_v48, %v12187_v62  ;;  %v8664_v48 = vmul.f32 -1.442695, %v6839_v35  ;;  %v12241_v63 = vpop.f32.mrf.mxu3 }
 0xf79   : > { %v6704_v62 = vadd.f32 %v6690_v32, %v6478_v14  ;;  %v6841_v32 = vadd.f32 %v12200_v31, %v6703_v16  ;;  %9057 = vpow2.f32 %v8664_v48  ;;  %v12239_v22 = vpop.f32.mrf.mxu2 }
 0xf7b   : > { %v6842_v34 = vadd.f32 %v6825_v53, %v6704_v62 }
 0xf7e   : > { %v6480_v0 = vpop.f32.mrf.mxu1 }
 0xf7f   : > { %v6693_v6 = vpop.f32.mrf.mxu0  ;;  %v6481_v30 = vadd.f32 %v6480_v0, %v12190_v29  ;;  %v6840_v29 = vadd.f32 %v12196_v1, %v6702_v45 }
 0xf81   : > { %v6705_v42 = vadd.f32 %v6693_v6, %v6481_v30  ;;  %v8665_v19 = vmul.f32 -1.442695, %v6840_v29  ;;  %v8666_v6 = vmul.f32 -1.442695, %v6841_v32  ;;  %v12266_v44 = vpop.f32.mrf.mxu2 }
 0xf83   : > { %v6843_v27 = vadd.f32 %v12193_v39, %v6705_v42  ;;  %9059 = vpow2.f32 %v8665_v19  ;;  %v9056_v39 = vpop.eup %9055 }
 0xf84   : > { %v9058_v53 = vpop.eup %9057 }
 0xf85   : > { %v8668_v36 = vmul.f32 -1.442695, %v6843_v27  ;;  %v12237_v15 = vadd.f32 1.0, %v9058_v53 }
 0xf86   : > { %v6483_v40 = vpop.f32.mrf.mxu1 }
 0xf87   : > { %v6484_v25 = vadd.f32 %v6483_v40, %v6418_v2  ;;  %v6696_v23 = vpop.f32.mrf.mxu0  ;;  %v12235_v40 = vadd.f32 1.0, %v9056_v39  ;;  %v6972_v39 = vand.u32 2147483647, %v12237_v15  ;;  %vm6968_vm13 = vweird.f32 %v12237_v15 }
 0xf89   : > { %v6706_v46 = vadd.f32 %v6696_v23, %v6484_v25  ;;  %v9060_v28 = vpop.eup %9059  ;;  %v6554_v48 = vpop.f32.mrf.mxu2 }
 0xf8a   : > { %v12243_v13 = vadd.f32 1.0, %v9060_v28 }
 0xf8b   : > { %v6844_v5 = vadd.f32 %v12198_v50, %v6706_v46  ;;  %v8667_v50 = vmul.f32 -1.442695, %v6842_v34 }
 0xf8c   : > { %vm6983_vm5 = vweird.f32 %v12243_v13 }
 0xf8d   : > { %v8669_v1 = vmul.f32 -1.442695, %v6844_v5 }
 0xf8e   : > { %v6757_v47 = vpop.f32.mrf.mxu1 }
 0xf8f   : > { %v6781_v2 = vadd.f32 %v6757_v47, %v6602_v43  ;;  %9061 = vpow2.f32 %v8669_v1  ;;  %v12268_v47 = vpop.f32.mrf.mxu3 }
 0xf90   : > { %9063 = vpow2.f32 %v8667_v50 }
 0xf91   : > { %v6893_v11 = vadd.f32 %v6856_v24, %v6781_v2  ;;  %9065 = vpow2.f32 %v8668_v36 }
 0xf92   : > { %9067 = vpow2.f32 %v8666_v6  ;;  %v6557_v6 = vpop.f32.mrf.mxu2 }
 0xf93   : > { %v7053_v8 = vmul.f32 %v6946_v60, %v6893_v11  ;;  %9069 = vrcp.f32 %v12235_v40 }
 0xf94   : > { %9071 = vrcp.f32 %v12237_v15 }
 0xf95   : > { %v12224_v43 = vadd.f32 %v7069_v58, %v7053_v8  ;;  %v9062_v26 = vpop.eup %9061  ;;  %9073 = vrcp.f32 %v12243_v13 }
 0xf96   : > { %v12227_v0 = vpop.f32.mrf.mxu1  ;;  %v9064_v7 = vpop.eup %9063  ;;  %v12246_v25 = vadd.f32 1.0, %v9062_v26  ;;  %v12305_v26 = vadd.f32 %v12206_v52, %v12204_v9  ;;  %v12320_v9 = vadd.f32 %v12218_v41, %v12215_v10 }
 0xf97   : > { %v9066_v4 = vpop.eup %9065  ;;  %v12249_v17 = vadd.f32 1.0, %v9064_v7  ;;  %v6619_v1 = vpop.f32.mrf.mxu3 }
 0xf98   : > { %v9068_v21 = vpop.eup %9067  ;;  %v12251_v14 = vadd.f32 1.0, %v9066_v4  ;;  %9075 = vrcp.f32 %v12246_v25  ;;  %vm7043_vm2 = vweird.f32 %v12246_v25 }
 0xf99   : > { %v12256_v60 = vadd.f32 1.0, %v9068_v21  ;;  %9077 = vrcp.f32 %v12249_v17  ;;  %v12260_v30 = vpop.eup %9069  ;;  %vm7013_vm14 = vweird.f32 %v12249_v17 }
 0xf9a   : > { %9079 = vrcp.f32 %v12251_v14  ;;  %v12263_v45 = vpop.eup %9071  ;;  %v6949_v51 = vmul.f32 %v12260_v30, %v12235_v40  ;;  %vm6954_vm3 = vweird.f32 %v12260_v30  ;;  %vm7028_vm15 = vweird.f32 %v12251_v14 }
 0xf9b   : > { %9081 = vrcp.f32 %v12256_v60  ;;  %v12270_v20 = vpop.eup %9073  ;;  %v6964_v2 = vmul.f32 %v12263_v45, %v12237_v15  ;;  %v7002_v52 = vand.u32 2147483647, %v12256_v60  ;;  %vm6969_vm12 = vweird.f32 %v12263_v45 }
 0xf9c   : > { %v6950_v42 = vsub.f32 1.0, %v6949_v51  ;;  %v6979_v5 = vmul.f32 %v12270_v20, %v12243_v13  ;;  %vm6984_vm9 = vweird.f32 %v12270_v20  ;;  %vm6998_vm6 = vweird.f32 %v12256_v60 }
 0xf9d   : > { %v6965_v29 = vsub.f32 1.0, %v6964_v2  ;;  %v6987_v2 = vand.u32 2147483647, %v12243_v13  ;;  %v7004_v10 = vand.u32 2147483648, %v12256_v60  ;;  %vm12342_vm1 = vcmp.eq.f32.partialorder %v7002_v52, 8.507059e+37 }
 0xf9e   : > { %v12233_v31 = vpop.f32.mrf.mxu1  ;;  %v12274_v46 = vpop.eup %9075  ;;  %v6951_v58 = vmul.f32 %v12260_v30, %v6950_v42  ;;  %v6980_v53 = vsub.f32 1.0, %v6979_v5  ;;  %v6989_v42 = vand.u32 2147483648, %v12243_v13  ;;  %v7034_v52 = vand.u32 2147483648, %v12251_v14 }
 0xf9f   : > { %v12280_v24 = vpop.eup %9077  ;;  %v7039_v11 = vmul.f32 %v12274_v46, %v12246_v25  ;;  %v6966_v27 = vmul.f32 %v12263_v45, %v6965_v29  ;;  %vm7044_vm11 = vweird.f32 %v12274_v46  ;;  %v6622_v50 = vpop.f32.mrf.mxu3 }
 0xfa0   : > { %v12282_v35 = vpop.eup %9079  ;;  %v7009_v16 = vmul.f32 %v12280_v24, %v12249_v17  ;;  %v12308_v7 = vadd.f32 %v12260_v30, %v6951_v58  ;;  %vm7014_vm0 = vweird.f32 %v12280_v24  ;;  %vm12356_vm7 = vmor %vm7043_vm2, %vm7044_vm11  ;;  %vm6953_vm11 = vweird.f32 %v12235_v40 }
 0xfa1   : > { %v12284_v62 = vpop.eup %9081  ;;  %v7024_v54 = vmul.f32 %v12282_v35, %v12251_v14  ;;  %v7040_v34 = vsub.f32 1.0, %v7039_v11  ;;  %v12313_v51 = vadd.f32 %v12263_v45, %v6966_v27  ;;  %vm7029_vm10 = vweird.f32 %v12282_v35  ;;  %vm12366_vm4 = vmor %vm7013_vm14, %vm7014_vm0 }
 0xfa2   : > { %v6994_v8 = vmul.f32 %v12284_v62, %v12256_v60  ;;  %v7010_v32 = vsub.f32 1.0, %v7009_v16  ;;  %v12325_v16 = vpop.permute.xlu2 %6890  ;;  %vm6999_vm8 = vweird.f32 %v12284_v62  ;;  %vm12384_vm14 = vmor %vm7028_vm15, %vm7029_vm10  ;;  %vm12388_vm0 = vcmp.eq.f32.partialorder %v6972_v39, 8.507059e+37 }
 0xfa3   : > { %v7025_v36 = vsub.f32 1.0, %v7024_v54  ;;  %v7041_v21 = vmul.f32 %v12274_v46, %v7040_v34  ;;  %v6981_v54 = vmul.f32 %v12270_v20, %v6980_v53  ;;  %v7049_v34 = vand.u32 2147483648, %v12246_v25  ;;  %vm12401_vm10 = vmor %vm6998_vm6, %vm6999_vm8 }
 0xfa4   : > { %v6995_v28 = vsub.f32 1.0, %v6994_v8  ;;  %v7011_v11 = vmul.f32 %v12280_v24, %v7010_v32  ;;  %v6620_v32 = vadd.f32 %v6619_v1, %v6554_v48  ;;  %v7047_v53 = vand.u32 2147483647, %v12246_v25 }
 0xfa5   : > { %v7026_v29 = vmul.f32 %v12282_v35, %v7025_v36  ;;  %v7042_v41 = vadd.f32 %v12274_v46, %v7041_v21  ;;  %v7017_v21 = vand.u32 2147483647, %v12249_v17  ;;  %v6617_v25 = vadd.f32 %v12268_v47, %v12266_v44 }
 0xfa6   : > { %v12253_v23 = vpop.f32.mrf.mxu1  ;;  %v6996_v5 = vmul.f32 %v12284_v62, %v6995_v28  ;;  %v7012_v8 = vadd.f32 %v12280_v24, %v7011_v11  ;;  %v7019_v11 = vand.u32 2147483648, %v12249_v17  ;;  %v6982_v44 = vadd.f32 %v12270_v20, %v6981_v54  ;;  %v6881_v54 = vpop.permute.xlu1 %6880 }
 0xfa7   : > { %v7027_v36 = vadd.f32 %v12282_v35, %v7026_v29  ;;  %v7032_v29 = vand.u32 2147483647, %v12251_v14  ;;  %v6614_v47 = vadd.f32 %v12241_v63, %v12239_v22  ;;  %v7050_v14 = vor.u32 1.1754944e-38, %v7049_v34 }
 0xfa8   : > { %v6997_v28 = vadd.f32 %v12284_v62, %v6996_v5  ;;  %v7046_v5 = vsel %vm12356_vm7, %v12274_v46, %v7042_v41  ;;  %v7016_v17 = vsel %vm12366_vm4, %v12280_v24, %v7012_v8  ;;  %v6623_v63 = vadd.f32 %v6622_v50, %v6557_v6  ;;  %vm12409_vm7 = vmor %vm6983_vm5, %vm6984_vm9 }
 0xfa9   : > { %v7031_v22 = vsel %vm12384_vm14, %v12282_v35, %v7027_v36  ;;  %vm7048_vm2 = vcmp.eq.f32.partialorder %v7047_v53, 8.507059e+37  ;;  %v6611_v24 = vadd.f32 %v12231_v61, %v12229_v56  ;;  %v7020_v8 = vor.u32 1.1754944e-38, %v7019_v11  ;;  %vm12424_vm9 = vmor %vm6968_vm13, %vm6969_vm12 }
 0xfaa   : > { %v7051_v34 = vsel %vm7048_vm2, %v7050_v14, %v7046_v5  ;;  %v7001_v56 = vsel %vm12401_vm10, %v12284_v62, %v6997_v28  ;;  %vm7018_vm6 = vcmp.eq.f32.partialorder %v7017_v21, 8.507059e+37  ;;  %vm7033_vm8 = vcmp.eq.f32.partialorder %v7032_v29, 8.507059e+37  ;;  %v6876_v60 = vpop.permute.xlu2 %6875  ;;  %vm12450_vm12 = vmor %vm6953_vm11, %vm6954_vm3 }
 0xfab   : > { %v6986_v50 = vsel %vm12409_vm7, %v12270_v20, %v6982_v44  ;;  %v7005_v6 = vor.u32 1.1754944e-38, %v7004_v10  ;;  %v7021_v4 = vsel %vm7018_vm6, %v7020_v8, %v7016_v17  ;;  %v7068_v21 = vsub.f32 1.0, %v7051_v34 }
 0xfac   : > { %v6971_v20 = vsel %vm12424_vm9, %v12263_v45, %v12313_v51  ;;  %vm6988_vm5 = vcmp.eq.f32.partialorder %v6987_v2, 8.507059e+37  ;;  %v6990_v10 = vor.u32 1.1754944e-38, %v6989_v42  ;;  %v13268_v45 = vand.u32 2147483648, %v12237_v15 }
 0xfad   : > { %v7006_v11 = vsel %vm12342_vm1, %v7005_v6, %v7001_v56  ;;  %v7066_v2 = vsub.f32 1.0, %v7021_v4  ;;  %v6956_v15 = vsel %vm12450_vm12, %v12260_v30, %v12308_v7  ;;  %v7085_v6 = vld [vmem:[%s13273_s22] sm:$0xff]  ;;  %vm13275_vm1 = vcmask 523264   ;;  %s12540_s22 = sand.u32 1, %s9491_s16  }
 0xfae   : > { %v12278_v55 = vpop.f32.mrf.mxu1  ;;  %v6975_v51 = vor.u32 1.1754944e-38, %v13268_v45  ;;  %v6991_v1 = vsel %vm6988_vm5, %v6990_v10, %v6986_v50  ;;  %v7065_v29 = vsub.f32 1.0, %v7006_v11  ;;  %v6866_v14 = vpop.permute.xlu1 %6865  ;;  %vm13276_vm3 = vmmov %vm13275_vm1 }
 0xfaf   : > { %v6785_v62 = vadd.f32 %v12278_v55, %v6614_v47  ;;  %v6784_v55 = vadd.f32 %v12253_v23, %v6611_v24  ;;  %v7074_v46 = vmul.f32 %v7066_v2, %v12094_v33  ;;  %vm13277_vm4 = vmmov %vm13275_vm1 }
 0xfb0   : > { %v7073_v8 = vmul.f32 %v7065_v29, %v12082_v59  ;;  %vm13278_vm15 = vmmov %vm13275_vm1  ;;  %v7207_v29 = vld [vmem:[%s13284_s2 + $0x8] sm:$0xff] }
 0xfb1   : > { %v6897_v23 = vadd.f32 %v6876_v60, %v6785_v62  ;;  %v6896_v5 = vadd.f32 %v12208_v3, %v6784_v55  ;;  %vm13279_vm11 = vmmov %vm13275_vm1 }
 0xfb2   : > { %vm13280_vm14 = vmmov %vm13275_vm1 }
 0xfb3   : > { %v7057_v30 = vmul.f32 %v7006_v11, %v6897_v23  ;;  %v7056_v39 = vmul.f32 %v6991_v1, %v6896_v5  ;;  %v7208_v5 = vld [vmem:[%s13284_s2 + $0x10] sm:$0xff] }
 0xfb6   : > { %v12298_v19 = vpop.f32.mrf.mxu1  ;;  %v7139_v10 = vpop.permute.xlu1 %7138 }
 0xfb7   : > { %v6786_v61 = vadd.f32 %v12298_v19, %v6617_v25  ;;  %v6783_v25 = vadd.f32 %v12233_v31, %v12320_v9  ;;  %v6782_v31 = vadd.f32 %v12227_v0, %v12305_v26  ;;  %v6976_v9 = vsel %vm12388_vm0, %v6975_v51, %v6971_v20  ;;  %vm13281_vm0 = vmmov %vm13275_vm1 }
 0xfb8   : > { %v13272_v0 = vand.u32 2147483648, %v12235_v40  ;;  %vm13282_vm2 = vmmov %vm13281_vm0 }
 0xfb9   : > { %vm13285_vm10 = vmmov %vm13281_vm0 }
 0xfba   : > { %v6960_v26 = vor.u32 1.1754944e-38, %v13272_v0  ;;  %vm13286_vm7 = vmmov %vm13281_vm0 }
 0xfbb   : > { %vm13287_vm6 = vmmov %vm13281_vm0 }
 0xfbc   : > { %vm13289_vm9 = vmmov %vm13281_vm0 }
 0xfbd   : > { %vm13290_vm5 = vmmov %vm13281_vm0 }
 0xfbe   : > { %v6775_v58 = vpop.f32.mrf.mxu1  ;;  %vm13291_vm12 = vmmov %vm13281_vm0 }
 0xfbf   : > { %v6787_v41 = vadd.f32 %v6775_v58, %v6620_v32  ;;  %v7035_v58 = vor.u32 1.1754944e-38, %v7034_v52  ;;  %v6898_v52 = vadd.f32 %v6881_v54, %v6786_v61  ;;  %v7063_v54 = vsub.f32 1.0, %v6976_v9 }
 0xfc1   : > { %v7036_v32 = vsel %vm7033_vm8, %v7035_v58, %v7031_v22  ;;  %v6899_v19 = vadd.f32 %v12202_v18, %v6787_v41  ;;  %v7058_v44 = vmul.f32 %v7021_v4, %v6898_v52  ;;  %v7064_v41 = vsub.f32 1.0, %v6991_v1  ;;  %v7088_v4 = vld [vmem:[%s13274_s1 + $0x18] sm:$0xff]  ;;  %v7129_v52 = vpop.permute.xlu0 %7128  ;;  %vm13288_vm8 = vmmov %vm13281_vm0 }
 0xfc2   : > { %v7067_v18 = vsub.f32 1.0, %v7036_v32  ;;  %v6895_v22 = vadd.f32 %v6866_v14, %v6783_v25  ;;  %v7071_v61 = vmul.f32 %v7063_v54, %v12049_v57  ;;  %v7087_v57 = vld [vmem:[%s13274_s1 + $0x10] sm:$0xff]  ;;  %v7124_v25 = vpop.permute.xlu1 %7123 }
 0xfc3   : > { %v7059_v42 = vmul.f32 %v7036_v32, %v6899_v19  ;;  %v7072_v35 = vmul.f32 %v7064_v41, %v12066_v49  ;;  %v7086_v49 = vld [vmem:[%s13274_s1 + $0x8] sm:$0xff]  ;;  %v7212_v14 = vld [vmem:[%s13284_s2 + $0x30] sm:$0xff] }
 0xfc4   : > { %v7075_v17 = vmul.f32 %v7067_v18, %v12105_v37  ;;  %v7082_v37 = vadd.f32 %v7074_v46, %v7058_v44  ;;  %v7090_v32 = vld [vmem:[%s13274_s1 + $0x28] sm:$0xff]  ;;  %v7209_v44 = vld [vmem:[%s13284_s2 + $0x18] sm:$0xff] }
 0xfc5   : > { %v7080_v33 = vadd.f32 %v7072_v35, %v7056_v39 }
 0xfc6   : > { %v6778_v36 = vpop.f32.mrf.mxu1  ;;  %v7083_v7 = vadd.f32 %v7075_v17, %v7059_v42  ;;  %v7211_v17 = vld [vmem:[%s13284_s2 + $0x28] sm:$0xff] }
 0xfc7   : > { %v6788_v28 = vadd.f32 %v6778_v36, %v6623_v63  ;;  %v6861_v63 = vpop.permute.xlu2 %6860  ;;  %v7091_v36 = vld [vmem:[%s13274_s1 + $0x30] sm:$0xff] }
 0xfc8   : > { %v6894_v24 = vadd.f32 %v6861_v63, %v6782_v31 }
 0xfc9   : > { %v6900_v48 = vadd.f32 %v12325_v16, %v6788_v28  ;;  %v7076_v16 = vmul.f32 %v7068_v21, %v12110_v38  ;;  %v13271_v38 = vand.u32 2147483647, %v12235_v40  ;;  %v7055_v40 = vmul.f32 %v6976_v9, %v6895_v22  ;;  %v7114_v23 = vpop.permute.xlu0 %7113  ;;  %v7206_v9 = vld [vmem:[%s13283_s15] sm:$0xff]  ;;  %s8046_s15 = sshll.u32 %s12540_s22, 6 }
 0xfcb   : > { %v7060_v27 = vmul.f32 %v7051_v34, %v6900_v48  ;;  %vm6958_vm13 = vcmp.eq.f32.partialorder %v13271_v38, 8.507059e+37  ;;  %v7081_v34 = vadd.f32 %v7073_v8, %v7057_v30  ;;  %v7079_v60 = vadd.f32 %v7071_v61, %v7055_v40  ;;  %v7213_v38 = vld [vmem:[%s13284_s2 + $0x38] sm:$0xff] }
 0xfcc   : > { %v6961_v3 = vsel %vm6958_vm13, %v6960_v26, %v6956_v15  ;;  %vm13292_vm13 = vmmov %vm13281_vm0 }
 0xfcd   : > { %v7084_v47 = vadd.f32 %v7076_v16, %v7060_v27  ;;  %v7062_v58 = vsub.f32 1.0, %v6961_v3  ;;  %v7054_v56 = vmul.f32 %v6961_v3, %v6894_v24  ;;  %v7109_v27 = vpop.permute.xlu1 %7108 }
 0xfcf   : > { %7173 = vmatpush.msrb.mxu2 %v7084_v47  ;;  %v7070_v59 = vmul.f32 %v7062_v58, %v12029_v12  ;;  %v7089_v12 = vld [vmem:[%s13274_s1 + $0x20] sm:$0xff]  ;;  %v7134_v55 = vpop.permute.xlu2 %7133 }
 0xfd0   : > { %v7210_v47 = vld [vmem:[%s13284_s2 + $0x20] sm:$0xff] }
 0xfd1   : > { %7174 = vmatpush.msrb.mxu2 %v7083_v7  ;;  %v7078_v50 = vadd.f32 %v7070_v59, %v7054_v56  ;;  %v7260_v46 = vpop.permute.xlu0 %7259 }
 0xfd3   : > { %7175 = vmatpush.msrb.mxu2 %v7082_v37 }
 0xfd5   : > { %7176 = vmatpush.msrb.mxu2 %v7081_v34  ;;  %v7255_v63 = vpop.permute.xlu1 %7254 }
 0xfd7   : > { %7177 = vmatpush.msrb.mxu2 %v7080_v33  ;;  %v7119_v51 = vpop.permute.xlu2 %7118 }
 0xfd9   : > { %7178 = vmatpush.msrb.mxu2 %v7079_v60  ;;  %v7245_v24 = vpop.permute.xlu0 %7244 }
 0xfdb   : > { %7179 = vmatpush.msrb.mxu2 %v7078_v50 }
 0xfdd   : > { %7180 = vmatpush.msrb.mxu2 %v12224_v43  ;;  %v7092_v43 = vld [vmem:[%s13274_s1 + $0x38] sm:$0xff]  ;;  %v7240_v58 = vpop.permute.xlu1 %7239  ;;  %s13294_s1 = smov %s13293_s18 }
 0xfde   : > { %8670 = vmatmul.msk.f32.vlgmr.msrb.gmra.mxu2 %vm13275_vm1, %v7085_v6  ;;  %vm13295_vm1 = vmmov %vm13281_vm0 }
 0xfdf   : > { %v7104_v31 = vpop.permute.xlu2 %7103 }
 0xfe1   : > { %v7230_v6 = vpop.permute.xlu0 %7229 }
 0xfe6   : > { %8671 = vmatmul.msk.f32.gmra.mxu2 %vm13276_vm3, %v7086_v49  ;;  %vm13296_vm3 = vmmov %vm13281_vm0 }
 0xfe7   : > { %v7250_v54 = vpop.permute.xlu2 %7249 }
 0xfee   : > { %8672 = vmatmul.msk.f32.gmra.mxu2 %vm13277_vm4, %v7087_v57  ;;  %vm13297_vm4 = vmmov %vm13281_vm0 }
 0xfef   : > { %v7235_v60 = vpop.permute.xlu2 %7234 }
 0xff6   : > { %8673 = vmatmul.msk.f32.gmra.mxu2 %vm13278_vm15, %v7088_v4  ;;  %v7225_v4 = vpop.permute.xlu1 %7224  ;;  %vm13298_vm15 = vmmov %vm13281_vm0 }
 0xffe   : > { %8674 = vmatmul.msk.f32.gmra.mxu2 %vm13279_vm11, %v7089_v12  ;;  %vm13299_vm11 = vmmov %vm13281_vm0 }
0x1006   : > { %8675 = vmatmul.msk.f32.gmra.mxu2 %vm13280_vm14, %v7090_v32  ;;  %vm13300_vm14 = vmmov %vm13281_vm0 }
0x100e   : > { %8676 = vmatmul.msk.f32.gmra.mxu2 %vm13281_vm0, %v7091_v36 }
0x1016   : > { %8677 = vmatmul.msk.f32.gmra.mxu2 %vm13282_vm2, %v7092_v43  ;;  %vm13301_vm2 = vmmov %vm13281_vm0 }
0x1061   : > { %v7182_v53 = vpop.f32.mrf.mxu2 }
0x1062   : > { %v7183_v15 = vadd.f32 %v7182_v53, %v7104_v31  ;;  %v7335_v53 = vld [vmem:[%s13293_s18] sm:$0xff]  ;;  %s12545_s18 = scalar_lea.vmem [#allocation17], %s8046_s15 }
0x1063   : > { %s7771_s5 = sshll.u32 %s12545_s18, 4  ;;  %s12574_s5 = int_to_ptr.vmem [resolvable:$true] %s7771_s5 }
0x1069   : > { %v7185_v62 = vpop.f32.mrf.mxu2 }
0x106a   : > { %v7186_v16 = vadd.f32 %v7185_v62, %v7109_v27  ;;  %v7336_v62 = vld [vmem:[%s13294_s1 + $0x8] sm:$0xff] }
0x1071   : > { %v7188_v19 = vpop.f32.mrf.mxu2 }
0x1072   : > { %v7189_v42 = vadd.f32 %v7188_v19, %v7114_v23  ;;  %v7337_v19 = vld [vmem:[%s13294_s1 + $0x10] sm:$0xff] }
0x1079   : > { %v7191_v28 = vpop.f32.mrf.mxu2 }
0x107a   : > { %v7192_v13 = vadd.f32 %v7191_v28, %v7119_v51  ;;  %v7338_v28 = vld [vmem:[%s13294_s1 + $0x18] sm:$0xff]  ;;  %v7389_v51 = vpop.permute.xlu2 %7388 }
0x1081   : > { %v7194_v21 = vpop.f32.mrf.mxu2 }
0x1082   : > { %v7195_v2 = vadd.f32 %v7194_v21, %v7124_v25  ;;  %v7339_v21 = vld [vmem:[%s13294_s1 + $0x20] sm:$0xff]  ;;  %v7374_v23 = vpop.permute.xlu2 %7373 }
0x1089   : > { %v7197_v20 = vpop.f32.mrf.mxu2 }
0x108a   : > { %v7198_v1 = vadd.f32 %v7197_v20, %v7129_v52  ;;  %v7340_v20 = vld [vmem:[%s13294_s1 + $0x28] sm:$0xff] }
0x1091   : > { %v7200_v11 = vpop.f32.mrf.mxu2 }
0x1092   : > { %v7201_v45 = vadd.f32 %v7200_v11, %v7134_v55  ;;  %v7342_v11 = vld [vmem:[%s13294_s1 + $0x38] sm:$0xff] }
0x1099   : > { %v7203_v18 = vpop.f32.mrf.mxu2 }
0x109a   : > { %v7204_v48 = vadd.f32 %v7203_v18, %v7139_v10  ;;  %v7341_v10 = vld [vmem:[%s13294_s1 + $0x30] sm:$0xff]  ;;  %s12553_s1 = scalar_lea.vmem [#allocation18], %s8046_s15  ;;  %s13310_s15 = sld [smem:[#allocation66_spill]] }
0x109c   : > { %7294 = vmatpush.msrb.mxu3 %v7204_v48 }
0x109e   : > { %7295 = vmatpush.msrb.mxu3 %v7201_v45 }
0x10a0   : > { %7296 = vmatpush.msrb.mxu3 %v7198_v1  ;;  %v7384_v1 = vpop.permute.xlu0 %7383  ;;  %s13311_s2 = smov %s13310_s15  ;;  %s7770_s4 = scalar_lea.hbm %s13310_s15, %s12774_s3 }
0x10a1   : > { %s7773_s6 = sshll.u32 %s7770_s4, 4  ;;  %s7754_s4 = scalar_lea.sflag [#allocation4], %s12540_s22  ;;  %s12578_s6 = int_to_ptr.hbm [resolvable:$true] %s7773_s6 }
0x10a2   : > { %7297 = vmatpush.msrb.mxu3 %v7195_v2  ;;  %s9399_s3 = sshra.s32 %s12578_s6, 4  ;;  %s9400_s3 = int_to_ptr.hbm [resolvable:$true] %s9399_s3 }
0x10a3   : > { %s9401_s7 = scalar_lea.hbm %s9400_s3, 64  ;;  %p9406_p11 = scmp.lt.s32.totalorder %s9400_s3, %s13311_s2 }
0x10a4   : > { %7298 = vmatpush.msrb.mxu3 %v7192_v13  ;;  %v7379_v13 = vpop.permute.xlu1 %7378  ;;  %p9402_p9 = scmp.ne.s32.totalorder %s9400_s3, %s9401_s7 }
0x10a6   : > { %7299 = vmatpush.msrb.mxu3 %v7189_v42  ;;  %p9403_p12 = pnand %p9402_p9, %p9864_p5 }
0x10a8   : > { %7300 = vmatpush.msrb.mxu3 %v7186_v16  ;;  %v7369_v31 = vpop.permute.xlu0 %7368  ;;  %p9404_p0 = pneg %p9403_p12 }
0x10aa   : > { %7301 = vmatpush.msrb.mxu3 %v7183_v15 }
0x10ab   : > { %8678 = vmatmul.msk.f32.vlgmr.msrb.gmra.mxu3 %vm13285_vm10, %v7206_v9  ;;  %vm13302_vm10 = vmmov %vm13281_vm0 }
0x10b3   : > { %8679 = vmatmul.msk.f32.gmra.mxu3 %vm13286_vm7, %v7207_v29  ;;  %vm13303_vm7 = vmmov %vm13281_vm0 }
0x10bb   : > { %8680 = vmatmul.msk.f32.gmra.mxu3 %vm13287_vm6, %v7208_v5  ;;  %vm13304_vm6 = vmmov %vm13281_vm0 }
0x10c3   : > { %8681 = vmatmul.msk.f32.gmra.mxu3 %vm13288_vm8, %v7209_v44  ;;  %vm13305_vm8 = vmmov %vm13281_vm0 }
0x10cb   : > { %8682 = vmatmul.msk.f32.gmra.mxu3 %vm13289_vm9, %v7210_v47  ;;  %vm13306_vm9 = vmmov %vm13281_vm0 }
0x10d3   : > { %8683 = vmatmul.msk.f32.gmra.mxu3 %vm13290_vm5, %v7211_v17  ;;  %v7364_v17 = vpop.permute.xlu1 %7363  ;;  %vm13307_vm5 = vmmov %vm13281_vm0 }
0x10db   : > { %8684 = vmatmul.msk.f32.gmra.mxu3 %vm13291_vm12, %v7212_v14  ;;  %vm13308_vm12 = vmmov %vm13281_vm0 }
0x10e3   : > { %8685 = vmatmul.msk.f32.gmra.mxu3 %vm13292_vm13, %v7213_v38  ;;  %vm13309_vm13 = vmmov %vm13281_vm0 }
0x112e   : > { %v7303_v0 = vpop.f32.mrf.mxu3 }
0x112f   : > { %v7304_v12 = vadd.f32 %v7303_v0, %v7225_v4  ;;  %v7359_v0 = vpop.permute.xlu2 %7358 }
0x1131   : > { %v7327_v43 = vmax.f32 %v7304_v12, 0.0 }
0x1136   : > { %v7306_v26 = vpop.f32.mrf.mxu3 }
0x1137   : > { %v7307_v49 = vadd.f32 %v7306_v26, %v7230_v6 }
0x1139   : > { %v7328_v36 = vmax.f32 %v7307_v49, 0.0 }
0x113e   : > { %v7309_v41 = vpop.f32.mrf.mxu3 }
0x113f   : > { %v7310_v59 = vadd.f32 %v7309_v41, %v7235_v60 }
0x1141   : > { %v7329_v32 = vmax.f32 %v7310_v59, 0.0 }
0x1146   : > { %v7312_v22 = vpop.f32.mrf.mxu3 }
0x1147   : > { %v7313_v33 = vadd.f32 %v7312_v22, %v7240_v58  ;;  %v7354_v22 = vpop.permute.xlu0 %7353  ;;  %v7470_v58 = vld [vmem:[%s12822_s8 + $0x30] sm:$0xff] }
0x1149   : > { %v7330_v57 = vmax.f32 %v7313_v33, 0.0 }
0x114e   : > { %v7315_v30 = vpop.f32.mrf.mxu3 }
0x114f   : > { %v7316_v35 = vadd.f32 %v7315_v30, %v7245_v24  ;;  %v7466_v24 = vld [vmem:[%s12822_s8 + $0x10] sm:$0xff] }
0x1151   : > { %v7331_v50 = vmax.f32 %v7316_v35, 0.0 }
0x1156   : > { %v7318_v7 = vpop.f32.mrf.mxu3 }
0x1157   : > { %v7319_v40 = vadd.f32 %v7318_v7, %v7250_v54  ;;  %v7465_v54 = vld [vmem:[%s12822_s8 + $0x8] sm:$0xff] }
0x1159   : > { %v7332_v61 = vmax.f32 %v7319_v40, 0.0  ;;  %v7471_v40 = vld [vmem:[%s12822_s8 + $0x38] sm:$0xff] }
0x115e   : > { %v7321_v3 = vpop.f32.mrf.mxu3 }
0x115f   : > { %v7322_v37 = vadd.f32 %v7321_v3, %v7255_v63  ;;  %v7464_v3 = vld [vmem:[%s12822_s8] sm:$0xff] }
0x1161   : > { %v7333_v56 = vmax.f32 %v7322_v37, 0.0  ;;  %v7468_v37 = vld [vmem:[%s12822_s8 + $0x20] sm:$0xff] }
0x1166   : > { %v7324_v39 = vpop.f32.mrf.mxu3 }
0x1167   : > { %v7325_v8 = vadd.f32 %v7324_v39, %v7260_v46  ;;  %v7467_v39 = vld [vmem:[%s12822_s8 + $0x18] sm:$0xff] }
0x1169   : > { %v7334_v34 = vmax.f32 %v7325_v8, 0.0  ;;  %v7469_v8 = vld [vmem:[%s12822_s8 + $0x28] sm:$0xff]  ;;  %s9405_s8 = scalar_lea.hbm %s13311_s2, 128 }
0x116a   : > { %p9407_p13 = scmp.lt.s32.totalorder %s9405_s8, %s9401_s7 }
0x116b   : > { %7423 = vmatpush.msrb.mxu0 %v7334_v34  ;;  %v7483_v34 = vpop.permute.xlu1 %7482 }
0x116c   : > { %p9408_p1 = por %p9407_p13, %p9406_p11 }
0x116d   : > { %7424 = vmatpush.msrb.mxu0 %v7333_v56 }
0x116e   : > { %p9409_p2 = pnand %p9408_p1, %p9404_p0 }
0x116f   : > { %7425 = vmatpush.msrb.mxu0 %v7332_v61  ;;  %v7488_v61 = vpop.permute.xlu2 %7487 }
0x1171   : > { %7426 = vmatpush.msrb.mxu0 %v7331_v50 }
0x1173   : > { %7427 = vmatpush.msrb.mxu0 %v7330_v57  ;;  %v7493_v57 = vpop.permute.xlu0 %7492 }
0x1175   : > { %7428 = vmatpush.msrb.mxu0 %v7329_v32 }
0x1177   : > { %7429 = vmatpush.msrb.mxu0 %v7328_v36 }
0x1179   : > { %7430 = vmatpush.msrb.mxu0 %v7327_v43 }
0x117a   : > { %8686 = vmatmul.msk.f32.vlgmr.msrb.gmra.mxu0 %vm13295_vm1, %v7335_v53 }
0x1182   : > { %8687 = vmatmul.msk.f32.gmra.mxu0 %vm13296_vm3, %v7336_v62 }
0x118a   : > { %8688 = vmatmul.msk.f32.gmra.mxu0 %vm13297_vm4, %v7337_v19 }
0x1192   : > { %8689 = vmatmul.msk.f32.gmra.mxu0 %vm13298_vm15, %v7338_v28  ;;  %v7498_v28 = vpop.permute.xlu1 %7497 }
0x119a   : > { %8690 = vmatmul.msk.f32.gmra.mxu0 %vm13299_vm11, %v7339_v21 }
0x11a2   : > { %8691 = vmatmul.msk.f32.gmra.mxu0 %vm13300_vm14, %v7340_v20 }
0x11aa   : > { %8692 = vmatmul.msk.f32.gmra.mxu0 %vm13281_vm0, %v7341_v10 }
0x11b2   : > { %8693 = vmatmul.msk.f32.gmra.mxu0 %vm13301_vm2, %v7342_v11 }
0x11f7   : > { %v7432_v55 = vpop.f32.mrf.mxu0 }
0x11f8   : > { %v7433_v30 = vadd.f32 %v7432_v55, %v7354_v22  ;;  %v7508_v22 = vpop.permute.xlu0 %7507 }
0x11fa   : > { %v7456_v63 = vmax.f32 %v7433_v30, 0.0 }
0x11ff   : > { %v7435_v52 = vpop.f32.mrf.mxu0 }
0x1200   : > { %v7436_v26 = vadd.f32 %v7435_v52, %v7359_v0 }
0x1202   : > { %v7457_v46 = vmax.f32 %v7436_v26, 0.0 }
0x1207   : > { %v7438_v18 = vpop.f32.mrf.mxu0 }
0x1208   : > { %v7439_v14 = vadd.f32 %v7438_v18, %v7364_v17 }
0x120a   : > { %v7458_v7 = vmax.f32 %v7439_v14, 0.0 }
0x120f   : > { %v7441_v48 = vpop.f32.mrf.mxu0 }
0x1210   : > { %v7442_v44 = vadd.f32 %v7441_v48, %v7369_v31 }
0x1212   : > { %v7459_v41 = vmax.f32 %v7442_v44, 0.0 }
0x1217   : > { %v7444_v25 = vpop.f32.mrf.mxu0 }
0x1218   : > { %v7445_v29 = vadd.f32 %v7444_v25, %v7374_v23 }
0x121a   : > { %v7460_v38 = vmax.f32 %v7445_v29, 0.0 }
0x121f   : > { %v7447_v45 = vpop.f32.mrf.mxu0 }
0x1220   : > { %v7448_v15 = vadd.f32 %v7447_v45, %v7379_v13 }
0x1222   : > { %v7461_v47 = vmax.f32 %v7448_v15, 0.0 }
0x1227   : > { %v7450_v2 = vpop.f32.mrf.mxu0 }
0x1228   : > { %v7451_v27 = vadd.f32 %v7450_v2, %v7384_v1 }
0x122a   : > { %v7462_v5 = vmax.f32 %v7451_v27, 0.0 }
0x122f   : > { %v7453_v42 = vpop.f32.mrf.mxu0 }
0x1230   : > { %v7454_v16 = vadd.f32 %v7453_v42, %v7389_v51  ;;  %v7503_v42 = vpop.permute.xlu2 %7502 }
0x1232   : > { %v7463_v9 = vmax.f32 %v7454_v16, 0.0 }
0x1234   : > { %7552 = vmatpush.msrb.mxu1 %v7463_v9 }
0x1236   : > { %7553 = vmatpush.msrb.mxu1 %v7462_v5 }
0x1238   : > { %7554 = vmatpush.msrb.mxu1 %v7461_v47 }
0x123a   : > { %7555 = vmatpush.msrb.mxu1 %v7460_v38 }
0x123c   : > { %7556 = vmatpush.msrb.mxu1 %v7459_v41 }
0x123e   : > { %7557 = vmatpush.msrb.mxu1 %v7458_v7 }
0x1240   : > { %7558 = vmatpush.msrb.mxu1 %v7457_v46 }
0x1242   : > { %7559 = vmatpush.msrb.mxu1 %v7456_v63 }
0x1243   : > { %8694 = vmatmul.msk.f32.vlgmr.msrb.gmra.mxu1 %vm13302_vm10, %v7464_v3 }
0x124b   : > { %8695 = vmatmul.msk.f32.gmra.mxu1 %vm13303_vm7, %v7465_v54 }
0x1253   : > { %8696 = vmatmul.msk.f32.gmra.mxu1 %vm13304_vm6, %v7466_v24 }
0x125b   : > { %8697 = vmatmul.msk.f32.gmra.mxu1 %vm13305_vm8, %v7467_v39 }
0x1263   : > { %8698 = vmatmul.msk.f32.gmra.mxu1 %vm13306_vm9, %v7468_v37 }
0x126b   : > { %8699 = vmatmul.msk.f32.gmra.mxu1 %vm13307_vm5, %v7469_v8 }
0x1273   : > { %8700 = vmatmul.msk.f32.gmra.mxu1 %vm13308_vm12, %v7470_v58 }
0x127b   : > { %8701 = vmatmul.msk.f32.gmra.mxu1 %vm13309_vm13, %v7471_v40 }
0x12c0   : > { %v7561_v35 = vpop.f32.mrf.mxu1 }
0x12c1   : > { %v7562_v56 = vadd.f32 %v7561_v35, %v7483_v34 }
0x12c3   : > { %7585 = vst [vmem:[%s12545_s18] sm:$0xff] %v7562_v56  ;;  %v8702_v33 = vmul.f32 -1.442695, %v7562_v56 }
0x12c5   : > { %9083 = vpow2.f32 %v8702_v33  ;;  %v7513_v33 = vpop.permute.xlu1 %7512 }
0x12c8   : > { %v7564_v60 = vpop.f32.mrf.mxu1 }
0x12c9   : > { %v7565_v59 = vadd.f32 %v7564_v60, %v7488_v61 }
0x12cb   : > { %v9084_v50 = vpop.eup %9083  ;;  %7586 = vst [vmem:[%s12545_s18 + $0x8] sm:$0xff] %v7565_v59  ;;  %v8703_v6 = vmul.f32 -1.442695, %v7565_v59 }
0x12cc   : > { %v7617_v49 = vadd.f32 1.0, %v9084_v50 }
0x12cd   : > { %9085 = vpow2.f32 %v8703_v6 }
0x12ce   : > { %9087 = vrcp.f32 %v7617_v49  ;;  %v7636_v21 = vand.u32 2147483648, %v7617_v49  ;;  %v7634_v11 = vand.u32 2147483647, %v7617_v49  ;;  %vm7630_vm3 = vweird.f32 %v7617_v49 }
0x12d0   : > { %v7567_v4 = vpop.f32.mrf.mxu1  ;;  %v7637_v45 = vor.u32 1.1754944e-38, %v7636_v21  ;;  %vm7635_vm15 = vcmp.eq.f32.partialorder %v7634_v11, 8.507059e+37 }
0x12d1   : > { %v7568_v12 = vadd.f32 %v7567_v4, %v7493_v57 }
0x12d3   : > { %v9086_v32 = vpop.eup %9085  ;;  %7587 = vst [vmem:[%s12545_s18 + $0x10] sm:$0xff] %v7568_v12  ;;  %v8704_v36 = vmul.f32 -1.442695, %v7568_v12 }
0x12d4   : > { %v9088_v43 = vpop.eup %9087  ;;  %v7618_v53 = vadd.f32 1.0, %v9086_v32 }
0x12d5   : > { %v7626_v62 = vmul.f32 %v9088_v43, %v7617_v49  ;;  %9089 = vpow2.f32 %v8704_v36  ;;  %vm7631_vm1 = vweird.f32 %v9088_v43 }
0x12d6   : > { %9091 = vrcp.f32 %v7618_v53  ;;  %vm7632_vm4 = vmor %vm7630_vm3, %vm7631_vm1  ;;  %v7651_v27 = vand.u32 2147483648, %v7618_v53  ;;  %v7649_v15 = vand.u32 2147483647, %v7618_v53  ;;  %vm7645_vm14 = vweird.f32 %v7618_v53 }
0x12d7   : > { %v7627_v19 = vsub.f32 1.0, %v7626_v62 }
0x12d8   : > { %v7570_v20 = vpop.f32.mrf.mxu1  ;;  %v7652_v17 = vor.u32 1.1754944e-38, %v7651_v27  ;;  %vm7650_vm2 = vcmp.eq.f32.partialorder %v7649_v15, 8.507059e+37 }
0x12d9   : > { %v7628_v10 = vmul.f32 %v9088_v43, %v7627_v19  ;;  %v7571_v55 = vadd.f32 %v7570_v20, %v7498_v28  ;;  %v7518_v28 = vpop.permute.xlu2 %7517 }
0x12db   : > { %v9090_v52 = vpop.eup %9089  ;;  %v7629_v18 = vadd.f32 %v9088_v43, %v7628_v10  ;;  %7588 = vst [vmem:[%s12545_s18 + $0x18] sm:$0xff] %v7571_v55  ;;  %v8705_v48 = vmul.f32 -1.442695, %v7571_v55 }
0x12dc   : > { %v9092_v25 = vpop.eup %9091  ;;  %v7619_v51 = vadd.f32 1.0, %v9090_v52 }
0x12dd   : > { %v7633_v1 = vsel %vm7632_vm4, %v9088_v43, %v7629_v18  ;;  %v7641_v2 = vmul.f32 %v9092_v25, %v7618_v53  ;;  %9093 = vpow2.f32 %v8705_v48  ;;  %vm7646_vm11 = vweird.f32 %v9092_v25 }
0x12de   : > { %v7638_v13 = vsel %vm7635_vm15, %v7637_v45, %v7633_v1  ;;  %9095 = vrcp.f32 %v7619_v51  ;;  %vm7647_vm0 = vmor %vm7645_vm14, %vm7646_vm11  ;;  %v7666_v30 = vand.u32 2147483648, %v7619_v51  ;;  %v7664_v63 = vand.u32 2147483647, %v7619_v51 }
0x12df   : > { %7745 = vst [vmem:[%s12553_s1] sm:$0xff] %v7638_v13  ;;  %v7642_v23 = vsub.f32 1.0, %v7641_v2  ;;  %vm7660_vm7 = vweird.f32 %v7619_v51 }
0x12e0   : > { %v7573_v16 = vpop.f32.mrf.mxu1  ;;  %v7667_v8 = vor.u32 1.1754944e-38, %v7666_v30  ;;  %vm7665_vm8 = vcmp.eq.f32.partialorder %v7664_v63, 8.507059e+37 }
0x12e1   : > { %v7643_v31 = vmul.f32 %v9092_v25, %v7642_v23  ;;  %v7574_v9 = vadd.f32 %v7573_v16, %v7503_v42 }
0x12e3   : > { %v9094_v29 = vpop.eup %9093  ;;  %v7644_v5 = vadd.f32 %v9092_v25, %v7643_v31  ;;  %7589 = vst [vmem:[%s12545_s18 + $0x20] sm:$0xff] %v7574_v9  ;;  %v8706_v44 = vmul.f32 -1.442695, %v7574_v9 }
0x12e4   : > { %v9096_v47 = vpop.eup %9095  ;;  %v7620_v14 = vadd.f32 1.0, %v9094_v29 }
0x12e5   : > { %v7648_v38 = vsel %vm7647_vm0, %v9092_v25, %v7644_v5  ;;  %v7656_v0 = vmul.f32 %v9096_v47, %v7619_v51  ;;  %9097 = vpow2.f32 %v8706_v44  ;;  %vm7661_vm10 = vweird.f32 %v9096_v47 }
0x12e6   : > { %v7653_v26 = vsel %vm7650_vm2, %v7652_v17, %v7648_v38  ;;  %9099 = vrcp.f32 %v7620_v14  ;;  %vm7662_vm6 = vmor %vm7660_vm7, %vm7661_vm10  ;;  %v7681_v61 = vand.u32 2147483648, %v7620_v14  ;;  %v7679_v50 = vand.u32 2147483647, %v7620_v14 }
0x12e7   : > { %7746 = vst [vmem:[%s12553_s1 + $0x8] sm:$0xff] %v7653_v26  ;;  %v7657_v41 = vsub.f32 1.0, %v7656_v0  ;;  %vm7675_vm5 = vweird.f32 %v7620_v14 }
0x12e8   : > { %v7576_v7 = vpop.f32.mrf.mxu1  ;;  %v7682_v32 = vor.u32 1.1754944e-38, %v7681_v61  ;;  %vm7680_vm13 = vcmp.eq.f32.partialorder %v7679_v50, 8.507059e+37 }
0x12e9   : > { %v7658_v46 = vmul.f32 %v9096_v47, %v7657_v41  ;;  %v7577_v3 = vadd.f32 %v7576_v7, %v7508_v22 }
0x12eb   : > { %v9098_v54 = vpop.eup %9097  ;;  %v7659_v24 = vadd.f32 %v9096_v47, %v7658_v46  ;;  %7590 = vst [vmem:[%s12545_s18 + $0x28] sm:$0xff] %v7577_v3  ;;  %v8707_v39 = vmul.f32 -1.442695, %v7577_v3 }
0x12ec   : > { %v9100_v37 = vpop.eup %9099  ;;  %v12559_v58 = vadd.f32 1.0, %v9098_v54 }
0x12ed   : > { %v7663_v40 = vsel %vm7662_vm6, %v9096_v47, %v7659_v24  ;;  %v7671_v34 = vmul.f32 %v9100_v37, %v7620_v14  ;;  %9101 = vpow2.f32 %v8707_v39  ;;  %vm7676_vm9 = vweird.f32 %v9100_v37 }
0x12ee   : > { %v7668_v35 = vsel %vm7665_vm8, %v7667_v8, %v7663_v40  ;;  %9103 = vrcp.f32 %v12559_v58  ;;  %vm7677_vm12 = vmor %vm7675_vm5, %vm7676_vm9  ;;  %v7696_v21 = vand.u32 2147483648, %v12559_v58  ;;  %v7694_v11 = vand.u32 2147483647, %v12559_v58 }
0x12ef   : > { %7747 = vst [vmem:[%s12553_s1 + $0x10] sm:$0xff] %v7668_v35  ;;  %v7672_v56 = vsub.f32 1.0, %v7671_v34  ;;  %vm7690_vm3 = vweird.f32 %v12559_v58 }
0x12f0   : > { %v7579_v60 = vpop.f32.mrf.mxu1  ;;  %v7697_v51 = vor.u32 1.1754944e-38, %v7696_v21 }
0x12f1   : > { %v7673_v59 = vmul.f32 %v9100_v37, %v7672_v56  ;;  %v7580_v6 = vadd.f32 %v7579_v60, %v7513_v33 }
0x12f3   : > { %v9102_v49 = vpop.eup %9101  ;;  %v7674_v57 = vadd.f32 %v9100_v37, %v7673_v59  ;;  %7591 = vst [vmem:[%s12545_s18 + $0x30] sm:$0xff] %v7580_v6  ;;  %v8708_v4 = vmul.f32 -1.442695, %v7580_v6 }
0x12f4   : > { %v9104_v12 = vpop.eup %9103  ;;  %v12568_v36 = vadd.f32 1.0, %v9102_v49 }
0x12f5   : > { %v7678_v43 = vsel %vm7677_vm12, %v9100_v37, %v7674_v57  ;;  %v7686_v53 = vmul.f32 %v9104_v12, %v12559_v58  ;;  %9105 = vpow2.f32 %v8708_v4  ;;  %vm7691_vm1 = vweird.f32 %v9104_v12 }
0x12f6   : > { %v7683_v62 = vsel %vm7680_vm13, %v7682_v32, %v7678_v43  ;;  %9107 = vrcp.f32 %v12568_v36  ;;  %vm12582_vm4 = vmor %vm7690_vm3, %vm7691_vm1 }
0x12f7   : > { %7748 = vst [vmem:[%s12553_s1 + $0x18] sm:$0xff] %v7683_v62  ;;  %v7687_v19 = vsub.f32 1.0, %v7686_v53 }
0x12f8   : > { %v7582_v20 = vpop.f32.mrf.mxu1 }
0x12f9   : > { %v7688_v10 = vmul.f32 %v9104_v12, %v7687_v19  ;;  %v7583_v55 = vadd.f32 %v7582_v20, %v7518_v28 }
0x12fb   : > { %v9106_v52 = vpop.eup %9105  ;;  %v7689_v18 = vadd.f32 %v9104_v12, %v7688_v10  ;;  %7592 = vst [vmem:[%s12545_s18 + $0x38] sm:$0xff] %v7583_v55  ;;  %v8709_v48 = vmul.f32 -1.442695, %v7583_v55 }
0x12fc   : > { %v9108_v25 = vpop.eup %9107  ;;  %v7623_v1 = vadd.f32 1.0, %v9106_v52 }
0x12fd   : > { %9412 = shalt.err (!%p9409_p2)
}
0x12fe   : > { %s9564_s18 = smov 128   ;;  %s9565_s9 = smov 8   ;;  %v7693_v2 = vsel %vm12582_vm4, %v9104_v12, %v7689_v18  ;;  %vm7695_vm15 = vcmp.eq.f32.partialorder %v7694_v11, 8.507059e+37  ;;  %v7701_v13 = vmul.f32 %v9108_v25, %v12568_v36  ;;  %9109 = vpow2.f32 %v8709_v48 }
0x12ff   : > { %8765 = dma.vmem_to_hbm [thread:$0]  (%p9864_p5), %s12574_s5, 1024, %s12578_s6, %s7754_s4, %s9564_s18, %s9564_s18, %s9565_s9   ;;  %v7698_v23 = vsel %vm7695_vm15, %v7697_v51, %v7693_v2  ;;  %9111 = vrcp.f32 %v7623_v1  ;;  %v7711_v27 = vand.u32 2147483648, %v12568_v36  ;;  %vm7706_vm11 = vweird.f32 %v9108_v25 }
0x1300   : > { %7749 = vst [vmem:[%s12553_s1 + $0x20] sm:$0xff] %v7698_v23  ;;  %v7702_v42 = vsub.f32 1.0, %v7701_v13  ;;  %v7709_v31 = vand.u32 2147483647, %v12568_v36  ;;  %vm7705_vm14 = vweird.f32 %v12568_v36  ;;  %s13315_s5 = sld [smem:[#allocation67_spill]]  ;;  %v7726_v0 = vand.u32 2147483648, %v7623_v1 }
0x1301   : > { %vm7707_vm0 = vmor %vm7705_vm14, %vm7706_vm11  ;;  %v7712_v5 = vor.u32 1.1754944e-38, %v7711_v27  ;;  %v7724_v41 = vand.u32 2147483647, %v7623_v1  ;;  %vm7720_vm7 = vweird.f32 %v7623_v1  ;;  %s13316_s8 = sshll.u32 %s9847_s0, 6  ;;  %s7788_s7 = sshll.u32 %s12553_s1, 4  ;;  %s7789_s7 = int_to_ptr.vmem [resolvable:$true] %s7788_s7 }
0x1302   : > { %v7703_v16 = vmul.f32 %v9108_v25, %v7702_v42  ;;  %vm7710_vm2 = vcmp.eq.f32.partialorder %v7709_v31, 8.507059e+37  ;;  %v7727_v7 = vor.u32 1.1754944e-38, %v7726_v0  ;;  %s7759_s0 = scalar_lea.sflag [#allocation19], %s12540_s22 }
0x1303   : > { %vm7725_vm8 = vcmp.eq.f32.partialorder %v7724_v41, 8.507059e+37 }
0x1304   : > { %v9110_v15 = vpop.eup %9109  ;;  %v7704_v9 = vadd.f32 %v9108_v25, %v7703_v16 }
0x1305   : > { %v9112_v29 = vpop.eup %9111  ;;  %v7624_v44 = vadd.f32 1.0, %v9110_v15 }
0x1306   : > { %v7708_v47 = vsel %vm7707_vm0, %v9108_v25, %v7704_v9  ;;  %v7716_v17 = vmul.f32 %v9112_v29, %v7623_v1  ;;  %vm7721_vm10 = vweird.f32 %v9112_v29  ;;  %s7787_s6 = scalar_lea.hbm %s13315_s5, %s13316_s8 }
0x1307   : > { %v7713_v14 = vsel %vm7710_vm2, %v7712_v5, %v7708_v47  ;;  %9113 = vrcp.f32 %v7624_v44  ;;  %vm7722_vm6 = vmor %vm7720_vm7, %vm7721_vm10  ;;  %v7741_v24 = vand.u32 2147483648, %v7624_v44  ;;  %v7739_v37 = vand.u32 2147483647, %v7624_v44  ;;  %s7790_s3 = sshll.u32 %s7787_s6, 4  ;;  %s9433_s6 = scalar_lea.hbm %s13315_s5, 128  ;;  %s7791_s3 = int_to_ptr.hbm [resolvable:$true] %s7790_s3 }
0x1308   : > { %7750 = vst [vmem:[%s12553_s1 + $0x28] sm:$0xff] %v7713_v14  ;;  %v7717_v38 = vsub.f32 1.0, %v7716_v17  ;;  %vm7735_vm5 = vweird.f32 %v7624_v44  ;;  %s9427_s4 = sshra.s32 %s7791_s3, 4  ;;  %s9428_s4 = int_to_ptr.hbm [resolvable:$true] %s9427_s4 }
0x1309   : > { %v7742_v58 = vor.u32 1.1754944e-38, %v7741_v24  ;;  %vm7740_vm13 = vcmp.eq.f32.partialorder %v7739_v37, 8.507059e+37  ;;  %s9429_s8 = scalar_lea.hbm %s9428_s4, 64  ;;  %p9434_p8 = scmp.lt.s32.totalorder %s9428_s4, %s13315_s5 }
0x130a   : > { %v7718_v26 = vmul.f32 %v9112_v29, %v7717_v38  ;;  %p9430_p3 = scmp.ne.s32.totalorder %s9428_s4, %s9429_s8  ;;  %p9435_p10 = scmp.lt.s32.totalorder %s9433_s6, %s9429_s8 }
0x130c   : > { %v7719_v22 = vadd.f32 %v9112_v29, %v7718_v26  ;;  %p9431_p4 = pnand %p9430_p3, %p9864_p5  ;;  %p9436_p9 = por %p9435_p10, %p9434_p8 }
0x130d   : > { %v9114_v30 = vpop.eup %9113 }
0x130e   : > { %v7723_v46 = vsel %vm7722_vm6, %v9112_v29, %v7719_v22  ;;  %v7731_v63 = vmul.f32 %v9114_v30, %v7624_v44  ;;  %vm7736_vm9 = vweird.f32 %v9114_v30  ;;  %p9432_p7 = pneg %p9431_p4 }
0x130f   : > { %v7728_v3 = vsel %vm7725_vm8, %v7727_v7, %v7723_v46  ;;  %vm7737_vm12 = vmor %vm7735_vm5, %vm7736_vm9 }
0x1310   : > { %7751 = vst [vmem:[%s12553_s1 + $0x30] sm:$0xff] %v7728_v3  ;;  %v7732_v54 = vsub.f32 1.0, %v7731_v63  ;;  %p9437_p12 = pnand %p9436_p9, %p9432_p7 }
0x1312   : > { %v7733_v39 = vmul.f32 %v9114_v30, %v7732_v54 }
0x1314   : > { %v7734_v8 = vadd.f32 %v9114_v30, %v7733_v39 }
0x1316   : > { %v7738_v40 = vsel %vm7737_vm12, %v9114_v30, %v7734_v8 }
0x1317   : > { %v7743_v34 = vsel %vm7740_vm13, %v7742_v58, %v7738_v40 }
0x1318   : > { %7752 = vst [vmem:[%s12553_s1 + $0x38] sm:$0xff] %v7743_v34 }
0x1319   : > { %9440 = shalt.err (!%p9437_p12)
}
0x131a   : > { %8766 = dma.vmem_to_hbm [thread:$0]  (%p9864_p5), %s7789_s7, 1024, %s7791_s3, %s7759_s0, %s9564_s18, %s9564_s18, %s9565_s9  }
0x131b PF: > { %s13317_s1 = sld [smem:[#allocation70_spill]] }
0x131c   : > { %s13318_s22 = sld [smem:[#allocation68_spill]] }
0x1321   : > { %p8822_p0 = scmp.ge.s32.totalorder %s13317_s1, 2 }
0x1322   : > { %s7805_s10 = sand.u32 1, %s13318_s22  }
0x1323   : > { %p8798_p11 = pnand %p8822_p0, %p9868_p6  ;;  %s7806_s4 = scalar_lea.sflag [#allocation4], %s7805_s10 }
0x1325   : > { %p8799_p13 = pneg %p8798_p11 }
0x1327   : > { %9478 = dma.done.wait (%p8799_p13), %s7806_s4, 1024  }
0x1328   : > { %9480 = vsyncadd (%p8799_p13), %s7806_s4, 4294966272  ;;  %s7816_s8 = scalar_lea.sflag [#allocation19], %s7805_s10 }
0x1329   : > { %9482 = dma.done.wait (%p8799_p13), %s7816_s8, 1024  }
0x132a   : > { %9484 = vsyncadd (%p8799_p13), %s7816_s8, 4294966272  ;;  %s13320_s22 = sld [smem:[#allocation71_spill]]  ;;  %s13323_s15 = smov %s9491_s16 }
0x132b   : > { %s13321_s6 = sld [smem:[#allocation69_spill]] }
0x132c   : > { %s13322_s18 = sld [smem:[#allocation72_spill]] }
0x1330   : > { %p120_p5 = scmp.ge.s32.totalorder %s13320_s22, 4  }
0x1331   : > { %s13324_s16 = smov %s13321_s6 }
0x1332   :  { %122 = sbr.rel (!%p120_p5) target bundleno = 106 (0x6a), region = 389 }
0x1337   :  { %7822 = vsyncpa [#allocation3], 1 }
0x1338   :  { %7824 = vsyncpa [#allocation3 + $0x1], 1 }
0x1339   :  { %7825 = vsyncpa [#allocation6], 1 }
0x133a   :  { %7826 = vsyncpa [#allocation9], 1 }
0x133b   :  { %7827 = vsyncpa [#allocation12], 1 }
0x133c   :  { %7828 = vsyncpa [#allocation15], 1 }
0x133d   :  { %7829 = vsyncpa [#allocation4], 1 }
0x133e   :  { %7831 = vsyncpa [#allocation4 + $0x1], 1 }
0x133f   :  { %7832 = vsyncpa [#allocation19], 1 }
0x1340   :  { %7834 = vsyncpa [#allocation19 + $0x1], 1 }

</bundles_post_ra>
